<compile_context>
chip_gen: v7x
topology: tpu7x:2x2x1
jax: 0.10.0
libtpu: 0.0.40
codegen_flags: <defaults>
</compile_context>

<pallas_src>
import jax
import jax.numpy as jnp
from jax.experimental import pallas as pl
from jax.experimental.pallas import tpu as pltpu

# ---------------------------------------------------------------------------
# model constants (small synthetic sizes consistent with the forward pass)
# ---------------------------------------------------------------------------
SELF_GROUP_ID = 0          # args.self_group_id
B, C_IN, H, W = 2, 4, 16, 16
S, F_ENT = 8, 32
C_CONV = 16
D_EMB = 256                # embedding width + LSTM hidden (forced by get_self_embed)
N_MOVE = 9
D_ATT = 64
N_SLOT = 8                 # global_id % 8 slots in get_self_embed
HW = H * W
C9 = C_IN * 9
K_FC = C_CONV * HW         # 4096

# packed output slab layout (lane-aligned width)
OFF_H = 0
OFF_C = D_EMB
OFF_MP = 2 * D_EMB
OFF_AP = OFF_MP + N_MOVE
OFF_MA = OFF_AP + S
OFF_AA = OFF_MA + 1
OUT_W = 5 * 128            # 640 >= 531 used columns

assert B & (B - 1) == 0 and S & (S - 1) == 0 and N_SLOT == S  # power-of-2 tricks


# ---------------------------------------------------------------------------
# masked softmax + argmax (eval-mode action heads); runs inside the fused kernel
# ---------------------------------------------------------------------------
def _masked_softmax_argmax(logits, mask):
    valid = mask > 0.0
    masked = jnp.where(valid, logits, jnp.full_like(logits, -1e9))
    m = jnp.max(masked, axis=-1, keepdims=True)
    e = jnp.exp(masked - m)
    prob = e / jnp.sum(e, axis=-1, keepdims=True)
    bsz, n = logits.shape
    idx = jax.lax.broadcasted_iota(jnp.int32, (bsz, n), 1)
    is_max = masked >= m
    act = jnp.min(jnp.where(is_max, idx, jnp.full((bsz, n), n, jnp.int32)),
                  axis=-1, keepdims=True)
    return prob, act


# ---------------------------------------------------------------------------
# THE fused kernel: conv -> spatial fc -> entity encoder -> masked avg -> LSTM
#                   -> move head -> get_self_embed -> attack head -> softmax
# ---------------------------------------------------------------------------
def _fused_kernel(
        # data
        patches_ref, ent_ref, gid_ref, glob_ref, cnt_ref,
        h_prev_ref, c_prev_ref, move_mask_ref, avail_ref,
        # weights
        conv_big_ref, conv_bias_ref,
        sp_fc_w_hbm, sp_fc_b_ref,
        ent_w_ref, ent_b_ref, ent_sp_w_ref,
        lstm_w_hbm, lstm_b_ref,
        move_w_ref, move_b_ref,
        attn_qh_w_ref, attn_qs_w_ref, attn_q_b_ref,
        attn_k_w_ref, attn_k_b_ref,
        # output
        out_ref,
        # scratch
        spw_vmem, lstmw_vmem, dma_sem):
    f32, bf16 = jnp.float32, jnp.bfloat16

    # kick off the two big weight DMAs immediately; they stream while the conv,
    # entity projection, spatial fc and attack-head prep compute runs.
    cp_sp = pltpu.make_async_copy(sp_fc_w_hbm, spw_vmem, dma_sem.at[0])
    cp_lstm = pltpu.make_async_copy(lstm_w_hbm, lstmw_vmem, dma_sem.at[1])
    cp_sp.start()
    cp_lstm.start()

    out_ref[...] = jnp.zeros((B, OUT_W), f32)

    # ---- conv3x3 + ReLU: ONE block-diagonal matmul, rows ordered oc*B + b ----
    conv_all = jnp.maximum(
        jnp.dot(conv_big_ref[...], patches_ref[...],
                preferred_element_type=f32) + conv_bias_ref[...], 0.0)   # (OC*B, HW)

    # ---- entity projection (independent of sp_embed -> overlaps the DMA) ----
    ep = jnp.dot(ent_ref[...].astype(bf16), ent_w_ref[...],
                 preferred_element_type=f32) + ent_b_ref[...]            # (B*S, D)

    # ---- SpatialEncoder fc: manual K loop over the 16 OC-blocks (== the full
    #      K=4096 dot, but consumes the (OC*B, HW) conv layout with no relayout)
    cp_sp.wait()
    acc = jnp.zeros((B, D_EMB), f32)
    for oc in range(C_CONV):
        x = conv_all[oc * B:(oc + 1) * B, :].astype(bf16)                # (B, HW)
        w = spw_vmem[oc * HW:(oc + 1) * HW, :]                           # (HW, D)
        acc += jnp.dot(x, w, preferred_element_type=f32)
    sp_embed = jnp.maximum(acc + sp_fc_b_ref[...], 0.0)                  # (B, D)

    # ---- EntityEncoder: relu(entity_proj + spatial conditioning) ------------
    # broadcast sp_proj[b] onto the S rows of batch b via a K=2 constant 0/1
    # matmul (free in the MXU slot; avoids a risky sublane-broadcast relayout).
    sp_proj = jnp.dot(sp_embed.astype(bf16), ent_sp_w_ref[...],
                      preferred_element_type=f32)                        # (B, D)
    r_bs = jax.lax.broadcasted_iota(jnp.int32, (B * S, B), 0)
    c_bs = jax.lax.broadcasted_iota(jnp.int32, (B * S, B), 1)
    expand = ((r_bs >= c_bs * S) & (r_bs < (c_bs + 1) * S)).astype(f32)  # (B*S, B)
    en = jnp.maximum(ep + jnp.dot(expand, sp_proj,
                                  preferred_element_type=f32), 0.0)      # (B*S, D)

    # ---- en_embed.sum(axis=1) / cnt (segment-sum matrix reused for logits) --
    r_b = jax.lax.broadcasted_iota(jnp.int32, (B, B * S), 0)
    c_b = jax.lax.broadcasted_iota(jnp.int32, (B, B * S), 1)
    seg = ((c_b >= r_b * S) & (c_b < (r_b + 1) * S)).astype(f32)         # (B, B*S)
    en_avg = jnp.dot(seg, en, preferred_element_type=f32) / cnt_ref[...]  # (B, D)

    # ---- attack-head prep that does NOT need h_new (overlaps the lstm DMA) --
    k_all = jnp.dot(en.astype(bf16), attn_k_w_ref[...],
                    preferred_element_type=f32) + attn_k_b_ref[...]      # (B*S, 64)

    # get_self_embed: one block-diagonal (B*N_SLOT, B*S) selection matrix,
    # rows ordered slot-major (r = k*B + b); last write wins via a strictly
    # upper-triangular suffix-count matmul.
    slot_flat = jnp.bitwise_and(glob_ref[...], N_SLOT - 1)               # (1, B*S)
    r_i = jax.lax.broadcasted_iota(jnp.int32, (B * N_SLOT, B * S), 0)
    c_i = jax.lax.broadcasted_iota(jnp.int32, (B * N_SLOT, B * S), 1)
    b_row = jnp.bitwise_and(r_i, B - 1)            # b of row (r = k*B + b)
    k_rowB = r_i - b_row                           # k * B
    cond_slot = (slot_flat * B) == k_rowB
    cond_gid = gid_ref[...] == SELF_GROUP_ID
    cond_batch = (c_i >= b_row * S) & (c_i < (b_row + 1) * S)
    sel = jnp.where(cond_slot & cond_gid & cond_batch, 1.0, 0.0)         # (B*8, B*S)
    rr = jax.lax.broadcasted_iota(jnp.int32, (B * S, B * S), 0)
    cc = jax.lax.broadcasted_iota(jnp.int32, (B * S, B * S), 1)
    upper = (rr > cc).astype(f32)                  # upper[c', c] = 1 iff c' > c
    later = jnp.dot(sel, upper, preferred_element_type=f32)
    sel_last = jnp.where(later == 0.0, sel, 0.0)   # keep only the last match
    self_flat = jnp.dot(sel_last, en, preferred_element_type=f32)        # (B*8, D)

    # per-slot query projections, batched over B (8 dots of (B,256)x(256,64))
    q_self = jnp.zeros((B, D_ATT), f32)
    for k in range(N_SLOT):
        q_self += jnp.dot(self_flat[k * B:(k + 1) * B, :].astype(bf16),
                          attn_qs_w_ref[k], preferred_element_type=f32)

    # ---- Core: LSTMCell (PyTorch gate order i, f, g, o) ----------------------
    cp_lstm.wait()
    gates = (jnp.dot(en_avg.astype(bf16), lstmw_vmem[0:D_EMB, :],
                     preferred_element_type=f32)
             + jnp.dot(h_prev_ref[...].astype(bf16),
                       lstmw_vmem[D_EMB:2 * D_EMB, :],
                       preferred_element_type=f32)
             + lstm_b_ref[...])                                          # (B, 4D)
    i_g = jax.nn.sigmoid(gates[:, 0:D_EMB])
    f_g = jax.nn.sigmoid(gates[:, D_EMB:2 * D_EMB])
    g_g = jnp.tanh(gates[:, 2 * D_EMB:3 * D_EMB])
    o_g = jax.nn.sigmoid(gates[:, 3 * D_EMB:4 * D_EMB])
    c_new = f_g * c_prev_ref[...] + i_g * g_g
    h_new = o_g * jnp.tanh(c_new)
    out_ref[:, OFF_H:OFF_H + D_EMB] = h_new
    out_ref[:, OFF_C:OFF_C + D_EMB] = c_new

    # ---- MoveHead (weight split over [lstm_out, sp_embed], no lane concat) ---
    move_logits = (jnp.dot(h_new.astype(bf16), move_w_ref[0:D_EMB, :],
                           preferred_element_type=f32)
                   + jnp.dot(sp_embed.astype(bf16),
                             move_w_ref[D_EMB:2 * D_EMB, :],
                             preferred_element_type=f32)
                   + move_b_ref[...])                                    # (B, 9)
    mprob, mact = _masked_softmax_argmax(move_logits, move_mask_ref[...])

    # ---- AttackHead: batched q @ k^T + block-diagonal gather -----------------
    q = (q_self
         + jnp.dot(h_new.astype(bf16), attn_qh_w_ref[...],
                   preferred_element_type=f32)
         + attn_q_b_ref[...])                                            # (B, 64)
    logits_full = jax.lax.dot_general(q, k_all, (((1,), (1,)), ((), ())),
                                      preferred_element_type=f32)        # (B, B*S)
    rg = jax.lax.broadcasted_iota(jnp.int32, (B * S, S), 0)
    cg = jax.lax.broadcasted_iota(jnp.int32, (B * S, S), 1)
    gather = (jnp.bitwise_and(rg, S - 1) == cg).astype(f32)              # (B*S, S)
    attack_logits = jnp.dot(logits_full * seg, gather,
                            preferred_element_type=f32) * (1.0 / D_ATT ** 0.5)
    aprob, aact = _masked_softmax_argmax(attack_logits, avail_ref[...])

    # ---- pack the narrow results into the single lane-dense output slab ------
    out_ref[:, OFF_MP:OFF_MP + N_MOVE] = mprob
    out_ref[:, OFF_AP:OFF_AP + S] = aprob
    out_ref[:, OFF_MA:OFF_MA + 1] = mact.astype(f32)
    out_ref[:, OFF_AA:OFF_AA + 1] = aact.astype(f32)


def fused_forward(params, patches, entities, group_id, global_id, cnt,
                  h_prev, c_prev, move_possible, available):
    vmem = pl.BlockSpec(memory_space=pltpu.MemorySpace.VMEM)
    hbm = pl.BlockSpec(memory_space=pl.ANY)   # big weights stay in HBM; manual DMA
    in_specs = [
        vmem, vmem, vmem, vmem, vmem,         # patches, entities, gid, glob, cnt
        vmem, vmem, vmem, vmem,               # h_prev, c_prev, move_mask, avail
        vmem, vmem,                           # conv_big, conv_bias_rows
        hbm, vmem,                            # sp_fc_w (HBM), sp_fc_b
        vmem, vmem, vmem,                     # ent_w, ent_b, ent_sp_w
        hbm, vmem,                            # lstm_w (HBM), lstm_b
        vmem, vmem,                           # move_w, move_b
        vmem, vmem, vmem, vmem, vmem,         # attn qh_w, qs_w, q_b, k_w, k_b
    ]
    return pl.pallas_call(
        _fused_kernel,
        out_shape=jax.ShapeDtypeStruct((B, OUT_W), jnp.float32),
        in_specs=in_specs,
        out_specs=vmem,
        scratch_shapes=[
            pltpu.VMEM((K_FC, D_EMB), jnp.bfloat16),        # sp_fc_w landing buf
            pltpu.VMEM((2 * D_EMB, 4 * D_EMB), jnp.bfloat16),  # lstm_w landing buf
            pltpu.SemaphoreType.DMA((2,)),
        ],
        compiler_params=pltpu.CompilerParams(
            vmem_limit_bytes=8 * 1024 * 1024),   # real footprint ~3.6 MiB
    )(
        patches, entities, group_id, global_id, cnt,
        h_prev, c_prev, move_possible, available,
        params["conv_big"], params["conv_bias_rows"],
        params["sp_fc_w"], params["sp_fc_b"],
        params["ent_w"], params["ent_b"], params["ent_sp_w"],
        params["lstm_w"], params["lstm_b"],
        params["move_w"], params["move_b"],
        params["attn_qh_w"], params["attn_qs_w"], params["attn_q_b"],
        params["attn_k_w"], params["attn_k_b"])


# ---------------------------------------------------------------------------
# parameters (deterministic synthetic init; big matmul weights in bf16)
# ---------------------------------------------------------------------------
def init_params(key):
    ks = jax.random.split(key, 10)

    def w(k, shape, scale=0.02, dtype=jnp.float32):
        return (scale * jax.random.normal(k, shape, jnp.float32)).astype(dtype)

    # SpatialEncoder conv3x3(C_IN->C_CONV): pre-packed block-diagonal im2col
    # weight so the conv over ALL batches is one matmul inside the kernel.
    #   conv_big[oc*B + b, b2*C9 + j] = W2[oc, j] * (b == b2)
    conv_w2 = w(ks[0], (C_CONV, C9))
    conv_b = jnp.zeros((C_CONV, 1), jnp.float32)
    eye_b = jnp.eye(B, dtype=jnp.float32)
    conv_big = (conv_w2[:, None, None, :] * eye_b[None, :, :, None]).reshape(
        C_CONV * B, B * C9)
    conv_bias_rows = jnp.repeat(conv_b, B, axis=0)            # (OC*B, 1)

    return {
        "conv_big": conv_big,
        "conv_bias_rows": conv_bias_rows,
        # SpatialEncoder fc (NCHW flatten -> 256) + relu
        "sp_fc_w": w(ks[1], (K_FC, D_EMB), dtype=jnp.bfloat16),
        "sp_fc_b": jnp.zeros((1, D_EMB), jnp.float32),
        # EntityEncoder: per-entity linear + spatial-conditioning linear
        "ent_w": w(ks[2], (F_ENT, D_EMB), dtype=jnp.bfloat16),
        "ent_b": jnp.zeros((1, D_EMB), jnp.float32),
        "ent_sp_w": w(ks[3], (D_EMB, D_EMB), dtype=jnp.bfloat16),
        # Core: LSTMCell(256 -> 256); rows [0:256]=W_ih, [256:512]=W_hh
        "lstm_w": w(ks[4], (2 * D_EMB, 4 * D_EMB), dtype=jnp.bfloat16),
        "lstm_b": jnp.zeros((1, 4 * D_EMB), jnp.float32),
        # MoveHead: rows [0:256] consume lstm_out, [256:512] consume sp_embed
        "move_w": w(ks[5], (2 * D_EMB, N_MOVE), dtype=jnp.bfloat16),
        "move_b": jnp.zeros((1, N_MOVE), jnp.float32),
        # AttackHead query: lstm_out part + per-slot self-embed parts; key proj
        "attn_qh_w": w(ks[6], (D_EMB, D_ATT), dtype=jnp.bfloat16),
        "attn_qs_w": w(ks[7], (N_SLOT, D_EMB, D_ATT), dtype=jnp.bfloat16),
        "attn_q_b": jnp.zeros((1, D_ATT), jnp.float32),
        "attn_k_w": w(ks[8], (D_EMB, D_ATT), dtype=jnp.bfloat16),
        "attn_k_b": jnp.zeros((1, D_ATT), jnp.float32),
    }


# ---------------------------------------------------------------------------
# top-level forward (mirrors Archtecture.forward)
# ---------------------------------------------------------------------------
def architecture_forward(params, tiles, group_id, global_id, entities, cnt,
                         lstm_lst_hidd, move_possible, available, mode="eval"):
    # TODO(synk): only eval-mode (argmax) heads; train-mode sampling not done.
    b_, c_in, h_, w_ = tiles.shape
    # im2col in NCHW order: patches[(b,c,dy,dx), (y,x)] = x_pad[b, c, y+dy, x+dx]
    # (pad + slices + stack + free relabel reshapes only)
    xp = jnp.pad(tiles, ((0, 0), (0, 0), (1, 1), (1, 1)))
    cols = [xp[:, :, dy:dy + h_, dx:dx + w_] for dy in range(3) for dx in range(3)]
    patches = jnp.stack(cols, axis=2).reshape(b_ * c_in * 9, h_ * w_)

    h_prev, c_prev = lstm_lst_hidd
    slab = fused_forward(
        params,
        patches.astype(jnp.float32),
        entities.reshape(b_ * S, F_ENT).astype(jnp.float32),
        group_id.reshape(1, b_ * S).astype(jnp.int32),
        global_id.reshape(1, b_ * S).astype(jnp.int32),
        cnt.reshape(b_, 1).astype(jnp.float32),
        h_prev.astype(jnp.float32), c_prev.astype(jnp.float32),
        move_possible.astype(jnp.float32), available.astype(jnp.float32))

    h_new = slab[:, OFF_H:OFF_H + D_EMB]
    c_new = slab[:, OFF_C:OFF_C + D_EMB]
    move_prob = slab[:, OFF_MP:OFF_MP + N_MOVE]
    attack_prob = slab[:, OFF_AP:OFF_AP + S]
    move_act = slab[:, OFF_MA].astype(jnp.int32)
    attack_act = slab[:, OFF_AA].astype(jnp.int32)
    return ((h_new, c_new), move_act, attack_act, move_prob, attack_prob)


# ---------------------------------------------------------------------------
if __name__ == "__main__":
    key = jax.random.PRNGKey(0)
    k_tiles, k_ent = jax.random.split(key, 2)

    tiles = jax.random.normal(k_tiles, (B, C_IN, H, W), jnp.float32)
    entities = jax.random.normal(k_ent, (B, S, F_ENT), jnp.float32)
    group_id = jnp.array([[0, 1, 0, 1, 2, 0, 1, 2],
                          [1, 0, 1, 2, 0, 1, 0, 2]], jnp.int32)
    global_id = jnp.arange(B * S, dtype=jnp.int32).reshape(B, S)
    cnt = jnp.array([8.0, 5.0], jnp.float32)
    lstm_lst_hidd = (jnp.zeros((B, D_EMB), jnp.float32),
                     jnp.zeros((B, D_EMB), jnp.float32))
    move_possible = jnp.array([[1, 1, 1, 0, 1, 1, 1, 1, 1],
                               [1, 0, 1, 1, 1, 1, 0, 1, 1]], jnp.float32)
    available = jnp.array([[1, 1, 0, 1, 1, 1, 1, 0],
                           [1, 1, 1, 1, 0, 1, 1, 1]], jnp.float32)

    params = init_params(jax.random.PRNGKey(42))

    fwd = jax.jit(architecture_forward, static_argnames=("mode",))
    out = fwd(params, tiles, group_id, global_id, entities, cnt,
              lstm_lst_hidd, move_possible, available, mode="eval")
    jax.tree_util.tree_map(jax.block_until_ready, out)
    print("KERNEL_OK")
</pallas_src>

<mosaic_0001>
module attributes {stable_mosaic.version = 11 : i64} {
  func.func @_fused_kernel(%arg0: memref<72x256xf32, #tpu.memory_space<vmem>>, %arg1: memref<16x32xf32, #tpu.memory_space<vmem>>, %arg2: memref<1x16xi32, #tpu.memory_space<vmem>>, %arg3: memref<1x16xi32, #tpu.memory_space<vmem>>, %arg4: memref<2x1xf32, #tpu.memory_space<vmem>>, %arg5: memref<2x256xf32, #tpu.memory_space<vmem>>, %arg6: memref<2x256xf32, #tpu.memory_space<vmem>>, %arg7: memref<2x9xf32, #tpu.memory_space<vmem>>, %arg8: memref<2x8xf32, #tpu.memory_space<vmem>>, %arg9: memref<32x72xf32, #tpu.memory_space<vmem>>, %arg10: memref<32x1xf32, #tpu.memory_space<vmem>>, %arg11: memref<4096x256xbf16, #tpu.memory_space<any>>, %arg12: memref<1x256xf32, #tpu.memory_space<vmem>>, %arg13: memref<32x256xbf16, #tpu.memory_space<vmem>>, %arg14: memref<1x256xf32, #tpu.memory_space<vmem>>, %arg15: memref<256x256xbf16, #tpu.memory_space<vmem>>, %arg16: memref<512x1024xbf16, #tpu.memory_space<any>>, %arg17: memref<1x1024xf32, #tpu.memory_space<vmem>>, %arg18: memref<512x9xbf16, #tpu.memory_space<vmem>>, %arg19: memref<1x9xf32, #tpu.memory_space<vmem>>, %arg20: memref<256x64xbf16, #tpu.memory_space<vmem>>, %arg21: memref<8x256x64xbf16, #tpu.memory_space<vmem>>, %arg22: memref<1x64xf32, #tpu.memory_space<vmem>>, %arg23: memref<256x64xbf16, #tpu.memory_space<vmem>>, %arg24: memref<1x64xf32, #tpu.memory_space<vmem>>, %arg25: memref<2x640xf32, #tpu.memory_space<vmem>>, %arg26: memref<4096x256xbf16, #tpu.memory_space<vmem>>, %arg27: memref<512x1024xbf16, #tpu.memory_space<vmem>>, %arg28: memref<2x!tpu.dma_semaphore, #tpu.memory_space<semaphore_mem>>) attributes {dimension_semantics = [], scalar_prefetch = 0 : i64, scratch_operands = 3 : i64, tpu.core_type = #tpu.core_type<tc>} {
    %c0_i32 = arith.constant 0 : i32
    %0 = tpu.memref_slice %arg28[%c0_i32] : memref<2x!tpu.dma_semaphore, #tpu.memory_space<semaphore_mem>> -> memref<1x!tpu.dma_semaphore, #tpu.memory_space<semaphore_mem>>
    %1 = tpu.memref_squeeze %0 : memref<1x!tpu.dma_semaphore, #tpu.memory_space<semaphore_mem>> -> memref<!tpu.dma_semaphore, #tpu.memory_space<semaphore_mem>>
    tpu.enqueue_dma source(%arg11 : memref<4096x256xbf16, #tpu.memory_space<any>>) target(%arg26 : memref<4096x256xbf16, #tpu.memory_space<vmem>>) target_semaphore(%1 : memref<!tpu.dma_semaphore, #tpu.memory_space<semaphore_mem>>)
    %c1_i32 = arith.constant 1 : i32
    %2 = tpu.memref_slice %arg28[%c1_i32] : memref<2x!tpu.dma_semaphore, #tpu.memory_space<semaphore_mem>> -> memref<1x!tpu.dma_semaphore, #tpu.memory_space<semaphore_mem>>
    %3 = tpu.memref_squeeze %2 : memref<1x!tpu.dma_semaphore, #tpu.memory_space<semaphore_mem>> -> memref<!tpu.dma_semaphore, #tpu.memory_space<semaphore_mem>>
    tpu.enqueue_dma source(%arg16 : memref<512x1024xbf16, #tpu.memory_space<any>>) target(%arg27 : memref<512x1024xbf16, #tpu.memory_space<vmem>>) target_semaphore(%3 : memref<!tpu.dma_semaphore, #tpu.memory_space<semaphore_mem>>)
    %cst = arith.constant 0.000000e+00 : f32
    %4 = vector.broadcast %cst : f32 to vector<2x640xf32>
    %c0 = arith.constant 0 : index
    %c0_0 = arith.constant 0 : index
    %5 = vector.load %arg25[%c0, %c0_0] : memref<2x640xf32, #tpu.memory_space<vmem>>, vector<2x640xf32>
    tpu.vector_store %arg25[%c0, %c0_0], %4 {strides = array<i32>} : memref<2x640xf32, #tpu.memory_space<vmem>>, vector<2x640xf32>,
    %c0_1 = arith.constant 0 : index
    %c0_2 = arith.constant 0 : index
    %6 = vector.load %arg9[%c0_1, %c0_2] : memref<32x72xf32, #tpu.memory_space<vmem>>, vector<32x72xf32>
    %c0_3 = arith.constant 0 : index
    %c0_4 = arith.constant 0 : index
    %7 = vector.load %arg0[%c0_3, %c0_4] : memref<72x256xf32, #tpu.memory_space<vmem>>, vector<72x256xf32>
    %cst_5 = arith.constant dense<0.000000e+00> : vector<32x256xf32>
    %8 = tpu.matmul %6, %7, %cst_5 {dimension_numbers = #tpu.dot_dimension_numbers<[1], [0], [0], [1], [0, 0, 1, 1], [], []>} : vector<32x72xf32>, vector<72x256xf32>, vector<32x256xf32> -> vector<32x256xf32>
    %c0_6 = arith.constant 0 : index
    %c0_7 = arith.constant 0 : index
    %9 = vector.load %arg10[%c0_6, %c0_7] : memref<32x1xf32, #tpu.memory_space<vmem>>, vector<32x1xf32>
    %10 = vector.broadcast %9 : vector<32x1xf32> to vector<32x256xf32>
    %11 = arith.addf %8, %10 : vector<32x256xf32>
    %cst_8 = arith.constant 0.000000e+00 : f32
    %12 = vector.broadcast %cst_8 : f32 to vector<32x256xf32>
    %13 = arith.maximumf %11, %12 : vector<32x256xf32>
    %c0_9 = arith.constant 0 : index
    %c0_10 = arith.constant 0 : index
    %14 = vector.load %arg1[%c0_9, %c0_10] : memref<16x32xf32, #tpu.memory_space<vmem>>, vector<16x32xf32>
    %15 = arith.truncf %14 : vector<16x32xf32> to vector<16x32xbf16>
    %c0_11 = arith.constant 0 : index
    %c0_12 = arith.constant 0 : index
    %16 = vector.load %arg13[%c0_11, %c0_12] : memref<32x256xbf16, #tpu.memory_space<vmem>>, vector<32x256xbf16>
    %cst_13 = arith.constant dense<0.000000e+00> : vector<16x256xf32>
    %17 = tpu.matmul %15, %16, %cst_13 {dimension_numbers = #tpu.dot_dimension_numbers<[1], [0], [0], [1], [0, 0, 1, 1], [], []>} : vector<16x32xbf16>, vector<32x256xbf16>, vector<16x256xf32> -> vector<16x256xf32>
    %c0_14 = arith.constant 0 : index
    %c0_15 = arith.constant 0 : index
    %18 = vector.load %arg14[%c0_14, %c0_15] : memref<1x256xf32, #tpu.memory_space<vmem>>, vector<1x256xf32>
    %19 = vector.broadcast %18 : vector<1x256xf32> to vector<16x256xf32>
    %20 = arith.addf %17, %19 : vector<16x256xf32>
    %c0_i32_16 = arith.constant 0 : i32
    %21 = tpu.memref_slice %arg28[%c0_i32_16] : memref<2x!tpu.dma_semaphore, #tpu.memory_space<semaphore_mem>> -> memref<1x!tpu.dma_semaphore, #tpu.memory_space<semaphore_mem>>
    %22 = tpu.memref_squeeze %21 : memref<1x!tpu.dma_semaphore, #tpu.memory_space<semaphore_mem>> -> memref<!tpu.dma_semaphore, #tpu.memory_space<semaphore_mem>>
    tpu.wait_dma2 semaphore(%22 : memref<!tpu.dma_semaphore, #tpu.memory_space<semaphore_mem>>) src(%arg11 : memref<4096x256xbf16, #tpu.memory_space<any>>) dst(%arg26 : memref<4096x256xbf16, #tpu.memory_space<vmem>>)
    %cst_17 = arith.constant 0.000000e+00 : f32
    %23 = vector.broadcast %cst_17 : f32 to vector<2x256xf32>
    %24 = vector.extract_strided_slice %13 {offsets = [0, 0], sizes = [2, 256], strides = [1, 1]} : vector<32x256xf32> to vector<2x256xf32>
    %25 = arith.truncf %24 : vector<2x256xf32> to vector<2x256xbf16>
    %c0_18 = arith.constant 0 : index
    %c0_19 = arith.constant 0 : index
    %26 = vector.load %arg26[%c0_18, %c0_19] : memref<4096x256xbf16, #tpu.memory_space<vmem>>, vector<256x256xbf16>
    %cst_20 = arith.constant dense<0.000000e+00> : vector<2x256xf32>
    %27 = tpu.matmul %25, %26, %cst_20 {dimension_numbers = #tpu.dot_dimension_numbers<[1], [0], [0], [1], [0, 0, 1, 1], [], []>} : vector<2x256xbf16>, vector<256x256xbf16>, vector<2x256xf32> -> vector<2x256xf32>
    %28 = arith.addf %23, %27 : vector<2x256xf32>
    %29 = vector.extract_strided_slice %13 {offsets = [2, 0], sizes = [2, 256], strides = [1, 1]} : vector<32x256xf32> to vector<2x256xf32>
    %30 = arith.truncf %29 : vector<2x256xf32> to vector<2x256xbf16>
    %c256 = arith.constant 256 : index
    %c0_21 = arith.constant 0 : index
    %31 = vector.load %arg26[%c256, %c0_21] : memref<4096x256xbf16, #tpu.memory_space<vmem>>, vector<256x256xbf16>
    %cst_22 = arith.constant dense<0.000000e+00> : vector<2x256xf32>
    %32 = tpu.matmul %30, %31, %cst_22 {dimension_numbers = #tpu.dot_dimension_numbers<[1], [0], [0], [1], [0, 0, 1, 1], [], []>} : vector<2x256xbf16>, vector<256x256xbf16>, vector<2x256xf32> -> vector<2x256xf32>
    %33 = arith.addf %28, %32 : vector<2x256xf32>
    %34 = vector.extract_strided_slice %13 {offsets = [4, 0], sizes = [2, 256], strides = [1, 1]} : vector<32x256xf32> to vector<2x256xf32>
    %35 = arith.truncf %34 : vector<2x256xf32> to vector<2x256xbf16>
    %c512 = arith.constant 512 : index
    %c0_23 = arith.constant 0 : index
    %36 = vector.load %arg26[%c512, %c0_23] : memref<4096x256xbf16, #tpu.memory_space<vmem>>, vector<256x256xbf16>
    %cst_24 = arith.constant dense<0.000000e+00> : vector<2x256xf32>
    %37 = tpu.matmul %35, %36, %cst_24 {dimension_numbers = #tpu.dot_dimension_numbers<[1], [0], [0], [1], [0, 0, 1, 1], [], []>} : vector<2x256xbf16>, vector<256x256xbf16>, vector<2x256xf32> -> vector<2x256xf32>
    %38 = arith.addf %33, %37 : vector<2x256xf32>
    %39 = vector.extract_strided_slice %13 {offsets = [6, 0], sizes = [2, 256], strides = [1, 1]} : vector<32x256xf32> to vector<2x256xf32>
    %40 = arith.truncf %39 : vector<2x256xf32> to vector<2x256xbf16>
    %c768 = arith.constant 768 : index
    %c0_25 = arith.constant 0 : index
    %41 = vector.load %arg26[%c768, %c0_25] : memref<4096x256xbf16, #tpu.memory_space<vmem>>, vector<256x256xbf16>
    %cst_26 = arith.constant dense<0.000000e+00> : vector<2x256xf32>
    %42 = tpu.matmul %40, %41, %cst_26 {dimension_numbers = #tpu.dot_dimension_numbers<[1], [0], [0], [1], [0, 0, 1, 1], [], []>} : vector<2x256xbf16>, vector<256x256xbf16>, vector<2x256xf32> -> vector<2x256xf32>
    %43 = arith.addf %38, %42 : vector<2x256xf32>
    %44 = vector.extract_strided_slice %13 {offsets = [8, 0], sizes = [2, 256], strides = [1, 1]} : vector<32x256xf32> to vector<2x256xf32>
    %45 = arith.truncf %44 : vector<2x256xf32> to vector<2x256xbf16>
    %c1024 = arith.constant 1024 : index
    %c0_27 = arith.constant 0 : index
    %46 = vector.load %arg26[%c1024, %c0_27] : memref<4096x256xbf16, #tpu.memory_space<vmem>>, vector<256x256xbf16>
    %cst_28 = arith.constant dense<0.000000e+00> : vector<2x256xf32>
    %47 = tpu.matmul %45, %46, %cst_28 {dimension_numbers = #tpu.dot_dimension_numbers<[1], [0], [0], [1], [0, 0, 1, 1], [], []>} : vector<2x256xbf16>, vector<256x256xbf16>, vector<2x256xf32> -> vector<2x256xf32>
    %48 = arith.addf %43, %47 : vector<2x256xf32>
    %49 = vector.extract_strided_slice %13 {offsets = [10, 0], sizes = [2, 256], strides = [1, 1]} : vector<32x256xf32> to vector<2x256xf32>
    %50 = arith.truncf %49 : vector<2x256xf32> to vector<2x256xbf16>
    %c1280 = arith.constant 1280 : index
    %c0_29 = arith.constant 0 : index
    %51 = vector.load %arg26[%c1280, %c0_29] : memref<4096x256xbf16, #tpu.memory_space<vmem>>, vector<256x256xbf16>
    %cst_30 = arith.constant dense<0.000000e+00> : vector<2x256xf32>
    %52 = tpu.matmul %50, %51, %cst_30 {dimension_numbers = #tpu.dot_dimension_numbers<[1], [0], [0], [1], [0, 0, 1, 1], [], []>} : vector<2x256xbf16>, vector<256x256xbf16>, vector<2x256xf32> -> vector<2x256xf32>
    %53 = arith.addf %48, %52 : vector<2x256xf32>
    %54 = vector.extract_strided_slice %13 {offsets = [12, 0], sizes = [2, 256], strides = [1, 1]} : vector<32x256xf32> to vector<2x256xf32>
    %55 = arith.truncf %54 : vector<2x256xf32> to vector<2x256xbf16>
    %c1536 = arith.constant 1536 : index
    %c0_31 = arith.constant 0 : index
    %56 = vector.load %arg26[%c1536, %c0_31] : memref<4096x256xbf16, #tpu.memory_space<vmem>>, vector<256x256xbf16>
    %cst_32 = arith.constant dense<0.000000e+00> : vector<2x256xf32>
    %57 = tpu.matmul %55, %56, %cst_32 {dimension_numbers = #tpu.dot_dimension_numbers<[1], [0], [0], [1], [0, 0, 1, 1], [], []>} : vector<2x256xbf16>, vector<256x256xbf16>, vector<2x256xf32> -> vector<2x256xf32>
    %58 = arith.addf %53, %57 : vector<2x256xf32>
    %59 = vector.extract_strided_slice %13 {offsets = [14, 0], sizes = [2, 256], strides = [1, 1]} : vector<32x256xf32> to vector<2x256xf32>
    %60 = arith.truncf %59 : vector<2x256xf32> to vector<2x256xbf16>
    %c1792 = arith.constant 1792 : index
    %c0_33 = arith.constant 0 : index
    %61 = vector.load %arg26[%c1792, %c0_33] : memref<4096x256xbf16, #tpu.memory_space<vmem>>, vector<256x256xbf16>
    %cst_34 = arith.constant dense<0.000000e+00> : vector<2x256xf32>
    %62 = tpu.matmul %60, %61, %cst_34 {dimension_numbers = #tpu.dot_dimension_numbers<[1], [0], [0], [1], [0, 0, 1, 1], [], []>} : vector<2x256xbf16>, vector<256x256xbf16>, vector<2x256xf32> -> vector<2x256xf32>
    %63 = arith.addf %58, %62 : vector<2x256xf32>
    %64 = vector.extract_strided_slice %13 {offsets = [16, 0], sizes = [2, 256], strides = [1, 1]} : vector<32x256xf32> to vector<2x256xf32>
    %65 = arith.truncf %64 : vector<2x256xf32> to vector<2x256xbf16>
    %c2048 = arith.constant 2048 : index
    %c0_35 = arith.constant 0 : index
    %66 = vector.load %arg26[%c2048, %c0_35] : memref<4096x256xbf16, #tpu.memory_space<vmem>>, vector<256x256xbf16>
    %cst_36 = arith.constant dense<0.000000e+00> : vector<2x256xf32>
    %67 = tpu.matmul %65, %66, %cst_36 {dimension_numbers = #tpu.dot_dimension_numbers<[1], [0], [0], [1], [0, 0, 1, 1], [], []>} : vector<2x256xbf16>, vector<256x256xbf16>, vector<2x256xf32> -> vector<2x256xf32>
    %68 = arith.addf %63, %67 : vector<2x256xf32>
    %69 = vector.extract_strided_slice %13 {offsets = [18, 0], sizes = [2, 256], strides = [1, 1]} : vector<32x256xf32> to vector<2x256xf32>
    %70 = arith.truncf %69 : vector<2x256xf32> to vector<2x256xbf16>
    %c2304 = arith.constant 2304 : index
    %c0_37 = arith.constant 0 : index
    %71 = vector.load %arg26[%c2304, %c0_37] : memref<4096x256xbf16, #tpu.memory_space<vmem>>, vector<256x256xbf16>
    %cst_38 = arith.constant dense<0.000000e+00> : vector<2x256xf32>
    %72 = tpu.matmul %70, %71, %cst_38 {dimension_numbers = #tpu.dot_dimension_numbers<[1], [0], [0], [1], [0, 0, 1, 1], [], []>} : vector<2x256xbf16>, vector<256x256xbf16>, vector<2x256xf32> -> vector<2x256xf32>
    %73 = arith.addf %68, %72 : vector<2x256xf32>
    %74 = vector.extract_strided_slice %13 {offsets = [20, 0], sizes = [2, 256], strides = [1, 1]} : vector<32x256xf32> to vector<2x256xf32>
    %75 = arith.truncf %74 : vector<2x256xf32> to vector<2x256xbf16>
    %c2560 = arith.constant 2560 : index
    %c0_39 = arith.constant 0 : index
    %76 = vector.load %arg26[%c2560, %c0_39] : memref<4096x256xbf16, #tpu.memory_space<vmem>>, vector<256x256xbf16>
    %cst_40 = arith.constant dense<0.000000e+00> : vector<2x256xf32>
    %77 = tpu.matmul %75, %76, %cst_40 {dimension_numbers = #tpu.dot_dimension_numbers<[1], [0], [0], [1], [0, 0, 1, 1], [], []>} : vector<2x256xbf16>, vector<256x256xbf16>, vector<2x256xf32> -> vector<2x256xf32>
    %78 = arith.addf %73, %77 : vector<2x256xf32>
    %79 = vector.extract_strided_slice %13 {offsets = [22, 0], sizes = [2, 256], strides = [1, 1]} : vector<32x256xf32> to vector<2x256xf32>
    %80 = arith.truncf %79 : vector<2x256xf32> to vector<2x256xbf16>
    %c2816 = arith.constant 2816 : index
    %c0_41 = arith.constant 0 : index
    %81 = vector.load %arg26[%c2816, %c0_41] : memref<4096x256xbf16, #tpu.memory_space<vmem>>, vector<256x256xbf16>
    %cst_42 = arith.constant dense<0.000000e+00> : vector<2x256xf32>
    %82 = tpu.matmul %80, %81, %cst_42 {dimension_numbers = #tpu.dot_dimension_numbers<[1], [0], [0], [1], [0, 0, 1, 1], [], []>} : vector<2x256xbf16>, vector<256x256xbf16>, vector<2x256xf32> -> vector<2x256xf32>
    %83 = arith.addf %78, %82 : vector<2x256xf32>
    %84 = vector.extract_strided_slice %13 {offsets = [24, 0], sizes = [2, 256], strides = [1, 1]} : vector<32x256xf32> to vector<2x256xf32>
    %85 = arith.truncf %84 : vector<2x256xf32> to vector<2x256xbf16>
    %c3072 = arith.constant 3072 : index
    %c0_43 = arith.constant 0 : index
    %86 = vector.load %arg26[%c3072, %c0_43] : memref<4096x256xbf16, #tpu.memory_space<vmem>>, vector<256x256xbf16>
    %cst_44 = arith.constant dense<0.000000e+00> : vector<2x256xf32>
    %87 = tpu.matmul %85, %86, %cst_44 {dimension_numbers = #tpu.dot_dimension_numbers<[1], [0], [0], [1], [0, 0, 1, 1], [], []>} : vector<2x256xbf16>, vector<256x256xbf16>, vector<2x256xf32> -> vector<2x256xf32>
    %88 = arith.addf %83, %87 : vector<2x256xf32>
    %89 = vector.extract_strided_slice %13 {offsets = [26, 0], sizes = [2, 256], strides = [1, 1]} : vector<32x256xf32> to vector<2x256xf32>
    %90 = arith.truncf %89 : vector<2x256xf32> to vector<2x256xbf16>
    %c3328 = arith.constant 3328 : index
    %c0_45 = arith.constant 0 : index
    %91 = vector.load %arg26[%c3328, %c0_45] : memref<4096x256xbf16, #tpu.memory_space<vmem>>, vector<256x256xbf16>
    %cst_46 = arith.constant dense<0.000000e+00> : vector<2x256xf32>
    %92 = tpu.matmul %90, %91, %cst_46 {dimension_numbers = #tpu.dot_dimension_numbers<[1], [0], [0], [1], [0, 0, 1, 1], [], []>} : vector<2x256xbf16>, vector<256x256xbf16>, vector<2x256xf32> -> vector<2x256xf32>
    %93 = arith.addf %88, %92 : vector<2x256xf32>
    %94 = vector.extract_strided_slice %13 {offsets = [28, 0], sizes = [2, 256], strides = [1, 1]} : vector<32x256xf32> to vector<2x256xf32>
    %95 = arith.truncf %94 : vector<2x256xf32> to vector<2x256xbf16>
    %c3584 = arith.constant 3584 : index
    %c0_47 = arith.constant 0 : index
    %96 = vector.load %arg26[%c3584, %c0_47] : memref<4096x256xbf16, #tpu.memory_space<vmem>>, vector<256x256xbf16>
    %cst_48 = arith.constant dense<0.000000e+00> : vector<2x256xf32>
    %97 = tpu.matmul %95, %96, %cst_48 {dimension_numbers = #tpu.dot_dimension_numbers<[1], [0], [0], [1], [0, 0, 1, 1], [], []>} : vector<2x256xbf16>, vector<256x256xbf16>, vector<2x256xf32> -> vector<2x256xf32>
    %98 = arith.addf %93, %97 : vector<2x256xf32>
    %99 = vector.extract_strided_slice %13 {offsets = [30, 0], sizes = [2, 256], strides = [1, 1]} : vector<32x256xf32> to vector<2x256xf32>
    %100 = arith.truncf %99 : vector<2x256xf32> to vector<2x256xbf16>
    %c3840 = arith.constant 3840 : index
    %c0_49 = arith.constant 0 : index
    %101 = vector.load %arg26[%c3840, %c0_49] : memref<4096x256xbf16, #tpu.memory_space<vmem>>, vector<256x256xbf16>
    %cst_50 = arith.constant dense<0.000000e+00> : vector<2x256xf32>
    %102 = tpu.matmul %100, %101, %cst_50 {dimension_numbers = #tpu.dot_dimension_numbers<[1], [0], [0], [1], [0, 0, 1, 1], [], []>} : vector<2x256xbf16>, vector<256x256xbf16>, vector<2x256xf32> -> vector<2x256xf32>
    %103 = arith.addf %98, %102 : vector<2x256xf32>
    %c0_51 = arith.constant 0 : index
    %c0_52 = arith.constant 0 : index
    %104 = vector.load %arg12[%c0_51, %c0_52] : memref<1x256xf32, #tpu.memory_space<vmem>>, vector<1x256xf32>
    %105 = vector.broadcast %104 : vector<1x256xf32> to vector<2x256xf32>
    %106 = arith.addf %103, %105 : vector<2x256xf32>
    %cst_53 = arith.constant 0.000000e+00 : f32
    %107 = vector.broadcast %cst_53 : f32 to vector<2x256xf32>
    %108 = arith.maximumf %106, %107 : vector<2x256xf32>
    %109 = arith.truncf %108 : vector<2x256xf32> to vector<2x256xbf16>
    %c0_54 = arith.constant 0 : index
    %c0_55 = arith.constant 0 : index
    %110 = vector.load %arg15[%c0_54, %c0_55] : memref<256x256xbf16, #tpu.memory_space<vmem>>, vector<256x256xbf16>
    %cst_56 = arith.constant dense<0.000000e+00> : vector<2x256xf32>
    %111 = tpu.matmul %109, %110, %cst_56 {dimension_numbers = #tpu.dot_dimension_numbers<[1], [0], [0], [1], [0, 0, 1, 1], [], []>} : vector<2x256xbf16>, vector<256x256xbf16>, vector<2x256xf32> -> vector<2x256xf32>
    %112 = tpu.iota {dimensions = array<i32: 0>} : vector<16x2xi32>
    %113 = tpu.iota {dimensions = array<i32: 1>} : vector<16x2xi32>
    %c8_i32 = arith.constant 8 : i32
    %114 = vector.broadcast %c8_i32 : i32 to vector<16x2xi32>
    %115 = arith.muli %113, %114 : vector<16x2xi32>
    %116 = arith.cmpi sge, %112, %115 : vector<16x2xi32>
    %c1_i32_57 = arith.constant 1 : i32
    %117 = vector.broadcast %c1_i32_57 : i32 to vector<16x2xi32>
    %118 = arith.addi %113, %117 : vector<16x2xi32>
    %c8_i32_58 = arith.constant 8 : i32
    %119 = vector.broadcast %c8_i32_58 : i32 to vector<16x2xi32>
    %120 = arith.muli %118, %119 : vector<16x2xi32>
    %121 = arith.cmpi slt, %112, %120 : vector<16x2xi32>
    %122 = arith.andi %116, %121 : vector<16x2xi1>
    %123 = arith.extui %122 : vector<16x2xi1> to vector<16x2xi32>
    %124 = arith.sitofp %123 : vector<16x2xi32> to vector<16x2xf32>
    %cst_59 = arith.constant dense<0.000000e+00> : vector<16x256xf32>
    %125 = tpu.matmul %124, %111, %cst_59 {dimension_numbers = #tpu.dot_dimension_numbers<[1], [0], [0], [1], [0, 0, 1, 1], [], []>} : vector<16x2xf32>, vector<2x256xf32>, vector<16x256xf32> -> vector<16x256xf32>
    %126 = arith.addf %20, %125 : vector<16x256xf32>
    %cst_60 = arith.constant 0.000000e+00 : f32
    %127 = vector.broadcast %cst_60 : f32 to vector<16x256xf32>
    %128 = arith.maximumf %126, %127 : vector<16x256xf32>
    %129 = tpu.iota {dimensions = array<i32: 0>} : vector<2x16xi32>
    %130 = tpu.iota {dimensions = array<i32: 1>} : vector<2x16xi32>
    %c8_i32_61 = arith.constant 8 : i32
    %131 = vector.broadcast %c8_i32_61 : i32 to vector<2x16xi32>
    %132 = arith.muli %129, %131 : vector<2x16xi32>
    %133 = arith.cmpi sge, %130, %132 : vector<2x16xi32>
    %c1_i32_62 = arith.constant 1 : i32
    %134 = vector.broadcast %c1_i32_62 : i32 to vector<2x16xi32>
    %135 = arith.addi %129, %134 : vector<2x16xi32>
    %c8_i32_63 = arith.constant 8 : i32
    %136 = vector.broadcast %c8_i32_63 : i32 to vector<2x16xi32>
    %137 = arith.muli %135, %136 : vector<2x16xi32>
    %138 = arith.cmpi slt, %130, %137 : vector<2x16xi32>
    %139 = arith.andi %133, %138 : vector<2x16xi1>
    %140 = arith.extui %139 : vector<2x16xi1> to vector<2x16xi32>
    %141 = arith.sitofp %140 : vector<2x16xi32> to vector<2x16xf32>
    %cst_64 = arith.constant dense<0.000000e+00> : vector<2x256xf32>
    %142 = tpu.matmul %141, %128, %cst_64 {dimension_numbers = #tpu.dot_dimension_numbers<[1], [0], [0], [1], [0, 0, 1, 1], [], []>} : vector<2x16xf32>, vector<16x256xf32>, vector<2x256xf32> -> vector<2x256xf32>
    %c0_65 = arith.constant 0 : index
    %c0_66 = arith.constant 0 : index
    %143 = vector.load %arg4[%c0_65, %c0_66] : memref<2x1xf32, #tpu.memory_space<vmem>>, vector<2x1xf32>
    %144 = vector.broadcast %143 : vector<2x1xf32> to vector<2x256xf32>
    %145 = arith.divf %142, %144 : vector<2x256xf32>
    %146 = arith.truncf %128 : vector<16x256xf32> to vector<16x256xbf16>
    %c0_67 = arith.constant 0 : index
    %c0_68 = arith.constant 0 : index
    %147 = vector.load %arg23[%c0_67, %c0_68] : memref<256x64xbf16, #tpu.memory_space<vmem>>, vector<256x64xbf16>
    %cst_69 = arith.constant dense<0.000000e+00> : vector<16x64xf32>
    %148 = tpu.matmul %146, %147, %cst_69 {dimension_numbers = #tpu.dot_dimension_numbers<[1], [0], [0], [1], [0, 0, 1, 1], [], []>} : vector<16x256xbf16>, vector<256x64xbf16>, vector<16x64xf32> -> vector<16x64xf32>
    %c0_70 = arith.constant 0 : index
    %c0_71 = arith.constant 0 : index
    %149 = vector.load %arg24[%c0_70, %c0_71] : memref<1x64xf32, #tpu.memory_space<vmem>>, vector<1x64xf32>
    %150 = vector.broadcast %149 : vector<1x64xf32> to vector<16x64xf32>
    %151 = arith.addf %148, %150 : vector<16x64xf32>
    %c0_72 = arith.constant 0 : index
    %c0_73 = arith.constant 0 : index
    %152 = vector.load %arg3[%c0_72, %c0_73] : memref<1x16xi32, #tpu.memory_space<vmem>>, vector<1x16xi32>
    %c7_i32 = arith.constant 7 : i32
    %153 = vector.broadcast %c7_i32 : i32 to vector<1x16xi32>
    %154 = arith.andi %152, %153 : vector<1x16xi32>
    %155 = tpu.iota {dimensions = array<i32: 0>} : vector<16x16xi32>
    %156 = tpu.iota {dimensions = array<i32: 1>} : vector<16x16xi32>
    %c1_i32_74 = arith.constant 1 : i32
    %157 = vector.broadcast %c1_i32_74 : i32 to vector<16x16xi32>
    %158 = arith.andi %155, %157 : vector<16x16xi32>
    %159 = arith.subi %155, %158 : vector<16x16xi32>
    %c2_i32 = arith.constant 2 : i32
    %160 = vector.broadcast %c2_i32 : i32 to vector<1x16xi32>
    %161 = arith.muli %154, %160 : vector<1x16xi32>
    %162 = vector.broadcast %161 : vector<1x16xi32> to vector<16x16xi32>
    %163 = arith.cmpi eq, %162, %159 : vector<16x16xi32>
    %c0_75 = arith.constant 0 : index
    %c0_76 = arith.constant 0 : index
    %164 = vector.load %arg2[%c0_75, %c0_76] : memref<1x16xi32, #tpu.memory_space<vmem>>, vector<1x16xi32>
    %c0_i32_77 = arith.constant 0 : i32
    %165 = vector.broadcast %c0_i32_77 : i32 to vector<1x16xi32>
    %166 = arith.cmpi eq, %164, %165 : vector<1x16xi32>
    %c8_i32_78 = arith.constant 8 : i32
    %167 = vector.broadcast %c8_i32_78 : i32 to vector<16x16xi32>
    %168 = arith.muli %158, %167 : vector<16x16xi32>
    %169 = arith.cmpi sge, %156, %168 : vector<16x16xi32>
    %c1_i32_79 = arith.constant 1 : i32
    %170 = vector.broadcast %c1_i32_79 : i32 to vector<16x16xi32>
    %171 = arith.addi %158, %170 : vector<16x16xi32>
    %c8_i32_80 = arith.constant 8 : i32
    %172 = vector.broadcast %c8_i32_80 : i32 to vector<16x16xi32>
    %173 = arith.muli %171, %172 : vector<16x16xi32>
    %174 = arith.cmpi slt, %156, %173 : vector<16x16xi32>
    %175 = arith.andi %169, %174 : vector<16x16xi1>
    %176 = vector.broadcast %166 : vector<1x16xi1> to vector<16x16xi1>
    %177 = arith.andi %163, %176 : vector<16x16xi1>
    %178 = arith.andi %177, %175 : vector<16x16xi1>
    %cst_81 = arith.constant 1.000000e+00 : f32
    %cst_82 = arith.constant 0.000000e+00 : f32
    %179 = vector.broadcast %cst_81 : f32 to vector<16x16xf32>
    %180 = vector.broadcast %cst_82 : f32 to vector<16x16xf32>
    %181 = arith.select %178, %179, %180 : vector<16x16xi1>, vector<16x16xf32>
    %182 = tpu.iota {dimensions = array<i32: 0>} : vector<16x16xi32>
    %183 = tpu.iota {dimensions = array<i32: 1>} : vector<16x16xi32>
    %184 = arith.cmpi sgt, %182, %183 : vector<16x16xi32>
    %185 = arith.extui %184 : vector<16x16xi1> to vector<16x16xi32>
    %186 = arith.sitofp %185 : vector<16x16xi32> to vector<16x16xf32>
    %cst_83 = arith.constant dense<0.000000e+00> : vector<16x16xf32>
    %187 = tpu.matmul %181, %186, %cst_83 {dimension_numbers = #tpu.dot_dimension_numbers<[1], [0], [0], [1], [0, 0, 1, 1], [], []>} : vector<16x16xf32>, vector<16x16xf32>, vector<16x16xf32> -> vector<16x16xf32>
    %cst_84 = arith.constant 0.000000e+00 : f32
    %188 = vector.broadcast %cst_84 : f32 to vector<16x16xf32>
    %189 = arith.cmpf oeq, %187, %188 : vector<16x16xf32>
    %cst_85 = arith.constant 0.000000e+00 : f32
    %190 = vector.broadcast %cst_85 : f32 to vector<16x16xf32>
    %191 = arith.select %189, %181, %190 : vector<16x16xi1>, vector<16x16xf32>
    %cst_86 = arith.constant dense<0.000000e+00> : vector<16x256xf32>
    %192 = tpu.matmul %191, %128, %cst_86 {dimension_numbers = #tpu.dot_dimension_numbers<[1], [0], [0], [1], [0, 0, 1, 1], [], []>} : vector<16x16xf32>, vector<16x256xf32>, vector<16x256xf32> -> vector<16x256xf32>
    %cst_87 = arith.constant 0.000000e+00 : f32
    %193 = vector.broadcast %cst_87 : f32 to vector<2x64xf32>
    %194 = vector.extract_strided_slice %192 {offsets = [0, 0], sizes = [2, 256], strides = [1, 1]} : vector<16x256xf32> to vector<2x256xf32>
    %195 = arith.truncf %194 : vector<2x256xf32> to vector<2x256xbf16>
    %c0_88 = arith.constant 0 : index
    %c0_89 = arith.constant 0 : index
    %c0_90 = arith.constant 0 : index
    %196 = vector.load %arg21[%c0_88, %c0_89, %c0_90] : memref<8x256x64xbf16, #tpu.memory_space<vmem>>, vector<1x256x64xbf16>
    %197 = vector.shape_cast %196 : vector<1x256x64xbf16> to vector<256x64xbf16>
    %cst_91 = arith.constant dense<0.000000e+00> : vector<2x64xf32>
    %198 = tpu.matmul %195, %197, %cst_91 {dimension_numbers = #tpu.dot_dimension_numbers<[1], [0], [0], [1], [0, 0, 1, 1], [], []>} : vector<2x256xbf16>, vector<256x64xbf16>, vector<2x64xf32> -> vector<2x64xf32>
    %199 = arith.addf %193, %198 : vector<2x64xf32>
    %200 = vector.extract_strided_slice %192 {offsets = [2, 0], sizes = [2, 256], strides = [1, 1]} : vector<16x256xf32> to vector<2x256xf32>
    %201 = arith.truncf %200 : vector<2x256xf32> to vector<2x256xbf16>
    %c1 = arith.constant 1 : index
    %c0_92 = arith.constant 0 : index
    %c0_93 = arith.constant 0 : index
    %202 = vector.load %arg21[%c1, %c0_92, %c0_93] : memref<8x256x64xbf16, #tpu.memory_space<vmem>>, vector<1x256x64xbf16>
    %203 = vector.shape_cast %202 : vector<1x256x64xbf16> to vector<256x64xbf16>
    %cst_94 = arith.constant dense<0.000000e+00> : vector<2x64xf32>
    %204 = tpu.matmul %201, %203, %cst_94 {dimension_numbers = #tpu.dot_dimension_numbers<[1], [0], [0], [1], [0, 0, 1, 1], [], []>} : vector<2x256xbf16>, vector<256x64xbf16>, vector<2x64xf32> -> vector<2x64xf32>
    %205 = arith.addf %199, %204 : vector<2x64xf32>
    %206 = vector.extract_strided_slice %192 {offsets = [4, 0], sizes = [2, 256], strides = [1, 1]} : vector<16x256xf32> to vector<2x256xf32>
    %207 = arith.truncf %206 : vector<2x256xf32> to vector<2x256xbf16>
    %c2 = arith.constant 2 : index
    %c0_95 = arith.constant 0 : index
    %c0_96 = arith.constant 0 : index
    %208 = vector.load %arg21[%c2, %c0_95, %c0_96] : memref<8x256x64xbf16, #tpu.memory_space<vmem>>, vector<1x256x64xbf16>
    %209 = vector.shape_cast %208 : vector<1x256x64xbf16> to vector<256x64xbf16>
    %cst_97 = arith.constant dense<0.000000e+00> : vector<2x64xf32>
    %210 = tpu.matmul %207, %209, %cst_97 {dimension_numbers = #tpu.dot_dimension_numbers<[1], [0], [0], [1], [0, 0, 1, 1], [], []>} : vector<2x256xbf16>, vector<256x64xbf16>, vector<2x64xf32> -> vector<2x64xf32>
    %211 = arith.addf %205, %210 : vector<2x64xf32>
    %212 = vector.extract_strided_slice %192 {offsets = [6, 0], sizes = [2, 256], strides = [1, 1]} : vector<16x256xf32> to vector<2x256xf32>
    %213 = arith.truncf %212 : vector<2x256xf32> to vector<2x256xbf16>
    %c3 = arith.constant 3 : index
    %c0_98 = arith.constant 0 : index
    %c0_99 = arith.constant 0 : index
    %214 = vector.load %arg21[%c3, %c0_98, %c0_99] : memref<8x256x64xbf16, #tpu.memory_space<vmem>>, vector<1x256x64xbf16>
    %215 = vector.shape_cast %214 : vector<1x256x64xbf16> to vector<256x64xbf16>
    %cst_100 = arith.constant dense<0.000000e+00> : vector<2x64xf32>
    %216 = tpu.matmul %213, %215, %cst_100 {dimension_numbers = #tpu.dot_dimension_numbers<[1], [0], [0], [1], [0, 0, 1, 1], [], []>} : vector<2x256xbf16>, vector<256x64xbf16>, vector<2x64xf32> -> vector<2x64xf32>
    %217 = arith.addf %211, %216 : vector<2x64xf32>
    %218 = vector.extract_strided_slice %192 {offsets = [8, 0], sizes = [2, 256], strides = [1, 1]} : vector<16x256xf32> to vector<2x256xf32>
    %219 = arith.truncf %218 : vector<2x256xf32> to vector<2x256xbf16>
    %c4 = arith.constant 4 : index
    %c0_101 = arith.constant 0 : index
    %c0_102 = arith.constant 0 : index
    %220 = vector.load %arg21[%c4, %c0_101, %c0_102] : memref<8x256x64xbf16, #tpu.memory_space<vmem>>, vector<1x256x64xbf16>
    %221 = vector.shape_cast %220 : vector<1x256x64xbf16> to vector<256x64xbf16>
    %cst_103 = arith.constant dense<0.000000e+00> : vector<2x64xf32>
    %222 = tpu.matmul %219, %221, %cst_103 {dimension_numbers = #tpu.dot_dimension_numbers<[1], [0], [0], [1], [0, 0, 1, 1], [], []>} : vector<2x256xbf16>, vector<256x64xbf16>, vector<2x64xf32> -> vector<2x64xf32>
    %223 = arith.addf %217, %222 : vector<2x64xf32>
    %224 = vector.extract_strided_slice %192 {offsets = [10, 0], sizes = [2, 256], strides = [1, 1]} : vector<16x256xf32> to vector<2x256xf32>
    %225 = arith.truncf %224 : vector<2x256xf32> to vector<2x256xbf16>
    %c5 = arith.constant 5 : index
    %c0_104 = arith.constant 0 : index
    %c0_105 = arith.constant 0 : index
    %226 = vector.load %arg21[%c5, %c0_104, %c0_105] : memref<8x256x64xbf16, #tpu.memory_space<vmem>>, vector<1x256x64xbf16>
    %227 = vector.shape_cast %226 : vector<1x256x64xbf16> to vector<256x64xbf16>
    %cst_106 = arith.constant dense<0.000000e+00> : vector<2x64xf32>
    %228 = tpu.matmul %225, %227, %cst_106 {dimension_numbers = #tpu.dot_dimension_numbers<[1], [0], [0], [1], [0, 0, 1, 1], [], []>} : vector<2x256xbf16>, vector<256x64xbf16>, vector<2x64xf32> -> vector<2x64xf32>
    %229 = arith.addf %223, %228 : vector<2x64xf32>
    %230 = vector.extract_strided_slice %192 {offsets = [12, 0], sizes = [2, 256], strides = [1, 1]} : vector<16x256xf32> to vector<2x256xf32>
    %231 = arith.truncf %230 : vector<2x256xf32> to vector<2x256xbf16>
    %c6 = arith.constant 6 : index
    %c0_107 = arith.constant 0 : index
    %c0_108 = arith.constant 0 : index
    %232 = vector.load %arg21[%c6, %c0_107, %c0_108] : memref<8x256x64xbf16, #tpu.memory_space<vmem>>, vector<1x256x64xbf16>
    %233 = vector.shape_cast %232 : vector<1x256x64xbf16> to vector<256x64xbf16>
    %cst_109 = arith.constant dense<0.000000e+00> : vector<2x64xf32>
    %234 = tpu.matmul %231, %233, %cst_109 {dimension_numbers = #tpu.dot_dimension_numbers<[1], [0], [0], [1], [0, 0, 1, 1], [], []>} : vector<2x256xbf16>, vector<256x64xbf16>, vector<2x64xf32> -> vector<2x64xf32>
    %235 = arith.addf %229, %234 : vector<2x64xf32>
    %236 = vector.extract_strided_slice %192 {offsets = [14, 0], sizes = [2, 256], strides = [1, 1]} : vector<16x256xf32> to vector<2x256xf32>
    %237 = arith.truncf %236 : vector<2x256xf32> to vector<2x256xbf16>
    %c7 = arith.constant 7 : index
    %c0_110 = arith.constant 0 : index
    %c0_111 = arith.constant 0 : index
    %238 = vector.load %arg21[%c7, %c0_110, %c0_111] : memref<8x256x64xbf16, #tpu.memory_space<vmem>>, vector<1x256x64xbf16>
    %239 = vector.shape_cast %238 : vector<1x256x64xbf16> to vector<256x64xbf16>
    %cst_112 = arith.constant dense<0.000000e+00> : vector<2x64xf32>
    %240 = tpu.matmul %237, %239, %cst_112 {dimension_numbers = #tpu.dot_dimension_numbers<[1], [0], [0], [1], [0, 0, 1, 1], [], []>} : vector<2x256xbf16>, vector<256x64xbf16>, vector<2x64xf32> -> vector<2x64xf32>
    %241 = arith.addf %235, %240 : vector<2x64xf32>
    %c1_i32_113 = arith.constant 1 : i32
    %242 = tpu.memref_slice %arg28[%c1_i32_113] : memref<2x!tpu.dma_semaphore, #tpu.memory_space<semaphore_mem>> -> memref<1x!tpu.dma_semaphore, #tpu.memory_space<semaphore_mem>>
    %243 = tpu.memref_squeeze %242 : memref<1x!tpu.dma_semaphore, #tpu.memory_space<semaphore_mem>> -> memref<!tpu.dma_semaphore, #tpu.memory_space<semaphore_mem>>
    tpu.wait_dma2 semaphore(%243 : memref<!tpu.dma_semaphore, #tpu.memory_space<semaphore_mem>>) src(%arg16 : memref<512x1024xbf16, #tpu.memory_space<any>>) dst(%arg27 : memref<512x1024xbf16, #tpu.memory_space<vmem>>)
    %244 = arith.truncf %145 : vector<2x256xf32> to vector<2x256xbf16>
    %c0_114 = arith.constant 0 : index
    %c0_115 = arith.constant 0 : index
    %245 = vector.load %arg27[%c0_114, %c0_115] : memref<512x1024xbf16, #tpu.memory_space<vmem>>, vector<256x1024xbf16>
    %cst_116 = arith.constant dense<0.000000e+00> : vector<2x1024xf32>
    %246 = tpu.matmul %244, %245, %cst_116 {dimension_numbers = #tpu.dot_dimension_numbers<[1], [0], [0], [1], [0, 0, 1, 1], [], []>} : vector<2x256xbf16>, vector<256x1024xbf16>, vector<2x1024xf32> -> vector<2x1024xf32>
    %c0_117 = arith.constant 0 : index
    %c0_118 = arith.constant 0 : index
    %247 = vector.load %arg5[%c0_117, %c0_118] : memref<2x256xf32, #tpu.memory_space<vmem>>, vector<2x256xf32>
    %248 = arith.truncf %247 : vector<2x256xf32> to vector<2x256xbf16>
    %c256_119 = arith.constant 256 : index
    %c0_120 = arith.constant 0 : index
    %249 = vector.load %arg27[%c256_119, %c0_120] : memref<512x1024xbf16, #tpu.memory_space<vmem>>, vector<256x1024xbf16>
    %cst_121 = arith.constant dense<0.000000e+00> : vector<2x1024xf32>
    %250 = tpu.matmul %248, %249, %cst_121 {dimension_numbers = #tpu.dot_dimension_numbers<[1], [0], [0], [1], [0, 0, 1, 1], [], []>} : vector<2x256xbf16>, vector<256x1024xbf16>, vector<2x1024xf32> -> vector<2x1024xf32>
    %251 = arith.addf %246, %250 : vector<2x1024xf32>
    %c0_122 = arith.constant 0 : index
    %c0_123 = arith.constant 0 : index
    %252 = vector.load %arg17[%c0_122, %c0_123] : memref<1x1024xf32, #tpu.memory_space<vmem>>, vector<1x1024xf32>
    %253 = vector.broadcast %252 : vector<1x1024xf32> to vector<2x1024xf32>
    %254 = arith.addf %251, %253 : vector<2x1024xf32>
    %255 = vector.extract_strided_slice %254 {offsets = [0, 0], sizes = [2, 256], strides = [1, 1]} : vector<2x1024xf32> to vector<2x256xf32>
    %256 = arith.negf %255 : vector<2x256xf32>
    %257 = math.exp %256 : vector<2x256xf32>
    %cst_124 = arith.constant 1.000000e+00 : f32
    %258 = vector.broadcast %cst_124 : f32 to vector<2x256xf32>
    %259 = arith.addf %258, %257 : vector<2x256xf32>
    %260 = arith.divf %258, %259 : vector<2x256xf32>
    %261 = vector.extract_strided_slice %254 {offsets = [0, 256], sizes = [2, 256], strides = [1, 1]} : vector<2x1024xf32> to vector<2x256xf32>
    %262 = arith.negf %261 : vector<2x256xf32>
    %263 = math.exp %262 : vector<2x256xf32>
    %cst_125 = arith.constant 1.000000e+00 : f32
    %264 = vector.broadcast %cst_125 : f32 to vector<2x256xf32>
    %265 = arith.addf %264, %263 : vector<2x256xf32>
    %266 = arith.divf %264, %265 : vector<2x256xf32>
    %267 = vector.extract_strided_slice %254 {offsets = [0, 512], sizes = [2, 256], strides = [1, 1]} : vector<2x1024xf32> to vector<2x256xf32>
    %268 = math.tanh %267 : vector<2x256xf32>
    %269 = vector.extract_strided_slice %254 {offsets = [0, 768], sizes = [2, 256], strides = [1, 1]} : vector<2x1024xf32> to vector<2x256xf32>
    %270 = arith.negf %269 : vector<2x256xf32>
    %271 = math.exp %270 : vector<2x256xf32>
    %cst_126 = arith.constant 1.000000e+00 : f32
    %272 = vector.broadcast %cst_126 : f32 to vector<2x256xf32>
    %273 = arith.addf %272, %271 : vector<2x256xf32>
    %274 = arith.divf %272, %273 : vector<2x256xf32>
    %c0_127 = arith.constant 0 : index
    %c0_128 = arith.constant 0 : index
    %275 = vector.load %arg6[%c0_127, %c0_128] : memref<2x256xf32, #tpu.memory_space<vmem>>, vector<2x256xf32>
    %276 = arith.mulf %266, %275 : vector<2x256xf32>
    %277 = arith.mulf %260, %268 : vector<2x256xf32>
    %278 = arith.addf %276, %277 : vector<2x256xf32>
    %279 = math.tanh %278 : vector<2x256xf32>
    %280 = arith.mulf %274, %279 : vector<2x256xf32>
    %c0_129 = arith.constant 0 : index
    %c0_130 = arith.constant 0 : index
    %281 = vector.load %arg25[%c0_129, %c0_130] : memref<2x640xf32, #tpu.memory_space<vmem>>, vector<2x256xf32>
    tpu.vector_store %arg25[%c0_129, %c0_130], %280 {strides = array<i32>} : memref<2x640xf32, #tpu.memory_space<vmem>>, vector<2x256xf32>,
    %c0_131 = arith.constant 0 : index
    %c256_132 = arith.constant 256 : index
    %282 = vector.load %arg25[%c0_131, %c256_132] : memref<2x640xf32, #tpu.memory_space<vmem>>, vector<2x256xf32>
    tpu.vector_store %arg25[%c0_131, %c256_132], %278 {strides = array<i32>} : memref<2x640xf32, #tpu.memory_space<vmem>>, vector<2x256xf32>,
    %283 = arith.truncf %280 : vector<2x256xf32> to vector<2x256xbf16>
    %c0_133 = arith.constant 0 : index
    %c0_134 = arith.constant 0 : index
    %284 = vector.load %arg18[%c0_133, %c0_134] : memref<512x9xbf16, #tpu.memory_space<vmem>>, vector<256x9xbf16>
    %cst_135 = arith.constant dense<0.000000e+00> : vector<2x9xf32>
    %285 = tpu.matmul %283, %284, %cst_135 {dimension_numbers = #tpu.dot_dimension_numbers<[1], [0], [0], [1], [0, 0, 1, 1], [], []>} : vector<2x256xbf16>, vector<256x9xbf16>, vector<2x9xf32> -> vector<2x9xf32>
    %286 = arith.truncf %108 : vector<2x256xf32> to vector<2x256xbf16>
    %c256_136 = arith.constant 256 : index
    %c0_137 = arith.constant 0 : index
    %287 = vector.load %arg18[%c256_136, %c0_137] : memref<512x9xbf16, #tpu.memory_space<vmem>>, vector<256x9xbf16>
    %cst_138 = arith.constant dense<0.000000e+00> : vector<2x9xf32>
    %288 = tpu.matmul %286, %287, %cst_138 {dimension_numbers = #tpu.dot_dimension_numbers<[1], [0], [0], [1], [0, 0, 1, 1], [], []>} : vector<2x256xbf16>, vector<256x9xbf16>, vector<2x9xf32> -> vector<2x9xf32>
    %289 = arith.addf %285, %288 : vector<2x9xf32>
    %c0_139 = arith.constant 0 : index
    %c0_140 = arith.constant 0 : index
    %290 = vector.load %arg19[%c0_139, %c0_140] : memref<1x9xf32, #tpu.memory_space<vmem>>, vector<1x9xf32>
    %291 = vector.broadcast %290 : vector<1x9xf32> to vector<2x9xf32>
    %292 = arith.addf %289, %291 : vector<2x9xf32>
    %c0_141 = arith.constant 0 : index
    %c0_142 = arith.constant 0 : index
    %293 = vector.load %arg7[%c0_141, %c0_142] : memref<2x9xf32, #tpu.memory_space<vmem>>, vector<2x9xf32>
    %cst_143 = arith.constant 0.000000e+00 : f32
    %294 = vector.broadcast %cst_143 : f32 to vector<2x9xf32>
    %295 = arith.cmpf ogt, %293, %294 : vector<2x9xf32>
    %cst_144 = arith.constant -1.000000e+09 : f32
    %296 = vector.broadcast %cst_144 : f32 to vector<2x9xf32>
    %297 = arith.select %295, %292, %296 : vector<2x9xi1>, vector<2x9xf32>
    %cst_145 = arith.constant dense<0xFF800000> : vector<2xf32>
    %298 = vector.multi_reduction <maximumf>, %297, %cst_145 [1] : vector<2x9xf32> to vector<2xf32>
    %299 = vector.shape_cast %298 : vector<2xf32> to vector<2x1xf32>
    %300 = vector.broadcast %299 : vector<2x1xf32> to vector<2x9xf32>
    %301 = arith.subf %297, %300 : vector<2x9xf32>
    %302 = math.exp %301 : vector<2x9xf32>
    %cst_146 = arith.constant dense<0.000000e+00> : vector<2xf32>
    %303 = vector.multi_reduction <add>, %302, %cst_146 [1] : vector<2x9xf32> to vector<2xf32>
    %304 = vector.shape_cast %303 : vector<2xf32> to vector<2x1xf32>
    %305 = vector.broadcast %304 : vector<2x1xf32> to vector<2x9xf32>
    %306 = arith.divf %302, %305 : vector<2x9xf32>
    %307 = tpu.iota {dimensions = array<i32: 1>} : vector<2x9xi32>
    %308 = vector.broadcast %299 : vector<2x1xf32> to vector<2x9xf32>
    %309 = arith.cmpf oge, %297, %308 : vector<2x9xf32>
    %c9_i32 = arith.constant 9 : i32
    %310 = vector.broadcast %c9_i32 : i32 to vector<2x9xi32>
    %311 = arith.select %309, %307, %310 : vector<2x9xi1>, vector<2x9xi32>
    %cst_147 = arith.constant dense<2147483647> : vector<2xi32>
    %312 = vector.multi_reduction <minsi>, %311, %cst_147 [1] : vector<2x9xi32> to vector<2xi32>
    %313 = vector.shape_cast %312 : vector<2xi32> to vector<2x1xi32>
    %314 = arith.truncf %280 : vector<2x256xf32> to vector<2x256xbf16>
    %c0_148 = arith.constant 0 : index
    %c0_149 = arith.constant 0 : index
    %315 = vector.load %arg20[%c0_148, %c0_149] : memref<256x64xbf16, #tpu.memory_space<vmem>>, vector<256x64xbf16>
    %cst_150 = arith.constant dense<0.000000e+00> : vector<2x64xf32>
    %316 = tpu.matmul %314, %315, %cst_150 {dimension_numbers = #tpu.dot_dimension_numbers<[1], [0], [0], [1], [0, 0, 1, 1], [], []>} : vector<2x256xbf16>, vector<256x64xbf16>, vector<2x64xf32> -> vector<2x64xf32>
    %317 = arith.addf %241, %316 : vector<2x64xf32>
    %c0_151 = arith.constant 0 : index
    %c0_152 = arith.constant 0 : index
    %318 = vector.load %arg22[%c0_151, %c0_152] : memref<1x64xf32, #tpu.memory_space<vmem>>, vector<1x64xf32>
    %319 = vector.broadcast %318 : vector<1x64xf32> to vector<2x64xf32>
    %320 = arith.addf %317, %319 : vector<2x64xf32>
    %cst_153 = arith.constant dense<0.000000e+00> : vector<2x16xf32>
    %321 = tpu.matmul %320, %151, %cst_153 {dimension_numbers = #tpu.dot_dimension_numbers<[1], [1], [0], [0], [0, 0, 1, 0], [], []>} : vector<2x64xf32>, vector<16x64xf32>, vector<2x16xf32> -> vector<2x16xf32>
    %322 = tpu.iota {dimensions = array<i32: 0>} : vector<16x8xi32>
    %323 = tpu.iota {dimensions = array<i32: 1>} : vector<16x8xi32>
    %c7_i32_154 = arith.constant 7 : i32
    %324 = vector.broadcast %c7_i32_154 : i32 to vector<16x8xi32>
    %325 = arith.andi %322, %324 : vector<16x8xi32>
    %326 = arith.cmpi eq, %325, %323 : vector<16x8xi32>
    %327 = arith.extui %326 : vector<16x8xi1> to vector<16x8xi32>
    %328 = arith.sitofp %327 : vector<16x8xi32> to vector<16x8xf32>
    %329 = arith.mulf %321, %141 : vector<2x16xf32>
    %cst_155 = arith.constant dense<0.000000e+00> : vector<2x8xf32>
    %330 = tpu.matmul %329, %328, %cst_155 {dimension_numbers = #tpu.dot_dimension_numbers<[1], [0], [0], [1], [0, 0, 1, 1], [], []>} : vector<2x16xf32>, vector<16x8xf32>, vector<2x8xf32> -> vector<2x8xf32>
    %cst_156 = arith.constant 1.250000e-01 : f32
    %331 = vector.broadcast %cst_156 : f32 to vector<2x8xf32>
    %332 = arith.mulf %330, %331 : vector<2x8xf32>
    %c0_157 = arith.constant 0 : index
    %c0_158 = arith.constant 0 : index
    %333 = vector.load %arg8[%c0_157, %c0_158] : memref<2x8xf32, #tpu.memory_space<vmem>>, vector<2x8xf32>
    %cst_159 = arith.constant 0.000000e+00 : f32
    %334 = vector.broadcast %cst_159 : f32 to vector<2x8xf32>
    %335 = arith.cmpf ogt, %333, %334 : vector<2x8xf32>
    %cst_160 = arith.constant -1.000000e+09 : f32
    %336 = vector.broadcast %cst_160 : f32 to vector<2x8xf32>
    %337 = arith.select %335, %332, %336 : vector<2x8xi1>, vector<2x8xf32>
    %cst_161 = arith.constant dense<0xFF800000> : vector<2xf32>
    %338 = vector.multi_reduction <maximumf>, %337, %cst_161 [1] : vector<2x8xf32> to vector<2xf32>
    %339 = vector.shape_cast %338 : vector<2xf32> to vector<2x1xf32>
    %340 = vector.broadcast %339 : vector<2x1xf32> to vector<2x8xf32>
    %341 = arith.subf %337, %340 : vector<2x8xf32>
    %342 = math.exp %341 : vector<2x8xf32>
    %cst_162 = arith.constant dense<0.000000e+00> : vector<2xf32>
    %343 = vector.multi_reduction <add>, %342, %cst_162 [1] : vector<2x8xf32> to vector<2xf32>
    %344 = vector.shape_cast %343 : vector<2xf32> to vector<2x1xf32>
    %345 = vector.broadcast %344 : vector<2x1xf32> to vector<2x8xf32>
    %346 = arith.divf %342, %345 : vector<2x8xf32>
    %347 = tpu.iota {dimensions = array<i32: 1>} : vector<2x8xi32>
    %348 = vector.broadcast %339 : vector<2x1xf32> to vector<2x8xf32>
    %349 = arith.cmpf oge, %337, %348 : vector<2x8xf32>
    %c8_i32_163 = arith.constant 8 : i32
    %350 = vector.broadcast %c8_i32_163 : i32 to vector<2x8xi32>
    %351 = arith.select %349, %347, %350 : vector<2x8xi1>, vector<2x8xi32>
    %cst_164 = arith.constant dense<2147483647> : vector<2xi32>
    %352 = vector.multi_reduction <minsi>, %351, %cst_164 [1] : vector<2x8xi32> to vector<2xi32>
    %353 = vector.shape_cast %352 : vector<2xi32> to vector<2x1xi32>
    %c0_165 = arith.constant 0 : index
    %c512_166 = arith.constant 512 : index
    %354 = vector.load %arg25[%c0_165, %c512_166] : memref<2x640xf32, #tpu.memory_space<vmem>>, vector<2x9xf32>
    tpu.vector_store %arg25[%c0_165, %c512_166], %306 {strides = array<i32>} : memref<2x640xf32, #tpu.memory_space<vmem>>, vector<2x9xf32>,
    %c0_167 = arith.constant 0 : index
    %c521 = arith.constant 521 : index
    %355 = vector.load %arg25[%c0_167, %c521] : memref<2x640xf32, #tpu.memory_space<vmem>>, vector<2x8xf32>
    tpu.vector_store %arg25[%c0_167, %c521], %346 {strides = array<i32>} : memref<2x640xf32, #tpu.memory_space<vmem>>, vector<2x8xf32>,
    %356 = arith.sitofp %313 : vector<2x1xi32> to vector<2x1xf32>
    %c0_168 = arith.constant 0 : index
    %c529 = arith.constant 529 : index
    %357 = vector.load %arg25[%c0_168, %c529] : memref<2x640xf32, #tpu.memory_space<vmem>>, vector<2x1xf32>
    tpu.vector_store %arg25[%c0_168, %c529], %356 {strides = array<i32>} : memref<2x640xf32, #tpu.memory_space<vmem>>, vector<2x1xf32>,
    %358 = arith.sitofp %353 : vector<2x1xi32> to vector<2x1xf32>
    %c0_169 = arith.constant 0 : index
    %c530 = arith.constant 530 : index
    %359 = vector.load %arg25[%c0_169, %c530] : memref<2x640xf32, #tpu.memory_space<vmem>>, vector<2x1xf32>
    tpu.vector_store %arg25[%c0_169, %c530], %358 {strides = array<i32>} : memref<2x640xf32, #tpu.memory_space<vmem>>, vector<2x1xf32>,
    return
  }
}

</mosaic_0001>

<bundles_post_ra>
// kernel: architecture_forward.1
= control target key start
LH: loop header
LB: loop body
LE: loop exit
PB: predicated region body
PF: predicated region fallthrough
CT: control target
= control target key end

     0   :  { %s15228_s29 = smov [#allocation2]   ;;  %s18943_s0 = inlined_call_operand.vmem [shape: f32[72,256], index: 0, kind: input, shape index: {}]   ;;  %s18944_s1 = inlined_call_operand.vmem [shape: f32[16,32], index: 1, kind: input, shape index: {}]   ;;  %s18945_s2 = inlined_call_operand.vmem [shape: s32[1,16], index: 2, kind: input, shape index: {}]   ;;  %s18946_s3 = inlined_call_operand.vmem [shape: s32[1,16], index: 3, kind: input, shape index: {}]   ;;  %s18947_s4 = inlined_call_operand.vmem [shape: f32[2,1], index: 4, kind: input, shape index: {}]   ;;  %s18948_s5 = inlined_call_operand.vmem [shape: f32[2,256], index: 5, kind: input, shape index: {}]   ;;  %s18949_s6 = inlined_call_operand.vmem [shape: f32[2,256], index: 6, kind: input, shape index: {}]   ;;  %s18950_s7 = inlined_call_operand.vmem [shape: f32[2,9], index: 7, kind: input, shape index: {}]   ;;  %s18951_s8 = inlined_call_operand.vmem [shape: f32[2,8], index: 8, kind: input, shape index: {}]   ;;  %s18952_s9 = inlined_call_operand.vmem [shape: f32[32,72], index: 9, kind: input, shape index: {}]   ;;  %s18953_s10 = inlined_call_operand.vmem [shape: f32[32,1], index: 10, kind: input, shape index: {}]   ;;  %s18954_s11 = inlined_call_operand.vmem [shape: bf16[4096,256], index: 11, kind: input, shape index: {}]   ;;  %s18955_s12 = inlined_call_operand.vmem [shape: f32[1,256], index: 12, kind: input, shape index: {}]   ;;  %s18956_s13 = inlined_call_operand.vmem [shape: bf16[32,256], index: 13, kind: input, shape index: {}]   ;;  %s18957_s14 = inlined_call_operand.vmem [shape: f32[1,256], index: 14, kind: input, shape index: {}]   ;;  %s18958_s15 = inlined_call_operand.vmem [shape: bf16[256,256], index: 15, kind: input, shape index: {}]   ;;  %s18959_s16 = inlined_call_operand.vmem [shape: bf16[512,1024], index: 16, kind: input, shape index: {}]   ;;  %s18960_s17 = inlined_call_operand.vmem [shape: f32[1,1024], index: 17, kind: input, shape index: {}]   ;;  %s18961_s18 = inlined_call_operand.vmem [shape: bf16[512,9], index: 18, kind: input, shape index: {}]   ;;  %s18962_s19 = inlined_call_operand.vmem [shape: f32[1,9], index: 19, kind: input, shape index: {}]   ;;  %s18963_s20 = inlined_call_operand.vmem [shape: bf16[256,64], index: 20, kind: input, shape index: {}]   ;;  %s18964_s21 = inlined_call_operand.vmem [shape: bf16[8,256,64], index: 21, kind: input, shape index: {}]   ;;  %s18965_s22 = inlined_call_operand.vmem [shape: f32[1,64], index: 22, kind: input, shape index: {}]   ;;  %s18966_s23 = inlined_call_operand.vmem [shape: bf16[256,64], index: 23, kind: input, shape index: {}]   ;;  %s18967_s24 = inlined_call_operand.vmem [shape: f32[1,64], index: 24, kind: input, shape index: {}]   ;;  %s18968_s25 = inlined_call_operand.vmem [shape: f32[2,640], index: 25, kind: output, shape index: {}]  }
   0x1   :  { %18972 = sst [smem:[#allocation9_spill]] %s18943_s0  ;;  %s18982_s30 = smov %s18954_s11 }
   0x2   :  { %18973 = sst [smem:[#allocation10_spill]] %s18944_s1 }
   0x3   :  { %18974 = sst [smem:[#allocation11_spill]] %s18945_s2 }
   0x4   :  { %18975 = sst [smem:[#allocation12_spill]] %s18946_s3  ;;  %s15237_s3 = smov 0  }
   0x5   :  { %18976 = sst [smem:[#allocation13_spill]] %s18947_s4 }
   0x6   :  { %18977 = sst [smem:[#allocation14_spill]] %s18948_s5 }
   0x7   :  { %18978 = sst [smem:[#allocation15_spill]] %s18949_s6 }
   0x8   :  { %18979 = sst [smem:[#allocation16_spill]] %s18950_s7  ;;  %s15235_s7 = smov 0  }
   0x9   :  { %18980 = sst [smem:[#allocation17_spill]] %s18951_s8 }
   0xa   :  { %18981 = sst [smem:[#allocation18_spill]] %s18952_s9 }
   0xb LB: > { %v97_v0 = vld [vmem:[%s15081_s30] sm:$0xf]  ;;  %v99_v1 = vld [vmem:[%s15081_s30 + $0x4] sm:$0xf]  ;;  %v101_v2 = vld [vmem:[%s15081_s30 + $0x10] sm:$0xf]  ;;  %s15089_s3 = sphi %s15237_s3, %s93_s3   ;;  %s15085_s7 = sphi %s15235_s7, %s18983_s7   ;;  %s15081_s30 = sphi %s18982_s30, %s1126_s30   ;;  %s15077_s29 = sphi %s15228_s29, %s1127_s29  }
   0xc   : > { %98 = vst [vmem:[%s15077_s29] sm:$0xf] %v97_v0  ;;  %100 = vst [vmem:[%s15077_s29 + $0x8] sm:$0xf] %v99_v1  ;;  %v103_v3 = vld [vmem:[%s15081_s30 + $0x14] sm:$0xf]  ;;  %s1121_s26 = sadd.s32 1, %s15085_s7 }
   0xd   : > { %102 = vst [vmem:[%s15077_s29 + $0x10] sm:$0xf] %v101_v2  ;;  %v105_v4 = vld [vmem:[%s15081_s30 + $0x20] sm:$0xf]  ;;  %v107_v5 = vld [vmem:[%s15081_s30 + $0x24] sm:$0xf] }
   0xe   : > { %104 = vst [vmem:[%s15077_s29 + $0x18] sm:$0xf] %v103_v3  ;;  %106 = vst [vmem:[%s15077_s29 + $0x20] sm:$0xf] %v105_v4  ;;  %v109_v6 = vld [vmem:[%s15081_s30 + $0x30] sm:$0xf] }
   0xf   : > { %108 = vst [vmem:[%s15077_s29 + $0x28] sm:$0xf] %v107_v5  ;;  %v111_v7 = vld [vmem:[%s15081_s30 + $0x34] sm:$0xf]  ;;  %v113_v8 = vld [vmem:[%s15081_s30 + $0x40] sm:$0xf] }
  0x10   : > { %110 = vst [vmem:[%s15077_s29 + $0x30] sm:$0xf] %v109_v6  ;;  %112 = vst [vmem:[%s15077_s29 + $0x38] sm:$0xf] %v111_v7  ;;  %v115_v9 = vld [vmem:[%s15081_s30 + $0x44] sm:$0xf] }
  0x11   : > { %114 = vst [vmem:[%s15077_s29 + $0x40] sm:$0xf] %v113_v8  ;;  %v117_v10 = vld [vmem:[%s15081_s30 + $0x50] sm:$0xf]  ;;  %v119_v11 = vld [vmem:[%s15081_s30 + $0x54] sm:$0xf] }
  0x12   : > { %116 = vst [vmem:[%s15077_s29 + $0x48] sm:$0xf] %v115_v9  ;;  %118 = vst [vmem:[%s15077_s29 + $0x50] sm:$0xf] %v117_v10  ;;  %v121_v12 = vld [vmem:[%s15081_s30 + $0x60] sm:$0xf] }
  0x13   : > { %120 = vst [vmem:[%s15077_s29 + $0x58] sm:$0xf] %v119_v11  ;;  %v123_v13 = vld [vmem:[%s15081_s30 + $0x64] sm:$0xf]  ;;  %v125_v14 = vld [vmem:[%s15081_s30 + $0x70] sm:$0xf] }
  0x14   : > { %122 = vst [vmem:[%s15077_s29 + $0x60] sm:$0xf] %v121_v12  ;;  %124 = vst [vmem:[%s15077_s29 + $0x68] sm:$0xf] %v123_v13  ;;  %v127_v15 = vld [vmem:[%s15081_s30 + $0x74] sm:$0xf] }
  0x15   : > { %126 = vst [vmem:[%s15077_s29 + $0x70] sm:$0xf] %v125_v14  ;;  %v129_v16 = vld [vmem:[%s15081_s30 + $0x80] sm:$0xf]  ;;  %v131_v17 = vld [vmem:[%s15081_s30 + $0x84] sm:$0xf] }
  0x16   : > { %128 = vst [vmem:[%s15077_s29 + $0x78] sm:$0xf] %v127_v15  ;;  %130 = vst [vmem:[%s15077_s29 + $0x80] sm:$0xf] %v129_v16  ;;  %v133_v18 = vld [vmem:[%s15081_s30 + $0x90] sm:$0xf] }
  0x17   : > { %132 = vst [vmem:[%s15077_s29 + $0x88] sm:$0xf] %v131_v17  ;;  %v135_v19 = vld [vmem:[%s15081_s30 + $0x94] sm:$0xf]  ;;  %v137_v20 = vld [vmem:[%s15081_s30 + $0xa0] sm:$0xf] }
  0x18   : > { %134 = vst [vmem:[%s15077_s29 + $0x90] sm:$0xf] %v133_v18  ;;  %136 = vst [vmem:[%s15077_s29 + $0x98] sm:$0xf] %v135_v19  ;;  %v139_v21 = vld [vmem:[%s15081_s30 + $0xa4] sm:$0xf] }
  0x19   : > { %138 = vst [vmem:[%s15077_s29 + $0xa0] sm:$0xf] %v137_v20  ;;  %v141_v22 = vld [vmem:[%s15081_s30 + $0xb0] sm:$0xf]  ;;  %v143_v23 = vld [vmem:[%s15081_s30 + $0xb4] sm:$0xf] }
  0x1a   : > { %140 = vst [vmem:[%s15077_s29 + $0xa8] sm:$0xf] %v139_v21  ;;  %142 = vst [vmem:[%s15077_s29 + $0xb0] sm:$0xf] %v141_v22  ;;  %v145_v24 = vld [vmem:[%s15081_s30 + $0xc0] sm:$0xf] }
  0x1b   : > { %144 = vst [vmem:[%s15077_s29 + $0xb8] sm:$0xf] %v143_v23  ;;  %v147_v25 = vld [vmem:[%s15081_s30 + $0xc4] sm:$0xf]  ;;  %v149_v26 = vld [vmem:[%s15081_s30 + $0xd0] sm:$0xf] }
  0x1c   : > { %146 = vst [vmem:[%s15077_s29 + $0xc0] sm:$0xf] %v145_v24  ;;  %148 = vst [vmem:[%s15077_s29 + $0xc8] sm:$0xf] %v147_v25  ;;  %v151_v27 = vld [vmem:[%s15081_s30 + $0xd4] sm:$0xf] }
  0x1d   : > { %150 = vst [vmem:[%s15077_s29 + $0xd0] sm:$0xf] %v149_v26  ;;  %v153_v28 = vld [vmem:[%s15081_s30 + $0xe0] sm:$0xf]  ;;  %v155_v29 = vld [vmem:[%s15081_s30 + $0xe4] sm:$0xf] }
  0x1e   : > { %152 = vst [vmem:[%s15077_s29 + $0xd8] sm:$0xf] %v151_v27  ;;  %154 = vst [vmem:[%s15077_s29 + $0xe0] sm:$0xf] %v153_v28  ;;  %v157_v30 = vld [vmem:[%s15081_s30 + $0xf0] sm:$0xf] }
  0x1f   : > { %156 = vst [vmem:[%s15077_s29 + $0xe8] sm:$0xf] %v155_v29  ;;  %v159_v31 = vld [vmem:[%s15081_s30 + $0xf4] sm:$0xf]  ;;  %v161_v32 = vld [vmem:[%s15081_s30 + $0x100] sm:$0xf] }
  0x20   : > { %158 = vst [vmem:[%s15077_s29 + $0xf0] sm:$0xf] %v157_v30  ;;  %160 = vst [vmem:[%s15077_s29 + $0xf8] sm:$0xf] %v159_v31  ;;  %v163_v33 = vld [vmem:[%s15081_s30 + $0x104] sm:$0xf] }
  0x21   : > { %162 = vst [vmem:[%s15077_s29 + $0x100] sm:$0xf] %v161_v32  ;;  %v165_v34 = vld [vmem:[%s15081_s30 + $0x110] sm:$0xf]  ;;  %v167_v35 = vld [vmem:[%s15081_s30 + $0x114] sm:$0xf] }
  0x22   : > { %164 = vst [vmem:[%s15077_s29 + $0x108] sm:$0xf] %v163_v33  ;;  %166 = vst [vmem:[%s15077_s29 + $0x110] sm:$0xf] %v165_v34  ;;  %v169_v36 = vld [vmem:[%s15081_s30 + $0x120] sm:$0xf] }
  0x23   : > { %168 = vst [vmem:[%s15077_s29 + $0x118] sm:$0xf] %v167_v35  ;;  %v171_v37 = vld [vmem:[%s15081_s30 + $0x124] sm:$0xf]  ;;  %v173_v38 = vld [vmem:[%s15081_s30 + $0x130] sm:$0xf] }
  0x24   : > { %170 = vst [vmem:[%s15077_s29 + $0x120] sm:$0xf] %v169_v36  ;;  %172 = vst [vmem:[%s15077_s29 + $0x128] sm:$0xf] %v171_v37  ;;  %v175_v39 = vld [vmem:[%s15081_s30 + $0x134] sm:$0xf] }
  0x25   : > { %174 = vst [vmem:[%s15077_s29 + $0x130] sm:$0xf] %v173_v38  ;;  %v177_v40 = vld [vmem:[%s15081_s30 + $0x140] sm:$0xf]  ;;  %v179_v41 = vld [vmem:[%s15081_s30 + $0x144] sm:$0xf] }
  0x26   : > { %176 = vst [vmem:[%s15077_s29 + $0x138] sm:$0xf] %v175_v39  ;;  %178 = vst [vmem:[%s15077_s29 + $0x140] sm:$0xf] %v177_v40  ;;  %v181_v42 = vld [vmem:[%s15081_s30 + $0x150] sm:$0xf] }
  0x27   : > { %180 = vst [vmem:[%s15077_s29 + $0x148] sm:$0xf] %v179_v41  ;;  %v183_v43 = vld [vmem:[%s15081_s30 + $0x154] sm:$0xf]  ;;  %v185_v44 = vld [vmem:[%s15081_s30 + $0x160] sm:$0xf] }
  0x28   : > { %182 = vst [vmem:[%s15077_s29 + $0x150] sm:$0xf] %v181_v42  ;;  %184 = vst [vmem:[%s15077_s29 + $0x158] sm:$0xf] %v183_v43  ;;  %v187_v45 = vld [vmem:[%s15081_s30 + $0x164] sm:$0xf] }
  0x29   : > { %186 = vst [vmem:[%s15077_s29 + $0x160] sm:$0xf] %v185_v44  ;;  %v189_v46 = vld [vmem:[%s15081_s30 + $0x170] sm:$0xf]  ;;  %v191_v47 = vld [vmem:[%s15081_s30 + $0x174] sm:$0xf] }
  0x2a   : > { %188 = vst [vmem:[%s15077_s29 + $0x168] sm:$0xf] %v187_v45  ;;  %190 = vst [vmem:[%s15077_s29 + $0x170] sm:$0xf] %v189_v46  ;;  %v193_v48 = vld [vmem:[%s15081_s30 + $0x180] sm:$0xf] }
  0x2b   : > { %192 = vst [vmem:[%s15077_s29 + $0x178] sm:$0xf] %v191_v47  ;;  %v195_v49 = vld [vmem:[%s15081_s30 + $0x184] sm:$0xf]  ;;  %v197_v50 = vld [vmem:[%s15081_s30 + $0x190] sm:$0xf] }
  0x2c   : > { %194 = vst [vmem:[%s15077_s29 + $0x180] sm:$0xf] %v193_v48  ;;  %196 = vst [vmem:[%s15077_s29 + $0x188] sm:$0xf] %v195_v49  ;;  %v199_v51 = vld [vmem:[%s15081_s30 + $0x194] sm:$0xf] }
  0x2d   : > { %198 = vst [vmem:[%s15077_s29 + $0x190] sm:$0xf] %v197_v50  ;;  %v201_v52 = vld [vmem:[%s15081_s30 + $0x1a0] sm:$0xf]  ;;  %v203_v53 = vld [vmem:[%s15081_s30 + $0x1a4] sm:$0xf] }
  0x2e   : > { %200 = vst [vmem:[%s15077_s29 + $0x198] sm:$0xf] %v199_v51  ;;  %202 = vst [vmem:[%s15077_s29 + $0x1a0] sm:$0xf] %v201_v52  ;;  %v205_v54 = vld [vmem:[%s15081_s30 + $0x1b0] sm:$0xf] }
  0x2f   : > { %204 = vst [vmem:[%s15077_s29 + $0x1a8] sm:$0xf] %v203_v53  ;;  %v207_v55 = vld [vmem:[%s15081_s30 + $0x1b4] sm:$0xf]  ;;  %v209_v56 = vld [vmem:[%s15081_s30 + $0x1c0] sm:$0xf] }
  0x30   : > { %206 = vst [vmem:[%s15077_s29 + $0x1b0] sm:$0xf] %v205_v54  ;;  %208 = vst [vmem:[%s15077_s29 + $0x1b8] sm:$0xf] %v207_v55  ;;  %v211_v57 = vld [vmem:[%s15081_s30 + $0x1c4] sm:$0xf] }
  0x31   : > { %210 = vst [vmem:[%s15077_s29 + $0x1c0] sm:$0xf] %v209_v56  ;;  %v213_v58 = vld [vmem:[%s15081_s30 + $0x1d0] sm:$0xf]  ;;  %v215_v59 = vld [vmem:[%s15081_s30 + $0x1d4] sm:$0xf] }
  0x32   : > { %212 = vst [vmem:[%s15077_s29 + $0x1c8] sm:$0xf] %v211_v57  ;;  %214 = vst [vmem:[%s15077_s29 + $0x1d0] sm:$0xf] %v213_v58  ;;  %v217_v60 = vld [vmem:[%s15081_s30 + $0x1e0] sm:$0xf] }
  0x33   : > { %216 = vst [vmem:[%s15077_s29 + $0x1d8] sm:$0xf] %v215_v59  ;;  %v219_v61 = vld [vmem:[%s15081_s30 + $0x1e4] sm:$0xf]  ;;  %v221_v62 = vld [vmem:[%s15081_s30 + $0x1f0] sm:$0xf] }
  0x34   : > { %218 = vst [vmem:[%s15077_s29 + $0x1e0] sm:$0xf] %v217_v60  ;;  %220 = vst [vmem:[%s15077_s29 + $0x1e8] sm:$0xf] %v219_v61  ;;  %v223_v63 = vld [vmem:[%s15081_s30 + $0x1f4] sm:$0xf] }
  0x35   : > { %222 = vst [vmem:[%s15077_s29 + $0x1f0] sm:$0xf] %v221_v62  ;;  %v225_v0 = vld [vmem:[%s15081_s30 + $0x200] sm:$0xf]  ;;  %v227_v1 = vld [vmem:[%s15081_s30 + $0x204] sm:$0xf] }
  0x36   : > { %224 = vst [vmem:[%s15077_s29 + $0x1f8] sm:$0xf] %v223_v63  ;;  %226 = vst [vmem:[%s15077_s29 + $0x200] sm:$0xf] %v225_v0  ;;  %v229_v2 = vld [vmem:[%s15081_s30 + $0x210] sm:$0xf] }
  0x37   : > { %228 = vst [vmem:[%s15077_s29 + $0x208] sm:$0xf] %v227_v1  ;;  %v231_v3 = vld [vmem:[%s15081_s30 + $0x214] sm:$0xf]  ;;  %v233_v4 = vld [vmem:[%s15081_s30 + $0x220] sm:$0xf] }
  0x38   : > { %230 = vst [vmem:[%s15077_s29 + $0x210] sm:$0xf] %v229_v2  ;;  %232 = vst [vmem:[%s15077_s29 + $0x218] sm:$0xf] %v231_v3  ;;  %v235_v5 = vld [vmem:[%s15081_s30 + $0x224] sm:$0xf] }
  0x39   : > { %234 = vst [vmem:[%s15077_s29 + $0x220] sm:$0xf] %v233_v4  ;;  %v237_v6 = vld [vmem:[%s15081_s30 + $0x230] sm:$0xf]  ;;  %v239_v7 = vld [vmem:[%s15081_s30 + $0x234] sm:$0xf] }
  0x3a   : > { %236 = vst [vmem:[%s15077_s29 + $0x228] sm:$0xf] %v235_v5  ;;  %238 = vst [vmem:[%s15077_s29 + $0x230] sm:$0xf] %v237_v6  ;;  %v241_v8 = vld [vmem:[%s15081_s30 + $0x240] sm:$0xf] }
  0x3b   : > { %240 = vst [vmem:[%s15077_s29 + $0x238] sm:$0xf] %v239_v7  ;;  %v243_v9 = vld [vmem:[%s15081_s30 + $0x244] sm:$0xf]  ;;  %v245_v10 = vld [vmem:[%s15081_s30 + $0x250] sm:$0xf] }
  0x3c   : > { %242 = vst [vmem:[%s15077_s29 + $0x240] sm:$0xf] %v241_v8  ;;  %244 = vst [vmem:[%s15077_s29 + $0x248] sm:$0xf] %v243_v9  ;;  %v247_v11 = vld [vmem:[%s15081_s30 + $0x254] sm:$0xf] }
  0x3d   : > { %246 = vst [vmem:[%s15077_s29 + $0x250] sm:$0xf] %v245_v10  ;;  %v249_v12 = vld [vmem:[%s15081_s30 + $0x260] sm:$0xf]  ;;  %v251_v13 = vld [vmem:[%s15081_s30 + $0x264] sm:$0xf] }
  0x3e   : > { %248 = vst [vmem:[%s15077_s29 + $0x258] sm:$0xf] %v247_v11  ;;  %250 = vst [vmem:[%s15077_s29 + $0x260] sm:$0xf] %v249_v12  ;;  %v253_v14 = vld [vmem:[%s15081_s30 + $0x270] sm:$0xf] }
  0x3f   : > { %252 = vst [vmem:[%s15077_s29 + $0x268] sm:$0xf] %v251_v13  ;;  %v255_v15 = vld [vmem:[%s15081_s30 + $0x274] sm:$0xf]  ;;  %v257_v16 = vld [vmem:[%s15081_s30 + $0x280] sm:$0xf] }
  0x40   : > { %254 = vst [vmem:[%s15077_s29 + $0x270] sm:$0xf] %v253_v14  ;;  %256 = vst [vmem:[%s15077_s29 + $0x278] sm:$0xf] %v255_v15  ;;  %v259_v17 = vld [vmem:[%s15081_s30 + $0x284] sm:$0xf] }
  0x41   : > { %258 = vst [vmem:[%s15077_s29 + $0x280] sm:$0xf] %v257_v16  ;;  %v261_v18 = vld [vmem:[%s15081_s30 + $0x290] sm:$0xf]  ;;  %v263_v19 = vld [vmem:[%s15081_s30 + $0x294] sm:$0xf] }
  0x42   : > { %260 = vst [vmem:[%s15077_s29 + $0x288] sm:$0xf] %v259_v17  ;;  %262 = vst [vmem:[%s15077_s29 + $0x290] sm:$0xf] %v261_v18  ;;  %v265_v20 = vld [vmem:[%s15081_s30 + $0x2a0] sm:$0xf] }
  0x43   : > { %264 = vst [vmem:[%s15077_s29 + $0x298] sm:$0xf] %v263_v19  ;;  %v267_v21 = vld [vmem:[%s15081_s30 + $0x2a4] sm:$0xf]  ;;  %v269_v22 = vld [vmem:[%s15081_s30 + $0x2b0] sm:$0xf] }
  0x44   : > { %266 = vst [vmem:[%s15077_s29 + $0x2a0] sm:$0xf] %v265_v20  ;;  %268 = vst [vmem:[%s15077_s29 + $0x2a8] sm:$0xf] %v267_v21  ;;  %v271_v23 = vld [vmem:[%s15081_s30 + $0x2b4] sm:$0xf] }
  0x45   : > { %270 = vst [vmem:[%s15077_s29 + $0x2b0] sm:$0xf] %v269_v22  ;;  %v273_v24 = vld [vmem:[%s15081_s30 + $0x2c0] sm:$0xf]  ;;  %v275_v25 = vld [vmem:[%s15081_s30 + $0x2c4] sm:$0xf] }
  0x46   : > { %272 = vst [vmem:[%s15077_s29 + $0x2b8] sm:$0xf] %v271_v23  ;;  %274 = vst [vmem:[%s15077_s29 + $0x2c0] sm:$0xf] %v273_v24  ;;  %v277_v26 = vld [vmem:[%s15081_s30 + $0x2d0] sm:$0xf] }
  0x47   : > { %276 = vst [vmem:[%s15077_s29 + $0x2c8] sm:$0xf] %v275_v25  ;;  %v279_v27 = vld [vmem:[%s15081_s30 + $0x2d4] sm:$0xf]  ;;  %v281_v28 = vld [vmem:[%s15081_s30 + $0x2e0] sm:$0xf] }
  0x48   : > { %278 = vst [vmem:[%s15077_s29 + $0x2d0] sm:$0xf] %v277_v26  ;;  %280 = vst [vmem:[%s15077_s29 + $0x2d8] sm:$0xf] %v279_v27  ;;  %v283_v29 = vld [vmem:[%s15081_s30 + $0x2e4] sm:$0xf] }
  0x49   : > { %282 = vst [vmem:[%s15077_s29 + $0x2e0] sm:$0xf] %v281_v28  ;;  %v285_v30 = vld [vmem:[%s15081_s30 + $0x2f0] sm:$0xf]  ;;  %v287_v31 = vld [vmem:[%s15081_s30 + $0x2f4] sm:$0xf] }
  0x4a   : > { %284 = vst [vmem:[%s15077_s29 + $0x2e8] sm:$0xf] %v283_v29  ;;  %286 = vst [vmem:[%s15077_s29 + $0x2f0] sm:$0xf] %v285_v30  ;;  %v289_v32 = vld [vmem:[%s15081_s30 + $0x300] sm:$0xf] }
  0x4b   : > { %288 = vst [vmem:[%s15077_s29 + $0x2f8] sm:$0xf] %v287_v31  ;;  %v291_v33 = vld [vmem:[%s15081_s30 + $0x304] sm:$0xf]  ;;  %v293_v34 = vld [vmem:[%s15081_s30 + $0x310] sm:$0xf] }
  0x4c   : > { %290 = vst [vmem:[%s15077_s29 + $0x300] sm:$0xf] %v289_v32  ;;  %292 = vst [vmem:[%s15077_s29 + $0x308] sm:$0xf] %v291_v33  ;;  %v295_v35 = vld [vmem:[%s15081_s30 + $0x314] sm:$0xf] }
  0x4d   : > { %294 = vst [vmem:[%s15077_s29 + $0x310] sm:$0xf] %v293_v34  ;;  %v297_v36 = vld [vmem:[%s15081_s30 + $0x320] sm:$0xf]  ;;  %v299_v37 = vld [vmem:[%s15081_s30 + $0x324] sm:$0xf] }
  0x4e   : > { %296 = vst [vmem:[%s15077_s29 + $0x318] sm:$0xf] %v295_v35  ;;  %298 = vst [vmem:[%s15077_s29 + $0x320] sm:$0xf] %v297_v36  ;;  %v301_v38 = vld [vmem:[%s15081_s30 + $0x330] sm:$0xf] }
  0x4f   : > { %300 = vst [vmem:[%s15077_s29 + $0x328] sm:$0xf] %v299_v37  ;;  %v303_v39 = vld [vmem:[%s15081_s30 + $0x334] sm:$0xf]  ;;  %v305_v40 = vld [vmem:[%s15081_s30 + $0x340] sm:$0xf] }
  0x50   : > { %302 = vst [vmem:[%s15077_s29 + $0x330] sm:$0xf] %v301_v38  ;;  %304 = vst [vmem:[%s15077_s29 + $0x338] sm:$0xf] %v303_v39  ;;  %v307_v41 = vld [vmem:[%s15081_s30 + $0x344] sm:$0xf] }
  0x51   : > { %306 = vst [vmem:[%s15077_s29 + $0x340] sm:$0xf] %v305_v40  ;;  %v309_v42 = vld [vmem:[%s15081_s30 + $0x350] sm:$0xf]  ;;  %v311_v43 = vld [vmem:[%s15081_s30 + $0x354] sm:$0xf] }
  0x52   : > { %308 = vst [vmem:[%s15077_s29 + $0x348] sm:$0xf] %v307_v41  ;;  %310 = vst [vmem:[%s15077_s29 + $0x350] sm:$0xf] %v309_v42  ;;  %v313_v44 = vld [vmem:[%s15081_s30 + $0x360] sm:$0xf] }
  0x53   : > { %312 = vst [vmem:[%s15077_s29 + $0x358] sm:$0xf] %v311_v43  ;;  %v315_v45 = vld [vmem:[%s15081_s30 + $0x364] sm:$0xf]  ;;  %v317_v46 = vld [vmem:[%s15081_s30 + $0x370] sm:$0xf] }
  0x54   : > { %314 = vst [vmem:[%s15077_s29 + $0x360] sm:$0xf] %v313_v44  ;;  %316 = vst [vmem:[%s15077_s29 + $0x368] sm:$0xf] %v315_v45  ;;  %v319_v47 = vld [vmem:[%s15081_s30 + $0x374] sm:$0xf] }
  0x55   : > { %318 = vst [vmem:[%s15077_s29 + $0x370] sm:$0xf] %v317_v46  ;;  %v321_v48 = vld [vmem:[%s15081_s30 + $0x380] sm:$0xf]  ;;  %v323_v49 = vld [vmem:[%s15081_s30 + $0x384] sm:$0xf] }
  0x56   : > { %320 = vst [vmem:[%s15077_s29 + $0x378] sm:$0xf] %v319_v47  ;;  %322 = vst [vmem:[%s15077_s29 + $0x380] sm:$0xf] %v321_v48  ;;  %v325_v50 = vld [vmem:[%s15081_s30 + $0x390] sm:$0xf] }
  0x57   : > { %324 = vst [vmem:[%s15077_s29 + $0x388] sm:$0xf] %v323_v49  ;;  %v327_v51 = vld [vmem:[%s15081_s30 + $0x394] sm:$0xf]  ;;  %v329_v52 = vld [vmem:[%s15081_s30 + $0x3a0] sm:$0xf] }
  0x58   : > { %326 = vst [vmem:[%s15077_s29 + $0x390] sm:$0xf] %v325_v50  ;;  %328 = vst [vmem:[%s15077_s29 + $0x398] sm:$0xf] %v327_v51  ;;  %v331_v53 = vld [vmem:[%s15081_s30 + $0x3a4] sm:$0xf] }
  0x59   : > { %330 = vst [vmem:[%s15077_s29 + $0x3a0] sm:$0xf] %v329_v52  ;;  %v333_v54 = vld [vmem:[%s15081_s30 + $0x3b0] sm:$0xf]  ;;  %v335_v55 = vld [vmem:[%s15081_s30 + $0x3b4] sm:$0xf] }
  0x5a   : > { %332 = vst [vmem:[%s15077_s29 + $0x3a8] sm:$0xf] %v331_v53  ;;  %334 = vst [vmem:[%s15077_s29 + $0x3b0] sm:$0xf] %v333_v54  ;;  %v337_v56 = vld [vmem:[%s15081_s30 + $0x3c0] sm:$0xf] }
  0x5b   : > { %336 = vst [vmem:[%s15077_s29 + $0x3b8] sm:$0xf] %v335_v55  ;;  %v339_v57 = vld [vmem:[%s15081_s30 + $0x3c4] sm:$0xf]  ;;  %v341_v58 = vld [vmem:[%s15081_s30 + $0x3d0] sm:$0xf] }
  0x5c   : > { %338 = vst [vmem:[%s15077_s29 + $0x3c0] sm:$0xf] %v337_v56  ;;  %340 = vst [vmem:[%s15077_s29 + $0x3c8] sm:$0xf] %v339_v57  ;;  %v343_v59 = vld [vmem:[%s15081_s30 + $0x3d4] sm:$0xf] }
  0x5d   : > { %342 = vst [vmem:[%s15077_s29 + $0x3d0] sm:$0xf] %v341_v58  ;;  %v345_v60 = vld [vmem:[%s15081_s30 + $0x3e0] sm:$0xf]  ;;  %v347_v61 = vld [vmem:[%s15081_s30 + $0x3e4] sm:$0xf] }
  0x5e   : > { %344 = vst [vmem:[%s15077_s29 + $0x3d8] sm:$0xf] %v343_v59  ;;  %346 = vst [vmem:[%s15077_s29 + $0x3e0] sm:$0xf] %v345_v60  ;;  %v349_v62 = vld [vmem:[%s15081_s30 + $0x3f0] sm:$0xf] }
  0x5f   : > { %348 = vst [vmem:[%s15077_s29 + $0x3e8] sm:$0xf] %v347_v61  ;;  %v351_v63 = vld [vmem:[%s15081_s30 + $0x3f4] sm:$0xf]  ;;  %v353_v0 = vld [vmem:[%s15081_s30 + $0x400] sm:$0xf] }
  0x60   : > { %350 = vst [vmem:[%s15077_s29 + $0x3f0] sm:$0xf] %v349_v62  ;;  %352 = vst [vmem:[%s15077_s29 + $0x3f8] sm:$0xf] %v351_v63  ;;  %v355_v1 = vld [vmem:[%s15081_s30 + $0x404] sm:$0xf] }
  0x61   : > { %354 = vst [vmem:[%s15077_s29 + $0x400] sm:$0xf] %v353_v0  ;;  %v357_v2 = vld [vmem:[%s15081_s30 + $0x410] sm:$0xf]  ;;  %v359_v3 = vld [vmem:[%s15081_s30 + $0x414] sm:$0xf] }
  0x62   : > { %356 = vst [vmem:[%s15077_s29 + $0x408] sm:$0xf] %v355_v1  ;;  %358 = vst [vmem:[%s15077_s29 + $0x410] sm:$0xf] %v357_v2  ;;  %v361_v4 = vld [vmem:[%s15081_s30 + $0x420] sm:$0xf] }
  0x63   : > { %360 = vst [vmem:[%s15077_s29 + $0x418] sm:$0xf] %v359_v3  ;;  %v363_v5 = vld [vmem:[%s15081_s30 + $0x424] sm:$0xf]  ;;  %v365_v6 = vld [vmem:[%s15081_s30 + $0x430] sm:$0xf] }
  0x64   : > { %362 = vst [vmem:[%s15077_s29 + $0x420] sm:$0xf] %v361_v4  ;;  %364 = vst [vmem:[%s15077_s29 + $0x428] sm:$0xf] %v363_v5  ;;  %v367_v7 = vld [vmem:[%s15081_s30 + $0x434] sm:$0xf] }
  0x65   : > { %366 = vst [vmem:[%s15077_s29 + $0x430] sm:$0xf] %v365_v6  ;;  %v369_v8 = vld [vmem:[%s15081_s30 + $0x440] sm:$0xf]  ;;  %v371_v9 = vld [vmem:[%s15081_s30 + $0x444] sm:$0xf] }
  0x66   : > { %368 = vst [vmem:[%s15077_s29 + $0x438] sm:$0xf] %v367_v7  ;;  %370 = vst [vmem:[%s15077_s29 + $0x440] sm:$0xf] %v369_v8  ;;  %v373_v10 = vld [vmem:[%s15081_s30 + $0x450] sm:$0xf] }
  0x67   : > { %372 = vst [vmem:[%s15077_s29 + $0x448] sm:$0xf] %v371_v9  ;;  %v375_v11 = vld [vmem:[%s15081_s30 + $0x454] sm:$0xf]  ;;  %v377_v12 = vld [vmem:[%s15081_s30 + $0x460] sm:$0xf] }
  0x68   : > { %374 = vst [vmem:[%s15077_s29 + $0x450] sm:$0xf] %v373_v10  ;;  %376 = vst [vmem:[%s15077_s29 + $0x458] sm:$0xf] %v375_v11  ;;  %v379_v13 = vld [vmem:[%s15081_s30 + $0x464] sm:$0xf] }
  0x69   : > { %378 = vst [vmem:[%s15077_s29 + $0x460] sm:$0xf] %v377_v12  ;;  %v381_v14 = vld [vmem:[%s15081_s30 + $0x470] sm:$0xf]  ;;  %v383_v15 = vld [vmem:[%s15081_s30 + $0x474] sm:$0xf] }
  0x6a   : > { %380 = vst [vmem:[%s15077_s29 + $0x468] sm:$0xf] %v379_v13  ;;  %382 = vst [vmem:[%s15077_s29 + $0x470] sm:$0xf] %v381_v14  ;;  %v385_v16 = vld [vmem:[%s15081_s30 + $0x480] sm:$0xf] }
  0x6b   : > { %384 = vst [vmem:[%s15077_s29 + $0x478] sm:$0xf] %v383_v15  ;;  %v387_v17 = vld [vmem:[%s15081_s30 + $0x484] sm:$0xf]  ;;  %v389_v18 = vld [vmem:[%s15081_s30 + $0x490] sm:$0xf] }
  0x6c   : > { %386 = vst [vmem:[%s15077_s29 + $0x480] sm:$0xf] %v385_v16  ;;  %388 = vst [vmem:[%s15077_s29 + $0x488] sm:$0xf] %v387_v17  ;;  %v391_v19 = vld [vmem:[%s15081_s30 + $0x494] sm:$0xf] }
  0x6d   : > { %390 = vst [vmem:[%s15077_s29 + $0x490] sm:$0xf] %v389_v18  ;;  %v393_v20 = vld [vmem:[%s15081_s30 + $0x4a0] sm:$0xf]  ;;  %v395_v21 = vld [vmem:[%s15081_s30 + $0x4a4] sm:$0xf] }
  0x6e   : > { %392 = vst [vmem:[%s15077_s29 + $0x498] sm:$0xf] %v391_v19  ;;  %394 = vst [vmem:[%s15077_s29 + $0x4a0] sm:$0xf] %v393_v20  ;;  %v397_v22 = vld [vmem:[%s15081_s30 + $0x4b0] sm:$0xf] }
  0x6f   : > { %396 = vst [vmem:[%s15077_s29 + $0x4a8] sm:$0xf] %v395_v21  ;;  %v399_v23 = vld [vmem:[%s15081_s30 + $0x4b4] sm:$0xf]  ;;  %v401_v24 = vld [vmem:[%s15081_s30 + $0x4c0] sm:$0xf] }
  0x70   : > { %398 = vst [vmem:[%s15077_s29 + $0x4b0] sm:$0xf] %v397_v22  ;;  %400 = vst [vmem:[%s15077_s29 + $0x4b8] sm:$0xf] %v399_v23  ;;  %v403_v25 = vld [vmem:[%s15081_s30 + $0x4c4] sm:$0xf] }
  0x71   : > { %402 = vst [vmem:[%s15077_s29 + $0x4c0] sm:$0xf] %v401_v24  ;;  %v405_v26 = vld [vmem:[%s15081_s30 + $0x4d0] sm:$0xf]  ;;  %v407_v27 = vld [vmem:[%s15081_s30 + $0x4d4] sm:$0xf] }
  0x72   : > { %404 = vst [vmem:[%s15077_s29 + $0x4c8] sm:$0xf] %v403_v25  ;;  %406 = vst [vmem:[%s15077_s29 + $0x4d0] sm:$0xf] %v405_v26  ;;  %v409_v28 = vld [vmem:[%s15081_s30 + $0x4e0] sm:$0xf] }
  0x73   : > { %408 = vst [vmem:[%s15077_s29 + $0x4d8] sm:$0xf] %v407_v27  ;;  %v411_v29 = vld [vmem:[%s15081_s30 + $0x4e4] sm:$0xf]  ;;  %v413_v30 = vld [vmem:[%s15081_s30 + $0x4f0] sm:$0xf] }
  0x74   : > { %410 = vst [vmem:[%s15077_s29 + $0x4e0] sm:$0xf] %v409_v28  ;;  %412 = vst [vmem:[%s15077_s29 + $0x4e8] sm:$0xf] %v411_v29  ;;  %v415_v31 = vld [vmem:[%s15081_s30 + $0x4f4] sm:$0xf] }
  0x75   : > { %414 = vst [vmem:[%s15077_s29 + $0x4f0] sm:$0xf] %v413_v30  ;;  %v417_v32 = vld [vmem:[%s15081_s30 + $0x500] sm:$0xf]  ;;  %v419_v33 = vld [vmem:[%s15081_s30 + $0x504] sm:$0xf] }
  0x76   : > { %416 = vst [vmem:[%s15077_s29 + $0x4f8] sm:$0xf] %v415_v31  ;;  %418 = vst [vmem:[%s15077_s29 + $0x500] sm:$0xf] %v417_v32  ;;  %v421_v34 = vld [vmem:[%s15081_s30 + $0x510] sm:$0xf] }
  0x77   : > { %420 = vst [vmem:[%s15077_s29 + $0x508] sm:$0xf] %v419_v33  ;;  %v423_v35 = vld [vmem:[%s15081_s30 + $0x514] sm:$0xf]  ;;  %v425_v36 = vld [vmem:[%s15081_s30 + $0x520] sm:$0xf] }
  0x78   : > { %422 = vst [vmem:[%s15077_s29 + $0x510] sm:$0xf] %v421_v34  ;;  %424 = vst [vmem:[%s15077_s29 + $0x518] sm:$0xf] %v423_v35  ;;  %v427_v37 = vld [vmem:[%s15081_s30 + $0x524] sm:$0xf] }
  0x79   : > { %426 = vst [vmem:[%s15077_s29 + $0x520] sm:$0xf] %v425_v36  ;;  %v429_v38 = vld [vmem:[%s15081_s30 + $0x530] sm:$0xf]  ;;  %v431_v39 = vld [vmem:[%s15081_s30 + $0x534] sm:$0xf] }
  0x7a   : > { %428 = vst [vmem:[%s15077_s29 + $0x528] sm:$0xf] %v427_v37  ;;  %430 = vst [vmem:[%s15077_s29 + $0x530] sm:$0xf] %v429_v38  ;;  %v433_v40 = vld [vmem:[%s15081_s30 + $0x540] sm:$0xf] }
  0x7b   : > { %432 = vst [vmem:[%s15077_s29 + $0x538] sm:$0xf] %v431_v39  ;;  %v435_v41 = vld [vmem:[%s15081_s30 + $0x544] sm:$0xf]  ;;  %v437_v42 = vld [vmem:[%s15081_s30 + $0x550] sm:$0xf] }
  0x7c   : > { %434 = vst [vmem:[%s15077_s29 + $0x540] sm:$0xf] %v433_v40  ;;  %436 = vst [vmem:[%s15077_s29 + $0x548] sm:$0xf] %v435_v41  ;;  %v439_v43 = vld [vmem:[%s15081_s30 + $0x554] sm:$0xf] }
  0x7d   : > { %438 = vst [vmem:[%s15077_s29 + $0x550] sm:$0xf] %v437_v42  ;;  %v441_v44 = vld [vmem:[%s15081_s30 + $0x560] sm:$0xf]  ;;  %v443_v45 = vld [vmem:[%s15081_s30 + $0x564] sm:$0xf] }
  0x7e   : > { %440 = vst [vmem:[%s15077_s29 + $0x558] sm:$0xf] %v439_v43  ;;  %442 = vst [vmem:[%s15077_s29 + $0x560] sm:$0xf] %v441_v44  ;;  %v445_v46 = vld [vmem:[%s15081_s30 + $0x570] sm:$0xf] }
  0x7f   : > { %444 = vst [vmem:[%s15077_s29 + $0x568] sm:$0xf] %v443_v45  ;;  %v447_v47 = vld [vmem:[%s15081_s30 + $0x574] sm:$0xf]  ;;  %v449_v48 = vld [vmem:[%s15081_s30 + $0x580] sm:$0xf] }
  0x80   : > { %446 = vst [vmem:[%s15077_s29 + $0x570] sm:$0xf] %v445_v46  ;;  %448 = vst [vmem:[%s15077_s29 + $0x578] sm:$0xf] %v447_v47  ;;  %v451_v49 = vld [vmem:[%s15081_s30 + $0x584] sm:$0xf] }
  0x81   : > { %450 = vst [vmem:[%s15077_s29 + $0x580] sm:$0xf] %v449_v48  ;;  %v453_v50 = vld [vmem:[%s15081_s30 + $0x590] sm:$0xf]  ;;  %v455_v51 = vld [vmem:[%s15081_s30 + $0x594] sm:$0xf] }
  0x82   : > { %452 = vst [vmem:[%s15077_s29 + $0x588] sm:$0xf] %v451_v49  ;;  %454 = vst [vmem:[%s15077_s29 + $0x590] sm:$0xf] %v453_v50  ;;  %v457_v52 = vld [vmem:[%s15081_s30 + $0x5a0] sm:$0xf] }
  0x83   : > { %456 = vst [vmem:[%s15077_s29 + $0x598] sm:$0xf] %v455_v51  ;;  %v459_v53 = vld [vmem:[%s15081_s30 + $0x5a4] sm:$0xf]  ;;  %v461_v54 = vld [vmem:[%s15081_s30 + $0x5b0] sm:$0xf] }
  0x84   : > { %458 = vst [vmem:[%s15077_s29 + $0x5a0] sm:$0xf] %v457_v52  ;;  %460 = vst [vmem:[%s15077_s29 + $0x5a8] sm:$0xf] %v459_v53  ;;  %v463_v55 = vld [vmem:[%s15081_s30 + $0x5b4] sm:$0xf] }
  0x85   : > { %462 = vst [vmem:[%s15077_s29 + $0x5b0] sm:$0xf] %v461_v54  ;;  %v465_v56 = vld [vmem:[%s15081_s30 + $0x5c0] sm:$0xf]  ;;  %v467_v57 = vld [vmem:[%s15081_s30 + $0x5c4] sm:$0xf] }
  0x86   : > { %464 = vst [vmem:[%s15077_s29 + $0x5b8] sm:$0xf] %v463_v55  ;;  %466 = vst [vmem:[%s15077_s29 + $0x5c0] sm:$0xf] %v465_v56  ;;  %v469_v58 = vld [vmem:[%s15081_s30 + $0x5d0] sm:$0xf] }
  0x87   : > { %468 = vst [vmem:[%s15077_s29 + $0x5c8] sm:$0xf] %v467_v57  ;;  %v471_v59 = vld [vmem:[%s15081_s30 + $0x5d4] sm:$0xf]  ;;  %v473_v60 = vld [vmem:[%s15081_s30 + $0x5e0] sm:$0xf] }
  0x88   : > { %470 = vst [vmem:[%s15077_s29 + $0x5d0] sm:$0xf] %v469_v58  ;;  %472 = vst [vmem:[%s15077_s29 + $0x5d8] sm:$0xf] %v471_v59  ;;  %v475_v61 = vld [vmem:[%s15081_s30 + $0x5e4] sm:$0xf] }
  0x89   : > { %474 = vst [vmem:[%s15077_s29 + $0x5e0] sm:$0xf] %v473_v60  ;;  %v477_v62 = vld [vmem:[%s15081_s30 + $0x5f0] sm:$0xf]  ;;  %v479_v63 = vld [vmem:[%s15081_s30 + $0x5f4] sm:$0xf] }
  0x8a   : > { %476 = vst [vmem:[%s15077_s29 + $0x5e8] sm:$0xf] %v475_v61  ;;  %478 = vst [vmem:[%s15077_s29 + $0x5f0] sm:$0xf] %v477_v62  ;;  %v481_v0 = vld [vmem:[%s15081_s30 + $0x600] sm:$0xf] }
  0x8b   : > { %480 = vst [vmem:[%s15077_s29 + $0x5f8] sm:$0xf] %v479_v63  ;;  %v483_v1 = vld [vmem:[%s15081_s30 + $0x604] sm:$0xf]  ;;  %v485_v2 = vld [vmem:[%s15081_s30 + $0x610] sm:$0xf] }
  0x8c   : > { %482 = vst [vmem:[%s15077_s29 + $0x600] sm:$0xf] %v481_v0  ;;  %484 = vst [vmem:[%s15077_s29 + $0x608] sm:$0xf] %v483_v1  ;;  %v487_v3 = vld [vmem:[%s15081_s30 + $0x614] sm:$0xf] }
  0x8d   : > { %486 = vst [vmem:[%s15077_s29 + $0x610] sm:$0xf] %v485_v2  ;;  %v489_v4 = vld [vmem:[%s15081_s30 + $0x620] sm:$0xf]  ;;  %v491_v5 = vld [vmem:[%s15081_s30 + $0x624] sm:$0xf] }
  0x8e   : > { %488 = vst [vmem:[%s15077_s29 + $0x618] sm:$0xf] %v487_v3  ;;  %490 = vst [vmem:[%s15077_s29 + $0x620] sm:$0xf] %v489_v4  ;;  %v493_v6 = vld [vmem:[%s15081_s30 + $0x630] sm:$0xf] }
  0x8f   : > { %492 = vst [vmem:[%s15077_s29 + $0x628] sm:$0xf] %v491_v5  ;;  %v495_v7 = vld [vmem:[%s15081_s30 + $0x634] sm:$0xf]  ;;  %v497_v8 = vld [vmem:[%s15081_s30 + $0x640] sm:$0xf] }
  0x90   : > { %494 = vst [vmem:[%s15077_s29 + $0x630] sm:$0xf] %v493_v6  ;;  %496 = vst [vmem:[%s15077_s29 + $0x638] sm:$0xf] %v495_v7  ;;  %v499_v9 = vld [vmem:[%s15081_s30 + $0x644] sm:$0xf] }
  0x91   : > { %498 = vst [vmem:[%s15077_s29 + $0x640] sm:$0xf] %v497_v8  ;;  %v501_v10 = vld [vmem:[%s15081_s30 + $0x650] sm:$0xf]  ;;  %v503_v11 = vld [vmem:[%s15081_s30 + $0x654] sm:$0xf] }
  0x92   : > { %500 = vst [vmem:[%s15077_s29 + $0x648] sm:$0xf] %v499_v9  ;;  %502 = vst [vmem:[%s15077_s29 + $0x650] sm:$0xf] %v501_v10  ;;  %v505_v12 = vld [vmem:[%s15081_s30 + $0x660] sm:$0xf] }
  0x93   : > { %504 = vst [vmem:[%s15077_s29 + $0x658] sm:$0xf] %v503_v11  ;;  %v507_v13 = vld [vmem:[%s15081_s30 + $0x664] sm:$0xf]  ;;  %v509_v14 = vld [vmem:[%s15081_s30 + $0x670] sm:$0xf] }
  0x94   : > { %506 = vst [vmem:[%s15077_s29 + $0x660] sm:$0xf] %v505_v12  ;;  %508 = vst [vmem:[%s15077_s29 + $0x668] sm:$0xf] %v507_v13  ;;  %v511_v15 = vld [vmem:[%s15081_s30 + $0x674] sm:$0xf] }
  0x95   : > { %510 = vst [vmem:[%s15077_s29 + $0x670] sm:$0xf] %v509_v14  ;;  %v513_v16 = vld [vmem:[%s15081_s30 + $0x680] sm:$0xf]  ;;  %v515_v17 = vld [vmem:[%s15081_s30 + $0x684] sm:$0xf] }
  0x96   : > { %512 = vst [vmem:[%s15077_s29 + $0x678] sm:$0xf] %v511_v15  ;;  %514 = vst [vmem:[%s15077_s29 + $0x680] sm:$0xf] %v513_v16  ;;  %v517_v18 = vld [vmem:[%s15081_s30 + $0x690] sm:$0xf] }
  0x97   : > { %516 = vst [vmem:[%s15077_s29 + $0x688] sm:$0xf] %v515_v17  ;;  %v519_v19 = vld [vmem:[%s15081_s30 + $0x694] sm:$0xf]  ;;  %v521_v20 = vld [vmem:[%s15081_s30 + $0x6a0] sm:$0xf] }
  0x98   : > { %518 = vst [vmem:[%s15077_s29 + $0x690] sm:$0xf] %v517_v18  ;;  %520 = vst [vmem:[%s15077_s29 + $0x698] sm:$0xf] %v519_v19  ;;  %v523_v21 = vld [vmem:[%s15081_s30 + $0x6a4] sm:$0xf] }
  0x99   : > { %522 = vst [vmem:[%s15077_s29 + $0x6a0] sm:$0xf] %v521_v20  ;;  %v525_v22 = vld [vmem:[%s15081_s30 + $0x6b0] sm:$0xf]  ;;  %v527_v23 = vld [vmem:[%s15081_s30 + $0x6b4] sm:$0xf] }
  0x9a   : > { %524 = vst [vmem:[%s15077_s29 + $0x6a8] sm:$0xf] %v523_v21  ;;  %526 = vst [vmem:[%s15077_s29 + $0x6b0] sm:$0xf] %v525_v22  ;;  %v529_v24 = vld [vmem:[%s15081_s30 + $0x6c0] sm:$0xf] }
  0x9b   : > { %528 = vst [vmem:[%s15077_s29 + $0x6b8] sm:$0xf] %v527_v23  ;;  %v531_v25 = vld [vmem:[%s15081_s30 + $0x6c4] sm:$0xf]  ;;  %v533_v26 = vld [vmem:[%s15081_s30 + $0x6d0] sm:$0xf] }
  0x9c   : > { %530 = vst [vmem:[%s15077_s29 + $0x6c0] sm:$0xf] %v529_v24  ;;  %532 = vst [vmem:[%s15077_s29 + $0x6c8] sm:$0xf] %v531_v25  ;;  %v535_v27 = vld [vmem:[%s15081_s30 + $0x6d4] sm:$0xf] }
  0x9d   : > { %534 = vst [vmem:[%s15077_s29 + $0x6d0] sm:$0xf] %v533_v26  ;;  %v537_v28 = vld [vmem:[%s15081_s30 + $0x6e0] sm:$0xf]  ;;  %v539_v29 = vld [vmem:[%s15081_s30 + $0x6e4] sm:$0xf] }
  0x9e   : > { %536 = vst [vmem:[%s15077_s29 + $0x6d8] sm:$0xf] %v535_v27  ;;  %538 = vst [vmem:[%s15077_s29 + $0x6e0] sm:$0xf] %v537_v28  ;;  %v541_v30 = vld [vmem:[%s15081_s30 + $0x6f0] sm:$0xf] }
  0x9f   : > { %540 = vst [vmem:[%s15077_s29 + $0x6e8] sm:$0xf] %v539_v29  ;;  %v543_v31 = vld [vmem:[%s15081_s30 + $0x6f4] sm:$0xf]  ;;  %v545_v32 = vld [vmem:[%s15081_s30 + $0x700] sm:$0xf] }
  0xa0   : > { %542 = vst [vmem:[%s15077_s29 + $0x6f0] sm:$0xf] %v541_v30  ;;  %544 = vst [vmem:[%s15077_s29 + $0x6f8] sm:$0xf] %v543_v31  ;;  %v547_v33 = vld [vmem:[%s15081_s30 + $0x704] sm:$0xf] }
  0xa1   : > { %546 = vst [vmem:[%s15077_s29 + $0x700] sm:$0xf] %v545_v32  ;;  %v549_v34 = vld [vmem:[%s15081_s30 + $0x710] sm:$0xf]  ;;  %v551_v35 = vld [vmem:[%s15081_s30 + $0x714] sm:$0xf] }
  0xa2   : > { %548 = vst [vmem:[%s15077_s29 + $0x708] sm:$0xf] %v547_v33  ;;  %550 = vst [vmem:[%s15077_s29 + $0x710] sm:$0xf] %v549_v34  ;;  %v553_v36 = vld [vmem:[%s15081_s30 + $0x720] sm:$0xf] }
  0xa3   : > { %552 = vst [vmem:[%s15077_s29 + $0x718] sm:$0xf] %v551_v35  ;;  %v555_v37 = vld [vmem:[%s15081_s30 + $0x724] sm:$0xf]  ;;  %v557_v38 = vld [vmem:[%s15081_s30 + $0x730] sm:$0xf] }
  0xa4   : > { %554 = vst [vmem:[%s15077_s29 + $0x720] sm:$0xf] %v553_v36  ;;  %556 = vst [vmem:[%s15077_s29 + $0x728] sm:$0xf] %v555_v37  ;;  %v559_v39 = vld [vmem:[%s15081_s30 + $0x734] sm:$0xf] }
  0xa5   : > { %558 = vst [vmem:[%s15077_s29 + $0x730] sm:$0xf] %v557_v38  ;;  %v561_v40 = vld [vmem:[%s15081_s30 + $0x740] sm:$0xf]  ;;  %v563_v41 = vld [vmem:[%s15081_s30 + $0x744] sm:$0xf] }
  0xa6   : > { %560 = vst [vmem:[%s15077_s29 + $0x738] sm:$0xf] %v559_v39  ;;  %562 = vst [vmem:[%s15077_s29 + $0x740] sm:$0xf] %v561_v40  ;;  %v565_v42 = vld [vmem:[%s15081_s30 + $0x750] sm:$0xf] }
  0xa7   : > { %564 = vst [vmem:[%s15077_s29 + $0x748] sm:$0xf] %v563_v41  ;;  %v567_v43 = vld [vmem:[%s15081_s30 + $0x754] sm:$0xf]  ;;  %v569_v44 = vld [vmem:[%s15081_s30 + $0x760] sm:$0xf] }
  0xa8   : > { %566 = vst [vmem:[%s15077_s29 + $0x750] sm:$0xf] %v565_v42  ;;  %568 = vst [vmem:[%s15077_s29 + $0x758] sm:$0xf] %v567_v43  ;;  %v571_v45 = vld [vmem:[%s15081_s30 + $0x764] sm:$0xf] }
  0xa9   : > { %570 = vst [vmem:[%s15077_s29 + $0x760] sm:$0xf] %v569_v44  ;;  %v573_v46 = vld [vmem:[%s15081_s30 + $0x770] sm:$0xf]  ;;  %v575_v47 = vld [vmem:[%s15081_s30 + $0x774] sm:$0xf] }
  0xaa   : > { %572 = vst [vmem:[%s15077_s29 + $0x768] sm:$0xf] %v571_v45  ;;  %574 = vst [vmem:[%s15077_s29 + $0x770] sm:$0xf] %v573_v46  ;;  %v577_v48 = vld [vmem:[%s15081_s30 + $0x780] sm:$0xf] }
  0xab   : > { %576 = vst [vmem:[%s15077_s29 + $0x778] sm:$0xf] %v575_v47  ;;  %v579_v49 = vld [vmem:[%s15081_s30 + $0x784] sm:$0xf]  ;;  %v581_v50 = vld [vmem:[%s15081_s30 + $0x790] sm:$0xf] }
  0xac   : > { %578 = vst [vmem:[%s15077_s29 + $0x780] sm:$0xf] %v577_v48  ;;  %580 = vst [vmem:[%s15077_s29 + $0x788] sm:$0xf] %v579_v49  ;;  %v583_v51 = vld [vmem:[%s15081_s30 + $0x794] sm:$0xf] }
  0xad   : > { %582 = vst [vmem:[%s15077_s29 + $0x790] sm:$0xf] %v581_v50  ;;  %v585_v52 = vld [vmem:[%s15081_s30 + $0x7a0] sm:$0xf]  ;;  %v587_v53 = vld [vmem:[%s15081_s30 + $0x7a4] sm:$0xf] }
  0xae   : > { %584 = vst [vmem:[%s15077_s29 + $0x798] sm:$0xf] %v583_v51  ;;  %586 = vst [vmem:[%s15077_s29 + $0x7a0] sm:$0xf] %v585_v52  ;;  %v589_v54 = vld [vmem:[%s15081_s30 + $0x7b0] sm:$0xf] }
  0xaf   : > { %588 = vst [vmem:[%s15077_s29 + $0x7a8] sm:$0xf] %v587_v53  ;;  %v591_v55 = vld [vmem:[%s15081_s30 + $0x7b4] sm:$0xf]  ;;  %v593_v56 = vld [vmem:[%s15081_s30 + $0x7c0] sm:$0xf] }
  0xb0   : > { %590 = vst [vmem:[%s15077_s29 + $0x7b0] sm:$0xf] %v589_v54  ;;  %592 = vst [vmem:[%s15077_s29 + $0x7b8] sm:$0xf] %v591_v55  ;;  %v595_v57 = vld [vmem:[%s15081_s30 + $0x7c4] sm:$0xf] }
  0xb1   : > { %594 = vst [vmem:[%s15077_s29 + $0x7c0] sm:$0xf] %v593_v56  ;;  %v597_v58 = vld [vmem:[%s15081_s30 + $0x7d0] sm:$0xf]  ;;  %v599_v59 = vld [vmem:[%s15081_s30 + $0x7d4] sm:$0xf] }
  0xb2   : > { %596 = vst [vmem:[%s15077_s29 + $0x7c8] sm:$0xf] %v595_v57  ;;  %598 = vst [vmem:[%s15077_s29 + $0x7d0] sm:$0xf] %v597_v58  ;;  %v601_v60 = vld [vmem:[%s15081_s30 + $0x7e0] sm:$0xf] }
  0xb3   : > { %600 = vst [vmem:[%s15077_s29 + $0x7d8] sm:$0xf] %v599_v59  ;;  %v603_v61 = vld [vmem:[%s15081_s30 + $0x7e4] sm:$0xf]  ;;  %v605_v62 = vld [vmem:[%s15081_s30 + $0x7f0] sm:$0xf] }
  0xb4   : > { %602 = vst [vmem:[%s15077_s29 + $0x7e0] sm:$0xf] %v601_v60  ;;  %604 = vst [vmem:[%s15077_s29 + $0x7e8] sm:$0xf] %v603_v61  ;;  %v607_v63 = vld [vmem:[%s15081_s30 + $0x7f4] sm:$0xf] }
  0xb5   : > { %606 = vst [vmem:[%s15077_s29 + $0x7f0] sm:$0xf] %v605_v62  ;;  %v609_v0 = vld [vmem:[%s15081_s30 + $0x800] sm:$0xf]  ;;  %v611_v1 = vld [vmem:[%s15081_s30 + $0x804] sm:$0xf] }
  0xb6   : > { %608 = vst [vmem:[%s15077_s29 + $0x7f8] sm:$0xf] %v607_v63  ;;  %610 = vst [vmem:[%s15077_s29 + $0x800] sm:$0xf] %v609_v0  ;;  %v613_v2 = vld [vmem:[%s15081_s30 + $0x810] sm:$0xf] }
  0xb7   : > { %612 = vst [vmem:[%s15077_s29 + $0x808] sm:$0xf] %v611_v1  ;;  %v615_v3 = vld [vmem:[%s15081_s30 + $0x814] sm:$0xf]  ;;  %v617_v4 = vld [vmem:[%s15081_s30 + $0x820] sm:$0xf] }
  0xb8   : > { %614 = vst [vmem:[%s15077_s29 + $0x810] sm:$0xf] %v613_v2  ;;  %616 = vst [vmem:[%s15077_s29 + $0x818] sm:$0xf] %v615_v3  ;;  %v619_v5 = vld [vmem:[%s15081_s30 + $0x824] sm:$0xf] }
  0xb9   : > { %618 = vst [vmem:[%s15077_s29 + $0x820] sm:$0xf] %v617_v4  ;;  %v621_v6 = vld [vmem:[%s15081_s30 + $0x830] sm:$0xf]  ;;  %v623_v7 = vld [vmem:[%s15081_s30 + $0x834] sm:$0xf] }
  0xba   : > { %620 = vst [vmem:[%s15077_s29 + $0x828] sm:$0xf] %v619_v5  ;;  %622 = vst [vmem:[%s15077_s29 + $0x830] sm:$0xf] %v621_v6  ;;  %v625_v8 = vld [vmem:[%s15081_s30 + $0x840] sm:$0xf] }
  0xbb   : > { %624 = vst [vmem:[%s15077_s29 + $0x838] sm:$0xf] %v623_v7  ;;  %v627_v9 = vld [vmem:[%s15081_s30 + $0x844] sm:$0xf]  ;;  %v629_v10 = vld [vmem:[%s15081_s30 + $0x850] sm:$0xf] }
  0xbc   : > { %626 = vst [vmem:[%s15077_s29 + $0x840] sm:$0xf] %v625_v8  ;;  %628 = vst [vmem:[%s15077_s29 + $0x848] sm:$0xf] %v627_v9  ;;  %v631_v11 = vld [vmem:[%s15081_s30 + $0x854] sm:$0xf] }
  0xbd   : > { %630 = vst [vmem:[%s15077_s29 + $0x850] sm:$0xf] %v629_v10  ;;  %v633_v12 = vld [vmem:[%s15081_s30 + $0x860] sm:$0xf]  ;;  %v635_v13 = vld [vmem:[%s15081_s30 + $0x864] sm:$0xf] }
  0xbe   : > { %632 = vst [vmem:[%s15077_s29 + $0x858] sm:$0xf] %v631_v11  ;;  %634 = vst [vmem:[%s15077_s29 + $0x860] sm:$0xf] %v633_v12  ;;  %v637_v14 = vld [vmem:[%s15081_s30 + $0x870] sm:$0xf] }
  0xbf   : > { %636 = vst [vmem:[%s15077_s29 + $0x868] sm:$0xf] %v635_v13  ;;  %v639_v15 = vld [vmem:[%s15081_s30 + $0x874] sm:$0xf]  ;;  %v641_v16 = vld [vmem:[%s15081_s30 + $0x880] sm:$0xf] }
  0xc0   : > { %638 = vst [vmem:[%s15077_s29 + $0x870] sm:$0xf] %v637_v14  ;;  %640 = vst [vmem:[%s15077_s29 + $0x878] sm:$0xf] %v639_v15  ;;  %v643_v17 = vld [vmem:[%s15081_s30 + $0x884] sm:$0xf] }
  0xc1   : > { %642 = vst [vmem:[%s15077_s29 + $0x880] sm:$0xf] %v641_v16  ;;  %v645_v18 = vld [vmem:[%s15081_s30 + $0x890] sm:$0xf]  ;;  %v647_v19 = vld [vmem:[%s15081_s30 + $0x894] sm:$0xf] }
  0xc2   : > { %644 = vst [vmem:[%s15077_s29 + $0x888] sm:$0xf] %v643_v17  ;;  %646 = vst [vmem:[%s15077_s29 + $0x890] sm:$0xf] %v645_v18  ;;  %v649_v20 = vld [vmem:[%s15081_s30 + $0x8a0] sm:$0xf] }
  0xc3   : > { %648 = vst [vmem:[%s15077_s29 + $0x898] sm:$0xf] %v647_v19  ;;  %v651_v21 = vld [vmem:[%s15081_s30 + $0x8a4] sm:$0xf]  ;;  %v653_v22 = vld [vmem:[%s15081_s30 + $0x8b0] sm:$0xf] }
  0xc4   : > { %650 = vst [vmem:[%s15077_s29 + $0x8a0] sm:$0xf] %v649_v20  ;;  %652 = vst [vmem:[%s15077_s29 + $0x8a8] sm:$0xf] %v651_v21  ;;  %v655_v23 = vld [vmem:[%s15081_s30 + $0x8b4] sm:$0xf] }
  0xc5   : > { %654 = vst [vmem:[%s15077_s29 + $0x8b0] sm:$0xf] %v653_v22  ;;  %v657_v24 = vld [vmem:[%s15081_s30 + $0x8c0] sm:$0xf]  ;;  %v659_v25 = vld [vmem:[%s15081_s30 + $0x8c4] sm:$0xf] }
  0xc6   : > { %656 = vst [vmem:[%s15077_s29 + $0x8b8] sm:$0xf] %v655_v23  ;;  %658 = vst [vmem:[%s15077_s29 + $0x8c0] sm:$0xf] %v657_v24  ;;  %v661_v26 = vld [vmem:[%s15081_s30 + $0x8d0] sm:$0xf] }
  0xc7   : > { %660 = vst [vmem:[%s15077_s29 + $0x8c8] sm:$0xf] %v659_v25  ;;  %v663_v27 = vld [vmem:[%s15081_s30 + $0x8d4] sm:$0xf]  ;;  %v665_v28 = vld [vmem:[%s15081_s30 + $0x8e0] sm:$0xf] }
  0xc8   : > { %662 = vst [vmem:[%s15077_s29 + $0x8d0] sm:$0xf] %v661_v26  ;;  %664 = vst [vmem:[%s15077_s29 + $0x8d8] sm:$0xf] %v663_v27  ;;  %v667_v29 = vld [vmem:[%s15081_s30 + $0x8e4] sm:$0xf] }
  0xc9   : > { %666 = vst [vmem:[%s15077_s29 + $0x8e0] sm:$0xf] %v665_v28  ;;  %v669_v30 = vld [vmem:[%s15081_s30 + $0x8f0] sm:$0xf]  ;;  %v671_v31 = vld [vmem:[%s15081_s30 + $0x8f4] sm:$0xf] }
  0xca   : > { %668 = vst [vmem:[%s15077_s29 + $0x8e8] sm:$0xf] %v667_v29  ;;  %670 = vst [vmem:[%s15077_s29 + $0x8f0] sm:$0xf] %v669_v30  ;;  %v673_v32 = vld [vmem:[%s15081_s30 + $0x900] sm:$0xf] }
  0xcb   : > { %672 = vst [vmem:[%s15077_s29 + $0x8f8] sm:$0xf] %v671_v31  ;;  %v675_v33 = vld [vmem:[%s15081_s30 + $0x904] sm:$0xf]  ;;  %v677_v34 = vld [vmem:[%s15081_s30 + $0x910] sm:$0xf] }
  0xcc   : > { %674 = vst [vmem:[%s15077_s29 + $0x900] sm:$0xf] %v673_v32  ;;  %676 = vst [vmem:[%s15077_s29 + $0x908] sm:$0xf] %v675_v33  ;;  %v679_v35 = vld [vmem:[%s15081_s30 + $0x914] sm:$0xf] }
  0xcd   : > { %678 = vst [vmem:[%s15077_s29 + $0x910] sm:$0xf] %v677_v34  ;;  %v681_v36 = vld [vmem:[%s15081_s30 + $0x920] sm:$0xf]  ;;  %v683_v37 = vld [vmem:[%s15081_s30 + $0x924] sm:$0xf] }
  0xce   : > { %680 = vst [vmem:[%s15077_s29 + $0x918] sm:$0xf] %v679_v35  ;;  %682 = vst [vmem:[%s15077_s29 + $0x920] sm:$0xf] %v681_v36  ;;  %v685_v38 = vld [vmem:[%s15081_s30 + $0x930] sm:$0xf] }
  0xcf   : > { %684 = vst [vmem:[%s15077_s29 + $0x928] sm:$0xf] %v683_v37  ;;  %v687_v39 = vld [vmem:[%s15081_s30 + $0x934] sm:$0xf]  ;;  %v689_v40 = vld [vmem:[%s15081_s30 + $0x940] sm:$0xf] }
  0xd0   : > { %686 = vst [vmem:[%s15077_s29 + $0x930] sm:$0xf] %v685_v38  ;;  %688 = vst [vmem:[%s15077_s29 + $0x938] sm:$0xf] %v687_v39  ;;  %v691_v41 = vld [vmem:[%s15081_s30 + $0x944] sm:$0xf] }
  0xd1   : > { %690 = vst [vmem:[%s15077_s29 + $0x940] sm:$0xf] %v689_v40  ;;  %v693_v42 = vld [vmem:[%s15081_s30 + $0x950] sm:$0xf]  ;;  %v695_v43 = vld [vmem:[%s15081_s30 + $0x954] sm:$0xf] }
  0xd2   : > { %692 = vst [vmem:[%s15077_s29 + $0x948] sm:$0xf] %v691_v41  ;;  %694 = vst [vmem:[%s15077_s29 + $0x950] sm:$0xf] %v693_v42  ;;  %v697_v44 = vld [vmem:[%s15081_s30 + $0x960] sm:$0xf] }
  0xd3   : > { %696 = vst [vmem:[%s15077_s29 + $0x958] sm:$0xf] %v695_v43  ;;  %v699_v45 = vld [vmem:[%s15081_s30 + $0x964] sm:$0xf]  ;;  %v701_v46 = vld [vmem:[%s15081_s30 + $0x970] sm:$0xf] }
  0xd4   : > { %698 = vst [vmem:[%s15077_s29 + $0x960] sm:$0xf] %v697_v44  ;;  %700 = vst [vmem:[%s15077_s29 + $0x968] sm:$0xf] %v699_v45  ;;  %v703_v47 = vld [vmem:[%s15081_s30 + $0x974] sm:$0xf] }
  0xd5   : > { %702 = vst [vmem:[%s15077_s29 + $0x970] sm:$0xf] %v701_v46  ;;  %v705_v48 = vld [vmem:[%s15081_s30 + $0x980] sm:$0xf]  ;;  %v707_v49 = vld [vmem:[%s15081_s30 + $0x984] sm:$0xf] }
  0xd6   : > { %704 = vst [vmem:[%s15077_s29 + $0x978] sm:$0xf] %v703_v47  ;;  %706 = vst [vmem:[%s15077_s29 + $0x980] sm:$0xf] %v705_v48  ;;  %v709_v50 = vld [vmem:[%s15081_s30 + $0x990] sm:$0xf] }
  0xd7   : > { %708 = vst [vmem:[%s15077_s29 + $0x988] sm:$0xf] %v707_v49  ;;  %v711_v51 = vld [vmem:[%s15081_s30 + $0x994] sm:$0xf]  ;;  %v713_v52 = vld [vmem:[%s15081_s30 + $0x9a0] sm:$0xf] }
  0xd8   : > { %710 = vst [vmem:[%s15077_s29 + $0x990] sm:$0xf] %v709_v50  ;;  %712 = vst [vmem:[%s15077_s29 + $0x998] sm:$0xf] %v711_v51  ;;  %v715_v53 = vld [vmem:[%s15081_s30 + $0x9a4] sm:$0xf] }
  0xd9   : > { %714 = vst [vmem:[%s15077_s29 + $0x9a0] sm:$0xf] %v713_v52  ;;  %v717_v54 = vld [vmem:[%s15081_s30 + $0x9b0] sm:$0xf]  ;;  %v719_v55 = vld [vmem:[%s15081_s30 + $0x9b4] sm:$0xf] }
  0xda   : > { %716 = vst [vmem:[%s15077_s29 + $0x9a8] sm:$0xf] %v715_v53  ;;  %718 = vst [vmem:[%s15077_s29 + $0x9b0] sm:$0xf] %v717_v54  ;;  %v721_v56 = vld [vmem:[%s15081_s30 + $0x9c0] sm:$0xf] }
  0xdb   : > { %720 = vst [vmem:[%s15077_s29 + $0x9b8] sm:$0xf] %v719_v55  ;;  %v723_v57 = vld [vmem:[%s15081_s30 + $0x9c4] sm:$0xf]  ;;  %v725_v58 = vld [vmem:[%s15081_s30 + $0x9d0] sm:$0xf] }
  0xdc   : > { %722 = vst [vmem:[%s15077_s29 + $0x9c0] sm:$0xf] %v721_v56  ;;  %724 = vst [vmem:[%s15077_s29 + $0x9c8] sm:$0xf] %v723_v57  ;;  %v727_v59 = vld [vmem:[%s15081_s30 + $0x9d4] sm:$0xf] }
  0xdd   : > { %726 = vst [vmem:[%s15077_s29 + $0x9d0] sm:$0xf] %v725_v58  ;;  %v729_v60 = vld [vmem:[%s15081_s30 + $0x9e0] sm:$0xf]  ;;  %v731_v61 = vld [vmem:[%s15081_s30 + $0x9e4] sm:$0xf] }
  0xde   : > { %728 = vst [vmem:[%s15077_s29 + $0x9d8] sm:$0xf] %v727_v59  ;;  %730 = vst [vmem:[%s15077_s29 + $0x9e0] sm:$0xf] %v729_v60  ;;  %v733_v62 = vld [vmem:[%s15081_s30 + $0x9f0] sm:$0xf] }
  0xdf   : > { %732 = vst [vmem:[%s15077_s29 + $0x9e8] sm:$0xf] %v731_v61  ;;  %v735_v63 = vld [vmem:[%s15081_s30 + $0x9f4] sm:$0xf]  ;;  %v737_v0 = vld [vmem:[%s15081_s30 + $0xa00] sm:$0xf] }
  0xe0   : > { %734 = vst [vmem:[%s15077_s29 + $0x9f0] sm:$0xf] %v733_v62  ;;  %736 = vst [vmem:[%s15077_s29 + $0x9f8] sm:$0xf] %v735_v63  ;;  %v739_v1 = vld [vmem:[%s15081_s30 + $0xa04] sm:$0xf] }
  0xe1   : > { %738 = vst [vmem:[%s15077_s29 + $0xa00] sm:$0xf] %v737_v0  ;;  %v741_v2 = vld [vmem:[%s15081_s30 + $0xa10] sm:$0xf]  ;;  %v743_v3 = vld [vmem:[%s15081_s30 + $0xa14] sm:$0xf] }
  0xe2   : > { %740 = vst [vmem:[%s15077_s29 + $0xa08] sm:$0xf] %v739_v1  ;;  %742 = vst [vmem:[%s15077_s29 + $0xa10] sm:$0xf] %v741_v2  ;;  %v745_v4 = vld [vmem:[%s15081_s30 + $0xa20] sm:$0xf] }
  0xe3   : > { %744 = vst [vmem:[%s15077_s29 + $0xa18] sm:$0xf] %v743_v3  ;;  %v747_v5 = vld [vmem:[%s15081_s30 + $0xa24] sm:$0xf]  ;;  %v749_v6 = vld [vmem:[%s15081_s30 + $0xa30] sm:$0xf] }
  0xe4   : > { %746 = vst [vmem:[%s15077_s29 + $0xa20] sm:$0xf] %v745_v4  ;;  %748 = vst [vmem:[%s15077_s29 + $0xa28] sm:$0xf] %v747_v5  ;;  %v751_v7 = vld [vmem:[%s15081_s30 + $0xa34] sm:$0xf] }
  0xe5   : > { %750 = vst [vmem:[%s15077_s29 + $0xa30] sm:$0xf] %v749_v6  ;;  %v753_v8 = vld [vmem:[%s15081_s30 + $0xa40] sm:$0xf]  ;;  %v755_v9 = vld [vmem:[%s15081_s30 + $0xa44] sm:$0xf] }
  0xe6   : > { %752 = vst [vmem:[%s15077_s29 + $0xa38] sm:$0xf] %v751_v7  ;;  %754 = vst [vmem:[%s15077_s29 + $0xa40] sm:$0xf] %v753_v8  ;;  %v757_v10 = vld [vmem:[%s15081_s30 + $0xa50] sm:$0xf] }
  0xe7   : > { %756 = vst [vmem:[%s15077_s29 + $0xa48] sm:$0xf] %v755_v9  ;;  %v759_v11 = vld [vmem:[%s15081_s30 + $0xa54] sm:$0xf]  ;;  %v761_v12 = vld [vmem:[%s15081_s30 + $0xa60] sm:$0xf] }
  0xe8   : > { %758 = vst [vmem:[%s15077_s29 + $0xa50] sm:$0xf] %v757_v10  ;;  %760 = vst [vmem:[%s15077_s29 + $0xa58] sm:$0xf] %v759_v11  ;;  %v763_v13 = vld [vmem:[%s15081_s30 + $0xa64] sm:$0xf] }
  0xe9   : > { %762 = vst [vmem:[%s15077_s29 + $0xa60] sm:$0xf] %v761_v12  ;;  %v765_v14 = vld [vmem:[%s15081_s30 + $0xa70] sm:$0xf]  ;;  %v767_v15 = vld [vmem:[%s15081_s30 + $0xa74] sm:$0xf] }
  0xea   : > { %764 = vst [vmem:[%s15077_s29 + $0xa68] sm:$0xf] %v763_v13  ;;  %766 = vst [vmem:[%s15077_s29 + $0xa70] sm:$0xf] %v765_v14  ;;  %v769_v16 = vld [vmem:[%s15081_s30 + $0xa80] sm:$0xf] }
  0xeb   : > { %768 = vst [vmem:[%s15077_s29 + $0xa78] sm:$0xf] %v767_v15  ;;  %v771_v17 = vld [vmem:[%s15081_s30 + $0xa84] sm:$0xf]  ;;  %v773_v18 = vld [vmem:[%s15081_s30 + $0xa90] sm:$0xf] }
  0xec   : > { %770 = vst [vmem:[%s15077_s29 + $0xa80] sm:$0xf] %v769_v16  ;;  %772 = vst [vmem:[%s15077_s29 + $0xa88] sm:$0xf] %v771_v17  ;;  %v775_v19 = vld [vmem:[%s15081_s30 + $0xa94] sm:$0xf] }
  0xed   : > { %774 = vst [vmem:[%s15077_s29 + $0xa90] sm:$0xf] %v773_v18  ;;  %v777_v20 = vld [vmem:[%s15081_s30 + $0xaa0] sm:$0xf]  ;;  %v779_v21 = vld [vmem:[%s15081_s30 + $0xaa4] sm:$0xf] }
  0xee   : > { %776 = vst [vmem:[%s15077_s29 + $0xa98] sm:$0xf] %v775_v19  ;;  %778 = vst [vmem:[%s15077_s29 + $0xaa0] sm:$0xf] %v777_v20  ;;  %v781_v22 = vld [vmem:[%s15081_s30 + $0xab0] sm:$0xf] }
  0xef   : > { %780 = vst [vmem:[%s15077_s29 + $0xaa8] sm:$0xf] %v779_v21  ;;  %v783_v23 = vld [vmem:[%s15081_s30 + $0xab4] sm:$0xf]  ;;  %v785_v24 = vld [vmem:[%s15081_s30 + $0xac0] sm:$0xf] }
  0xf0   : > { %782 = vst [vmem:[%s15077_s29 + $0xab0] sm:$0xf] %v781_v22  ;;  %784 = vst [vmem:[%s15077_s29 + $0xab8] sm:$0xf] %v783_v23  ;;  %v787_v25 = vld [vmem:[%s15081_s30 + $0xac4] sm:$0xf] }
  0xf1   : > { %786 = vst [vmem:[%s15077_s29 + $0xac0] sm:$0xf] %v785_v24  ;;  %v789_v26 = vld [vmem:[%s15081_s30 + $0xad0] sm:$0xf]  ;;  %v791_v27 = vld [vmem:[%s15081_s30 + $0xad4] sm:$0xf] }
  0xf2   : > { %788 = vst [vmem:[%s15077_s29 + $0xac8] sm:$0xf] %v787_v25  ;;  %790 = vst [vmem:[%s15077_s29 + $0xad0] sm:$0xf] %v789_v26  ;;  %v793_v28 = vld [vmem:[%s15081_s30 + $0xae0] sm:$0xf] }
  0xf3   : > { %792 = vst [vmem:[%s15077_s29 + $0xad8] sm:$0xf] %v791_v27  ;;  %v795_v29 = vld [vmem:[%s15081_s30 + $0xae4] sm:$0xf]  ;;  %v797_v30 = vld [vmem:[%s15081_s30 + $0xaf0] sm:$0xf] }
  0xf4   : > { %794 = vst [vmem:[%s15077_s29 + $0xae0] sm:$0xf] %v793_v28  ;;  %796 = vst [vmem:[%s15077_s29 + $0xae8] sm:$0xf] %v795_v29  ;;  %v799_v31 = vld [vmem:[%s15081_s30 + $0xaf4] sm:$0xf] }
  0xf5   : > { %798 = vst [vmem:[%s15077_s29 + $0xaf0] sm:$0xf] %v797_v30  ;;  %v801_v32 = vld [vmem:[%s15081_s30 + $0xb00] sm:$0xf]  ;;  %v803_v33 = vld [vmem:[%s15081_s30 + $0xb04] sm:$0xf] }
  0xf6   : > { %800 = vst [vmem:[%s15077_s29 + $0xaf8] sm:$0xf] %v799_v31  ;;  %802 = vst [vmem:[%s15077_s29 + $0xb00] sm:$0xf] %v801_v32  ;;  %v805_v34 = vld [vmem:[%s15081_s30 + $0xb10] sm:$0xf] }
  0xf7   : > { %804 = vst [vmem:[%s15077_s29 + $0xb08] sm:$0xf] %v803_v33  ;;  %v807_v35 = vld [vmem:[%s15081_s30 + $0xb14] sm:$0xf]  ;;  %v809_v36 = vld [vmem:[%s15081_s30 + $0xb20] sm:$0xf] }
  0xf8   : > { %806 = vst [vmem:[%s15077_s29 + $0xb10] sm:$0xf] %v805_v34  ;;  %808 = vst [vmem:[%s15077_s29 + $0xb18] sm:$0xf] %v807_v35  ;;  %v811_v37 = vld [vmem:[%s15081_s30 + $0xb24] sm:$0xf] }
  0xf9   : > { %810 = vst [vmem:[%s15077_s29 + $0xb20] sm:$0xf] %v809_v36  ;;  %v813_v38 = vld [vmem:[%s15081_s30 + $0xb30] sm:$0xf]  ;;  %v815_v39 = vld [vmem:[%s15081_s30 + $0xb34] sm:$0xf] }
  0xfa   : > { %812 = vst [vmem:[%s15077_s29 + $0xb28] sm:$0xf] %v811_v37  ;;  %814 = vst [vmem:[%s15077_s29 + $0xb30] sm:$0xf] %v813_v38  ;;  %v817_v40 = vld [vmem:[%s15081_s30 + $0xb40] sm:$0xf] }
  0xfb   : > { %816 = vst [vmem:[%s15077_s29 + $0xb38] sm:$0xf] %v815_v39  ;;  %v819_v41 = vld [vmem:[%s15081_s30 + $0xb44] sm:$0xf]  ;;  %v821_v42 = vld [vmem:[%s15081_s30 + $0xb50] sm:$0xf] }
  0xfc   : > { %818 = vst [vmem:[%s15077_s29 + $0xb40] sm:$0xf] %v817_v40  ;;  %820 = vst [vmem:[%s15077_s29 + $0xb48] sm:$0xf] %v819_v41  ;;  %v823_v43 = vld [vmem:[%s15081_s30 + $0xb54] sm:$0xf] }
  0xfd   : > { %822 = vst [vmem:[%s15077_s29 + $0xb50] sm:$0xf] %v821_v42  ;;  %v825_v44 = vld [vmem:[%s15081_s30 + $0xb60] sm:$0xf]  ;;  %v827_v45 = vld [vmem:[%s15081_s30 + $0xb64] sm:$0xf] }
  0xfe   : > { %824 = vst [vmem:[%s15077_s29 + $0xb58] sm:$0xf] %v823_v43  ;;  %826 = vst [vmem:[%s15077_s29 + $0xb60] sm:$0xf] %v825_v44  ;;  %v829_v46 = vld [vmem:[%s15081_s30 + $0xb70] sm:$0xf] }
  0xff   : > { %828 = vst [vmem:[%s15077_s29 + $0xb68] sm:$0xf] %v827_v45  ;;  %v831_v47 = vld [vmem:[%s15081_s30 + $0xb74] sm:$0xf]  ;;  %v833_v48 = vld [vmem:[%s15081_s30 + $0xb80] sm:$0xf] }
 0x100   : > { %830 = vst [vmem:[%s15077_s29 + $0xb70] sm:$0xf] %v829_v46  ;;  %832 = vst [vmem:[%s15077_s29 + $0xb78] sm:$0xf] %v831_v47  ;;  %v835_v49 = vld [vmem:[%s15081_s30 + $0xb84] sm:$0xf] }
 0x101   : > { %834 = vst [vmem:[%s15077_s29 + $0xb80] sm:$0xf] %v833_v48  ;;  %v837_v50 = vld [vmem:[%s15081_s30 + $0xb90] sm:$0xf]  ;;  %v839_v51 = vld [vmem:[%s15081_s30 + $0xb94] sm:$0xf] }
 0x102   : > { %836 = vst [vmem:[%s15077_s29 + $0xb88] sm:$0xf] %v835_v49  ;;  %838 = vst [vmem:[%s15077_s29 + $0xb90] sm:$0xf] %v837_v50  ;;  %v841_v52 = vld [vmem:[%s15081_s30 + $0xba0] sm:$0xf] }
 0x103   : > { %840 = vst [vmem:[%s15077_s29 + $0xb98] sm:$0xf] %v839_v51  ;;  %v843_v53 = vld [vmem:[%s15081_s30 + $0xba4] sm:$0xf]  ;;  %v845_v54 = vld [vmem:[%s15081_s30 + $0xbb0] sm:$0xf] }
 0x104   : > { %842 = vst [vmem:[%s15077_s29 + $0xba0] sm:$0xf] %v841_v52  ;;  %844 = vst [vmem:[%s15077_s29 + $0xba8] sm:$0xf] %v843_v53  ;;  %v847_v55 = vld [vmem:[%s15081_s30 + $0xbb4] sm:$0xf] }
 0x105   : > { %846 = vst [vmem:[%s15077_s29 + $0xbb0] sm:$0xf] %v845_v54  ;;  %v849_v56 = vld [vmem:[%s15081_s30 + $0xbc0] sm:$0xf]  ;;  %v851_v57 = vld [vmem:[%s15081_s30 + $0xbc4] sm:$0xf] }
 0x106   : > { %848 = vst [vmem:[%s15077_s29 + $0xbb8] sm:$0xf] %v847_v55  ;;  %850 = vst [vmem:[%s15077_s29 + $0xbc0] sm:$0xf] %v849_v56  ;;  %v853_v58 = vld [vmem:[%s15081_s30 + $0xbd0] sm:$0xf] }
 0x107   : > { %852 = vst [vmem:[%s15077_s29 + $0xbc8] sm:$0xf] %v851_v57  ;;  %v855_v59 = vld [vmem:[%s15081_s30 + $0xbd4] sm:$0xf]  ;;  %v857_v60 = vld [vmem:[%s15081_s30 + $0xbe0] sm:$0xf] }
 0x108   : > { %854 = vst [vmem:[%s15077_s29 + $0xbd0] sm:$0xf] %v853_v58  ;;  %856 = vst [vmem:[%s15077_s29 + $0xbd8] sm:$0xf] %v855_v59  ;;  %v859_v61 = vld [vmem:[%s15081_s30 + $0xbe4] sm:$0xf] }
 0x109   : > { %858 = vst [vmem:[%s15077_s29 + $0xbe0] sm:$0xf] %v857_v60  ;;  %v861_v62 = vld [vmem:[%s15081_s30 + $0xbf0] sm:$0xf]  ;;  %v863_v63 = vld [vmem:[%s15081_s30 + $0xbf4] sm:$0xf] }
 0x10a   : > { %860 = vst [vmem:[%s15077_s29 + $0xbe8] sm:$0xf] %v859_v61  ;;  %862 = vst [vmem:[%s15077_s29 + $0xbf0] sm:$0xf] %v861_v62  ;;  %v865_v0 = vld [vmem:[%s15081_s30 + $0xc00] sm:$0xf] }
 0x10b   : > { %864 = vst [vmem:[%s15077_s29 + $0xbf8] sm:$0xf] %v863_v63  ;;  %v867_v1 = vld [vmem:[%s15081_s30 + $0xc04] sm:$0xf]  ;;  %v869_v2 = vld [vmem:[%s15081_s30 + $0xc10] sm:$0xf] }
 0x10c   : > { %866 = vst [vmem:[%s15077_s29 + $0xc00] sm:$0xf] %v865_v0  ;;  %868 = vst [vmem:[%s15077_s29 + $0xc08] sm:$0xf] %v867_v1  ;;  %v871_v3 = vld [vmem:[%s15081_s30 + $0xc14] sm:$0xf] }
 0x10d   : > { %870 = vst [vmem:[%s15077_s29 + $0xc10] sm:$0xf] %v869_v2  ;;  %v873_v4 = vld [vmem:[%s15081_s30 + $0xc20] sm:$0xf]  ;;  %v875_v5 = vld [vmem:[%s15081_s30 + $0xc24] sm:$0xf] }
 0x10e   : > { %872 = vst [vmem:[%s15077_s29 + $0xc18] sm:$0xf] %v871_v3  ;;  %874 = vst [vmem:[%s15077_s29 + $0xc20] sm:$0xf] %v873_v4  ;;  %v877_v6 = vld [vmem:[%s15081_s30 + $0xc30] sm:$0xf] }
 0x10f   : > { %876 = vst [vmem:[%s15077_s29 + $0xc28] sm:$0xf] %v875_v5  ;;  %v879_v7 = vld [vmem:[%s15081_s30 + $0xc34] sm:$0xf]  ;;  %v881_v8 = vld [vmem:[%s15081_s30 + $0xc40] sm:$0xf] }
 0x110   : > { %878 = vst [vmem:[%s15077_s29 + $0xc30] sm:$0xf] %v877_v6  ;;  %880 = vst [vmem:[%s15077_s29 + $0xc38] sm:$0xf] %v879_v7  ;;  %v883_v9 = vld [vmem:[%s15081_s30 + $0xc44] sm:$0xf] }
 0x111   : > { %882 = vst [vmem:[%s15077_s29 + $0xc40] sm:$0xf] %v881_v8  ;;  %v885_v10 = vld [vmem:[%s15081_s30 + $0xc50] sm:$0xf]  ;;  %v887_v11 = vld [vmem:[%s15081_s30 + $0xc54] sm:$0xf] }
 0x112   : > { %884 = vst [vmem:[%s15077_s29 + $0xc48] sm:$0xf] %v883_v9  ;;  %886 = vst [vmem:[%s15077_s29 + $0xc50] sm:$0xf] %v885_v10  ;;  %v889_v12 = vld [vmem:[%s15081_s30 + $0xc60] sm:$0xf] }
 0x113   : > { %888 = vst [vmem:[%s15077_s29 + $0xc58] sm:$0xf] %v887_v11  ;;  %v891_v13 = vld [vmem:[%s15081_s30 + $0xc64] sm:$0xf]  ;;  %v893_v14 = vld [vmem:[%s15081_s30 + $0xc70] sm:$0xf] }
 0x114   : > { %890 = vst [vmem:[%s15077_s29 + $0xc60] sm:$0xf] %v889_v12  ;;  %892 = vst [vmem:[%s15077_s29 + $0xc68] sm:$0xf] %v891_v13  ;;  %v895_v15 = vld [vmem:[%s15081_s30 + $0xc74] sm:$0xf] }
 0x115   : > { %894 = vst [vmem:[%s15077_s29 + $0xc70] sm:$0xf] %v893_v14  ;;  %v897_v16 = vld [vmem:[%s15081_s30 + $0xc80] sm:$0xf]  ;;  %v899_v17 = vld [vmem:[%s15081_s30 + $0xc84] sm:$0xf] }
 0x116   : > { %896 = vst [vmem:[%s15077_s29 + $0xc78] sm:$0xf] %v895_v15  ;;  %898 = vst [vmem:[%s15077_s29 + $0xc80] sm:$0xf] %v897_v16  ;;  %v901_v18 = vld [vmem:[%s15081_s30 + $0xc90] sm:$0xf] }
 0x117   : > { %900 = vst [vmem:[%s15077_s29 + $0xc88] sm:$0xf] %v899_v17  ;;  %v903_v19 = vld [vmem:[%s15081_s30 + $0xc94] sm:$0xf]  ;;  %v905_v20 = vld [vmem:[%s15081_s30 + $0xca0] sm:$0xf] }
 0x118   : > { %902 = vst [vmem:[%s15077_s29 + $0xc90] sm:$0xf] %v901_v18  ;;  %904 = vst [vmem:[%s15077_s29 + $0xc98] sm:$0xf] %v903_v19  ;;  %v907_v21 = vld [vmem:[%s15081_s30 + $0xca4] sm:$0xf] }
 0x119   : > { %906 = vst [vmem:[%s15077_s29 + $0xca0] sm:$0xf] %v905_v20  ;;  %v909_v22 = vld [vmem:[%s15081_s30 + $0xcb0] sm:$0xf]  ;;  %v911_v23 = vld [vmem:[%s15081_s30 + $0xcb4] sm:$0xf] }
 0x11a   : > { %908 = vst [vmem:[%s15077_s29 + $0xca8] sm:$0xf] %v907_v21  ;;  %910 = vst [vmem:[%s15077_s29 + $0xcb0] sm:$0xf] %v909_v22  ;;  %v913_v24 = vld [vmem:[%s15081_s30 + $0xcc0] sm:$0xf] }
 0x11b   : > { %912 = vst [vmem:[%s15077_s29 + $0xcb8] sm:$0xf] %v911_v23  ;;  %v915_v25 = vld [vmem:[%s15081_s30 + $0xcc4] sm:$0xf]  ;;  %v917_v26 = vld [vmem:[%s15081_s30 + $0xcd0] sm:$0xf] }
 0x11c   : > { %914 = vst [vmem:[%s15077_s29 + $0xcc0] sm:$0xf] %v913_v24  ;;  %916 = vst [vmem:[%s15077_s29 + $0xcc8] sm:$0xf] %v915_v25  ;;  %v919_v27 = vld [vmem:[%s15081_s30 + $0xcd4] sm:$0xf] }
 0x11d   : > { %918 = vst [vmem:[%s15077_s29 + $0xcd0] sm:$0xf] %v917_v26  ;;  %v921_v28 = vld [vmem:[%s15081_s30 + $0xce0] sm:$0xf]  ;;  %v923_v29 = vld [vmem:[%s15081_s30 + $0xce4] sm:$0xf] }
 0x11e   : > { %920 = vst [vmem:[%s15077_s29 + $0xcd8] sm:$0xf] %v919_v27  ;;  %922 = vst [vmem:[%s15077_s29 + $0xce0] sm:$0xf] %v921_v28  ;;  %v925_v30 = vld [vmem:[%s15081_s30 + $0xcf0] sm:$0xf] }
 0x11f   : > { %924 = vst [vmem:[%s15077_s29 + $0xce8] sm:$0xf] %v923_v29  ;;  %v927_v31 = vld [vmem:[%s15081_s30 + $0xcf4] sm:$0xf]  ;;  %v929_v32 = vld [vmem:[%s15081_s30 + $0xd00] sm:$0xf] }
 0x120   : > { %926 = vst [vmem:[%s15077_s29 + $0xcf0] sm:$0xf] %v925_v30  ;;  %928 = vst [vmem:[%s15077_s29 + $0xcf8] sm:$0xf] %v927_v31  ;;  %v931_v33 = vld [vmem:[%s15081_s30 + $0xd04] sm:$0xf] }
 0x121   : > { %930 = vst [vmem:[%s15077_s29 + $0xd00] sm:$0xf] %v929_v32  ;;  %v933_v34 = vld [vmem:[%s15081_s30 + $0xd10] sm:$0xf]  ;;  %v935_v35 = vld [vmem:[%s15081_s30 + $0xd14] sm:$0xf] }
 0x122   : > { %932 = vst [vmem:[%s15077_s29 + $0xd08] sm:$0xf] %v931_v33  ;;  %934 = vst [vmem:[%s15077_s29 + $0xd10] sm:$0xf] %v933_v34  ;;  %v937_v36 = vld [vmem:[%s15081_s30 + $0xd20] sm:$0xf] }
 0x123   : > { %936 = vst [vmem:[%s15077_s29 + $0xd18] sm:$0xf] %v935_v35  ;;  %v939_v37 = vld [vmem:[%s15081_s30 + $0xd24] sm:$0xf]  ;;  %v941_v38 = vld [vmem:[%s15081_s30 + $0xd30] sm:$0xf] }
 0x124   : > { %938 = vst [vmem:[%s15077_s29 + $0xd20] sm:$0xf] %v937_v36  ;;  %940 = vst [vmem:[%s15077_s29 + $0xd28] sm:$0xf] %v939_v37  ;;  %v943_v39 = vld [vmem:[%s15081_s30 + $0xd34] sm:$0xf] }
 0x125   : > { %942 = vst [vmem:[%s15077_s29 + $0xd30] sm:$0xf] %v941_v38  ;;  %v945_v40 = vld [vmem:[%s15081_s30 + $0xd40] sm:$0xf]  ;;  %v947_v41 = vld [vmem:[%s15081_s30 + $0xd44] sm:$0xf] }
 0x126   : > { %944 = vst [vmem:[%s15077_s29 + $0xd38] sm:$0xf] %v943_v39  ;;  %946 = vst [vmem:[%s15077_s29 + $0xd40] sm:$0xf] %v945_v40  ;;  %v949_v42 = vld [vmem:[%s15081_s30 + $0xd50] sm:$0xf] }
 0x127   : > { %948 = vst [vmem:[%s15077_s29 + $0xd48] sm:$0xf] %v947_v41  ;;  %v951_v43 = vld [vmem:[%s15081_s30 + $0xd54] sm:$0xf]  ;;  %v953_v44 = vld [vmem:[%s15081_s30 + $0xd60] sm:$0xf] }
 0x128   : > { %950 = vst [vmem:[%s15077_s29 + $0xd50] sm:$0xf] %v949_v42  ;;  %952 = vst [vmem:[%s15077_s29 + $0xd58] sm:$0xf] %v951_v43  ;;  %v955_v45 = vld [vmem:[%s15081_s30 + $0xd64] sm:$0xf] }
 0x129   : > { %954 = vst [vmem:[%s15077_s29 + $0xd60] sm:$0xf] %v953_v44  ;;  %v957_v46 = vld [vmem:[%s15081_s30 + $0xd70] sm:$0xf]  ;;  %v959_v47 = vld [vmem:[%s15081_s30 + $0xd74] sm:$0xf] }
 0x12a   : > { %956 = vst [vmem:[%s15077_s29 + $0xd68] sm:$0xf] %v955_v45  ;;  %958 = vst [vmem:[%s15077_s29 + $0xd70] sm:$0xf] %v957_v46  ;;  %v961_v48 = vld [vmem:[%s15081_s30 + $0xd80] sm:$0xf] }
 0x12b   : > { %960 = vst [vmem:[%s15077_s29 + $0xd78] sm:$0xf] %v959_v47  ;;  %v963_v49 = vld [vmem:[%s15081_s30 + $0xd84] sm:$0xf]  ;;  %v965_v50 = vld [vmem:[%s15081_s30 + $0xd90] sm:$0xf] }
 0x12c   : > { %962 = vst [vmem:[%s15077_s29 + $0xd80] sm:$0xf] %v961_v48  ;;  %964 = vst [vmem:[%s15077_s29 + $0xd88] sm:$0xf] %v963_v49  ;;  %v967_v51 = vld [vmem:[%s15081_s30 + $0xd94] sm:$0xf] }
 0x12d   : > { %966 = vst [vmem:[%s15077_s29 + $0xd90] sm:$0xf] %v965_v50  ;;  %v969_v52 = vld [vmem:[%s15081_s30 + $0xda0] sm:$0xf]  ;;  %v971_v53 = vld [vmem:[%s15081_s30 + $0xda4] sm:$0xf] }
 0x12e   : > { %968 = vst [vmem:[%s15077_s29 + $0xd98] sm:$0xf] %v967_v51  ;;  %970 = vst [vmem:[%s15077_s29 + $0xda0] sm:$0xf] %v969_v52  ;;  %v973_v54 = vld [vmem:[%s15081_s30 + $0xdb0] sm:$0xf] }
 0x12f   : > { %972 = vst [vmem:[%s15077_s29 + $0xda8] sm:$0xf] %v971_v53  ;;  %v975_v55 = vld [vmem:[%s15081_s30 + $0xdb4] sm:$0xf]  ;;  %v977_v56 = vld [vmem:[%s15081_s30 + $0xdc0] sm:$0xf] }
 0x130   : > { %974 = vst [vmem:[%s15077_s29 + $0xdb0] sm:$0xf] %v973_v54  ;;  %976 = vst [vmem:[%s15077_s29 + $0xdb8] sm:$0xf] %v975_v55  ;;  %v979_v57 = vld [vmem:[%s15081_s30 + $0xdc4] sm:$0xf] }
 0x131   : > { %978 = vst [vmem:[%s15077_s29 + $0xdc0] sm:$0xf] %v977_v56  ;;  %v981_v58 = vld [vmem:[%s15081_s30 + $0xdd0] sm:$0xf]  ;;  %v983_v59 = vld [vmem:[%s15081_s30 + $0xdd4] sm:$0xf] }
 0x132   : > { %980 = vst [vmem:[%s15077_s29 + $0xdc8] sm:$0xf] %v979_v57  ;;  %982 = vst [vmem:[%s15077_s29 + $0xdd0] sm:$0xf] %v981_v58  ;;  %v985_v60 = vld [vmem:[%s15081_s30 + $0xde0] sm:$0xf] }
 0x133   : > { %984 = vst [vmem:[%s15077_s29 + $0xdd8] sm:$0xf] %v983_v59  ;;  %v987_v61 = vld [vmem:[%s15081_s30 + $0xde4] sm:$0xf]  ;;  %v989_v62 = vld [vmem:[%s15081_s30 + $0xdf0] sm:$0xf] }
 0x134   : > { %986 = vst [vmem:[%s15077_s29 + $0xde0] sm:$0xf] %v985_v60  ;;  %988 = vst [vmem:[%s15077_s29 + $0xde8] sm:$0xf] %v987_v61  ;;  %v991_v63 = vld [vmem:[%s15081_s30 + $0xdf4] sm:$0xf] }
 0x135   : > { %990 = vst [vmem:[%s15077_s29 + $0xdf0] sm:$0xf] %v989_v62  ;;  %v993_v0 = vld [vmem:[%s15081_s30 + $0xe00] sm:$0xf]  ;;  %v995_v1 = vld [vmem:[%s15081_s30 + $0xe04] sm:$0xf] }
 0x136   : > { %992 = vst [vmem:[%s15077_s29 + $0xdf8] sm:$0xf] %v991_v63  ;;  %994 = vst [vmem:[%s15077_s29 + $0xe00] sm:$0xf] %v993_v0  ;;  %v997_v2 = vld [vmem:[%s15081_s30 + $0xe10] sm:$0xf] }
 0x137   : > { %996 = vst [vmem:[%s15077_s29 + $0xe08] sm:$0xf] %v995_v1  ;;  %v999_v3 = vld [vmem:[%s15081_s30 + $0xe14] sm:$0xf]  ;;  %v1001_v4 = vld [vmem:[%s15081_s30 + $0xe20] sm:$0xf] }
 0x138   : > { %998 = vst [vmem:[%s15077_s29 + $0xe10] sm:$0xf] %v997_v2  ;;  %1000 = vst [vmem:[%s15077_s29 + $0xe18] sm:$0xf] %v999_v3  ;;  %v1003_v5 = vld [vmem:[%s15081_s30 + $0xe24] sm:$0xf] }
 0x139   : > { %1002 = vst [vmem:[%s15077_s29 + $0xe20] sm:$0xf] %v1001_v4  ;;  %v1005_v6 = vld [vmem:[%s15081_s30 + $0xe30] sm:$0xf]  ;;  %v1007_v7 = vld [vmem:[%s15081_s30 + $0xe34] sm:$0xf] }
 0x13a   : > { %1004 = vst [vmem:[%s15077_s29 + $0xe28] sm:$0xf] %v1003_v5  ;;  %1006 = vst [vmem:[%s15077_s29 + $0xe30] sm:$0xf] %v1005_v6  ;;  %v1009_v8 = vld [vmem:[%s15081_s30 + $0xe40] sm:$0xf] }
 0x13b   : > { %1008 = vst [vmem:[%s15077_s29 + $0xe38] sm:$0xf] %v1007_v7  ;;  %v1011_v9 = vld [vmem:[%s15081_s30 + $0xe44] sm:$0xf]  ;;  %v1013_v10 = vld [vmem:[%s15081_s30 + $0xe50] sm:$0xf] }
 0x13c   : > { %1010 = vst [vmem:[%s15077_s29 + $0xe40] sm:$0xf] %v1009_v8  ;;  %1012 = vst [vmem:[%s15077_s29 + $0xe48] sm:$0xf] %v1011_v9  ;;  %v1015_v11 = vld [vmem:[%s15081_s30 + $0xe54] sm:$0xf] }
 0x13d   : > { %1014 = vst [vmem:[%s15077_s29 + $0xe50] sm:$0xf] %v1013_v10  ;;  %v1017_v12 = vld [vmem:[%s15081_s30 + $0xe60] sm:$0xf]  ;;  %v1019_v13 = vld [vmem:[%s15081_s30 + $0xe64] sm:$0xf] }
 0x13e   : > { %1016 = vst [vmem:[%s15077_s29 + $0xe58] sm:$0xf] %v1015_v11  ;;  %1018 = vst [vmem:[%s15077_s29 + $0xe60] sm:$0xf] %v1017_v12  ;;  %v1021_v14 = vld [vmem:[%s15081_s30 + $0xe70] sm:$0xf] }
 0x13f   : > { %1020 = vst [vmem:[%s15077_s29 + $0xe68] sm:$0xf] %v1019_v13  ;;  %v1023_v15 = vld [vmem:[%s15081_s30 + $0xe74] sm:$0xf]  ;;  %v1025_v16 = vld [vmem:[%s15081_s30 + $0xe80] sm:$0xf] }
 0x140   : > { %1022 = vst [vmem:[%s15077_s29 + $0xe70] sm:$0xf] %v1021_v14  ;;  %1024 = vst [vmem:[%s15077_s29 + $0xe78] sm:$0xf] %v1023_v15  ;;  %v1027_v17 = vld [vmem:[%s15081_s30 + $0xe84] sm:$0xf] }
 0x141   : > { %1026 = vst [vmem:[%s15077_s29 + $0xe80] sm:$0xf] %v1025_v16  ;;  %v1029_v18 = vld [vmem:[%s15081_s30 + $0xe90] sm:$0xf]  ;;  %v1031_v19 = vld [vmem:[%s15081_s30 + $0xe94] sm:$0xf] }
 0x142   : > { %1028 = vst [vmem:[%s15077_s29 + $0xe88] sm:$0xf] %v1027_v17  ;;  %1030 = vst [vmem:[%s15077_s29 + $0xe90] sm:$0xf] %v1029_v18  ;;  %v1033_v20 = vld [vmem:[%s15081_s30 + $0xea0] sm:$0xf] }
 0x143   : > { %1032 = vst [vmem:[%s15077_s29 + $0xe98] sm:$0xf] %v1031_v19  ;;  %v1035_v21 = vld [vmem:[%s15081_s30 + $0xea4] sm:$0xf]  ;;  %v1037_v22 = vld [vmem:[%s15081_s30 + $0xeb0] sm:$0xf] }
 0x144   : > { %1034 = vst [vmem:[%s15077_s29 + $0xea0] sm:$0xf] %v1033_v20  ;;  %1036 = vst [vmem:[%s15077_s29 + $0xea8] sm:$0xf] %v1035_v21  ;;  %v1039_v23 = vld [vmem:[%s15081_s30 + $0xeb4] sm:$0xf] }
 0x145   : > { %1038 = vst [vmem:[%s15077_s29 + $0xeb0] sm:$0xf] %v1037_v22  ;;  %v1041_v24 = vld [vmem:[%s15081_s30 + $0xec0] sm:$0xf]  ;;  %v1043_v25 = vld [vmem:[%s15081_s30 + $0xec4] sm:$0xf] }
 0x146   : > { %1040 = vst [vmem:[%s15077_s29 + $0xeb8] sm:$0xf] %v1039_v23  ;;  %1042 = vst [vmem:[%s15077_s29 + $0xec0] sm:$0xf] %v1041_v24  ;;  %v1045_v26 = vld [vmem:[%s15081_s30 + $0xed0] sm:$0xf] }
 0x147   : > { %1044 = vst [vmem:[%s15077_s29 + $0xec8] sm:$0xf] %v1043_v25  ;;  %v1047_v27 = vld [vmem:[%s15081_s30 + $0xed4] sm:$0xf]  ;;  %v1049_v28 = vld [vmem:[%s15081_s30 + $0xee0] sm:$0xf] }
 0x148   : > { %1046 = vst [vmem:[%s15077_s29 + $0xed0] sm:$0xf] %v1045_v26  ;;  %1048 = vst [vmem:[%s15077_s29 + $0xed8] sm:$0xf] %v1047_v27  ;;  %v1051_v29 = vld [vmem:[%s15081_s30 + $0xee4] sm:$0xf] }
 0x149   : > { %1050 = vst [vmem:[%s15077_s29 + $0xee0] sm:$0xf] %v1049_v28  ;;  %v1053_v30 = vld [vmem:[%s15081_s30 + $0xef0] sm:$0xf]  ;;  %v1055_v31 = vld [vmem:[%s15081_s30 + $0xef4] sm:$0xf] }
 0x14a   : > { %1052 = vst [vmem:[%s15077_s29 + $0xee8] sm:$0xf] %v1051_v29  ;;  %1054 = vst [vmem:[%s15077_s29 + $0xef0] sm:$0xf] %v1053_v30  ;;  %v1057_v32 = vld [vmem:[%s15081_s30 + $0xf00] sm:$0xf] }
 0x14b   : > { %1056 = vst [vmem:[%s15077_s29 + $0xef8] sm:$0xf] %v1055_v31  ;;  %v1059_v33 = vld [vmem:[%s15081_s30 + $0xf04] sm:$0xf]  ;;  %v1061_v34 = vld [vmem:[%s15081_s30 + $0xf10] sm:$0xf] }
 0x14c   : > { %1058 = vst [vmem:[%s15077_s29 + $0xf00] sm:$0xf] %v1057_v32  ;;  %1060 = vst [vmem:[%s15077_s29 + $0xf08] sm:$0xf] %v1059_v33  ;;  %v1063_v35 = vld [vmem:[%s15081_s30 + $0xf14] sm:$0xf] }
 0x14d   : > { %1062 = vst [vmem:[%s15077_s29 + $0xf10] sm:$0xf] %v1061_v34  ;;  %v1065_v36 = vld [vmem:[%s15081_s30 + $0xf20] sm:$0xf]  ;;  %v1067_v37 = vld [vmem:[%s15081_s30 + $0xf24] sm:$0xf] }
 0x14e   : > { %1064 = vst [vmem:[%s15077_s29 + $0xf18] sm:$0xf] %v1063_v35  ;;  %1066 = vst [vmem:[%s15077_s29 + $0xf20] sm:$0xf] %v1065_v36  ;;  %v1069_v38 = vld [vmem:[%s15081_s30 + $0xf30] sm:$0xf] }
 0x14f   : > { %1068 = vst [vmem:[%s15077_s29 + $0xf28] sm:$0xf] %v1067_v37  ;;  %v1071_v39 = vld [vmem:[%s15081_s30 + $0xf34] sm:$0xf]  ;;  %v1073_v40 = vld [vmem:[%s15081_s30 + $0xf40] sm:$0xf] }
 0x150   : > { %1070 = vst [vmem:[%s15077_s29 + $0xf30] sm:$0xf] %v1069_v38  ;;  %1072 = vst [vmem:[%s15077_s29 + $0xf38] sm:$0xf] %v1071_v39  ;;  %v1075_v41 = vld [vmem:[%s15081_s30 + $0xf44] sm:$0xf] }
 0x151   : > { %1074 = vst [vmem:[%s15077_s29 + $0xf40] sm:$0xf] %v1073_v40  ;;  %v1077_v42 = vld [vmem:[%s15081_s30 + $0xf50] sm:$0xf]  ;;  %v1079_v43 = vld [vmem:[%s15081_s30 + $0xf54] sm:$0xf] }
 0x152   : > { %1076 = vst [vmem:[%s15077_s29 + $0xf48] sm:$0xf] %v1075_v41  ;;  %1078 = vst [vmem:[%s15077_s29 + $0xf50] sm:$0xf] %v1077_v42  ;;  %v1081_v44 = vld [vmem:[%s15081_s30 + $0xf60] sm:$0xf] }
 0x153   : > { %1080 = vst [vmem:[%s15077_s29 + $0xf58] sm:$0xf] %v1079_v43  ;;  %v1083_v45 = vld [vmem:[%s15081_s30 + $0xf64] sm:$0xf]  ;;  %v1085_v46 = vld [vmem:[%s15081_s30 + $0xf70] sm:$0xf] }
 0x154   : > { %1082 = vst [vmem:[%s15077_s29 + $0xf60] sm:$0xf] %v1081_v44  ;;  %1084 = vst [vmem:[%s15077_s29 + $0xf68] sm:$0xf] %v1083_v45  ;;  %v1087_v47 = vld [vmem:[%s15081_s30 + $0xf74] sm:$0xf] }
 0x155   : > { %1086 = vst [vmem:[%s15077_s29 + $0xf70] sm:$0xf] %v1085_v46  ;;  %v1089_v48 = vld [vmem:[%s15081_s30 + $0xf80] sm:$0xf]  ;;  %v1091_v49 = vld [vmem:[%s15081_s30 + $0xf84] sm:$0xf] }
 0x156   : > { %1088 = vst [vmem:[%s15077_s29 + $0xf78] sm:$0xf] %v1087_v47  ;;  %1090 = vst [vmem:[%s15077_s29 + $0xf80] sm:$0xf] %v1089_v48  ;;  %v1093_v50 = vld [vmem:[%s15081_s30 + $0xf90] sm:$0xf] }
 0x157   : > { %1092 = vst [vmem:[%s15077_s29 + $0xf88] sm:$0xf] %v1091_v49  ;;  %v1095_v51 = vld [vmem:[%s15081_s30 + $0xf94] sm:$0xf]  ;;  %v1097_v52 = vld [vmem:[%s15081_s30 + $0xfa0] sm:$0xf] }
 0x158   : > { %1094 = vst [vmem:[%s15077_s29 + $0xf90] sm:$0xf] %v1093_v50  ;;  %1096 = vst [vmem:[%s15077_s29 + $0xf98] sm:$0xf] %v1095_v51  ;;  %v1099_v53 = vld [vmem:[%s15081_s30 + $0xfa4] sm:$0xf] }
 0x159   : > { %1098 = vst [vmem:[%s15077_s29 + $0xfa0] sm:$0xf] %v1097_v52  ;;  %v1101_v54 = vld [vmem:[%s15081_s30 + $0xfb0] sm:$0xf]  ;;  %v1103_v55 = vld [vmem:[%s15081_s30 + $0xfb4] sm:$0xf] }
 0x15a   : > { %1100 = vst [vmem:[%s15077_s29 + $0xfa8] sm:$0xf] %v1099_v53  ;;  %1102 = vst [vmem:[%s15077_s29 + $0xfb0] sm:$0xf] %v1101_v54  ;;  %v1105_v56 = vld [vmem:[%s15081_s30 + $0xfc0] sm:$0xf] }
 0x15b   : > { %1104 = vst [vmem:[%s15077_s29 + $0xfb8] sm:$0xf] %v1103_v55  ;;  %v1107_v57 = vld [vmem:[%s15081_s30 + $0xfc4] sm:$0xf]  ;;  %v1109_v58 = vld [vmem:[%s15081_s30 + $0xfd0] sm:$0xf] }
 0x15c   : > { %1106 = vst [vmem:[%s15077_s29 + $0xfc0] sm:$0xf] %v1105_v56  ;;  %1108 = vst [vmem:[%s15077_s29 + $0xfc8] sm:$0xf] %v1107_v57  ;;  %v1111_v59 = vld [vmem:[%s15081_s30 + $0xfd4] sm:$0xf] }
 0x15d   : > { %1110 = vst [vmem:[%s15077_s29 + $0xfd0] sm:$0xf] %v1109_v58  ;;  %v1113_v60 = vld [vmem:[%s15081_s30 + $0xfe0] sm:$0xf]  ;;  %v1115_v61 = vld [vmem:[%s15081_s30 + $0xfe4] sm:$0xf] }
 0x15e   : > { %1112 = vst [vmem:[%s15077_s29 + $0xfd8] sm:$0xf] %v1111_v59  ;;  %1114 = vst [vmem:[%s15077_s29 + $0xfe0] sm:$0xf] %v1113_v60  ;;  %v1117_v62 = vld [vmem:[%s15081_s30 + $0xff0] sm:$0xf] }
 0x15f   : > { %1116 = vst [vmem:[%s15077_s29 + $0xfe8] sm:$0xf] %v1115_v61  ;;  %v1119_v63 = vld [vmem:[%s15081_s30 + $0xff4] sm:$0xf]  ;;  %1118 = vst [vmem:[%s15077_s29 + $0xff0] sm:$0xf] %v1117_v62 }
 0x160   : > { %1120 = vst [vmem:[%s15077_s29 + $0xff8] sm:$0xf] %v1119_v63  ;;  %p1122_p0 = scmp.ge.s32.totalorder %s1121_s26, 2  ;;  %s93_s3 = sadd.s32 1, %s15089_s3  }
 0x161   : > { %p90_p1 = scmp.ge.s32.totalorder %s93_s3, 2  }
 0x162   : > { %s19005_s26 = smov (%p1122_p0, %s1121_s26), 0 }
 0x163   : > { %s13893_s1 = sshll.u32 %s19005_s26, 3  ;;  %s13894_s8 = sshll.u32 %s19005_s26, 2 }
 0x164   : > { %s1126_s30 = scalar_lea.vmem %s18954_s11, %s13893_s1   ;;  %s1127_s29 = scalar_lea.vmem [#allocation2], %s13894_s8  }
 0x165   : > { %s18983_s7 = smov %s19005_s26  ;;  %92 = sbr.rel (!%p90_p1) target bundleno = 11 (0xb), region = 274 }
 0x16c   :  { %4297 = vsyncadd [#allocation4], 65536  ;;  %v4316_v0 = vld [vmem:[%s18959_s16] sm:$0xf]  ;;  %v4320_v2 = vld [vmem:[%s18959_s16 + $0x4] sm:$0xf] }
 0x16d   :  { %v4318_v1 = vld [vmem:[%s18959_s16 + $0x20] sm:$0xf]  ;;  %4317 = vst [vmem:[#allocation3] sm:$0xf] %v4316_v0  ;;  %v4322_v3 = vld [vmem:[%s18959_s16 + $0x24] sm:$0xf] }
 0x16e   :  { %4319 = vst [vmem:[#allocation3 + $0x4] sm:$0xf] %v4318_v1  ;;  %v4324_v4 = vld [vmem:[%s18959_s16 + $0x8] sm:$0xf]  ;;  %4321 = vst [vmem:[#allocation3 + $0x8] sm:$0xf] %v4320_v2 }
 0x16f   :  { %4323 = vst [vmem:[#allocation3 + $0xc] sm:$0xf] %v4322_v3  ;;  %4325 = vst [vmem:[#allocation3 + $0x10] sm:$0xf] %v4324_v4  ;;  %v4326_v5 = vld [vmem:[%s18959_s16 + $0x28] sm:$0xf] }
 0x170   :  { %v4328_v6 = vld [vmem:[%s18959_s16 + $0xc] sm:$0xf]  ;;  %4327 = vst [vmem:[#allocation3 + $0x14] sm:$0xf] %v4326_v5  ;;  %v4332_v8 = vld [vmem:[%s18959_s16 + $0x10] sm:$0xf] }
 0x171   :  { %v4330_v7 = vld [vmem:[%s18959_s16 + $0x2c] sm:$0xf]  ;;  %4329 = vst [vmem:[#allocation3 + $0x18] sm:$0xf] %v4328_v6  ;;  %v4334_v9 = vld [vmem:[%s18959_s16 + $0x30] sm:$0xf] }
 0x172   :  { %4331 = vst [vmem:[#allocation3 + $0x1c] sm:$0xf] %v4330_v7  ;;  %v4336_v10 = vld [vmem:[%s18959_s16 + $0x14] sm:$0xf]  ;;  %4333 = vst [vmem:[#allocation3 + $0x20] sm:$0xf] %v4332_v8 }
 0x173   :  { %4335 = vst [vmem:[#allocation3 + $0x24] sm:$0xf] %v4334_v9  ;;  %4337 = vst [vmem:[#allocation3 + $0x28] sm:$0xf] %v4336_v10  ;;  %v4338_v11 = vld [vmem:[%s18959_s16 + $0x34] sm:$0xf] }
 0x174   :  { %v4340_v12 = vld [vmem:[%s18959_s16 + $0x18] sm:$0xf]  ;;  %4339 = vst [vmem:[#allocation3 + $0x2c] sm:$0xf] %v4338_v11  ;;  %v4344_v14 = vld [vmem:[%s18959_s16 + $0x1c] sm:$0xf] }
 0x175   :  { %v4342_v13 = vld [vmem:[%s18959_s16 + $0x38] sm:$0xf]  ;;  %4341 = vst [vmem:[#allocation3 + $0x30] sm:$0xf] %v4340_v12  ;;  %v4346_v15 = vld [vmem:[%s18959_s16 + $0x3c] sm:$0xff]  }
 0x176   :  { %4343 = vst [vmem:[#allocation3 + $0x34] sm:$0xf] %v4342_v13  ;;  %v4350_v16 = vld [vmem:[%s18959_s16 + $0x60] sm:$0xf]  ;;  %4345 = vst [vmem:[#allocation3 + $0x38] sm:$0xf] %v4344_v14 }
 0x177   :  { %4347 = vst [vmem:[#allocation3 + $0x3c] sm:$0xff] %v4346_v15   ;;  %4351 = vst [vmem:[#allocation3 + $0x44] sm:$0xf] %v4350_v16  ;;  %v4352_v17 = vld [vmem:[%s18959_s16 + $0x44] sm:$0xf]  ;;  %v4378_v30 = vld [vmem:[%s18959_s16 + $0x7c] sm:$0xff]  }
 0x178   :  { %v4354_v18 = vld [vmem:[%s18959_s16 + $0x64] sm:$0xf]  ;;  %v4356_v19 = vld [vmem:[%s18959_s16 + $0x48] sm:$0xf]  ;;  %4353 = vst [vmem:[#allocation3 + $0x48] sm:$0xf] %v4352_v17 }
 0x179   :  { %4355 = vst [vmem:[#allocation3 + $0x4c] sm:$0xf] %v4354_v18  ;;  %4357 = vst [vmem:[#allocation3 + $0x50] sm:$0xf] %v4356_v19  ;;  %v4358_v20 = vld [vmem:[%s18959_s16 + $0x68] sm:$0xf] }
 0x17a   :  { %v4360_v21 = vld [vmem:[%s18959_s16 + $0x4c] sm:$0xf]  ;;  %4359 = vst [vmem:[#allocation3 + $0x54] sm:$0xf] %v4358_v20  ;;  %v4364_v23 = vld [vmem:[%s18959_s16 + $0x50] sm:$0xf] }
 0x17b   :  { %v4362_v22 = vld [vmem:[%s18959_s16 + $0x6c] sm:$0xf]  ;;  %4361 = vst [vmem:[#allocation3 + $0x58] sm:$0xf] %v4360_v21  ;;  %v4366_v24 = vld [vmem:[%s18959_s16 + $0x70] sm:$0xf] }
 0x17c   :  { %4363 = vst [vmem:[#allocation3 + $0x5c] sm:$0xf] %v4362_v22  ;;  %v4368_v25 = vld [vmem:[%s18959_s16 + $0x54] sm:$0xf]  ;;  %4365 = vst [vmem:[#allocation3 + $0x60] sm:$0xf] %v4364_v23 }
 0x17d   :  { %4367 = vst [vmem:[#allocation3 + $0x64] sm:$0xf] %v4366_v24  ;;  %4369 = vst [vmem:[#allocation3 + $0x68] sm:$0xf] %v4368_v25  ;;  %v4370_v26 = vld [vmem:[%s18959_s16 + $0x74] sm:$0xf] }
 0x17e   :  { %v4372_v27 = vld [vmem:[%s18959_s16 + $0x58] sm:$0xf]  ;;  %4371 = vst [vmem:[#allocation3 + $0x6c] sm:$0xf] %v4370_v26  ;;  %v4376_v29 = vld [vmem:[%s18959_s16 + $0x5c] sm:$0xf] }
 0x17f   :  { %v4374_v28 = vld [vmem:[%s18959_s16 + $0x78] sm:$0xf]  ;;  %4373 = vst [vmem:[#allocation3 + $0x70] sm:$0xf] %v4372_v27  ;;  %v4382_v31 = vld [vmem:[%s18959_s16 + $0xa0] sm:$0xf] }
 0x180   :  { %4375 = vst [vmem:[#allocation3 + $0x74] sm:$0xf] %v4374_v28  ;;  %4377 = vst [vmem:[#allocation3 + $0x78] sm:$0xf] %v4376_v29  ;;  %v4384_v32 = vld [vmem:[%s18959_s16 + $0x84] sm:$0xf] }
 0x181   :  { %4379 = vst [vmem:[#allocation3 + $0x7c] sm:$0xff] %v4378_v30   ;;  %4383 = vst [vmem:[#allocation3 + $0x84] sm:$0xf] %v4382_v31  ;;  %v4386_v33 = vld [vmem:[%s18959_s16 + $0xa4] sm:$0xf]  ;;  %v4410_v45 = vld [vmem:[%s18959_s16 + $0xbc] sm:$0xff]  }
 0x182   :  { %v4388_v34 = vld [vmem:[%s18959_s16 + $0x88] sm:$0xf]  ;;  %4385 = vst [vmem:[#allocation3 + $0x88] sm:$0xf] %v4384_v32  ;;  %4387 = vst [vmem:[#allocation3 + $0x8c] sm:$0xf] %v4386_v33 }
 0x183   :  { %4389 = vst [vmem:[#allocation3 + $0x90] sm:$0xf] %v4388_v34  ;;  %v4390_v35 = vld [vmem:[%s18959_s16 + $0xa8] sm:$0xf]  ;;  %v4392_v36 = vld [vmem:[%s18959_s16 + $0x8c] sm:$0xf] }
 0x184   :  { %v4394_v37 = vld [vmem:[%s18959_s16 + $0xac] sm:$0xf]  ;;  %4391 = vst [vmem:[#allocation3 + $0x94] sm:$0xf] %v4390_v35  ;;  %4393 = vst [vmem:[#allocation3 + $0x98] sm:$0xf] %v4392_v36 }
 0x185   :  { %4395 = vst [vmem:[#allocation3 + $0x9c] sm:$0xf] %v4394_v37  ;;  %v4396_v38 = vld [vmem:[%s18959_s16 + $0x90] sm:$0xf]  ;;  %v4400_v40 = vld [vmem:[%s18959_s16 + $0x94] sm:$0xf] }
 0x186   :  { %v4398_v39 = vld [vmem:[%s18959_s16 + $0xb0] sm:$0xf]  ;;  %4397 = vst [vmem:[#allocation3 + $0xa0] sm:$0xf] %v4396_v38  ;;  %4401 = vst [vmem:[#allocation3 + $0xa8] sm:$0xf] %v4400_v40 }
 0x187   :  { %4399 = vst [vmem:[#allocation3 + $0xa4] sm:$0xf] %v4398_v39  ;;  %v4402_v41 = vld [vmem:[%s18959_s16 + $0xb4] sm:$0xf]  ;;  %v4404_v42 = vld [vmem:[%s18959_s16 + $0x98] sm:$0xf] }
 0x188   :  { %v4406_v43 = vld [vmem:[%s18959_s16 + $0xb8] sm:$0xf]  ;;  %4403 = vst [vmem:[#allocation3 + $0xac] sm:$0xf] %v4402_v41  ;;  %4405 = vst [vmem:[#allocation3 + $0xb0] sm:$0xf] %v4404_v42 }
 0x189   :  { %4407 = vst [vmem:[#allocation3 + $0xb4] sm:$0xf] %v4406_v43  ;;  %v4408_v44 = vld [vmem:[%s18959_s16 + $0x9c] sm:$0xf]  ;;  %v4414_v46 = vld [vmem:[%s18959_s16 + $0xe0] sm:$0xf] }
 0x18a   :  { %4409 = vst [vmem:[#allocation3 + $0xb8] sm:$0xf] %v4408_v44  ;;  %4411 = vst [vmem:[#allocation3 + $0xbc] sm:$0xff] %v4410_v45   ;;  %v4416_v47 = vld [vmem:[%s18959_s16 + $0xc4] sm:$0xf]  ;;  %v4442_v60 = vld [vmem:[%s18959_s16 + $0xfc] sm:$0xff]  }
 0x18b   :  { %4415 = vst [vmem:[#allocation3 + $0xc4] sm:$0xf] %v4414_v46  ;;  %v4418_v48 = vld [vmem:[%s18959_s16 + $0xe4] sm:$0xf]  ;;  %v4420_v49 = vld [vmem:[%s18959_s16 + $0xc8] sm:$0xf] }
 0x18c   :  { %4417 = vst [vmem:[#allocation3 + $0xc8] sm:$0xf] %v4416_v47  ;;  %4419 = vst [vmem:[#allocation3 + $0xcc] sm:$0xf] %v4418_v48  ;;  %v4422_v50 = vld [vmem:[%s18959_s16 + $0xe8] sm:$0xf] }
 0x18d   :  { %4421 = vst [vmem:[#allocation3 + $0xd0] sm:$0xf] %v4420_v49  ;;  %v4424_v51 = vld [vmem:[%s18959_s16 + $0xcc] sm:$0xf]  ;;  %4423 = vst [vmem:[#allocation3 + $0xd4] sm:$0xf] %v4422_v50 }
 0x18e   :  { %v4426_v52 = vld [vmem:[%s18959_s16 + $0xec] sm:$0xf]  ;;  %4425 = vst [vmem:[#allocation3 + $0xd8] sm:$0xf] %v4424_v51  ;;  %v4428_v53 = vld [vmem:[%s18959_s16 + $0xd0] sm:$0xf] }
 0x18f   :  { %4427 = vst [vmem:[#allocation3 + $0xdc] sm:$0xf] %v4426_v52  ;;  %v4430_v54 = vld [vmem:[%s18959_s16 + $0xf0] sm:$0xf]  ;;  %v4432_v55 = vld [vmem:[%s18959_s16 + $0xd4] sm:$0xf] }
 0x190   :  { %4429 = vst [vmem:[#allocation3 + $0xe0] sm:$0xf] %v4428_v53  ;;  %4431 = vst [vmem:[#allocation3 + $0xe4] sm:$0xf] %v4430_v54  ;;  %v4434_v56 = vld [vmem:[%s18959_s16 + $0xf4] sm:$0xf] }
 0x191   :  { %4433 = vst [vmem:[#allocation3 + $0xe8] sm:$0xf] %v4432_v55  ;;  %v4436_v57 = vld [vmem:[%s18959_s16 + $0xd8] sm:$0xf]  ;;  %4435 = vst [vmem:[#allocation3 + $0xec] sm:$0xf] %v4434_v56 }
 0x192   :  { %v4438_v58 = vld [vmem:[%s18959_s16 + $0xf8] sm:$0xf]  ;;  %4437 = vst [vmem:[#allocation3 + $0xf0] sm:$0xf] %v4436_v57  ;;  %v4440_v59 = vld [vmem:[%s18959_s16 + $0xdc] sm:$0xf] }
 0x193   :  { %4439 = vst [vmem:[#allocation3 + $0xf4] sm:$0xf] %v4438_v58  ;;  %v4446_v61 = vld [vmem:[%s18959_s16 + $0x120] sm:$0xf]  ;;  %4441 = vst [vmem:[#allocation3 + $0xf8] sm:$0xf] %v4440_v59 }
 0x194   :  { %4443 = vst [vmem:[#allocation3 + $0xfc] sm:$0xff] %v4442_v60   ;;  %4447 = vst [vmem:[#allocation3 + $0x104] sm:$0xf] %v4446_v61  ;;  %v4448_v62 = vld [vmem:[%s18959_s16 + $0x104] sm:$0xf]  ;;  %v4474_v11 = vld [vmem:[%s18959_s16 + $0x13c] sm:$0xff]  }
 0x195   :  { %v4450_v63 = vld [vmem:[%s18959_s16 + $0x124] sm:$0xf]  ;;  %v4452_v0 = vld [vmem:[%s18959_s16 + $0x108] sm:$0xf]  ;;  %4449 = vst [vmem:[#allocation3 + $0x108] sm:$0xf] %v4448_v62 }
 0x196   :  { %4451 = vst [vmem:[#allocation3 + $0x10c] sm:$0xf] %v4450_v63  ;;  %4453 = vst [vmem:[#allocation3 + $0x110] sm:$0xf] %v4452_v0  ;;  %v4454_v1 = vld [vmem:[%s18959_s16 + $0x128] sm:$0xf] }
 0x197   :  { %v4456_v2 = vld [vmem:[%s18959_s16 + $0x10c] sm:$0xf]  ;;  %4455 = vst [vmem:[#allocation3 + $0x114] sm:$0xf] %v4454_v1  ;;  %v4460_v4 = vld [vmem:[%s18959_s16 + $0x110] sm:$0xf] }
 0x198   :  { %v4458_v3 = vld [vmem:[%s18959_s16 + $0x12c] sm:$0xf]  ;;  %4457 = vst [vmem:[#allocation3 + $0x118] sm:$0xf] %v4456_v2  ;;  %v4462_v5 = vld [vmem:[%s18959_s16 + $0x130] sm:$0xf] }
 0x199   :  { %4459 = vst [vmem:[#allocation3 + $0x11c] sm:$0xf] %v4458_v3  ;;  %v4464_v6 = vld [vmem:[%s18959_s16 + $0x114] sm:$0xf]  ;;  %4461 = vst [vmem:[#allocation3 + $0x120] sm:$0xf] %v4460_v4 }
 0x19a   :  { %4463 = vst [vmem:[#allocation3 + $0x124] sm:$0xf] %v4462_v5  ;;  %4465 = vst [vmem:[#allocation3 + $0x128] sm:$0xf] %v4464_v6  ;;  %v4466_v7 = vld [vmem:[%s18959_s16 + $0x134] sm:$0xf] }
 0x19b   :  { %v4468_v8 = vld [vmem:[%s18959_s16 + $0x118] sm:$0xf]  ;;  %4467 = vst [vmem:[#allocation3 + $0x12c] sm:$0xf] %v4466_v7  ;;  %v4472_v10 = vld [vmem:[%s18959_s16 + $0x11c] sm:$0xf] }
 0x19c   :  { %v4470_v9 = vld [vmem:[%s18959_s16 + $0x138] sm:$0xf]  ;;  %4469 = vst [vmem:[#allocation3 + $0x130] sm:$0xf] %v4468_v8  ;;  %v4478_v12 = vld [vmem:[%s18959_s16 + $0x160] sm:$0xf] }
 0x19d   :  { %4471 = vst [vmem:[#allocation3 + $0x134] sm:$0xf] %v4470_v9  ;;  %4473 = vst [vmem:[#allocation3 + $0x138] sm:$0xf] %v4472_v10  ;;  %v4480_v13 = vld [vmem:[%s18959_s16 + $0x144] sm:$0xf] }
 0x19e   :  { %4475 = vst [vmem:[#allocation3 + $0x13c] sm:$0xff] %v4474_v11   ;;  %4479 = vst [vmem:[#allocation3 + $0x144] sm:$0xf] %v4478_v12  ;;  %v4482_v14 = vld [vmem:[%s18959_s16 + $0x164] sm:$0xf]  ;;  %v4506_v26 = vld [vmem:[%s18959_s16 + $0x17c] sm:$0xff]  }
 0x19f   :  { %v4484_v15 = vld [vmem:[%s18959_s16 + $0x148] sm:$0xf]  ;;  %4481 = vst [vmem:[#allocation3 + $0x148] sm:$0xf] %v4480_v13  ;;  %4483 = vst [vmem:[#allocation3 + $0x14c] sm:$0xf] %v4482_v14 }
 0x1a0   :  { %4485 = vst [vmem:[#allocation3 + $0x150] sm:$0xf] %v4484_v15  ;;  %v4486_v16 = vld [vmem:[%s18959_s16 + $0x168] sm:$0xf]  ;;  %v4488_v17 = vld [vmem:[%s18959_s16 + $0x14c] sm:$0xf] }
 0x1a1   :  { %v4490_v18 = vld [vmem:[%s18959_s16 + $0x16c] sm:$0xf]  ;;  %4487 = vst [vmem:[#allocation3 + $0x154] sm:$0xf] %v4486_v16  ;;  %4489 = vst [vmem:[#allocation3 + $0x158] sm:$0xf] %v4488_v17 }
 0x1a2   :  { %4491 = vst [vmem:[#allocation3 + $0x15c] sm:$0xf] %v4490_v18  ;;  %v4492_v19 = vld [vmem:[%s18959_s16 + $0x150] sm:$0xf]  ;;  %v4496_v21 = vld [vmem:[%s18959_s16 + $0x154] sm:$0xf] }
 0x1a3   :  { %v4494_v20 = vld [vmem:[%s18959_s16 + $0x170] sm:$0xf]  ;;  %4493 = vst [vmem:[#allocation3 + $0x160] sm:$0xf] %v4492_v19  ;;  %4497 = vst [vmem:[#allocation3 + $0x168] sm:$0xf] %v4496_v21 }
 0x1a4   :  { %4495 = vst [vmem:[#allocation3 + $0x164] sm:$0xf] %v4494_v20  ;;  %v4498_v22 = vld [vmem:[%s18959_s16 + $0x174] sm:$0xf]  ;;  %v4500_v23 = vld [vmem:[%s18959_s16 + $0x158] sm:$0xf] }
 0x1a5   :  { %v4502_v24 = vld [vmem:[%s18959_s16 + $0x178] sm:$0xf]  ;;  %4499 = vst [vmem:[#allocation3 + $0x16c] sm:$0xf] %v4498_v22  ;;  %4501 = vst [vmem:[#allocation3 + $0x170] sm:$0xf] %v4500_v23 }
 0x1a6   :  { %4503 = vst [vmem:[#allocation3 + $0x174] sm:$0xf] %v4502_v24  ;;  %v4504_v25 = vld [vmem:[%s18959_s16 + $0x15c] sm:$0xf]  ;;  %v4510_v27 = vld [vmem:[%s18959_s16 + $0x1a0] sm:$0xf] }
 0x1a7   :  { %4505 = vst [vmem:[#allocation3 + $0x178] sm:$0xf] %v4504_v25  ;;  %4507 = vst [vmem:[#allocation3 + $0x17c] sm:$0xff] %v4506_v26   ;;  %v4512_v28 = vld [vmem:[%s18959_s16 + $0x184] sm:$0xf]  ;;  %v4538_v41 = vld [vmem:[%s18959_s16 + $0x1bc] sm:$0xff]  }
 0x1a8   :  { %4511 = vst [vmem:[#allocation3 + $0x184] sm:$0xf] %v4510_v27  ;;  %v4514_v29 = vld [vmem:[%s18959_s16 + $0x1a4] sm:$0xf]  ;;  %v4516_v30 = vld [vmem:[%s18959_s16 + $0x188] sm:$0xf] }
 0x1a9   :  { %4513 = vst [vmem:[#allocation3 + $0x188] sm:$0xf] %v4512_v28  ;;  %4515 = vst [vmem:[#allocation3 + $0x18c] sm:$0xf] %v4514_v29  ;;  %v4518_v31 = vld [vmem:[%s18959_s16 + $0x1a8] sm:$0xf] }
 0x1aa   :  { %4517 = vst [vmem:[#allocation3 + $0x190] sm:$0xf] %v4516_v30  ;;  %v4520_v32 = vld [vmem:[%s18959_s16 + $0x18c] sm:$0xf]  ;;  %4519 = vst [vmem:[#allocation3 + $0x194] sm:$0xf] %v4518_v31 }
 0x1ab   :  { %v4522_v33 = vld [vmem:[%s18959_s16 + $0x1ac] sm:$0xf]  ;;  %4521 = vst [vmem:[#allocation3 + $0x198] sm:$0xf] %v4520_v32  ;;  %v4524_v34 = vld [vmem:[%s18959_s16 + $0x190] sm:$0xf] }
 0x1ac   :  { %4523 = vst [vmem:[#allocation3 + $0x19c] sm:$0xf] %v4522_v33  ;;  %v4526_v35 = vld [vmem:[%s18959_s16 + $0x1b0] sm:$0xf]  ;;  %v4528_v36 = vld [vmem:[%s18959_s16 + $0x194] sm:$0xf] }
 0x1ad   :  { %4525 = vst [vmem:[#allocation3 + $0x1a0] sm:$0xf] %v4524_v34  ;;  %4527 = vst [vmem:[#allocation3 + $0x1a4] sm:$0xf] %v4526_v35  ;;  %v4530_v37 = vld [vmem:[%s18959_s16 + $0x1b4] sm:$0xf] }
 0x1ae   :  { %4529 = vst [vmem:[#allocation3 + $0x1a8] sm:$0xf] %v4528_v36  ;;  %v4532_v38 = vld [vmem:[%s18959_s16 + $0x198] sm:$0xf]  ;;  %4531 = vst [vmem:[#allocation3 + $0x1ac] sm:$0xf] %v4530_v37 }
 0x1af   :  { %v4534_v39 = vld [vmem:[%s18959_s16 + $0x1b8] sm:$0xf]  ;;  %4533 = vst [vmem:[#allocation3 + $0x1b0] sm:$0xf] %v4532_v38  ;;  %v4536_v40 = vld [vmem:[%s18959_s16 + $0x19c] sm:$0xf] }
 0x1b0   :  { %4535 = vst [vmem:[#allocation3 + $0x1b4] sm:$0xf] %v4534_v39  ;;  %v4542_v42 = vld [vmem:[%s18959_s16 + $0x1e0] sm:$0xf]  ;;  %4537 = vst [vmem:[#allocation3 + $0x1b8] sm:$0xf] %v4536_v40 }
 0x1b1   :  { %4539 = vst [vmem:[#allocation3 + $0x1bc] sm:$0xff] %v4538_v41   ;;  %4543 = vst [vmem:[#allocation3 + $0x1c4] sm:$0xf] %v4542_v42  ;;  %v4544_v43 = vld [vmem:[%s18959_s16 + $0x1c4] sm:$0xf]  ;;  %v4570_v56 = vld [vmem:[%s18959_s16 + $0x1fc] sm:$0xff]  }
 0x1b2   :  { %v4546_v44 = vld [vmem:[%s18959_s16 + $0x1e4] sm:$0xf]  ;;  %v4548_v45 = vld [vmem:[%s18959_s16 + $0x1c8] sm:$0xf]  ;;  %4545 = vst [vmem:[#allocation3 + $0x1c8] sm:$0xf] %v4544_v43 }
 0x1b3   :  { %4547 = vst [vmem:[#allocation3 + $0x1cc] sm:$0xf] %v4546_v44  ;;  %4549 = vst [vmem:[#allocation3 + $0x1d0] sm:$0xf] %v4548_v45  ;;  %v4550_v46 = vld [vmem:[%s18959_s16 + $0x1e8] sm:$0xf] }
 0x1b4   :  { %v4552_v47 = vld [vmem:[%s18959_s16 + $0x1cc] sm:$0xf]  ;;  %4551 = vst [vmem:[#allocation3 + $0x1d4] sm:$0xf] %v4550_v46  ;;  %v4556_v49 = vld [vmem:[%s18959_s16 + $0x1d0] sm:$0xf] }
 0x1b5   :  { %v4554_v48 = vld [vmem:[%s18959_s16 + $0x1ec] sm:$0xf]  ;;  %4553 = vst [vmem:[#allocation3 + $0x1d8] sm:$0xf] %v4552_v47  ;;  %v4558_v50 = vld [vmem:[%s18959_s16 + $0x1f0] sm:$0xf] }
 0x1b6   :  { %4555 = vst [vmem:[#allocation3 + $0x1dc] sm:$0xf] %v4554_v48  ;;  %v4560_v51 = vld [vmem:[%s18959_s16 + $0x1d4] sm:$0xf]  ;;  %4557 = vst [vmem:[#allocation3 + $0x1e0] sm:$0xf] %v4556_v49 }
 0x1b7   :  { %4559 = vst [vmem:[#allocation3 + $0x1e4] sm:$0xf] %v4558_v50  ;;  %4561 = vst [vmem:[#allocation3 + $0x1e8] sm:$0xf] %v4560_v51  ;;  %v4562_v52 = vld [vmem:[%s18959_s16 + $0x1f4] sm:$0xf] }
 0x1b8   :  { %v4564_v53 = vld [vmem:[%s18959_s16 + $0x1d8] sm:$0xf]  ;;  %4563 = vst [vmem:[#allocation3 + $0x1ec] sm:$0xf] %v4562_v52  ;;  %v4568_v55 = vld [vmem:[%s18959_s16 + $0x1dc] sm:$0xf] }
 0x1b9   :  { %v4566_v54 = vld [vmem:[%s18959_s16 + $0x1f8] sm:$0xf]  ;;  %4565 = vst [vmem:[#allocation3 + $0x1f0] sm:$0xf] %v4564_v53  ;;  %v4574_v57 = vld [vmem:[%s18959_s16 + $0x220] sm:$0xf] }
 0x1ba   :  { %4567 = vst [vmem:[#allocation3 + $0x1f4] sm:$0xf] %v4566_v54  ;;  %4569 = vst [vmem:[#allocation3 + $0x1f8] sm:$0xf] %v4568_v55  ;;  %v4576_v58 = vld [vmem:[%s18959_s16 + $0x204] sm:$0xf] }
 0x1bb   :  { %4571 = vst [vmem:[#allocation3 + $0x1fc] sm:$0xff] %v4570_v56   ;;  %4575 = vst [vmem:[#allocation3 + $0x204] sm:$0xf] %v4574_v57  ;;  %v4578_v59 = vld [vmem:[%s18959_s16 + $0x224] sm:$0xf]  ;;  %v4602_v7 = vld [vmem:[%s18959_s16 + $0x23c] sm:$0xff]  }
 0x1bc   :  { %v4580_v60 = vld [vmem:[%s18959_s16 + $0x208] sm:$0xf]  ;;  %4577 = vst [vmem:[#allocation3 + $0x208] sm:$0xf] %v4576_v58  ;;  %4579 = vst [vmem:[#allocation3 + $0x20c] sm:$0xf] %v4578_v59 }
 0x1bd   :  { %4581 = vst [vmem:[#allocation3 + $0x210] sm:$0xf] %v4580_v60  ;;  %v4582_v61 = vld [vmem:[%s18959_s16 + $0x228] sm:$0xf]  ;;  %v4584_v62 = vld [vmem:[%s18959_s16 + $0x20c] sm:$0xf] }
 0x1be   :  { %v4586_v63 = vld [vmem:[%s18959_s16 + $0x22c] sm:$0xf]  ;;  %4583 = vst [vmem:[#allocation3 + $0x214] sm:$0xf] %v4582_v61  ;;  %4585 = vst [vmem:[#allocation3 + $0x218] sm:$0xf] %v4584_v62 }
 0x1bf   :  { %4587 = vst [vmem:[#allocation3 + $0x21c] sm:$0xf] %v4586_v63  ;;  %v4588_v0 = vld [vmem:[%s18959_s16 + $0x210] sm:$0xf]  ;;  %v4592_v2 = vld [vmem:[%s18959_s16 + $0x214] sm:$0xf] }
 0x1c0   :  { %v4590_v1 = vld [vmem:[%s18959_s16 + $0x230] sm:$0xf]  ;;  %4589 = vst [vmem:[#allocation3 + $0x220] sm:$0xf] %v4588_v0  ;;  %4593 = vst [vmem:[#allocation3 + $0x228] sm:$0xf] %v4592_v2 }
 0x1c1   :  { %4591 = vst [vmem:[#allocation3 + $0x224] sm:$0xf] %v4590_v1  ;;  %v4594_v3 = vld [vmem:[%s18959_s16 + $0x234] sm:$0xf]  ;;  %v4596_v4 = vld [vmem:[%s18959_s16 + $0x218] sm:$0xf] }
 0x1c2   :  { %v4598_v5 = vld [vmem:[%s18959_s16 + $0x238] sm:$0xf]  ;;  %4595 = vst [vmem:[#allocation3 + $0x22c] sm:$0xf] %v4594_v3  ;;  %4597 = vst [vmem:[#allocation3 + $0x230] sm:$0xf] %v4596_v4 }
 0x1c3   :  { %4599 = vst [vmem:[#allocation3 + $0x234] sm:$0xf] %v4598_v5  ;;  %v4600_v6 = vld [vmem:[%s18959_s16 + $0x21c] sm:$0xf]  ;;  %v4606_v8 = vld [vmem:[%s18959_s16 + $0x260] sm:$0xf] }
 0x1c4   :  { %4601 = vst [vmem:[#allocation3 + $0x238] sm:$0xf] %v4600_v6  ;;  %4603 = vst [vmem:[#allocation3 + $0x23c] sm:$0xff] %v4602_v7   ;;  %v4608_v9 = vld [vmem:[%s18959_s16 + $0x244] sm:$0xf]  ;;  %v4634_v22 = vld [vmem:[%s18959_s16 + $0x27c] sm:$0xff]  }
 0x1c5   :  { %4607 = vst [vmem:[#allocation3 + $0x244] sm:$0xf] %v4606_v8  ;;  %v4610_v10 = vld [vmem:[%s18959_s16 + $0x264] sm:$0xf]  ;;  %v4612_v11 = vld [vmem:[%s18959_s16 + $0x248] sm:$0xf] }
 0x1c6   :  { %4609 = vst [vmem:[#allocation3 + $0x248] sm:$0xf] %v4608_v9  ;;  %4611 = vst [vmem:[#allocation3 + $0x24c] sm:$0xf] %v4610_v10  ;;  %v4614_v12 = vld [vmem:[%s18959_s16 + $0x268] sm:$0xf] }
 0x1c7   :  { %4613 = vst [vmem:[#allocation3 + $0x250] sm:$0xf] %v4612_v11  ;;  %v4616_v13 = vld [vmem:[%s18959_s16 + $0x24c] sm:$0xf]  ;;  %4615 = vst [vmem:[#allocation3 + $0x254] sm:$0xf] %v4614_v12 }
 0x1c8   :  { %v4618_v14 = vld [vmem:[%s18959_s16 + $0x26c] sm:$0xf]  ;;  %4617 = vst [vmem:[#allocation3 + $0x258] sm:$0xf] %v4616_v13  ;;  %v4620_v15 = vld [vmem:[%s18959_s16 + $0x250] sm:$0xf] }
 0x1c9   :  { %4619 = vst [vmem:[#allocation3 + $0x25c] sm:$0xf] %v4618_v14  ;;  %v4622_v16 = vld [vmem:[%s18959_s16 + $0x270] sm:$0xf]  ;;  %v4624_v17 = vld [vmem:[%s18959_s16 + $0x254] sm:$0xf] }
 0x1ca   :  { %4621 = vst [vmem:[#allocation3 + $0x260] sm:$0xf] %v4620_v15  ;;  %4623 = vst [vmem:[#allocation3 + $0x264] sm:$0xf] %v4622_v16  ;;  %v4626_v18 = vld [vmem:[%s18959_s16 + $0x274] sm:$0xf] }
 0x1cb   :  { %4625 = vst [vmem:[#allocation3 + $0x268] sm:$0xf] %v4624_v17  ;;  %v4628_v19 = vld [vmem:[%s18959_s16 + $0x258] sm:$0xf]  ;;  %4627 = vst [vmem:[#allocation3 + $0x26c] sm:$0xf] %v4626_v18 }
 0x1cc   :  { %v4630_v20 = vld [vmem:[%s18959_s16 + $0x278] sm:$0xf]  ;;  %4629 = vst [vmem:[#allocation3 + $0x270] sm:$0xf] %v4628_v19  ;;  %v4632_v21 = vld [vmem:[%s18959_s16 + $0x25c] sm:$0xf] }
 0x1cd   :  { %4631 = vst [vmem:[#allocation3 + $0x274] sm:$0xf] %v4630_v20  ;;  %v4638_v23 = vld [vmem:[%s18959_s16 + $0x2a0] sm:$0xf]  ;;  %4633 = vst [vmem:[#allocation3 + $0x278] sm:$0xf] %v4632_v21 }
 0x1ce   :  { %4635 = vst [vmem:[#allocation3 + $0x27c] sm:$0xff] %v4634_v22   ;;  %4639 = vst [vmem:[#allocation3 + $0x284] sm:$0xf] %v4638_v23  ;;  %v4640_v24 = vld [vmem:[%s18959_s16 + $0x284] sm:$0xf]  ;;  %v4666_v37 = vld [vmem:[%s18959_s16 + $0x2bc] sm:$0xff]  }
 0x1cf   :  { %v4642_v25 = vld [vmem:[%s18959_s16 + $0x2a4] sm:$0xf]  ;;  %v4644_v26 = vld [vmem:[%s18959_s16 + $0x288] sm:$0xf]  ;;  %4641 = vst [vmem:[#allocation3 + $0x288] sm:$0xf] %v4640_v24 }
 0x1d0   :  { %4643 = vst [vmem:[#allocation3 + $0x28c] sm:$0xf] %v4642_v25  ;;  %4645 = vst [vmem:[#allocation3 + $0x290] sm:$0xf] %v4644_v26  ;;  %v4646_v27 = vld [vmem:[%s18959_s16 + $0x2a8] sm:$0xf] }
 0x1d1   :  { %v4648_v28 = vld [vmem:[%s18959_s16 + $0x28c] sm:$0xf]  ;;  %4647 = vst [vmem:[#allocation3 + $0x294] sm:$0xf] %v4646_v27  ;;  %v4652_v30 = vld [vmem:[%s18959_s16 + $0x290] sm:$0xf] }
 0x1d2   :  { %v4650_v29 = vld [vmem:[%s18959_s16 + $0x2ac] sm:$0xf]  ;;  %4649 = vst [vmem:[#allocation3 + $0x298] sm:$0xf] %v4648_v28  ;;  %v4654_v31 = vld [vmem:[%s18959_s16 + $0x2b0] sm:$0xf] }
 0x1d3   :  { %4651 = vst [vmem:[#allocation3 + $0x29c] sm:$0xf] %v4650_v29  ;;  %v4656_v32 = vld [vmem:[%s18959_s16 + $0x294] sm:$0xf]  ;;  %4653 = vst [vmem:[#allocation3 + $0x2a0] sm:$0xf] %v4652_v30 }
 0x1d4   :  { %4655 = vst [vmem:[#allocation3 + $0x2a4] sm:$0xf] %v4654_v31  ;;  %4657 = vst [vmem:[#allocation3 + $0x2a8] sm:$0xf] %v4656_v32  ;;  %v4658_v33 = vld [vmem:[%s18959_s16 + $0x2b4] sm:$0xf] }
 0x1d5   :  { %v4660_v34 = vld [vmem:[%s18959_s16 + $0x298] sm:$0xf]  ;;  %4659 = vst [vmem:[#allocation3 + $0x2ac] sm:$0xf] %v4658_v33  ;;  %v4664_v36 = vld [vmem:[%s18959_s16 + $0x29c] sm:$0xf] }
 0x1d6   :  { %v4662_v35 = vld [vmem:[%s18959_s16 + $0x2b8] sm:$0xf]  ;;  %4661 = vst [vmem:[#allocation3 + $0x2b0] sm:$0xf] %v4660_v34  ;;  %v4670_v38 = vld [vmem:[%s18959_s16 + $0x2e0] sm:$0xf] }
 0x1d7   :  { %4663 = vst [vmem:[#allocation3 + $0x2b4] sm:$0xf] %v4662_v35  ;;  %4665 = vst [vmem:[#allocation3 + $0x2b8] sm:$0xf] %v4664_v36  ;;  %v4672_v39 = vld [vmem:[%s18959_s16 + $0x2c4] sm:$0xf] }
 0x1d8   :  { %4667 = vst [vmem:[#allocation3 + $0x2bc] sm:$0xff] %v4666_v37   ;;  %4671 = vst [vmem:[#allocation3 + $0x2c4] sm:$0xf] %v4670_v38  ;;  %v4674_v40 = vld [vmem:[%s18959_s16 + $0x2e4] sm:$0xf]  ;;  %v4698_v52 = vld [vmem:[%s18959_s16 + $0x2fc] sm:$0xff]  }
 0x1d9   :  { %v4676_v41 = vld [vmem:[%s18959_s16 + $0x2c8] sm:$0xf]  ;;  %4673 = vst [vmem:[#allocation3 + $0x2c8] sm:$0xf] %v4672_v39  ;;  %4675 = vst [vmem:[#allocation3 + $0x2cc] sm:$0xf] %v4674_v40 }
 0x1da   :  { %4677 = vst [vmem:[#allocation3 + $0x2d0] sm:$0xf] %v4676_v41  ;;  %v4678_v42 = vld [vmem:[%s18959_s16 + $0x2e8] sm:$0xf]  ;;  %v4680_v43 = vld [vmem:[%s18959_s16 + $0x2cc] sm:$0xf] }
 0x1db   :  { %v4682_v44 = vld [vmem:[%s18959_s16 + $0x2ec] sm:$0xf]  ;;  %4679 = vst [vmem:[#allocation3 + $0x2d4] sm:$0xf] %v4678_v42  ;;  %4681 = vst [vmem:[#allocation3 + $0x2d8] sm:$0xf] %v4680_v43 }
 0x1dc   :  { %4683 = vst [vmem:[#allocation3 + $0x2dc] sm:$0xf] %v4682_v44  ;;  %v4684_v45 = vld [vmem:[%s18959_s16 + $0x2d0] sm:$0xf]  ;;  %v4688_v47 = vld [vmem:[%s18959_s16 + $0x2d4] sm:$0xf] }
 0x1dd   :  { %v4686_v46 = vld [vmem:[%s18959_s16 + $0x2f0] sm:$0xf]  ;;  %4685 = vst [vmem:[#allocation3 + $0x2e0] sm:$0xf] %v4684_v45  ;;  %4689 = vst [vmem:[#allocation3 + $0x2e8] sm:$0xf] %v4688_v47 }
 0x1de   :  { %4687 = vst [vmem:[#allocation3 + $0x2e4] sm:$0xf] %v4686_v46  ;;  %v4690_v48 = vld [vmem:[%s18959_s16 + $0x2f4] sm:$0xf]  ;;  %v4692_v49 = vld [vmem:[%s18959_s16 + $0x2d8] sm:$0xf] }
 0x1df   :  { %v4694_v50 = vld [vmem:[%s18959_s16 + $0x2f8] sm:$0xf]  ;;  %4691 = vst [vmem:[#allocation3 + $0x2ec] sm:$0xf] %v4690_v48  ;;  %4693 = vst [vmem:[#allocation3 + $0x2f0] sm:$0xf] %v4692_v49 }
 0x1e0   :  { %4695 = vst [vmem:[#allocation3 + $0x2f4] sm:$0xf] %v4694_v50  ;;  %v4696_v51 = vld [vmem:[%s18959_s16 + $0x2dc] sm:$0xf]  ;;  %v4702_v53 = vld [vmem:[%s18959_s16 + $0x320] sm:$0xf] }
 0x1e1   :  { %4697 = vst [vmem:[#allocation3 + $0x2f8] sm:$0xf] %v4696_v51  ;;  %4699 = vst [vmem:[#allocation3 + $0x2fc] sm:$0xff] %v4698_v52   ;;  %v4704_v54 = vld [vmem:[%s18959_s16 + $0x304] sm:$0xf]  ;;  %v4730_v3 = vld [vmem:[%s18959_s16 + $0x33c] sm:$0xff]  }
 0x1e2   :  { %4703 = vst [vmem:[#allocation3 + $0x304] sm:$0xf] %v4702_v53  ;;  %v4706_v55 = vld [vmem:[%s18959_s16 + $0x324] sm:$0xf]  ;;  %v4708_v56 = vld [vmem:[%s18959_s16 + $0x308] sm:$0xf] }
 0x1e3   :  { %4705 = vst [vmem:[#allocation3 + $0x308] sm:$0xf] %v4704_v54  ;;  %4707 = vst [vmem:[#allocation3 + $0x30c] sm:$0xf] %v4706_v55  ;;  %v4710_v57 = vld [vmem:[%s18959_s16 + $0x328] sm:$0xf] }
 0x1e4   :  { %4709 = vst [vmem:[#allocation3 + $0x310] sm:$0xf] %v4708_v56  ;;  %v4712_v58 = vld [vmem:[%s18959_s16 + $0x30c] sm:$0xf]  ;;  %4711 = vst [vmem:[#allocation3 + $0x314] sm:$0xf] %v4710_v57 }
 0x1e5   :  { %v4714_v59 = vld [vmem:[%s18959_s16 + $0x32c] sm:$0xf]  ;;  %4713 = vst [vmem:[#allocation3 + $0x318] sm:$0xf] %v4712_v58  ;;  %v4716_v60 = vld [vmem:[%s18959_s16 + $0x310] sm:$0xf] }
 0x1e6   :  { %4715 = vst [vmem:[#allocation3 + $0x31c] sm:$0xf] %v4714_v59  ;;  %v4718_v61 = vld [vmem:[%s18959_s16 + $0x330] sm:$0xf]  ;;  %v4720_v62 = vld [vmem:[%s18959_s16 + $0x314] sm:$0xf] }
 0x1e7   :  { %4717 = vst [vmem:[#allocation3 + $0x320] sm:$0xf] %v4716_v60  ;;  %4719 = vst [vmem:[#allocation3 + $0x324] sm:$0xf] %v4718_v61  ;;  %v4722_v63 = vld [vmem:[%s18959_s16 + $0x334] sm:$0xf] }
 0x1e8   :  { %4721 = vst [vmem:[#allocation3 + $0x328] sm:$0xf] %v4720_v62  ;;  %v4724_v0 = vld [vmem:[%s18959_s16 + $0x318] sm:$0xf]  ;;  %4723 = vst [vmem:[#allocation3 + $0x32c] sm:$0xf] %v4722_v63 }
 0x1e9   :  { %v4726_v1 = vld [vmem:[%s18959_s16 + $0x338] sm:$0xf]  ;;  %4725 = vst [vmem:[#allocation3 + $0x330] sm:$0xf] %v4724_v0  ;;  %v4728_v2 = vld [vmem:[%s18959_s16 + $0x31c] sm:$0xf] }
 0x1ea   :  { %4727 = vst [vmem:[#allocation3 + $0x334] sm:$0xf] %v4726_v1  ;;  %v4734_v4 = vld [vmem:[%s18959_s16 + $0x360] sm:$0xf]  ;;  %4729 = vst [vmem:[#allocation3 + $0x338] sm:$0xf] %v4728_v2 }
 0x1eb   :  { %4731 = vst [vmem:[#allocation3 + $0x33c] sm:$0xff] %v4730_v3   ;;  %4735 = vst [vmem:[#allocation3 + $0x344] sm:$0xf] %v4734_v4  ;;  %v4736_v5 = vld [vmem:[%s18959_s16 + $0x344] sm:$0xf]  ;;  %v4762_v18 = vld [vmem:[%s18959_s16 + $0x37c] sm:$0xff]  }
 0x1ec   :  { %v4738_v6 = vld [vmem:[%s18959_s16 + $0x364] sm:$0xf]  ;;  %v4740_v7 = vld [vmem:[%s18959_s16 + $0x348] sm:$0xf]  ;;  %4737 = vst [vmem:[#allocation3 + $0x348] sm:$0xf] %v4736_v5 }
 0x1ed   :  { %4739 = vst [vmem:[#allocation3 + $0x34c] sm:$0xf] %v4738_v6  ;;  %4741 = vst [vmem:[#allocation3 + $0x350] sm:$0xf] %v4740_v7  ;;  %v4742_v8 = vld [vmem:[%s18959_s16 + $0x368] sm:$0xf] }
 0x1ee   :  { %v4744_v9 = vld [vmem:[%s18959_s16 + $0x34c] sm:$0xf]  ;;  %4743 = vst [vmem:[#allocation3 + $0x354] sm:$0xf] %v4742_v8  ;;  %v4748_v11 = vld [vmem:[%s18959_s16 + $0x350] sm:$0xf] }
 0x1ef   :  { %v4746_v10 = vld [vmem:[%s18959_s16 + $0x36c] sm:$0xf]  ;;  %4745 = vst [vmem:[#allocation3 + $0x358] sm:$0xf] %v4744_v9  ;;  %v4750_v12 = vld [vmem:[%s18959_s16 + $0x370] sm:$0xf] }
 0x1f0   :  { %4747 = vst [vmem:[#allocation3 + $0x35c] sm:$0xf] %v4746_v10  ;;  %v4752_v13 = vld [vmem:[%s18959_s16 + $0x354] sm:$0xf]  ;;  %4749 = vst [vmem:[#allocation3 + $0x360] sm:$0xf] %v4748_v11 }
 0x1f1   :  { %4751 = vst [vmem:[#allocation3 + $0x364] sm:$0xf] %v4750_v12  ;;  %4753 = vst [vmem:[#allocation3 + $0x368] sm:$0xf] %v4752_v13  ;;  %v4754_v14 = vld [vmem:[%s18959_s16 + $0x374] sm:$0xf] }
 0x1f2   :  { %v4756_v15 = vld [vmem:[%s18959_s16 + $0x358] sm:$0xf]  ;;  %4755 = vst [vmem:[#allocation3 + $0x36c] sm:$0xf] %v4754_v14  ;;  %v4760_v17 = vld [vmem:[%s18959_s16 + $0x35c] sm:$0xf] }
 0x1f3   :  { %v4758_v16 = vld [vmem:[%s18959_s16 + $0x378] sm:$0xf]  ;;  %4757 = vst [vmem:[#allocation3 + $0x370] sm:$0xf] %v4756_v15  ;;  %v4766_v19 = vld [vmem:[%s18959_s16 + $0x3a0] sm:$0xf] }
 0x1f4   :  { %4759 = vst [vmem:[#allocation3 + $0x374] sm:$0xf] %v4758_v16  ;;  %4761 = vst [vmem:[#allocation3 + $0x378] sm:$0xf] %v4760_v17  ;;  %v4768_v20 = vld [vmem:[%s18959_s16 + $0x384] sm:$0xf] }
 0x1f5   :  { %4763 = vst [vmem:[#allocation3 + $0x37c] sm:$0xff] %v4762_v18   ;;  %4767 = vst [vmem:[#allocation3 + $0x384] sm:$0xf] %v4766_v19  ;;  %v4770_v21 = vld [vmem:[%s18959_s16 + $0x3a4] sm:$0xf]  ;;  %v4794_v33 = vld [vmem:[%s18959_s16 + $0x3bc] sm:$0xff]  }
 0x1f6   :  { %v4772_v22 = vld [vmem:[%s18959_s16 + $0x388] sm:$0xf]  ;;  %4769 = vst [vmem:[#allocation3 + $0x388] sm:$0xf] %v4768_v20  ;;  %4771 = vst [vmem:[#allocation3 + $0x38c] sm:$0xf] %v4770_v21 }
 0x1f7   :  { %4773 = vst [vmem:[#allocation3 + $0x390] sm:$0xf] %v4772_v22  ;;  %v4774_v23 = vld [vmem:[%s18959_s16 + $0x3a8] sm:$0xf]  ;;  %v4776_v24 = vld [vmem:[%s18959_s16 + $0x38c] sm:$0xf] }
 0x1f8   :  { %v4778_v25 = vld [vmem:[%s18959_s16 + $0x3ac] sm:$0xf]  ;;  %4775 = vst [vmem:[#allocation3 + $0x394] sm:$0xf] %v4774_v23  ;;  %4777 = vst [vmem:[#allocation3 + $0x398] sm:$0xf] %v4776_v24 }
 0x1f9   :  { %4779 = vst [vmem:[#allocation3 + $0x39c] sm:$0xf] %v4778_v25  ;;  %v4780_v26 = vld [vmem:[%s18959_s16 + $0x390] sm:$0xf]  ;;  %v4784_v28 = vld [vmem:[%s18959_s16 + $0x394] sm:$0xf] }
 0x1fa   :  { %v4782_v27 = vld [vmem:[%s18959_s16 + $0x3b0] sm:$0xf]  ;;  %4781 = vst [vmem:[#allocation3 + $0x3a0] sm:$0xf] %v4780_v26  ;;  %4785 = vst [vmem:[#allocation3 + $0x3a8] sm:$0xf] %v4784_v28 }
 0x1fb   :  { %4783 = vst [vmem:[#allocation3 + $0x3a4] sm:$0xf] %v4782_v27  ;;  %v4786_v29 = vld [vmem:[%s18959_s16 + $0x3b4] sm:$0xf]  ;;  %v4788_v30 = vld [vmem:[%s18959_s16 + $0x398] sm:$0xf] }
 0x1fc   :  { %v4790_v31 = vld [vmem:[%s18959_s16 + $0x3b8] sm:$0xf]  ;;  %4787 = vst [vmem:[#allocation3 + $0x3ac] sm:$0xf] %v4786_v29  ;;  %4789 = vst [vmem:[#allocation3 + $0x3b0] sm:$0xf] %v4788_v30 }
 0x1fd   :  { %4791 = vst [vmem:[#allocation3 + $0x3b4] sm:$0xf] %v4790_v31  ;;  %v4792_v32 = vld [vmem:[%s18959_s16 + $0x39c] sm:$0xf]  ;;  %v4798_v34 = vld [vmem:[%s18959_s16 + $0x3e0] sm:$0xf] }
 0x1fe   :  { %4793 = vst [vmem:[#allocation3 + $0x3b8] sm:$0xf] %v4792_v32  ;;  %4795 = vst [vmem:[#allocation3 + $0x3bc] sm:$0xff] %v4794_v33   ;;  %v4800_v35 = vld [vmem:[%s18959_s16 + $0x3c4] sm:$0xf]  ;;  %v4826_v48 = vld [vmem:[%s18959_s16 + $0x3fc] sm:$0xff]  }
 0x1ff   :  { %4799 = vst [vmem:[#allocation3 + $0x3c4] sm:$0xf] %v4798_v34  ;;  %v4802_v36 = vld [vmem:[%s18959_s16 + $0x3e4] sm:$0xf]  ;;  %v4804_v37 = vld [vmem:[%s18959_s16 + $0x3c8] sm:$0xf] }
 0x200   :  { %4801 = vst [vmem:[#allocation3 + $0x3c8] sm:$0xf] %v4800_v35  ;;  %4803 = vst [vmem:[#allocation3 + $0x3cc] sm:$0xf] %v4802_v36  ;;  %v4806_v38 = vld [vmem:[%s18959_s16 + $0x3e8] sm:$0xf] }
 0x201   :  { %4805 = vst [vmem:[#allocation3 + $0x3d0] sm:$0xf] %v4804_v37  ;;  %v4808_v39 = vld [vmem:[%s18959_s16 + $0x3cc] sm:$0xf]  ;;  %4807 = vst [vmem:[#allocation3 + $0x3d4] sm:$0xf] %v4806_v38 }
 0x202   :  { %v4810_v40 = vld [vmem:[%s18959_s16 + $0x3ec] sm:$0xf]  ;;  %4809 = vst [vmem:[#allocation3 + $0x3d8] sm:$0xf] %v4808_v39  ;;  %v4812_v41 = vld [vmem:[%s18959_s16 + $0x3d0] sm:$0xf] }
 0x203   :  { %4811 = vst [vmem:[#allocation3 + $0x3dc] sm:$0xf] %v4810_v40  ;;  %v4814_v42 = vld [vmem:[%s18959_s16 + $0x3f0] sm:$0xf]  ;;  %v4816_v43 = vld [vmem:[%s18959_s16 + $0x3d4] sm:$0xf] }
 0x204   :  { %4813 = vst [vmem:[#allocation3 + $0x3e0] sm:$0xf] %v4812_v41  ;;  %4815 = vst [vmem:[#allocation3 + $0x3e4] sm:$0xf] %v4814_v42  ;;  %v4818_v44 = vld [vmem:[%s18959_s16 + $0x3f4] sm:$0xf] }
 0x205   :  { %4817 = vst [vmem:[#allocation3 + $0x3e8] sm:$0xf] %v4816_v43  ;;  %v4820_v45 = vld [vmem:[%s18959_s16 + $0x3d8] sm:$0xf]  ;;  %4819 = vst [vmem:[#allocation3 + $0x3ec] sm:$0xf] %v4818_v44 }
 0x206   :  { %v4822_v46 = vld [vmem:[%s18959_s16 + $0x3f8] sm:$0xf]  ;;  %4821 = vst [vmem:[#allocation3 + $0x3f0] sm:$0xf] %v4820_v45  ;;  %v4824_v47 = vld [vmem:[%s18959_s16 + $0x3dc] sm:$0xf] }
 0x207   :  { %4823 = vst [vmem:[#allocation3 + $0x3f4] sm:$0xf] %v4822_v46  ;;  %v4830_v49 = vld [vmem:[%s18959_s16 + $0x420] sm:$0xf]  ;;  %4825 = vst [vmem:[#allocation3 + $0x3f8] sm:$0xf] %v4824_v47 }
 0x208   :  { %4827 = vst [vmem:[#allocation3 + $0x3fc] sm:$0xff] %v4826_v48   ;;  %4831 = vst [vmem:[#allocation3 + $0x404] sm:$0xf] %v4830_v49  ;;  %v4832_v50 = vld [vmem:[%s18959_s16 + $0x404] sm:$0xf]  ;;  %v4858_v63 = vld [vmem:[%s18959_s16 + $0x43c] sm:$0xff]  }
 0x209   :  { %v4834_v51 = vld [vmem:[%s18959_s16 + $0x424] sm:$0xf]  ;;  %v4836_v52 = vld [vmem:[%s18959_s16 + $0x408] sm:$0xf]  ;;  %4833 = vst [vmem:[#allocation3 + $0x408] sm:$0xf] %v4832_v50 }
 0x20a   :  { %4835 = vst [vmem:[#allocation3 + $0x40c] sm:$0xf] %v4834_v51  ;;  %4837 = vst [vmem:[#allocation3 + $0x410] sm:$0xf] %v4836_v52  ;;  %v4838_v53 = vld [vmem:[%s18959_s16 + $0x428] sm:$0xf] }
 0x20b   :  { %v4840_v54 = vld [vmem:[%s18959_s16 + $0x40c] sm:$0xf]  ;;  %4839 = vst [vmem:[#allocation3 + $0x414] sm:$0xf] %v4838_v53  ;;  %v4844_v56 = vld [vmem:[%s18959_s16 + $0x410] sm:$0xf] }
 0x20c   :  { %v4842_v55 = vld [vmem:[%s18959_s16 + $0x42c] sm:$0xf]  ;;  %4841 = vst [vmem:[#allocation3 + $0x418] sm:$0xf] %v4840_v54  ;;  %v4846_v57 = vld [vmem:[%s18959_s16 + $0x430] sm:$0xf] }
 0x20d   :  { %4843 = vst [vmem:[#allocation3 + $0x41c] sm:$0xf] %v4842_v55  ;;  %v4848_v58 = vld [vmem:[%s18959_s16 + $0x414] sm:$0xf]  ;;  %4845 = vst [vmem:[#allocation3 + $0x420] sm:$0xf] %v4844_v56 }
 0x20e   :  { %4847 = vst [vmem:[#allocation3 + $0x424] sm:$0xf] %v4846_v57  ;;  %4849 = vst [vmem:[#allocation3 + $0x428] sm:$0xf] %v4848_v58  ;;  %v4850_v59 = vld [vmem:[%s18959_s16 + $0x434] sm:$0xf] }
 0x20f   :  { %v4852_v60 = vld [vmem:[%s18959_s16 + $0x418] sm:$0xf]  ;;  %4851 = vst [vmem:[#allocation3 + $0x42c] sm:$0xf] %v4850_v59  ;;  %v4856_v62 = vld [vmem:[%s18959_s16 + $0x41c] sm:$0xf] }
 0x210   :  { %v4854_v61 = vld [vmem:[%s18959_s16 + $0x438] sm:$0xf]  ;;  %4853 = vst [vmem:[#allocation3 + $0x430] sm:$0xf] %v4852_v60  ;;  %v4862_v0 = vld [vmem:[%s18959_s16 + $0x460] sm:$0xf] }
 0x211   :  { %4855 = vst [vmem:[#allocation3 + $0x434] sm:$0xf] %v4854_v61  ;;  %4857 = vst [vmem:[#allocation3 + $0x438] sm:$0xf] %v4856_v62  ;;  %v4864_v1 = vld [vmem:[%s18959_s16 + $0x444] sm:$0xf] }
 0x212   :  { %4859 = vst [vmem:[#allocation3 + $0x43c] sm:$0xff] %v4858_v63   ;;  %4863 = vst [vmem:[#allocation3 + $0x444] sm:$0xf] %v4862_v0  ;;  %v4866_v2 = vld [vmem:[%s18959_s16 + $0x464] sm:$0xf]  ;;  %v4890_v14 = vld [vmem:[%s18959_s16 + $0x47c] sm:$0xff]  }
 0x213   :  { %v4868_v3 = vld [vmem:[%s18959_s16 + $0x448] sm:$0xf]  ;;  %4865 = vst [vmem:[#allocation3 + $0x448] sm:$0xf] %v4864_v1  ;;  %4867 = vst [vmem:[#allocation3 + $0x44c] sm:$0xf] %v4866_v2 }
 0x214   :  { %4869 = vst [vmem:[#allocation3 + $0x450] sm:$0xf] %v4868_v3  ;;  %v4870_v4 = vld [vmem:[%s18959_s16 + $0x468] sm:$0xf]  ;;  %v4872_v5 = vld [vmem:[%s18959_s16 + $0x44c] sm:$0xf] }
 0x215   :  { %v4874_v6 = vld [vmem:[%s18959_s16 + $0x46c] sm:$0xf]  ;;  %4871 = vst [vmem:[#allocation3 + $0x454] sm:$0xf] %v4870_v4  ;;  %4873 = vst [vmem:[#allocation3 + $0x458] sm:$0xf] %v4872_v5 }
 0x216   :  { %4875 = vst [vmem:[#allocation3 + $0x45c] sm:$0xf] %v4874_v6  ;;  %v4876_v7 = vld [vmem:[%s18959_s16 + $0x450] sm:$0xf]  ;;  %v4880_v9 = vld [vmem:[%s18959_s16 + $0x454] sm:$0xf] }
 0x217   :  { %v4878_v8 = vld [vmem:[%s18959_s16 + $0x470] sm:$0xf]  ;;  %4877 = vst [vmem:[#allocation3 + $0x460] sm:$0xf] %v4876_v7  ;;  %4881 = vst [vmem:[#allocation3 + $0x468] sm:$0xf] %v4880_v9 }
 0x218   :  { %4879 = vst [vmem:[#allocation3 + $0x464] sm:$0xf] %v4878_v8  ;;  %v4882_v10 = vld [vmem:[%s18959_s16 + $0x474] sm:$0xf]  ;;  %v4884_v11 = vld [vmem:[%s18959_s16 + $0x458] sm:$0xf] }
 0x219   :  { %v4886_v12 = vld [vmem:[%s18959_s16 + $0x478] sm:$0xf]  ;;  %4883 = vst [vmem:[#allocation3 + $0x46c] sm:$0xf] %v4882_v10  ;;  %4885 = vst [vmem:[#allocation3 + $0x470] sm:$0xf] %v4884_v11 }
 0x21a   :  { %4887 = vst [vmem:[#allocation3 + $0x474] sm:$0xf] %v4886_v12  ;;  %v4888_v13 = vld [vmem:[%s18959_s16 + $0x45c] sm:$0xf]  ;;  %v4894_v15 = vld [vmem:[%s18959_s16 + $0x4a0] sm:$0xf] }
 0x21b   :  { %4889 = vst [vmem:[#allocation3 + $0x478] sm:$0xf] %v4888_v13  ;;  %4891 = vst [vmem:[#allocation3 + $0x47c] sm:$0xff] %v4890_v14   ;;  %v4896_v16 = vld [vmem:[%s18959_s16 + $0x484] sm:$0xf]  ;;  %v4922_v29 = vld [vmem:[%s18959_s16 + $0x4bc] sm:$0xff]  }
 0x21c   :  { %4895 = vst [vmem:[#allocation3 + $0x484] sm:$0xf] %v4894_v15  ;;  %v4898_v17 = vld [vmem:[%s18959_s16 + $0x4a4] sm:$0xf]  ;;  %v4900_v18 = vld [vmem:[%s18959_s16 + $0x488] sm:$0xf] }
 0x21d   :  { %4897 = vst [vmem:[#allocation3 + $0x488] sm:$0xf] %v4896_v16  ;;  %4899 = vst [vmem:[#allocation3 + $0x48c] sm:$0xf] %v4898_v17  ;;  %v4902_v19 = vld [vmem:[%s18959_s16 + $0x4a8] sm:$0xf] }
 0x21e   :  { %4901 = vst [vmem:[#allocation3 + $0x490] sm:$0xf] %v4900_v18  ;;  %v4904_v20 = vld [vmem:[%s18959_s16 + $0x48c] sm:$0xf]  ;;  %4903 = vst [vmem:[#allocation3 + $0x494] sm:$0xf] %v4902_v19 }
 0x21f   :  { %v4906_v21 = vld [vmem:[%s18959_s16 + $0x4ac] sm:$0xf]  ;;  %4905 = vst [vmem:[#allocation3 + $0x498] sm:$0xf] %v4904_v20  ;;  %v4908_v22 = vld [vmem:[%s18959_s16 + $0x490] sm:$0xf] }
 0x220   :  { %4907 = vst [vmem:[#allocation3 + $0x49c] sm:$0xf] %v4906_v21  ;;  %v4910_v23 = vld [vmem:[%s18959_s16 + $0x4b0] sm:$0xf]  ;;  %v4912_v24 = vld [vmem:[%s18959_s16 + $0x494] sm:$0xf] }
 0x221   :  { %4909 = vst [vmem:[#allocation3 + $0x4a0] sm:$0xf] %v4908_v22  ;;  %4911 = vst [vmem:[#allocation3 + $0x4a4] sm:$0xf] %v4910_v23  ;;  %v4914_v25 = vld [vmem:[%s18959_s16 + $0x4b4] sm:$0xf] }
 0x222   :  { %4913 = vst [vmem:[#allocation3 + $0x4a8] sm:$0xf] %v4912_v24  ;;  %v4916_v26 = vld [vmem:[%s18959_s16 + $0x498] sm:$0xf]  ;;  %4915 = vst [vmem:[#allocation3 + $0x4ac] sm:$0xf] %v4914_v25 }
 0x223   :  { %v4918_v27 = vld [vmem:[%s18959_s16 + $0x4b8] sm:$0xf]  ;;  %4917 = vst [vmem:[#allocation3 + $0x4b0] sm:$0xf] %v4916_v26  ;;  %v4920_v28 = vld [vmem:[%s18959_s16 + $0x49c] sm:$0xf] }
 0x224   :  { %4919 = vst [vmem:[#allocation3 + $0x4b4] sm:$0xf] %v4918_v27  ;;  %v4926_v30 = vld [vmem:[%s18959_s16 + $0x4e0] sm:$0xf]  ;;  %4921 = vst [vmem:[#allocation3 + $0x4b8] sm:$0xf] %v4920_v28 }
 0x225   :  { %4923 = vst [vmem:[#allocation3 + $0x4bc] sm:$0xff] %v4922_v29   ;;  %4927 = vst [vmem:[#allocation3 + $0x4c4] sm:$0xf] %v4926_v30  ;;  %v4928_v31 = vld [vmem:[%s18959_s16 + $0x4c4] sm:$0xf]  ;;  %v4954_v44 = vld [vmem:[%s18959_s16 + $0x4fc] sm:$0xff]  }
 0x226   :  { %v4930_v32 = vld [vmem:[%s18959_s16 + $0x4e4] sm:$0xf]  ;;  %v4932_v33 = vld [vmem:[%s18959_s16 + $0x4c8] sm:$0xf]  ;;  %4929 = vst [vmem:[#allocation3 + $0x4c8] sm:$0xf] %v4928_v31 }
 0x227   :  { %4931 = vst [vmem:[#allocation3 + $0x4cc] sm:$0xf] %v4930_v32  ;;  %4933 = vst [vmem:[#allocation3 + $0x4d0] sm:$0xf] %v4932_v33  ;;  %v4934_v34 = vld [vmem:[%s18959_s16 + $0x4e8] sm:$0xf] }
 0x228   :  { %v4936_v35 = vld [vmem:[%s18959_s16 + $0x4cc] sm:$0xf]  ;;  %4935 = vst [vmem:[#allocation3 + $0x4d4] sm:$0xf] %v4934_v34  ;;  %v4940_v37 = vld [vmem:[%s18959_s16 + $0x4d0] sm:$0xf] }
 0x229   :  { %v4938_v36 = vld [vmem:[%s18959_s16 + $0x4ec] sm:$0xf]  ;;  %4937 = vst [vmem:[#allocation3 + $0x4d8] sm:$0xf] %v4936_v35  ;;  %v4942_v38 = vld [vmem:[%s18959_s16 + $0x4f0] sm:$0xf] }
 0x22a   :  { %4939 = vst [vmem:[#allocation3 + $0x4dc] sm:$0xf] %v4938_v36  ;;  %v4944_v39 = vld [vmem:[%s18959_s16 + $0x4d4] sm:$0xf]  ;;  %4941 = vst [vmem:[#allocation3 + $0x4e0] sm:$0xf] %v4940_v37 }
 0x22b   :  { %4943 = vst [vmem:[#allocation3 + $0x4e4] sm:$0xf] %v4942_v38  ;;  %4945 = vst [vmem:[#allocation3 + $0x4e8] sm:$0xf] %v4944_v39  ;;  %v4946_v40 = vld [vmem:[%s18959_s16 + $0x4f4] sm:$0xf] }
 0x22c   :  { %v4948_v41 = vld [vmem:[%s18959_s16 + $0x4d8] sm:$0xf]  ;;  %4947 = vst [vmem:[#allocation3 + $0x4ec] sm:$0xf] %v4946_v40  ;;  %v4952_v43 = vld [vmem:[%s18959_s16 + $0x4dc] sm:$0xf] }
 0x22d   :  { %v4950_v42 = vld [vmem:[%s18959_s16 + $0x4f8] sm:$0xf]  ;;  %4949 = vst [vmem:[#allocation3 + $0x4f0] sm:$0xf] %v4948_v41  ;;  %v4958_v45 = vld [vmem:[%s18959_s16 + $0x520] sm:$0xf] }
 0x22e   :  { %4951 = vst [vmem:[#allocation3 + $0x4f4] sm:$0xf] %v4950_v42  ;;  %4953 = vst [vmem:[#allocation3 + $0x4f8] sm:$0xf] %v4952_v43  ;;  %v4960_v46 = vld [vmem:[%s18959_s16 + $0x504] sm:$0xf] }
 0x22f   :  { %4955 = vst [vmem:[#allocation3 + $0x4fc] sm:$0xff] %v4954_v44   ;;  %4959 = vst [vmem:[#allocation3 + $0x504] sm:$0xf] %v4958_v45  ;;  %v4962_v47 = vld [vmem:[%s18959_s16 + $0x524] sm:$0xf]  ;;  %v4986_v59 = vld [vmem:[%s18959_s16 + $0x53c] sm:$0xff]  }
 0x230   :  { %v4964_v48 = vld [vmem:[%s18959_s16 + $0x508] sm:$0xf]  ;;  %4961 = vst [vmem:[#allocation3 + $0x508] sm:$0xf] %v4960_v46  ;;  %4963 = vst [vmem:[#allocation3 + $0x50c] sm:$0xf] %v4962_v47 }
 0x231   :  { %4965 = vst [vmem:[#allocation3 + $0x510] sm:$0xf] %v4964_v48  ;;  %v4966_v49 = vld [vmem:[%s18959_s16 + $0x528] sm:$0xf]  ;;  %v4968_v50 = vld [vmem:[%s18959_s16 + $0x50c] sm:$0xf] }
 0x232   :  { %v4970_v51 = vld [vmem:[%s18959_s16 + $0x52c] sm:$0xf]  ;;  %4967 = vst [vmem:[#allocation3 + $0x514] sm:$0xf] %v4966_v49  ;;  %4969 = vst [vmem:[#allocation3 + $0x518] sm:$0xf] %v4968_v50 }
 0x233   :  { %4971 = vst [vmem:[#allocation3 + $0x51c] sm:$0xf] %v4970_v51  ;;  %v4972_v52 = vld [vmem:[%s18959_s16 + $0x510] sm:$0xf]  ;;  %v4976_v54 = vld [vmem:[%s18959_s16 + $0x514] sm:$0xf] }
 0x234   :  { %v4974_v53 = vld [vmem:[%s18959_s16 + $0x530] sm:$0xf]  ;;  %4973 = vst [vmem:[#allocation3 + $0x520] sm:$0xf] %v4972_v52  ;;  %4977 = vst [vmem:[#allocation3 + $0x528] sm:$0xf] %v4976_v54 }
 0x235   :  { %4975 = vst [vmem:[#allocation3 + $0x524] sm:$0xf] %v4974_v53  ;;  %v4978_v55 = vld [vmem:[%s18959_s16 + $0x534] sm:$0xf]  ;;  %v4980_v56 = vld [vmem:[%s18959_s16 + $0x518] sm:$0xf] }
 0x236   :  { %v4982_v57 = vld [vmem:[%s18959_s16 + $0x538] sm:$0xf]  ;;  %4979 = vst [vmem:[#allocation3 + $0x52c] sm:$0xf] %v4978_v55  ;;  %4981 = vst [vmem:[#allocation3 + $0x530] sm:$0xf] %v4980_v56 }
 0x237   :  { %4983 = vst [vmem:[#allocation3 + $0x534] sm:$0xf] %v4982_v57  ;;  %v4984_v58 = vld [vmem:[%s18959_s16 + $0x51c] sm:$0xf]  ;;  %v4990_v60 = vld [vmem:[%s18959_s16 + $0x560] sm:$0xf] }
 0x238   :  { %4985 = vst [vmem:[#allocation3 + $0x538] sm:$0xf] %v4984_v58  ;;  %4987 = vst [vmem:[#allocation3 + $0x53c] sm:$0xff] %v4986_v59   ;;  %v4992_v61 = vld [vmem:[%s18959_s16 + $0x544] sm:$0xf]  ;;  %v5018_v10 = vld [vmem:[%s18959_s16 + $0x57c] sm:$0xff]  }
 0x239   :  { %4991 = vst [vmem:[#allocation3 + $0x544] sm:$0xf] %v4990_v60  ;;  %v4994_v62 = vld [vmem:[%s18959_s16 + $0x564] sm:$0xf]  ;;  %v4996_v63 = vld [vmem:[%s18959_s16 + $0x548] sm:$0xf] }
 0x23a   :  { %4993 = vst [vmem:[#allocation3 + $0x548] sm:$0xf] %v4992_v61  ;;  %4995 = vst [vmem:[#allocation3 + $0x54c] sm:$0xf] %v4994_v62  ;;  %v4998_v0 = vld [vmem:[%s18959_s16 + $0x568] sm:$0xf] }
 0x23b   :  { %4997 = vst [vmem:[#allocation3 + $0x550] sm:$0xf] %v4996_v63  ;;  %v5000_v1 = vld [vmem:[%s18959_s16 + $0x54c] sm:$0xf]  ;;  %4999 = vst [vmem:[#allocation3 + $0x554] sm:$0xf] %v4998_v0 }
 0x23c   :  { %v5002_v2 = vld [vmem:[%s18959_s16 + $0x56c] sm:$0xf]  ;;  %5001 = vst [vmem:[#allocation3 + $0x558] sm:$0xf] %v5000_v1  ;;  %v5004_v3 = vld [vmem:[%s18959_s16 + $0x550] sm:$0xf] }
 0x23d   :  { %5003 = vst [vmem:[#allocation3 + $0x55c] sm:$0xf] %v5002_v2  ;;  %v5006_v4 = vld [vmem:[%s18959_s16 + $0x570] sm:$0xf]  ;;  %v5008_v5 = vld [vmem:[%s18959_s16 + $0x554] sm:$0xf] }
 0x23e   :  { %5005 = vst [vmem:[#allocation3 + $0x560] sm:$0xf] %v5004_v3  ;;  %5007 = vst [vmem:[#allocation3 + $0x564] sm:$0xf] %v5006_v4  ;;  %v5010_v6 = vld [vmem:[%s18959_s16 + $0x574] sm:$0xf] }
 0x23f   :  { %5009 = vst [vmem:[#allocation3 + $0x568] sm:$0xf] %v5008_v5  ;;  %v5012_v7 = vld [vmem:[%s18959_s16 + $0x558] sm:$0xf]  ;;  %5011 = vst [vmem:[#allocation3 + $0x56c] sm:$0xf] %v5010_v6 }
 0x240   :  { %v5014_v8 = vld [vmem:[%s18959_s16 + $0x578] sm:$0xf]  ;;  %5013 = vst [vmem:[#allocation3 + $0x570] sm:$0xf] %v5012_v7  ;;  %v5016_v9 = vld [vmem:[%s18959_s16 + $0x55c] sm:$0xf] }
 0x241   :  { %5015 = vst [vmem:[#allocation3 + $0x574] sm:$0xf] %v5014_v8  ;;  %v5022_v11 = vld [vmem:[%s18959_s16 + $0x5a0] sm:$0xf]  ;;  %5017 = vst [vmem:[#allocation3 + $0x578] sm:$0xf] %v5016_v9 }
 0x242   :  { %5019 = vst [vmem:[#allocation3 + $0x57c] sm:$0xff] %v5018_v10   ;;  %5023 = vst [vmem:[#allocation3 + $0x584] sm:$0xf] %v5022_v11  ;;  %v5024_v12 = vld [vmem:[%s18959_s16 + $0x584] sm:$0xf]  ;;  %v5050_v25 = vld [vmem:[%s18959_s16 + $0x5bc] sm:$0xff]  }
 0x243   :  { %v5026_v13 = vld [vmem:[%s18959_s16 + $0x5a4] sm:$0xf]  ;;  %v5028_v14 = vld [vmem:[%s18959_s16 + $0x588] sm:$0xf]  ;;  %5025 = vst [vmem:[#allocation3 + $0x588] sm:$0xf] %v5024_v12 }
 0x244   :  { %5027 = vst [vmem:[#allocation3 + $0x58c] sm:$0xf] %v5026_v13  ;;  %5029 = vst [vmem:[#allocation3 + $0x590] sm:$0xf] %v5028_v14  ;;  %v5030_v15 = vld [vmem:[%s18959_s16 + $0x5a8] sm:$0xf] }
 0x245   :  { %v5032_v16 = vld [vmem:[%s18959_s16 + $0x58c] sm:$0xf]  ;;  %5031 = vst [vmem:[#allocation3 + $0x594] sm:$0xf] %v5030_v15  ;;  %v5036_v18 = vld [vmem:[%s18959_s16 + $0x590] sm:$0xf] }
 0x246   :  { %v5034_v17 = vld [vmem:[%s18959_s16 + $0x5ac] sm:$0xf]  ;;  %5033 = vst [vmem:[#allocation3 + $0x598] sm:$0xf] %v5032_v16  ;;  %v5038_v19 = vld [vmem:[%s18959_s16 + $0x5b0] sm:$0xf] }
 0x247   :  { %5035 = vst [vmem:[#allocation3 + $0x59c] sm:$0xf] %v5034_v17  ;;  %v5040_v20 = vld [vmem:[%s18959_s16 + $0x594] sm:$0xf]  ;;  %5037 = vst [vmem:[#allocation3 + $0x5a0] sm:$0xf] %v5036_v18 }
 0x248   :  { %5039 = vst [vmem:[#allocation3 + $0x5a4] sm:$0xf] %v5038_v19  ;;  %5041 = vst [vmem:[#allocation3 + $0x5a8] sm:$0xf] %v5040_v20  ;;  %v5042_v21 = vld [vmem:[%s18959_s16 + $0x5b4] sm:$0xf] }
 0x249   :  { %v5044_v22 = vld [vmem:[%s18959_s16 + $0x598] sm:$0xf]  ;;  %5043 = vst [vmem:[#allocation3 + $0x5ac] sm:$0xf] %v5042_v21  ;;  %v5048_v24 = vld [vmem:[%s18959_s16 + $0x59c] sm:$0xf] }
 0x24a   :  { %v5046_v23 = vld [vmem:[%s18959_s16 + $0x5b8] sm:$0xf]  ;;  %5045 = vst [vmem:[#allocation3 + $0x5b0] sm:$0xf] %v5044_v22  ;;  %v5054_v26 = vld [vmem:[%s18959_s16 + $0x5e0] sm:$0xf] }
 0x24b   :  { %5047 = vst [vmem:[#allocation3 + $0x5b4] sm:$0xf] %v5046_v23  ;;  %5049 = vst [vmem:[#allocation3 + $0x5b8] sm:$0xf] %v5048_v24  ;;  %v5056_v27 = vld [vmem:[%s18959_s16 + $0x5c4] sm:$0xf] }
 0x24c   :  { %5051 = vst [vmem:[#allocation3 + $0x5bc] sm:$0xff] %v5050_v25   ;;  %5055 = vst [vmem:[#allocation3 + $0x5c4] sm:$0xf] %v5054_v26  ;;  %v5058_v28 = vld [vmem:[%s18959_s16 + $0x5e4] sm:$0xf]  ;;  %v5082_v40 = vld [vmem:[%s18959_s16 + $0x5fc] sm:$0xff]  }
 0x24d   :  { %v5060_v29 = vld [vmem:[%s18959_s16 + $0x5c8] sm:$0xf]  ;;  %5057 = vst [vmem:[#allocation3 + $0x5c8] sm:$0xf] %v5056_v27  ;;  %5059 = vst [vmem:[#allocation3 + $0x5cc] sm:$0xf] %v5058_v28 }
 0x24e   :  { %5061 = vst [vmem:[#allocation3 + $0x5d0] sm:$0xf] %v5060_v29  ;;  %v5062_v30 = vld [vmem:[%s18959_s16 + $0x5e8] sm:$0xf]  ;;  %v5064_v31 = vld [vmem:[%s18959_s16 + $0x5cc] sm:$0xf] }
 0x24f   :  { %v5066_v32 = vld [vmem:[%s18959_s16 + $0x5ec] sm:$0xf]  ;;  %5063 = vst [vmem:[#allocation3 + $0x5d4] sm:$0xf] %v5062_v30  ;;  %5065 = vst [vmem:[#allocation3 + $0x5d8] sm:$0xf] %v5064_v31 }
 0x250   :  { %5067 = vst [vmem:[#allocation3 + $0x5dc] sm:$0xf] %v5066_v32  ;;  %v5068_v33 = vld [vmem:[%s18959_s16 + $0x5d0] sm:$0xf]  ;;  %v5072_v35 = vld [vmem:[%s18959_s16 + $0x5d4] sm:$0xf] }
 0x251   :  { %v5070_v34 = vld [vmem:[%s18959_s16 + $0x5f0] sm:$0xf]  ;;  %5069 = vst [vmem:[#allocation3 + $0x5e0] sm:$0xf] %v5068_v33  ;;  %5073 = vst [vmem:[#allocation3 + $0x5e8] sm:$0xf] %v5072_v35 }
 0x252   :  { %5071 = vst [vmem:[#allocation3 + $0x5e4] sm:$0xf] %v5070_v34  ;;  %v5074_v36 = vld [vmem:[%s18959_s16 + $0x5f4] sm:$0xf]  ;;  %v5076_v37 = vld [vmem:[%s18959_s16 + $0x5d8] sm:$0xf] }
 0x253   :  { %v5078_v38 = vld [vmem:[%s18959_s16 + $0x5f8] sm:$0xf]  ;;  %5075 = vst [vmem:[#allocation3 + $0x5ec] sm:$0xf] %v5074_v36  ;;  %5077 = vst [vmem:[#allocation3 + $0x5f0] sm:$0xf] %v5076_v37 }
 0x254   :  { %5079 = vst [vmem:[#allocation3 + $0x5f4] sm:$0xf] %v5078_v38  ;;  %v5080_v39 = vld [vmem:[%s18959_s16 + $0x5dc] sm:$0xf]  ;;  %v5086_v41 = vld [vmem:[%s18959_s16 + $0x620] sm:$0xf] }
 0x255   :  { %5081 = vst [vmem:[#allocation3 + $0x5f8] sm:$0xf] %v5080_v39  ;;  %5083 = vst [vmem:[#allocation3 + $0x5fc] sm:$0xff] %v5082_v40   ;;  %v5088_v42 = vld [vmem:[%s18959_s16 + $0x604] sm:$0xf]  ;;  %v5114_v55 = vld [vmem:[%s18959_s16 + $0x63c] sm:$0xff]  }
 0x256   :  { %5087 = vst [vmem:[#allocation3 + $0x604] sm:$0xf] %v5086_v41  ;;  %v5090_v43 = vld [vmem:[%s18959_s16 + $0x624] sm:$0xf]  ;;  %v5092_v44 = vld [vmem:[%s18959_s16 + $0x608] sm:$0xf] }
 0x257   :  { %5089 = vst [vmem:[#allocation3 + $0x608] sm:$0xf] %v5088_v42  ;;  %5091 = vst [vmem:[#allocation3 + $0x60c] sm:$0xf] %v5090_v43  ;;  %v5094_v45 = vld [vmem:[%s18959_s16 + $0x628] sm:$0xf] }
 0x258   :  { %5093 = vst [vmem:[#allocation3 + $0x610] sm:$0xf] %v5092_v44  ;;  %v5096_v46 = vld [vmem:[%s18959_s16 + $0x60c] sm:$0xf]  ;;  %5095 = vst [vmem:[#allocation3 + $0x614] sm:$0xf] %v5094_v45 }
 0x259   :  { %v5098_v47 = vld [vmem:[%s18959_s16 + $0x62c] sm:$0xf]  ;;  %5097 = vst [vmem:[#allocation3 + $0x618] sm:$0xf] %v5096_v46  ;;  %v5100_v48 = vld [vmem:[%s18959_s16 + $0x610] sm:$0xf] }
 0x25a   :  { %5099 = vst [vmem:[#allocation3 + $0x61c] sm:$0xf] %v5098_v47  ;;  %v5102_v49 = vld [vmem:[%s18959_s16 + $0x630] sm:$0xf]  ;;  %v5104_v50 = vld [vmem:[%s18959_s16 + $0x614] sm:$0xf] }
 0x25b   :  { %5101 = vst [vmem:[#allocation3 + $0x620] sm:$0xf] %v5100_v48  ;;  %5103 = vst [vmem:[#allocation3 + $0x624] sm:$0xf] %v5102_v49  ;;  %v5106_v51 = vld [vmem:[%s18959_s16 + $0x634] sm:$0xf] }
 0x25c   :  { %5105 = vst [vmem:[#allocation3 + $0x628] sm:$0xf] %v5104_v50  ;;  %v5108_v52 = vld [vmem:[%s18959_s16 + $0x618] sm:$0xf]  ;;  %5107 = vst [vmem:[#allocation3 + $0x62c] sm:$0xf] %v5106_v51 }
 0x25d   :  { %v5110_v53 = vld [vmem:[%s18959_s16 + $0x638] sm:$0xf]  ;;  %5109 = vst [vmem:[#allocation3 + $0x630] sm:$0xf] %v5108_v52  ;;  %v5112_v54 = vld [vmem:[%s18959_s16 + $0x61c] sm:$0xf] }
 0x25e   :  { %5111 = vst [vmem:[#allocation3 + $0x634] sm:$0xf] %v5110_v53  ;;  %v5118_v56 = vld [vmem:[%s18959_s16 + $0x660] sm:$0xf]  ;;  %5113 = vst [vmem:[#allocation3 + $0x638] sm:$0xf] %v5112_v54 }
 0x25f   :  { %5115 = vst [vmem:[#allocation3 + $0x63c] sm:$0xff] %v5114_v55   ;;  %5119 = vst [vmem:[#allocation3 + $0x644] sm:$0xf] %v5118_v56  ;;  %v5120_v57 = vld [vmem:[%s18959_s16 + $0x644] sm:$0xf]  ;;  %v5146_v6 = vld [vmem:[%s18959_s16 + $0x67c] sm:$0xff]  }
 0x260   :  { %v5122_v58 = vld [vmem:[%s18959_s16 + $0x664] sm:$0xf]  ;;  %v5124_v59 = vld [vmem:[%s18959_s16 + $0x648] sm:$0xf]  ;;  %5121 = vst [vmem:[#allocation3 + $0x648] sm:$0xf] %v5120_v57 }
 0x261   :  { %5123 = vst [vmem:[#allocation3 + $0x64c] sm:$0xf] %v5122_v58  ;;  %5125 = vst [vmem:[#allocation3 + $0x650] sm:$0xf] %v5124_v59  ;;  %v5126_v60 = vld [vmem:[%s18959_s16 + $0x668] sm:$0xf] }
 0x262   :  { %v5128_v61 = vld [vmem:[%s18959_s16 + $0x64c] sm:$0xf]  ;;  %5127 = vst [vmem:[#allocation3 + $0x654] sm:$0xf] %v5126_v60  ;;  %v5132_v63 = vld [vmem:[%s18959_s16 + $0x650] sm:$0xf] }
 0x263   :  { %v5130_v62 = vld [vmem:[%s18959_s16 + $0x66c] sm:$0xf]  ;;  %5129 = vst [vmem:[#allocation3 + $0x658] sm:$0xf] %v5128_v61  ;;  %v5134_v0 = vld [vmem:[%s18959_s16 + $0x670] sm:$0xf] }
 0x264   :  { %5131 = vst [vmem:[#allocation3 + $0x65c] sm:$0xf] %v5130_v62  ;;  %v5136_v1 = vld [vmem:[%s18959_s16 + $0x654] sm:$0xf]  ;;  %5133 = vst [vmem:[#allocation3 + $0x660] sm:$0xf] %v5132_v63 }
 0x265   :  { %5135 = vst [vmem:[#allocation3 + $0x664] sm:$0xf] %v5134_v0  ;;  %5137 = vst [vmem:[#allocation3 + $0x668] sm:$0xf] %v5136_v1  ;;  %v5138_v2 = vld [vmem:[%s18959_s16 + $0x674] sm:$0xf] }
 0x266   :  { %v5140_v3 = vld [vmem:[%s18959_s16 + $0x658] sm:$0xf]  ;;  %5139 = vst [vmem:[#allocation3 + $0x66c] sm:$0xf] %v5138_v2  ;;  %v5144_v5 = vld [vmem:[%s18959_s16 + $0x65c] sm:$0xf] }
 0x267   :  { %v5142_v4 = vld [vmem:[%s18959_s16 + $0x678] sm:$0xf]  ;;  %5141 = vst [vmem:[#allocation3 + $0x670] sm:$0xf] %v5140_v3  ;;  %v5150_v7 = vld [vmem:[%s18959_s16 + $0x6a0] sm:$0xf] }
 0x268   :  { %5143 = vst [vmem:[#allocation3 + $0x674] sm:$0xf] %v5142_v4  ;;  %5145 = vst [vmem:[#allocation3 + $0x678] sm:$0xf] %v5144_v5  ;;  %v5152_v8 = vld [vmem:[%s18959_s16 + $0x684] sm:$0xf] }
 0x269   :  { %5147 = vst [vmem:[#allocation3 + $0x67c] sm:$0xff] %v5146_v6   ;;  %5151 = vst [vmem:[#allocation3 + $0x684] sm:$0xf] %v5150_v7  ;;  %v5154_v9 = vld [vmem:[%s18959_s16 + $0x6a4] sm:$0xf]  ;;  %v5178_v21 = vld [vmem:[%s18959_s16 + $0x6bc] sm:$0xff]  }
 0x26a   :  { %v5156_v10 = vld [vmem:[%s18959_s16 + $0x688] sm:$0xf]  ;;  %5153 = vst [vmem:[#allocation3 + $0x688] sm:$0xf] %v5152_v8  ;;  %5155 = vst [vmem:[#allocation3 + $0x68c] sm:$0xf] %v5154_v9 }
 0x26b   :  { %5157 = vst [vmem:[#allocation3 + $0x690] sm:$0xf] %v5156_v10  ;;  %v5158_v11 = vld [vmem:[%s18959_s16 + $0x6a8] sm:$0xf]  ;;  %v5160_v12 = vld [vmem:[%s18959_s16 + $0x68c] sm:$0xf] }
 0x26c   :  { %v5162_v13 = vld [vmem:[%s18959_s16 + $0x6ac] sm:$0xf]  ;;  %5159 = vst [vmem:[#allocation3 + $0x694] sm:$0xf] %v5158_v11  ;;  %5161 = vst [vmem:[#allocation3 + $0x698] sm:$0xf] %v5160_v12 }
 0x26d   :  { %5163 = vst [vmem:[#allocation3 + $0x69c] sm:$0xf] %v5162_v13  ;;  %v5164_v14 = vld [vmem:[%s18959_s16 + $0x690] sm:$0xf]  ;;  %v5168_v16 = vld [vmem:[%s18959_s16 + $0x694] sm:$0xf] }
 0x26e   :  { %v5166_v15 = vld [vmem:[%s18959_s16 + $0x6b0] sm:$0xf]  ;;  %5165 = vst [vmem:[#allocation3 + $0x6a0] sm:$0xf] %v5164_v14  ;;  %5169 = vst [vmem:[#allocation3 + $0x6a8] sm:$0xf] %v5168_v16 }
 0x26f   :  { %5167 = vst [vmem:[#allocation3 + $0x6a4] sm:$0xf] %v5166_v15  ;;  %v5170_v17 = vld [vmem:[%s18959_s16 + $0x6b4] sm:$0xf]  ;;  %v5172_v18 = vld [vmem:[%s18959_s16 + $0x698] sm:$0xf] }
 0x270   :  { %v5174_v19 = vld [vmem:[%s18959_s16 + $0x6b8] sm:$0xf]  ;;  %5171 = vst [vmem:[#allocation3 + $0x6ac] sm:$0xf] %v5170_v17  ;;  %5173 = vst [vmem:[#allocation3 + $0x6b0] sm:$0xf] %v5172_v18 }
 0x271   :  { %5175 = vst [vmem:[#allocation3 + $0x6b4] sm:$0xf] %v5174_v19  ;;  %v5176_v20 = vld [vmem:[%s18959_s16 + $0x69c] sm:$0xf]  ;;  %v5182_v22 = vld [vmem:[%s18959_s16 + $0x6e0] sm:$0xf] }
 0x272   :  { %5177 = vst [vmem:[#allocation3 + $0x6b8] sm:$0xf] %v5176_v20  ;;  %5179 = vst [vmem:[#allocation3 + $0x6bc] sm:$0xff] %v5178_v21   ;;  %v5184_v23 = vld [vmem:[%s18959_s16 + $0x6c4] sm:$0xf]  ;;  %v5210_v36 = vld [vmem:[%s18959_s16 + $0x6fc] sm:$0xff]  }
 0x273   :  { %5183 = vst [vmem:[#allocation3 + $0x6c4] sm:$0xf] %v5182_v22  ;;  %v5186_v24 = vld [vmem:[%s18959_s16 + $0x6e4] sm:$0xf]  ;;  %v5188_v25 = vld [vmem:[%s18959_s16 + $0x6c8] sm:$0xf] }
 0x274   :  { %5185 = vst [vmem:[#allocation3 + $0x6c8] sm:$0xf] %v5184_v23  ;;  %5187 = vst [vmem:[#allocation3 + $0x6cc] sm:$0xf] %v5186_v24  ;;  %v5190_v26 = vld [vmem:[%s18959_s16 + $0x6e8] sm:$0xf] }
 0x275   :  { %5189 = vst [vmem:[#allocation3 + $0x6d0] sm:$0xf] %v5188_v25  ;;  %v5192_v27 = vld [vmem:[%s18959_s16 + $0x6cc] sm:$0xf]  ;;  %5191 = vst [vmem:[#allocation3 + $0x6d4] sm:$0xf] %v5190_v26 }
 0x276   :  { %v5194_v28 = vld [vmem:[%s18959_s16 + $0x6ec] sm:$0xf]  ;;  %5193 = vst [vmem:[#allocation3 + $0x6d8] sm:$0xf] %v5192_v27  ;;  %v5196_v29 = vld [vmem:[%s18959_s16 + $0x6d0] sm:$0xf] }
 0x277   :  { %5195 = vst [vmem:[#allocation3 + $0x6dc] sm:$0xf] %v5194_v28  ;;  %v5198_v30 = vld [vmem:[%s18959_s16 + $0x6f0] sm:$0xf]  ;;  %v5200_v31 = vld [vmem:[%s18959_s16 + $0x6d4] sm:$0xf] }
 0x278   :  { %5197 = vst [vmem:[#allocation3 + $0x6e0] sm:$0xf] %v5196_v29  ;;  %5199 = vst [vmem:[#allocation3 + $0x6e4] sm:$0xf] %v5198_v30  ;;  %v5202_v32 = vld [vmem:[%s18959_s16 + $0x6f4] sm:$0xf] }
 0x279   :  { %5201 = vst [vmem:[#allocation3 + $0x6e8] sm:$0xf] %v5200_v31  ;;  %v5204_v33 = vld [vmem:[%s18959_s16 + $0x6d8] sm:$0xf]  ;;  %5203 = vst [vmem:[#allocation3 + $0x6ec] sm:$0xf] %v5202_v32 }
 0x27a   :  { %v5206_v34 = vld [vmem:[%s18959_s16 + $0x6f8] sm:$0xf]  ;;  %5205 = vst [vmem:[#allocation3 + $0x6f0] sm:$0xf] %v5204_v33  ;;  %v5208_v35 = vld [vmem:[%s18959_s16 + $0x6dc] sm:$0xf] }
 0x27b   :  { %5207 = vst [vmem:[#allocation3 + $0x6f4] sm:$0xf] %v5206_v34  ;;  %v5214_v37 = vld [vmem:[%s18959_s16 + $0x720] sm:$0xf]  ;;  %5209 = vst [vmem:[#allocation3 + $0x6f8] sm:$0xf] %v5208_v35 }
 0x27c   :  { %5211 = vst [vmem:[#allocation3 + $0x6fc] sm:$0xff] %v5210_v36   ;;  %5215 = vst [vmem:[#allocation3 + $0x704] sm:$0xf] %v5214_v37  ;;  %v5216_v38 = vld [vmem:[%s18959_s16 + $0x704] sm:$0xf]  ;;  %v5242_v51 = vld [vmem:[%s18959_s16 + $0x73c] sm:$0xff]  }
 0x27d   :  { %v5218_v39 = vld [vmem:[%s18959_s16 + $0x724] sm:$0xf]  ;;  %v5220_v40 = vld [vmem:[%s18959_s16 + $0x708] sm:$0xf]  ;;  %5217 = vst [vmem:[#allocation3 + $0x708] sm:$0xf] %v5216_v38 }
 0x27e   :  { %5219 = vst [vmem:[#allocation3 + $0x70c] sm:$0xf] %v5218_v39  ;;  %5221 = vst [vmem:[#allocation3 + $0x710] sm:$0xf] %v5220_v40  ;;  %v5222_v41 = vld [vmem:[%s18959_s16 + $0x728] sm:$0xf] }
 0x27f   :  { %v5224_v42 = vld [vmem:[%s18959_s16 + $0x70c] sm:$0xf]  ;;  %5223 = vst [vmem:[#allocation3 + $0x714] sm:$0xf] %v5222_v41  ;;  %v5228_v44 = vld [vmem:[%s18959_s16 + $0x710] sm:$0xf] }
 0x280   :  { %v5226_v43 = vld [vmem:[%s18959_s16 + $0x72c] sm:$0xf]  ;;  %5225 = vst [vmem:[#allocation3 + $0x718] sm:$0xf] %v5224_v42  ;;  %v5230_v45 = vld [vmem:[%s18959_s16 + $0x730] sm:$0xf] }
 0x281   :  { %5227 = vst [vmem:[#allocation3 + $0x71c] sm:$0xf] %v5226_v43  ;;  %v5232_v46 = vld [vmem:[%s18959_s16 + $0x714] sm:$0xf]  ;;  %5229 = vst [vmem:[#allocation3 + $0x720] sm:$0xf] %v5228_v44 }
 0x282   :  { %5231 = vst [vmem:[#allocation3 + $0x724] sm:$0xf] %v5230_v45  ;;  %5233 = vst [vmem:[#allocation3 + $0x728] sm:$0xf] %v5232_v46  ;;  %v5234_v47 = vld [vmem:[%s18959_s16 + $0x734] sm:$0xf] }
 0x283   :  { %v5236_v48 = vld [vmem:[%s18959_s16 + $0x718] sm:$0xf]  ;;  %5235 = vst [vmem:[#allocation3 + $0x72c] sm:$0xf] %v5234_v47  ;;  %v5240_v50 = vld [vmem:[%s18959_s16 + $0x71c] sm:$0xf] }
 0x284   :  { %v5238_v49 = vld [vmem:[%s18959_s16 + $0x738] sm:$0xf]  ;;  %5237 = vst [vmem:[#allocation3 + $0x730] sm:$0xf] %v5236_v48  ;;  %v5246_v52 = vld [vmem:[%s18959_s16 + $0x760] sm:$0xf] }
 0x285   :  { %5239 = vst [vmem:[#allocation3 + $0x734] sm:$0xf] %v5238_v49  ;;  %5241 = vst [vmem:[#allocation3 + $0x738] sm:$0xf] %v5240_v50  ;;  %v5248_v53 = vld [vmem:[%s18959_s16 + $0x744] sm:$0xf] }
 0x286   :  { %5243 = vst [vmem:[#allocation3 + $0x73c] sm:$0xff] %v5242_v51   ;;  %5247 = vst [vmem:[#allocation3 + $0x744] sm:$0xf] %v5246_v52  ;;  %v5250_v54 = vld [vmem:[%s18959_s16 + $0x764] sm:$0xf]  ;;  %v5274_v2 = vld [vmem:[%s18959_s16 + $0x77c] sm:$0xff]  }
 0x287   :  { %v5252_v55 = vld [vmem:[%s18959_s16 + $0x748] sm:$0xf]  ;;  %5249 = vst [vmem:[#allocation3 + $0x748] sm:$0xf] %v5248_v53  ;;  %5251 = vst [vmem:[#allocation3 + $0x74c] sm:$0xf] %v5250_v54 }
 0x288   :  { %5253 = vst [vmem:[#allocation3 + $0x750] sm:$0xf] %v5252_v55  ;;  %v5254_v56 = vld [vmem:[%s18959_s16 + $0x768] sm:$0xf]  ;;  %v5256_v57 = vld [vmem:[%s18959_s16 + $0x74c] sm:$0xf] }
 0x289   :  { %v5258_v58 = vld [vmem:[%s18959_s16 + $0x76c] sm:$0xf]  ;;  %5255 = vst [vmem:[#allocation3 + $0x754] sm:$0xf] %v5254_v56  ;;  %5257 = vst [vmem:[#allocation3 + $0x758] sm:$0xf] %v5256_v57 }
 0x28a   :  { %5259 = vst [vmem:[#allocation3 + $0x75c] sm:$0xf] %v5258_v58  ;;  %v5260_v59 = vld [vmem:[%s18959_s16 + $0x750] sm:$0xf]  ;;  %v5264_v61 = vld [vmem:[%s18959_s16 + $0x754] sm:$0xf] }
 0x28b   :  { %v5262_v60 = vld [vmem:[%s18959_s16 + $0x770] sm:$0xf]  ;;  %5261 = vst [vmem:[#allocation3 + $0x760] sm:$0xf] %v5260_v59  ;;  %5265 = vst [vmem:[#allocation3 + $0x768] sm:$0xf] %v5264_v61 }
 0x28c   :  { %5263 = vst [vmem:[#allocation3 + $0x764] sm:$0xf] %v5262_v60  ;;  %v5266_v62 = vld [vmem:[%s18959_s16 + $0x774] sm:$0xf]  ;;  %v5268_v63 = vld [vmem:[%s18959_s16 + $0x758] sm:$0xf] }
 0x28d   :  { %v5270_v0 = vld [vmem:[%s18959_s16 + $0x778] sm:$0xf]  ;;  %5267 = vst [vmem:[#allocation3 + $0x76c] sm:$0xf] %v5266_v62  ;;  %5269 = vst [vmem:[#allocation3 + $0x770] sm:$0xf] %v5268_v63 }
 0x28e   :  { %5271 = vst [vmem:[#allocation3 + $0x774] sm:$0xf] %v5270_v0  ;;  %v5272_v1 = vld [vmem:[%s18959_s16 + $0x75c] sm:$0xf]  ;;  %v5278_v3 = vld [vmem:[%s18959_s16 + $0x7a0] sm:$0xf] }
 0x28f   :  { %5273 = vst [vmem:[#allocation3 + $0x778] sm:$0xf] %v5272_v1  ;;  %5275 = vst [vmem:[#allocation3 + $0x77c] sm:$0xff] %v5274_v2   ;;  %v5280_v4 = vld [vmem:[%s18959_s16 + $0x784] sm:$0xf]  ;;  %v5306_v17 = vld [vmem:[%s18959_s16 + $0x7bc] sm:$0xff]  }
 0x290   :  { %5279 = vst [vmem:[#allocation3 + $0x784] sm:$0xf] %v5278_v3  ;;  %v5282_v5 = vld [vmem:[%s18959_s16 + $0x7a4] sm:$0xf]  ;;  %v5284_v6 = vld [vmem:[%s18959_s16 + $0x788] sm:$0xf] }
 0x291   :  { %5281 = vst [vmem:[#allocation3 + $0x788] sm:$0xf] %v5280_v4  ;;  %5283 = vst [vmem:[#allocation3 + $0x78c] sm:$0xf] %v5282_v5  ;;  %v5286_v7 = vld [vmem:[%s18959_s16 + $0x7a8] sm:$0xf] }
 0x292   :  { %5285 = vst [vmem:[#allocation3 + $0x790] sm:$0xf] %v5284_v6  ;;  %v5288_v8 = vld [vmem:[%s18959_s16 + $0x78c] sm:$0xf]  ;;  %5287 = vst [vmem:[#allocation3 + $0x794] sm:$0xf] %v5286_v7 }
 0x293   :  { %v5290_v9 = vld [vmem:[%s18959_s16 + $0x7ac] sm:$0xf]  ;;  %5289 = vst [vmem:[#allocation3 + $0x798] sm:$0xf] %v5288_v8  ;;  %v5292_v10 = vld [vmem:[%s18959_s16 + $0x790] sm:$0xf] }
 0x294   :  { %5291 = vst [vmem:[#allocation3 + $0x79c] sm:$0xf] %v5290_v9  ;;  %v5294_v11 = vld [vmem:[%s18959_s16 + $0x7b0] sm:$0xf]  ;;  %v5296_v12 = vld [vmem:[%s18959_s16 + $0x794] sm:$0xf] }
 0x295   :  { %5293 = vst [vmem:[#allocation3 + $0x7a0] sm:$0xf] %v5292_v10  ;;  %5295 = vst [vmem:[#allocation3 + $0x7a4] sm:$0xf] %v5294_v11  ;;  %v5298_v13 = vld [vmem:[%s18959_s16 + $0x7b4] sm:$0xf] }
 0x296   :  { %5297 = vst [vmem:[#allocation3 + $0x7a8] sm:$0xf] %v5296_v12  ;;  %v5300_v14 = vld [vmem:[%s18959_s16 + $0x798] sm:$0xf]  ;;  %5299 = vst [vmem:[#allocation3 + $0x7ac] sm:$0xf] %v5298_v13 }
 0x297   :  { %v5302_v15 = vld [vmem:[%s18959_s16 + $0x7b8] sm:$0xf]  ;;  %5301 = vst [vmem:[#allocation3 + $0x7b0] sm:$0xf] %v5300_v14  ;;  %v5304_v16 = vld [vmem:[%s18959_s16 + $0x79c] sm:$0xf] }
 0x298   :  { %5303 = vst [vmem:[#allocation3 + $0x7b4] sm:$0xf] %v5302_v15  ;;  %v5310_v18 = vld [vmem:[%s18959_s16 + $0x7e0] sm:$0xf]  ;;  %5305 = vst [vmem:[#allocation3 + $0x7b8] sm:$0xf] %v5304_v16 }
 0x299   :  { %5307 = vst [vmem:[#allocation3 + $0x7bc] sm:$0xff] %v5306_v17   ;;  %5311 = vst [vmem:[#allocation3 + $0x7c4] sm:$0xf] %v5310_v18  ;;  %v5312_v19 = vld [vmem:[%s18959_s16 + $0x7c4] sm:$0xf] }
 0x29a   :  { %v5314_v20 = vld [vmem:[%s18959_s16 + $0x7e4] sm:$0xf]  ;;  %v5316_v21 = vld [vmem:[%s18959_s16 + $0x7c8] sm:$0xf]  ;;  %5313 = vst [vmem:[#allocation3 + $0x7c8] sm:$0xf] %v5312_v19 }
 0x29b   :  { %5315 = vst [vmem:[#allocation3 + $0x7cc] sm:$0xf] %v5314_v20  ;;  %5317 = vst [vmem:[#allocation3 + $0x7d0] sm:$0xf] %v5316_v21  ;;  %v5318_v22 = vld [vmem:[%s18959_s16 + $0x7e8] sm:$0xf] }
 0x29c   :  { %v5320_v23 = vld [vmem:[%s18959_s16 + $0x7cc] sm:$0xf]  ;;  %5319 = vst [vmem:[#allocation3 + $0x7d4] sm:$0xf] %v5318_v22  ;;  %v5324_v25 = vld [vmem:[%s18959_s16 + $0x7d0] sm:$0xf] }
 0x29d   :  { %v5322_v24 = vld [vmem:[%s18959_s16 + $0x7ec] sm:$0xf]  ;;  %5321 = vst [vmem:[#allocation3 + $0x7d8] sm:$0xf] %v5320_v23  ;;  %v5326_v26 = vld [vmem:[%s18959_s16 + $0x7f0] sm:$0xf] }
 0x29e   :  { %5323 = vst [vmem:[#allocation3 + $0x7dc] sm:$0xf] %v5322_v24  ;;  %v5328_v27 = vld [vmem:[%s18959_s16 + $0x7d4] sm:$0xf]  ;;  %5325 = vst [vmem:[#allocation3 + $0x7e0] sm:$0xf] %v5324_v25 }
 0x29f   :  { %5327 = vst [vmem:[#allocation3 + $0x7e4] sm:$0xf] %v5326_v26  ;;  %5329 = vst [vmem:[#allocation3 + $0x7e8] sm:$0xf] %v5328_v27  ;;  %v5330_v28 = vld [vmem:[%s18959_s16 + $0x7f4] sm:$0xf] }
 0x2a0   :  { %v5332_v29 = vld [vmem:[%s18959_s16 + $0x7d8] sm:$0xf]  ;;  %5331 = vst [vmem:[#allocation3 + $0x7ec] sm:$0xf] %v5330_v28  ;;  %v5336_v31 = vld [vmem:[%s18959_s16 + $0x7dc] sm:$0xf] }
 0x2a1   :  { %v5334_v30 = vld [vmem:[%s18959_s16 + $0x7f8] sm:$0xf]  ;;  %5333 = vst [vmem:[#allocation3 + $0x7f0] sm:$0xf] %v5332_v29  ;;  %v5338_v32 = vld [vmem:[%s18959_s16 + $0x7fc] sm:$0xf] }
 0x2a2   :  { %5335 = vst [vmem:[#allocation3 + $0x7f4] sm:$0xf] %v5334_v30  ;;  %5337 = vst [vmem:[#allocation3 + $0x7f8] sm:$0xf] %v5336_v31 }
 0x2a3   :  { %5339 = vst [vmem:[#allocation3 + $0x7fc] sm:$0xf] %v5338_v32 }
 0x2a4   :  { %8475 = vsyncadd [#allocation4 + $0x1], 32768  ;;  %s18984_s2 = sld [smem:[#allocation9_spill]]  ;;  %v15091_v39 = vmov 0.0   ;;  %v15092_v44 = vmov 0   ;;  %v8500_v58 = vld [vmem:[%s18953_s10] sm:$0xff]  ;;  %v8643_v16 = vlaneseq }
 0x2a5   :  { %8476 = vst [vmem:[%s18968_s25] sm:$0xff] %v15091_v39  ;;  %8477 = vst [vmem:[%s18968_s25 + $0x8] sm:$0x3] %v15091_v39  ;;  %8601 = vmatprep.mubr.f32.mxu0 %v15091_v39  ;;  %14764 = vset.pattern.permute.xlu0 %v15092_v44  ;;  %v8502_v59 = vld [vmem:[%s18953_s10 + $0x10] sm:$0xff]  ;;  %v8501_v61 = vld [vmem:[%s18953_s10 + $0x8] sm:$0xff]  ;;  %s18985_s26 = sld [smem:[#allocation18_spill]]  ;;  %vm8524_vm0 = vcmask 588800  }
 0x2a6   :  { %14765 = vset.pattern.permute.xlu1 %v15092_v44  ;;  %8506 = vperm.xlu0 %14764, %v8500_v58   ;;  %v8503_v63 = vld [vmem:[%s18953_s10 + $0x18] sm:$0xff]  ;;  %v14768_v1 = vld [vmem:[%s18956_s13 + $0x4] ss:$8 sps:$4 sm:$0xff]   ;;  %v14766_v3 = vld [vmem:[%s18956_s13] ss:$8 sps:$4 sm:$0xff]   ;;  %s18986_s5 = sld [smem:[#allocation10_spill]] }
 0x2a7   :  { %8516 = vperm.xlu1 %14765, %v8502_v59   ;;  %v14771_v4 = vld [vmem:[%s18956_s13 + $0x14] ss:$8 sps:$4 sm:$0xff]   ;;  %v14769_v6 = vld [vmem:[%s18956_s13 + $0x10] ss:$8 sps:$4 sm:$0xff]   ;;  %vm8673_vm1 = vcmask 261120   ;;  %v17852_v25 = vshrl.u32 %v8643_v16, 7 }
 0x2a9   :  { %v17861_v32 = vsub.s32 0, %v17852_v25 }
 0x2aa   :  { %v8483_v33 = vld [vmem:[%s18984_s2 + $0x8] sm:$0xff]  ;;  %v8485_v34 = vld [vmem:[%s18984_s2 + $0x18] sm:$0xff]  ;;  %v8482_v36 = vld [vmem:[%s18984_s2] sm:$0xff]  ;;  %8511 = vperm.xlu0 %14764, %v8501_v61  }
 0x2ab   :  { %v14690_v35 = vpack.c.bf16 %v8485_v34, %v8483_v33  ;;  %v8484_v37 = vld [vmem:[%s18984_s2 + $0x10] sm:$0xff]  ;;  %v8487_v38 = vld [vmem:[%s18984_s2 + $0x28] sm:$0xff]  ;;  %v8489_v41 = vld [vmem:[%s18984_s2 + $0x38] sm:$0xff]  ;;  %8521 = vperm.xlu1 %14765, %v8503_v63  }
 0x2ac   :  { %v14692_v40 = vpack.c.bf16 %v8484_v37, %v8482_v36  ;;  %v8486_v42 = vld [vmem:[%s18984_s2 + $0x20] sm:$0xff]  ;;  %v8488_v43 = vld [vmem:[%s18984_s2 + $0x30] sm:$0xff]  ;;  %v14694_v45 = vpack.c.bf16 %v8489_v41, %v8487_v38  ;;  %v8491_v46 = vld [vmem:[%s18984_s2 + $0x48] sm:$0xff]  ;;  %v17869_v36 = vsub.s32 1, %v17852_v25 }
 0x2ad   :  { %14691 = vmatprep.subr.bf16.mxu0 %v14690_v35  ;;  %v8493_v47 = vld [vmem:[%s18984_s2 + $0x58] sm:$0xff]  ;;  %v14696_v48 = vpack.c.bf16 %v8488_v43, %v8486_v42  ;;  %v8490_v50 = vld [vmem:[%s18984_s2 + $0x40] sm:$0xff]  ;;  %v8492_v51 = vld [vmem:[%s18984_s2 + $0x50] sm:$0xff] }
 0x2ae   :  { %14693 = vmatpush1.bf16.msra.mxu0 %v14692_v40  ;;  %v14698_v49 = vpack.c.bf16 %v8493_v47, %v8491_v46  ;;  %v8495_v52 = vld [vmem:[%s18984_s2 + $0x68] sm:$0xff]  ;;  %v8497_v53 = vld [vmem:[%s18984_s2 + $0x78] sm:$0xff]  ;;  %v14700_v54 = vpack.c.bf16 %v8492_v51, %v8490_v50  ;;  %v8494_v56 = vld [vmem:[%s18984_s2 + $0x60] sm:$0xff] }
 0x2af   :  { %14695 = vmatprep.subr.bf16.mxu0 %v14694_v45  ;;  %v14702_v55 = vpack.c.bf16 %v8497_v53, %v8495_v52  ;;  %v8496_v57 = vld [vmem:[%s18984_s2 + $0x70] sm:$0xff]  ;;  %v8499_v62 = vld [vmem:[%s18984_s2 + $0x88] sm:$0xff]  ;;  %v8498_v0 = vld [vmem:[%s18984_s2 + $0x80] sm:$0xff] }
 0x2b0   :  { %v14704_v60 = vpack.c.bf16 %v8496_v57, %v8494_v56  ;;  %v8478_v2 = vld [vmem:[%s18985_s26] sm:$0xff]  ;;  %v8479_v5 = vld [vmem:[%s18985_s26 + $0x8] sm:$0xff]  ;;  %v8480_v7 = vld [vmem:[%s18985_s26 + $0x10] sm:$0xff] }
 0x2b1   :  { %v8481_v8 = vld [vmem:[%s18985_s26 + $0x18] sm:$0xff]  ;;  %v8634_v9 = vld [vmem:[%s18986_s5] sm:$0xff]  ;;  %v8635_v10 = vld [vmem:[%s18986_s5 + $0x8] sm:$0xff] }
 0x2b2   :  { %14697 = vmatpush1.bf16.msra.mxu0 %v14696_v48  ;;  %v8636_v11 = vpack.c.bf16 %v8635_v10, %v8634_v9  ;;  %v8641_v35 = vld [vmem:[%s18957_s14] sm:$0x3] }
 0x2b3   :  { %14699 = vmatprep.subr.bf16.mxu0 %v14698_v49  ;;  %v8646_v43 = vrot.slane %v8641_v35, %v17861_v32  ;;  %v8650_v46 = vrot.slane %v8641_v35, %v17869_v36 }
 0x2b6   :  { %14701 = vmatpush1.bf16.msra.mxu0 %v14700_v54 }
 0x2b7   :  { %14703 = vmatprep.subr.bf16.mxu0 %v14702_v55 }
 0x2ba   :  { %14705 = vmatpush1.bf16.msra.mxu0 %v14704_v60 }
 0x2bb   :  { %8553 = vmatprep.subr.mxu0 %v8499_v62 }
 0x2be   :  { %8554 = vmatpush1.msra.mxu0 %v8498_v0 }
 0x2bf   :  { %13899 = vmatmul.mubr.msk.f32.vlgmr.msra.gmra.mrb[0].mxu0 %vm8524_vm0, %v8478_v2  ;;  %8677 = vmatprep.subr.bf16.mxu0 %v14768_v1 }
 0x2c0   :  { %8678 = vmatpush1.bf16.msra.mxu0 %v14766_v3  ;;  %8607 = vmatprep.mubr.f32.mxu0 %v15091_v39 }
 0x2c1   :  { %8679 = vmatprep.subr.bf16.mxu0 %v14771_v4 }
 0x2c3   :  { %13900 = vmatmul.mubr.msk.f32.gmra.mrb[2].mxu0 %vm8524_vm0, %v8479_v5 }
 0x2c4   :  { %8613 = vmatprep.mubr.f32.mxu0 %v15091_v39  ;;  %8680 = vmatpush1.bf16.msra.mxu0 %v14769_v6 }
 0x2c7   :  { %13901 = vmatmul.mubr.msk.f32.gmra.mrb[4].mxu0 %vm8524_vm0, %v8480_v7 }
 0x2c8   :  { %8619 = vmatprep.mubr.f32.mxu0 %v15091_v39 }
 0x2cb   :  { %13902 = vmatmul.mubr.msk.f32.gmra.mrb[6].mxu0 %vm8524_vm0, %v8481_v8 }
 0x2cc   :  { %8709 = vmatprep.mubr.bf16.mxu0 %v15092_v44 }
 0x2cf   :  { %13907 = vmatmul.mubr.msk.bf16.vlgmr.msra.gmra.mrb[8].mxu0 %vm8673_vm1, %v8636_v11 }
 0x325   :  { %v8507_v12 = vpop.permute.xlu0 %8506 }
 0x326   :  { %v8517_v22 = vpop.permute.xlu1 %8516 }
 0x329   :  { %v8512_v18 = vpop.permute.xlu0 %8511 }
 0x32a   :  { %v8522_v34 = vpop.permute.xlu1 %8521 }
 0x392   :  { %v8603_v13 = vpop.f32.mrb[0].mxu0 }
 0x393   :  { %v17846_v14 = vadd.f32 %v8603_v13, %v8507_v12  ;;  %v8605_v15 = vpop.f32.mrb[1].mxu0 }
 0x394   :  { %v8606_v17 = vadd.f32 %v8605_v15, %v8507_v12 }
 0x395   :  { %v8626_v19 = vmax.f32 %v17846_v14, 0.0 }
 0x396   :  { %v8627_v20 = vmax.f32 %v8606_v17, 0.0  ;;  %v8609_v21 = vpop.f32.mrb[2].mxu0 }
 0x397   :  { %v17849_v23 = vadd.f32 %v8609_v21, %v8512_v18  ;;  %v8611_v24 = vpop.f32.mrb[3].mxu0 }
 0x398   :  { %v17854_v26 = vadd.f32 %v8611_v24, %v8512_v18 }
 0x399   :  { %v8628_v27 = vmax.f32 %v17849_v23, 0.0 }
 0x39a   :  { %v8629_v28 = vmax.f32 %v17854_v26, 0.0  ;;  %v8615_v29 = vpop.f32.mrb[4].mxu0 }
 0x39b   :  { %v17858_v30 = vadd.f32 %v8615_v29, %v8517_v22  ;;  %v8617_v31 = vpop.f32.mrb[5].mxu0 }
 0x39c   :  { %v17863_v33 = vadd.f32 %v8617_v31, %v8517_v22 }
 0x39d   :  { %v8630_v37 = vmax.f32 %v17858_v30, 0.0 }
 0x39e   :  { %v8631_v38 = vmax.f32 %v17863_v33, 0.0  ;;  %v8621_v40 = vpop.f32.mrb[6].mxu0 }
 0x39f   :  { %v17873_v41 = vadd.f32 %v8621_v40, %v8522_v34  ;;  %v8623_v42 = vpop.f32.mrb[7].mxu0 }
 0x3a0   :  { %v17876_v45 = vadd.f32 %v8623_v42, %v8522_v34 }
 0x3a1   :  { %v8632_v47 = vmax.f32 %v17873_v41, 0.0 }
 0x3a2   :  { %v8633_v48 = vmax.f32 %v17876_v45, 0.0  ;;  %v8711_v49 = vpop.f32.mrb[8].mxu0 }
 0x3a3   :  { %v17881_v50 = vadd.f32 %v8711_v49, %v8646_v43  ;;  %v8713_v51 = vpop.f32.mrb[9].mxu0 }
 0x3a4   :  { %v17883_v52 = vadd.f32 %v8713_v51, %v8650_v46  ;;  %v8715_v53 = vpop.f32.mrb[10].mxu0 }
 0x3a5   :  { %v17885_v54 = vadd.f32 %v8715_v53, %v8646_v43  ;;  %v8717_v55 = vpop.f32.mrb[11].mxu0 }
 0x3a6   :  { %v17887_v56 = vadd.f32 %v8717_v55, %v8650_v46 }
 0x3a7   :  { %15071 = dma.done.wait [#allocation4], 65536 }
 0x3a8   :  { %15072 = vsyncadd [#allocation4], 4294901760  ;;  %v17889_v57 = vpack.c.bf16 %v8627_v20, %v8627_v20  ;;  %14772 = vset.pattern.permute.xlu0 %v15092_v44  ;;  %v8759_v59 = vld [vmem:[#allocation2 + $0x108] sm:$0xff]  ;;  %v8758_v61 = vld [vmem:[#allocation2 + $0x100] sm:$0xff]  ;;  %vm10260_vm5 = vcmask 1041408   ;;  %vm10253_vm8 = vcmask 15360  }
 0x3a9   :  { %v8727_v60 = vld [vmem:[#allocation2 + $0x8] sm:$0xff]  ;;  %8796 = vmatprep.subr.bf16.mxu1 %v8759_v59  ;;  %v8726_v62 = vld [vmem:[#allocation2] sm:$0xff]  ;;  %v8761_v63 = vld [vmem:[#allocation2 + $0x118] sm:$0xff]  ;;  %s18987_s16 = sld [smem:[#allocation13_spill]]  ;;  %vm10360_vm13 = vcmask 130048   ;;  %s18988_s10 = sld [smem:[#allocation12_spill]] }
 0x3aa   :  { %v8793_v58 = vrot.slane %v17889_v57, 1  ;;  %8869 = vmatprep.mubr.bf16.mxu0 %v17889_v57  ;;  %8837 = vmatprep.subr.bf16.mxu0 %v8727_v60  ;;  %v8729_v0 = vld [vmem:[#allocation2 + $0x18] sm:$0xff]  ;;  %v8760_v1 = vld [vmem:[#allocation2 + $0x110] sm:$0xff]  ;;  %v8763_v3 = vld [vmem:[#allocation2 + $0x128] sm:$0xff] }
 0x3ab   :  { %8797 = vmatpush1.bf16.msra.mxu1 %v8758_v61  ;;  %8838 = vmatpush1.bf16.msra.mxu0 %v8726_v62  ;;  %v8728_v2 = vld [vmem:[#allocation2 + $0x10] sm:$0xff]  ;;  %v8731_v4 = vld [vmem:[#allocation2 + $0x28] sm:$0xff]  ;;  %v8762_v5 = vld [vmem:[#allocation2 + $0x120] sm:$0xff] }
 0x3ac   :  { %8828 = vmatprep.mubr.bf16.mxu1 %v8793_v58  ;;  %8798 = vmatprep.subr.bf16.mxu1 %v8761_v63  ;;  %v8730_v6 = vld [vmem:[#allocation2 + $0x20] sm:$0xff]  ;;  %v8765_v7 = vld [vmem:[#allocation2 + $0x138] sm:$0xff]  ;;  %v8764_v9 = vld [vmem:[#allocation2 + $0x130] sm:$0xff] }
 0x3ad   :  { %8839 = vmatprep.subr.bf16.mxu0 %v8729_v0  ;;  %v8733_v8 = vld [vmem:[#allocation2 + $0x38] sm:$0xff]  ;;  %v8732_v10 = vld [vmem:[#allocation2 + $0x30] sm:$0xff]  ;;  %v8767_v11 = vld [vmem:[#allocation2 + $0x148] sm:$0xff] }
 0x3ae   :  { %v8735_v12 = vld [vmem:[#allocation2 + $0x48] sm:$0xff]  ;;  %v8766_v13 = vld [vmem:[#allocation2 + $0x140] sm:$0xff]  ;;  %v8769_v17 = vld [vmem:[#allocation2 + $0x158] sm:$0xff] }
 0x3af   :  { %8799 = vmatpush1.bf16.msra.mxu1 %v8760_v1  ;;  %8840 = vmatpush1.bf16.msra.mxu0 %v8728_v2  ;;  %v8734_v15 = vld [vmem:[#allocation2 + $0x40] sm:$0xff]  ;;  %v8737_v18 = vld [vmem:[#allocation2 + $0x58] sm:$0xff]  ;;  %v8768_v20 = vld [vmem:[#allocation2 + $0x150] sm:$0xff] }
 0x3b0   :  { %8800 = vmatprep.subr.bf16.mxu1 %v8763_v3  ;;  %8841 = vmatprep.subr.bf16.mxu0 %v8731_v4  ;;  %v8736_v21 = vld [vmem:[#allocation2 + $0x50] sm:$0xff]  ;;  %v8771_v22 = vld [vmem:[#allocation2 + $0x168] sm:$0xff]  ;;  %v8770_v29 = vld [vmem:[#allocation2 + $0x160] sm:$0xff] }
 0x3b1   :  { %v8739_v24 = vld [vmem:[#allocation2 + $0x68] sm:$0xff]  ;;  %v8738_v31 = vld [vmem:[#allocation2 + $0x60] sm:$0xff]  ;;  %v8773_v34 = vld [vmem:[#allocation2 + $0x178] sm:$0xff] }
 0x3b2   :  { %v8741_v35 = vld [vmem:[#allocation2 + $0x78] sm:$0xff]  ;;  %v8772_v40 = vld [vmem:[#allocation2 + $0x170] sm:$0xff]  ;;  %v8775_v43 = vld [vmem:[#allocation2 + $0x188] sm:$0xff] }
 0x3b3   :  { %8801 = vmatpush1.bf16.msra.mxu1 %v8762_v5  ;;  %8842 = vmatpush1.bf16.msra.mxu0 %v8730_v6  ;;  %v8740_v42 = vld [vmem:[#allocation2 + $0x70] sm:$0xff]  ;;  %v8743_v46 = vld [vmem:[#allocation2 + $0x88] sm:$0xff]  ;;  %v8774_v49 = vld [vmem:[#allocation2 + $0x180] sm:$0xff] }
 0x3b4   :  { %8802 = vmatprep.subr.bf16.mxu1 %v8765_v7  ;;  %8843 = vmatprep.subr.bf16.mxu0 %v8733_v8  ;;  %v8742_v51 = vld [vmem:[#allocation2 + $0x80] sm:$0xff]  ;;  %v8777_v53 = vld [vmem:[#allocation2 + $0x198] sm:$0xff]  ;;  %v8776_v58 = vld [vmem:[#allocation2 + $0x190] sm:$0xff] }
 0x3b5   :  { %v8745_v55 = vld [vmem:[#allocation2 + $0x98] sm:$0xff]  ;;  %v8744_v59 = vld [vmem:[#allocation2 + $0x90] sm:$0xff]  ;;  %v8779_v60 = vld [vmem:[#allocation2 + $0x1a8] sm:$0xff] }
 0x3b6   :  { %v8747_v61 = vld [vmem:[#allocation2 + $0xa8] sm:$0xff]  ;;  %v8778_v62 = vld [vmem:[#allocation2 + $0x1a0] sm:$0xff]  ;;  %v8781_v0 = vld [vmem:[#allocation2 + $0x1b8] sm:$0xff] }
 0x3b7   :  { %8803 = vmatpush1.bf16.msra.mxu1 %v8764_v9  ;;  %8844 = vmatpush1.bf16.msra.mxu0 %v8732_v10  ;;  %v8746_v63 = vld [vmem:[#allocation2 + $0xa0] sm:$0xff]  ;;  %v8749_v1 = vld [vmem:[#allocation2 + $0xb8] sm:$0xff]  ;;  %v8780_v2 = vld [vmem:[#allocation2 + $0x1b0] sm:$0xff] }
 0x3b8   :  { %8804 = vmatprep.subr.bf16.mxu1 %v8767_v11  ;;  %8845 = vmatprep.subr.bf16.mxu0 %v8735_v12  ;;  %v8748_v3 = vld [vmem:[#allocation2 + $0xb0] sm:$0xff]  ;;  %v8783_v4 = vld [vmem:[#allocation2 + $0x1c8] sm:$0xff]  ;;  %v8782_v6 = vld [vmem:[#allocation2 + $0x1c0] sm:$0xff] }
 0x3b9   :  { %v8751_v5 = vld [vmem:[#allocation2 + $0xc8] sm:$0xff]  ;;  %v8750_v7 = vld [vmem:[#allocation2 + $0xc0] sm:$0xff]  ;;  %v8785_v8 = vld [vmem:[#allocation2 + $0x1d8] sm:$0xff] }
 0x3ba   :  { %v8753_v9 = vld [vmem:[#allocation2 + $0xd8] sm:$0xff]  ;;  %v8784_v10 = vld [vmem:[#allocation2 + $0x1d0] sm:$0xff]  ;;  %v8787_v12 = vld [vmem:[#allocation2 + $0x1e8] sm:$0xff] }
 0x3bb   :  { %8805 = vmatpush1.bf16.msra.mxu1 %v8766_v13  ;;  %8846 = vmatpush1.bf16.msra.mxu0 %v8734_v15  ;;  %v8752_v11 = vld [vmem:[#allocation2 + $0xd0] sm:$0xff]  ;;  %v8755_v13 = vld [vmem:[#allocation2 + $0xe8] sm:$0xff]  ;;  %v8786_v15 = vld [vmem:[#allocation2 + $0x1e0] sm:$0xff] }
 0x3bc   :  { %8806 = vmatprep.subr.bf16.mxu1 %v8769_v17  ;;  %8847 = vmatprep.subr.bf16.mxu0 %v8737_v18  ;;  %v8754_v17 = vld [vmem:[#allocation2 + $0xe0] sm:$0xff]  ;;  %v8789_v18 = vld [vmem:[#allocation2 + $0x1f8] sm:$0xff]  ;;  %v9040_v26 = vld [vmem:[#allocation2 + $0x410] sm:$0xff] }
 0x3bd   :  { %v8881_v14 = vld [vmem:[#allocation2 + $0x218] sm:$0xff]  ;;  %v9356_v33 = vld [vmem:[#allocation2 + $0x810] sm:$0xff] }
 0x3be   :  { %v9276_v23 = vld [vmem:[#allocation2 + $0x718] sm:$0xff]  ;;  %v9672_v45 = vld [vmem:[#allocation2 + $0xc10] sm:$0xff] }
 0x3bf   :  { %8807 = vmatpush1.bf16.msra.mxu1 %v8768_v20  ;;  %8848 = vmatpush1.bf16.msra.mxu0 %v8736_v21  ;;  %v8757_v20 = vld [vmem:[#allocation2 + $0xf8] sm:$0xff]  ;;  %v17897_v21 = vpack.c.bf16 %v8626_v19, %v8626_v19  ;;  %v8911_v19 = vrot.slane %v17889_v57, 2 }
 0x3c0   :  { %8808 = vmatprep.subr.bf16.mxu1 %v8771_v22  ;;  %8849 = vmatprep.subr.bf16.mxu0 %v8739_v24  ;;  %v8788_v22 = vld [vmem:[#allocation2 + $0x1f0] sm:$0xff]  ;;  %v9513_v30 = vld [vmem:[#allocation2 + $0xa18] sm:$0xff] }
 0x3c1   :  { %v8756_v24 = vld [vmem:[#allocation2 + $0xf0] sm:$0xff]  ;;  %v9829_v41 = vld [vmem:[#allocation2 + $0xe18] sm:$0xff] }
 0x3c3   :  { %8809 = vmatpush1.bf16.msra.mxu1 %v8770_v29  ;;  %8850 = vmatpush1.bf16.msra.mxu0 %v8738_v31  ;;  %v8879_v29 = vld [vmem:[#allocation2 + $0x208] sm:$0xff] }
 0x3c4   :  { %8810 = vmatprep.subr.bf16.mxu1 %v8773_v34  ;;  %8851 = vmatprep.subr.bf16.mxu0 %v8741_v35  ;;  %v8958_v31 = vld [vmem:[#allocation2 + $0x308] sm:$0xff]  ;;  %v8792_v34 = vrot.slane %v17897_v21, 1  ;;  %v8878_v35 = vld [vmem:[#allocation2 + $0x200] sm:$0xff] }
 0x3c7   :  { %8811 = vmatpush1.bf16.msra.mxu1 %v8772_v40  ;;  %8852 = vmatpush1.bf16.msra.mxu0 %v8740_v42  ;;  %v8957_v40 = vld [vmem:[#allocation2 + $0x300] sm:$0xff]  ;;  %v8960_v42 = vld [vmem:[#allocation2 + $0x318] sm:$0xff] }
 0x3c8   :  { %8812 = vmatprep.subr.bf16.mxu1 %v8775_v43  ;;  %8853 = vmatprep.subr.bf16.mxu0 %v8743_v46  ;;  %v8990_v43 = vrot.slane %v17889_v57, 3  ;;  %v8880_v46 = vld [vmem:[#allocation2 + $0x210] sm:$0xff]  ;;  %v8885_v57 = vld [vmem:[#allocation2 + $0x238] sm:$0xff] }
 0x3cb   :  { %8813 = vmatpush1.bf16.msra.mxu1 %v8774_v49  ;;  %8854 = vmatpush1.bf16.msra.mxu0 %v8742_v51  ;;  %v8959_v49 = vld [vmem:[#allocation2 + $0x310] sm:$0xff]  ;;  %v8883_v51 = vld [vmem:[#allocation2 + $0x228] sm:$0xff] }
 0x3cc   :  { %8814 = vmatprep.subr.bf16.mxu1 %v8777_v53  ;;  %8855 = vmatprep.subr.bf16.mxu0 %v8745_v55  ;;  %v8962_v53 = vld [vmem:[#allocation2 + $0x328] sm:$0xff]  ;;  %v8882_v55 = vld [vmem:[#allocation2 + $0x220] sm:$0xff] }
 0x3cf   :  { %8815 = vmatpush1.bf16.msra.mxu1 %v8776_v58  ;;  %8856 = vmatpush1.bf16.msra.mxu0 %v8744_v59  ;;  %v8961_v58 = vld [vmem:[#allocation2 + $0x320] sm:$0xff]  ;;  %v8964_v59 = vld [vmem:[#allocation2 + $0x338] sm:$0xff] }
 0x3d0   :  { %8816 = vmatprep.subr.bf16.mxu1 %v8779_v60  ;;  %8857 = vmatprep.subr.bf16.mxu0 %v8747_v61  ;;  %v8884_v60 = vld [vmem:[#allocation2 + $0x230] sm:$0xff] }
 0x3d1   :  { %v8963_v61 = vld [vmem:[#allocation2 + $0x330] sm:$0xff] }
 0x3d3   :  { %8817 = vmatpush1.bf16.msra.mxu1 %v8778_v62  ;;  %8858 = vmatpush1.bf16.msra.mxu0 %v8746_v63  ;;  %v8887_v62 = vld [vmem:[#allocation2 + $0x248] sm:$0xff] }
 0x3d4   :  { %8818 = vmatprep.subr.bf16.mxu1 %v8781_v0  ;;  %8859 = vmatprep.subr.bf16.mxu0 %v8749_v1  ;;  %v8966_v63 = vld [vmem:[#allocation2 + $0x348] sm:$0xff]  ;;  %v8886_v0 = vld [vmem:[#allocation2 + $0x240] sm:$0xff] }
 0x3d5   :  { %v8965_v1 = vld [vmem:[#allocation2 + $0x340] sm:$0xff] }
 0x3d7   :  { %8819 = vmatpush1.bf16.msra.mxu1 %v8780_v2  ;;  %8860 = vmatpush1.bf16.msra.mxu0 %v8748_v3  ;;  %v8889_v2 = vld [vmem:[#allocation2 + $0x258] sm:$0xff] }
 0x3d8   :  { %8820 = vmatprep.subr.bf16.mxu1 %v8783_v4  ;;  %8861 = vmatprep.subr.bf16.mxu0 %v8751_v5  ;;  %v8968_v3 = vld [vmem:[#allocation2 + $0x358] sm:$0xff]  ;;  %v8888_v4 = vld [vmem:[#allocation2 + $0x250] sm:$0xff] }
 0x3d9   :  { %v8967_v5 = vld [vmem:[#allocation2 + $0x350] sm:$0xff] }
 0x3db   :  { %8821 = vmatpush1.bf16.msra.mxu1 %v8782_v6  ;;  %8862 = vmatpush1.bf16.msra.mxu0 %v8750_v7  ;;  %v8891_v6 = vld [vmem:[#allocation2 + $0x268] sm:$0xff] }
 0x3dc   :  { %8822 = vmatprep.subr.bf16.mxu1 %v8785_v8  ;;  %8863 = vmatprep.subr.bf16.mxu0 %v8753_v9  ;;  %v8970_v7 = vld [vmem:[#allocation2 + $0x368] sm:$0xff]  ;;  %v8890_v8 = vld [vmem:[#allocation2 + $0x260] sm:$0xff] }
 0x3dd   :  { %v8969_v9 = vld [vmem:[#allocation2 + $0x360] sm:$0xff] }
 0x3df   :  { %8823 = vmatpush1.bf16.msra.mxu1 %v8784_v10  ;;  %8864 = vmatpush1.bf16.msra.mxu0 %v8752_v11  ;;  %v8893_v10 = vld [vmem:[#allocation2 + $0x278] sm:$0xff] }
 0x3e0   :  { %8824 = vmatprep.subr.bf16.mxu1 %v8787_v12  ;;  %8865 = vmatprep.subr.bf16.mxu0 %v8755_v13  ;;  %v8972_v11 = vld [vmem:[#allocation2 + $0x378] sm:$0xff]  ;;  %v8892_v12 = vld [vmem:[#allocation2 + $0x270] sm:$0xff] }
 0x3e1   :  { %v8971_v13 = vld [vmem:[#allocation2 + $0x370] sm:$0xff] }
 0x3e3   :  { %8825 = vmatpush1.bf16.msra.mxu1 %v8786_v15  ;;  %8866 = vmatpush1.bf16.msra.mxu0 %v8754_v17  ;;  %v8895_v15 = vld [vmem:[#allocation2 + $0x288] sm:$0xff] }
 0x3e4   :  { %8826 = vmatprep.subr.bf16.mxu1 %v8789_v18  ;;  %8867 = vmatprep.subr.bf16.mxu0 %v8757_v20  ;;  %v8974_v17 = vld [vmem:[#allocation2 + $0x388] sm:$0xff]  ;;  %v8894_v18 = vld [vmem:[#allocation2 + $0x280] sm:$0xff] }
 0x3e5   :  { %v8973_v20 = vld [vmem:[#allocation2 + $0x380] sm:$0xff] }
 0x3e7   :  { %8827 = vmatpush1.bf16.msra.mxu1 %v8788_v22  ;;  %8868 = vmatpush1.bf16.msra.mxu0 %v8756_v24  ;;  %v8897_v22 = vld [vmem:[#allocation2 + $0x298] sm:$0xff] }
 0x3e8   :  { %8914 = vmatprep.subr.bf16.mxu1 %v8879_v29  ;;  %8993 = vmatprep.subr.bf16.mxu0 %v8958_v31  ;;  %v8976_v24 = vld [vmem:[#allocation2 + $0x398] sm:$0xff]  ;;  %v8896_v29 = vld [vmem:[#allocation2 + $0x290] sm:$0xff] }
 0x3e9   :  { %v8975_v31 = vld [vmem:[#allocation2 + $0x390] sm:$0xff] }
 0x3ea   :  { %8829 = vmatmul.mubr.bf16.vlgmr.msra.gmra.mrb[0].mxu1 %v8792_v34  ;;  %8870 = vmatmul.mubr.bf16.vlgmr.msra.gmra.mrb[12].mxu0 %v17897_v21  ;;  %v8899_v34 = vld [vmem:[#allocation2 + $0x2a8] sm:$0xff] }
 0x3eb   :  { %8915 = vmatpush1.bf16.msra.mxu1 %v8878_v35  ;;  %8994 = vmatpush1.bf16.msra.mxu0 %v8957_v40  ;;  %v8978_v35 = vld [vmem:[#allocation2 + $0x3a8] sm:$0xff]  ;;  %v8898_v40 = vld [vmem:[#allocation2 + $0x2a0] sm:$0xff] }
 0x3ec   :  { %8916 = vmatprep.subr.bf16.mxu1 %v8881_v14  ;;  %8995 = vmatprep.subr.bf16.mxu0 %v8960_v42  ;;  %v8977_v14 = vld [vmem:[#allocation2 + $0x3a0] sm:$0xff]  ;;  %v8901_v42 = vld [vmem:[#allocation2 + $0x2b8] sm:$0xff] }
 0x3ed   :  { %8946 = vmatprep.mubr.bf16.mxu1 %v8911_v19  ;;  %9025 = vmatprep.mubr.bf16.mxu0 %v8990_v43  ;;  %v8980_v19 = vld [vmem:[#allocation2 + $0x3b8] sm:$0xff]  ;;  %v8900_v43 = vld [vmem:[#allocation2 + $0x2b0] sm:$0xff] }
 0x3ef   :  { %8917 = vmatpush1.bf16.msra.mxu1 %v8880_v46  ;;  %8996 = vmatpush1.bf16.msra.mxu0 %v8959_v49  ;;  %v8979_v46 = vld [vmem:[#allocation2 + $0x3b0] sm:$0xff]  ;;  %v8903_v49 = vld [vmem:[#allocation2 + $0x2c8] sm:$0xff] }
 0x3f0   :  { %8918 = vmatprep.subr.bf16.mxu1 %v8883_v51  ;;  %8997 = vmatprep.subr.bf16.mxu0 %v8962_v53  ;;  %v8982_v51 = vld [vmem:[#allocation2 + $0x3c8] sm:$0xff]  ;;  %v8902_v53 = vld [vmem:[#allocation2 + $0x2c0] sm:$0xff] }
 0x3f3   :  { %8919 = vmatpush1.bf16.msra.mxu1 %v8882_v55  ;;  %8998 = vmatpush1.bf16.msra.mxu0 %v8961_v58  ;;  %v8981_v55 = vld [vmem:[#allocation2 + $0x3c0] sm:$0xff]  ;;  %v8905_v58 = vld [vmem:[#allocation2 + $0x2d8] sm:$0xff] }
 0x3f4   :  { %8920 = vmatprep.subr.bf16.mxu1 %v8885_v57  ;;  %8999 = vmatprep.subr.bf16.mxu0 %v8964_v59  ;;  %v8984_v57 = vld [vmem:[#allocation2 + $0x3d8] sm:$0xff]  ;;  %v8904_v59 = vld [vmem:[#allocation2 + $0x2d0] sm:$0xff] }
 0x3f7   :  { %8921 = vmatpush1.bf16.msra.mxu1 %v8884_v60  ;;  %9000 = vmatpush1.bf16.msra.mxu0 %v8963_v61  ;;  %v8983_v60 = vld [vmem:[#allocation2 + $0x3d0] sm:$0xff]  ;;  %v8907_v61 = vld [vmem:[#allocation2 + $0x2e8] sm:$0xff] }
 0x3f8   :  { %8922 = vmatprep.subr.bf16.mxu1 %v8887_v62  ;;  %9001 = vmatprep.subr.bf16.mxu0 %v8966_v63  ;;  %v8986_v62 = vld [vmem:[#allocation2 + $0x3e8] sm:$0xff]  ;;  %v8906_v63 = vld [vmem:[#allocation2 + $0x2e0] sm:$0xff] }
 0x3fb   :  { %8923 = vmatpush1.bf16.msra.mxu1 %v8886_v0  ;;  %9002 = vmatpush1.bf16.msra.mxu0 %v8965_v1  ;;  %v8985_v0 = vld [vmem:[#allocation2 + $0x3e0] sm:$0xff]  ;;  %v8909_v1 = vld [vmem:[#allocation2 + $0x2f8] sm:$0xff] }
 0x3fc   :  { %8924 = vmatprep.subr.bf16.mxu1 %v8889_v2  ;;  %9003 = vmatprep.subr.bf16.mxu0 %v8968_v3  ;;  %v8988_v2 = vld [vmem:[#allocation2 + $0x3f8] sm:$0xff]  ;;  %v8908_v3 = vld [vmem:[#allocation2 + $0x2f0] sm:$0xff] }
 0x3ff   :  { %8925 = vmatpush1.bf16.msra.mxu1 %v8888_v4  ;;  %9004 = vmatpush1.bf16.msra.mxu0 %v8967_v5  ;;  %v8987_v4 = vld [vmem:[#allocation2 + $0x3f0] sm:$0xff]  ;;  %v9039_v5 = vld [vmem:[#allocation2 + $0x408] sm:$0xff] }
 0x400   :  { %8926 = vmatprep.subr.bf16.mxu1 %v8891_v6  ;;  %9005 = vmatprep.subr.bf16.mxu0 %v8970_v7  ;;  %v9114_v6 = vld [vmem:[#allocation2 + $0x508] sm:$0xff]  ;;  %v17906_v7 = vpack.c.bf16 %v8629_v28, %v8629_v28  ;;  %v9115_v28 = vld [vmem:[#allocation2 + $0x510] sm:$0xff] }
 0x403   :  { %8927 = vmatpush1.bf16.msra.mxu1 %v8890_v8  ;;  %9006 = vmatpush1.bf16.msra.mxu0 %v8969_v9  ;;  %v8910_v8 = vrot.slane %v17897_v21, 2  ;;  %v8989_v9 = vrot.slane %v17897_v21, 3  ;;  %v9118_v21 = vld [vmem:[#allocation2 + $0x528] sm:$0xff] }
 0x404   :  { %8928 = vmatprep.subr.bf16.mxu1 %v8893_v10  ;;  %9007 = vmatprep.subr.bf16.mxu0 %v8972_v11  ;;  %v9038_v10 = vld [vmem:[#allocation2 + $0x400] sm:$0xff] }
 0x405   :  { %v9113_v11 = vld [vmem:[#allocation2 + $0x500] sm:$0xff] }
 0x407   :  { %8929 = vmatpush1.bf16.msra.mxu1 %v8892_v12  ;;  %9008 = vmatpush1.bf16.msra.mxu0 %v8971_v13  ;;  %v9041_v12 = vld [vmem:[#allocation2 + $0x418] sm:$0xff] }
 0x408   :  { %8930 = vmatprep.subr.bf16.mxu1 %v8895_v15  ;;  %9009 = vmatprep.subr.bf16.mxu0 %v8974_v17  ;;  %v9116_v13 = vld [vmem:[#allocation2 + $0x518] sm:$0xff]  ;;  %v9148_v15 = vrot.slane %v17906_v7, 1  ;;  %v9043_v17 = vld [vmem:[#allocation2 + $0x428] sm:$0xff] }
 0x40b   :  { %8931 = vmatpush1.bf16.msra.mxu1 %v8894_v18  ;;  %9010 = vmatpush1.bf16.msra.mxu0 %v8973_v20  ;;  %v9042_v18 = vld [vmem:[#allocation2 + $0x420] sm:$0xff] }
 0x40c   :  { %8932 = vmatprep.subr.bf16.mxu1 %v8897_v22  ;;  %9011 = vmatprep.subr.bf16.mxu0 %v8976_v24  ;;  %v9117_v20 = vld [vmem:[#allocation2 + $0x520] sm:$0xff]  ;;  %v9045_v22 = vld [vmem:[#allocation2 + $0x438] sm:$0xff] }
 0x40d   :  { %v9120_v24 = vld [vmem:[#allocation2 + $0x538] sm:$0xff] }
 0x40f   :  { %8933 = vmatpush1.bf16.msra.mxu1 %v8896_v29  ;;  %9012 = vmatpush1.bf16.msra.mxu0 %v8975_v31  ;;  %v9044_v29 = vld [vmem:[#allocation2 + $0x430] sm:$0xff] }
 0x410   :  { %8934 = vmatprep.subr.bf16.mxu1 %v8899_v34  ;;  %9013 = vmatprep.subr.bf16.mxu0 %v8978_v35  ;;  %v9119_v31 = vld [vmem:[#allocation2 + $0x530] sm:$0xff]  ;;  %v9047_v34 = vld [vmem:[#allocation2 + $0x448] sm:$0xff] }
 0x411   :  { %v9122_v35 = vld [vmem:[#allocation2 + $0x548] sm:$0xff] }
 0x413   :  { %8935 = vmatpush1.bf16.msra.mxu1 %v8898_v40  ;;  %9014 = vmatpush1.bf16.msra.mxu0 %v8977_v14  ;;  %v9046_v40 = vld [vmem:[#allocation2 + $0x440] sm:$0xff] }
 0x414   :  { %8936 = vmatprep.subr.bf16.mxu1 %v8901_v42  ;;  %9015 = vmatprep.subr.bf16.mxu0 %v8980_v19  ;;  %v9121_v14 = vld [vmem:[#allocation2 + $0x540] sm:$0xff]  ;;  %v9049_v42 = vld [vmem:[#allocation2 + $0x458] sm:$0xff] }
 0x415   :  { %v9124_v19 = vld [vmem:[#allocation2 + $0x558] sm:$0xff] }
 0x417   :  { %8937 = vmatpush1.bf16.msra.mxu1 %v8900_v43  ;;  %9016 = vmatpush1.bf16.msra.mxu0 %v8979_v46  ;;  %v9048_v43 = vld [vmem:[#allocation2 + $0x450] sm:$0xff] }
 0x418   :  { %8938 = vmatprep.subr.bf16.mxu1 %v8903_v49  ;;  %9017 = vmatprep.subr.bf16.mxu0 %v8982_v51  ;;  %v9123_v46 = vld [vmem:[#allocation2 + $0x550] sm:$0xff]  ;;  %v9051_v49 = vld [vmem:[#allocation2 + $0x468] sm:$0xff] }
 0x419   :  { %v9126_v51 = vld [vmem:[#allocation2 + $0x568] sm:$0xff] }
 0x41b   :  { %8939 = vmatpush1.bf16.msra.mxu1 %v8902_v53  ;;  %9018 = vmatpush1.bf16.msra.mxu0 %v8981_v55  ;;  %v9050_v53 = vld [vmem:[#allocation2 + $0x460] sm:$0xff] }
 0x41c   :  { %8940 = vmatprep.subr.bf16.mxu1 %v8905_v58  ;;  %9019 = vmatprep.subr.bf16.mxu0 %v8984_v57  ;;  %v9125_v55 = vld [vmem:[#allocation2 + $0x560] sm:$0xff]  ;;  %v9053_v58 = vld [vmem:[#allocation2 + $0x478] sm:$0xff] }
 0x41d   :  { %v9128_v57 = vld [vmem:[#allocation2 + $0x578] sm:$0xff] }
 0x41f   :  { %8941 = vmatpush1.bf16.msra.mxu1 %v8904_v59  ;;  %9020 = vmatpush1.bf16.msra.mxu0 %v8983_v60  ;;  %v9052_v59 = vld [vmem:[#allocation2 + $0x470] sm:$0xff] }
 0x420   :  { %8942 = vmatprep.subr.bf16.mxu1 %v8907_v61  ;;  %9021 = vmatprep.subr.bf16.mxu0 %v8986_v62  ;;  %v9127_v60 = vld [vmem:[#allocation2 + $0x570] sm:$0xff]  ;;  %v9055_v61 = vld [vmem:[#allocation2 + $0x488] sm:$0xff] }
 0x421   :  { %v9130_v62 = vld [vmem:[#allocation2 + $0x588] sm:$0xff] }
 0x423   :  { %8943 = vmatpush1.bf16.msra.mxu1 %v8906_v63  ;;  %9022 = vmatpush1.bf16.msra.mxu0 %v8985_v0  ;;  %v9054_v63 = vld [vmem:[#allocation2 + $0x480] sm:$0xff] }
 0x424   :  { %8944 = vmatprep.subr.bf16.mxu1 %v8909_v1  ;;  %9023 = vmatprep.subr.bf16.mxu0 %v8988_v2  ;;  %v9129_v0 = vld [vmem:[#allocation2 + $0x580] sm:$0xff]  ;;  %v9057_v1 = vld [vmem:[#allocation2 + $0x498] sm:$0xff] }
 0x425   :  { %v9132_v2 = vld [vmem:[#allocation2 + $0x598] sm:$0xff] }
 0x427   :  { %8945 = vmatpush1.bf16.msra.mxu1 %v8908_v3  ;;  %9024 = vmatpush1.bf16.msra.mxu0 %v8987_v4  ;;  %v9056_v3 = vld [vmem:[#allocation2 + $0x490] sm:$0xff] }
 0x428   :  { %9070 = vmatprep.subr.bf16.mxu1 %v9039_v5  ;;  %9151 = vmatprep.subr.bf16.mxu0 %v9114_v6  ;;  %v9131_v4 = vld [vmem:[#allocation2 + $0x590] sm:$0xff]  ;;  %v9059_v5 = vld [vmem:[#allocation2 + $0x4a8] sm:$0xff] }
 0x429   :  { %v9134_v6 = vld [vmem:[#allocation2 + $0x5a8] sm:$0xff] }
 0x42a   :  { %8947 = vmatmul.mubr.bf16.vlgmr.msra.gmra.mrb[4].mxu1 %v8910_v8  ;;  %9026 = vmatmul.mubr.bf16.vlgmr.msra.gmra.mrb[16].mxu0 %v8989_v9  ;;  %v9058_v8 = vld [vmem:[#allocation2 + $0x4a0] sm:$0xff] }
 0x42b   :  { %9071 = vmatpush1.bf16.msra.mxu1 %v9038_v10  ;;  %9152 = vmatpush1.bf16.msra.mxu0 %v9113_v11  ;;  %v9133_v9 = vld [vmem:[#allocation2 + $0x5a0] sm:$0xff]  ;;  %v9061_v10 = vld [vmem:[#allocation2 + $0x4b8] sm:$0xff] }
 0x42c   :  { %9072 = vmatprep.subr.bf16.mxu1 %v9041_v12  ;;  %9153 = vmatprep.subr.bf16.mxu0 %v9116_v13  ;;  %v9136_v11 = vld [vmem:[#allocation2 + $0x5b8] sm:$0xff]  ;;  %v9060_v12 = vld [vmem:[#allocation2 + $0x4b0] sm:$0xff] }
 0x42d   :  { %9102 = vmatprep.mubr.bf16.mxu1 %v17906_v7  ;;  %9183 = vmatprep.mubr.bf16.mxu0 %v9148_v15  ;;  %v9135_v13 = vld [vmem:[#allocation2 + $0x5b0] sm:$0xff]  ;;  %v9063_v15 = vld [vmem:[#allocation2 + $0x4c8] sm:$0xff] }
 0x42f   :  { %9073 = vmatpush1.bf16.msra.mxu1 %v9040_v26  ;;  %9154 = vmatpush1.bf16.msra.mxu0 %v9115_v28  ;;  %v9138_v26 = vld [vmem:[#allocation2 + $0x5c8] sm:$0xff]  ;;  %v9062_v28 = vld [vmem:[#allocation2 + $0x4c0] sm:$0xff] }
 0x430   :  { %9074 = vmatprep.subr.bf16.mxu1 %v9043_v17  ;;  %9155 = vmatprep.subr.bf16.mxu0 %v9118_v21  ;;  %v9137_v17 = vld [vmem:[#allocation2 + $0x5c0] sm:$0xff]  ;;  %v9065_v21 = vld [vmem:[#allocation2 + $0x4d8] sm:$0xff] }
 0x433   :  { %9075 = vmatpush1.bf16.msra.mxu1 %v9042_v18  ;;  %9156 = vmatpush1.bf16.msra.mxu0 %v9117_v20  ;;  %v9140_v18 = vld [vmem:[#allocation2 + $0x5d8] sm:$0xff]  ;;  %v9064_v20 = vld [vmem:[#allocation2 + $0x4d0] sm:$0xff] }
 0x434   :  { %9076 = vmatprep.subr.bf16.mxu1 %v9045_v22  ;;  %9157 = vmatprep.subr.bf16.mxu0 %v9120_v24  ;;  %v9139_v22 = vld [vmem:[#allocation2 + $0x5d0] sm:$0xff]  ;;  %v9067_v24 = vld [vmem:[#allocation2 + $0x4e8] sm:$0xff] }
 0x437   :  { %9077 = vmatpush1.bf16.msra.mxu1 %v9044_v29  ;;  %9158 = vmatpush1.bf16.msra.mxu0 %v9119_v31  ;;  %v9142_v29 = vld [vmem:[#allocation2 + $0x5e8] sm:$0xff]  ;;  %v9066_v31 = vld [vmem:[#allocation2 + $0x4e0] sm:$0xff] }
 0x438   :  { %9078 = vmatprep.subr.bf16.mxu1 %v9047_v34  ;;  %9159 = vmatprep.subr.bf16.mxu0 %v9122_v35  ;;  %v9141_v34 = vld [vmem:[#allocation2 + $0x5e0] sm:$0xff]  ;;  %v9069_v35 = vld [vmem:[#allocation2 + $0x4f8] sm:$0xff] }
 0x43b   :  { %9079 = vmatpush1.bf16.msra.mxu1 %v9046_v40  ;;  %9160 = vmatpush1.bf16.msra.mxu0 %v9121_v14  ;;  %v9144_v40 = vld [vmem:[#allocation2 + $0x5f8] sm:$0xff]  ;;  %v9068_v14 = vld [vmem:[#allocation2 + $0x4f0] sm:$0xff] }
 0x43c   :  { %9080 = vmatprep.subr.bf16.mxu1 %v9049_v42  ;;  %9161 = vmatprep.subr.bf16.mxu0 %v9124_v19  ;;  %v17915_v42 = vpack.c.bf16 %v8628_v27, %v8628_v27  ;;  %v9143_v19 = vld [vmem:[#allocation2 + $0x5f0] sm:$0xff]  ;;  %v9227_v27 = vrot.slane %v17906_v7, 2 }
 0x43f   :  { %9081 = vmatpush1.bf16.msra.mxu1 %v9048_v43  ;;  %9162 = vmatpush1.bf16.msra.mxu0 %v9123_v46  ;;  %v9195_v43 = vld [vmem:[#allocation2 + $0x608] sm:$0xff] }
 0x440   :  { %9082 = vmatprep.subr.bf16.mxu1 %v9051_v49  ;;  %9163 = vmatprep.subr.bf16.mxu0 %v9126_v51  ;;  %v9274_v46 = vld [vmem:[#allocation2 + $0x708] sm:$0xff]  ;;  %v9147_v49 = vrot.slane %v17915_v42, 1  ;;  %v9194_v51 = vld [vmem:[#allocation2 + $0x600] sm:$0xff] }
 0x443   :  { %9083 = vmatpush1.bf16.msra.mxu1 %v9050_v53  ;;  %9164 = vmatpush1.bf16.msra.mxu0 %v9125_v55  ;;  %v9273_v53 = vld [vmem:[#allocation2 + $0x700] sm:$0xff]  ;;  %v9197_v55 = vld [vmem:[#allocation2 + $0x618] sm:$0xff] }
 0x444   :  { %9084 = vmatprep.subr.bf16.mxu1 %v9053_v58  ;;  %9165 = vmatprep.subr.bf16.mxu0 %v9128_v57  ;;  %v9306_v58 = vrot.slane %v17906_v7, 3  ;;  %v9196_v57 = vld [vmem:[#allocation2 + $0x610] sm:$0xff]  ;;  %v9201_v7 = vld [vmem:[#allocation2 + $0x638] sm:$0xff] }
 0x447   :  { %9085 = vmatpush1.bf16.msra.mxu1 %v9052_v59  ;;  %9166 = vmatpush1.bf16.msra.mxu0 %v9127_v60  ;;  %v9275_v59 = vld [vmem:[#allocation2 + $0x710] sm:$0xff]  ;;  %v9199_v60 = vld [vmem:[#allocation2 + $0x628] sm:$0xff] }
 0x448   :  { %9086 = vmatprep.subr.bf16.mxu1 %v9055_v61  ;;  %9167 = vmatprep.subr.bf16.mxu0 %v9130_v62  ;;  %v9278_v61 = vld [vmem:[#allocation2 + $0x728] sm:$0xff]  ;;  %v9198_v62 = vld [vmem:[#allocation2 + $0x620] sm:$0xff] }
 0x44b   :  { %9087 = vmatpush1.bf16.msra.mxu1 %v9054_v63  ;;  %9168 = vmatpush1.bf16.msra.mxu0 %v9129_v0  ;;  %v9277_v63 = vld [vmem:[#allocation2 + $0x720] sm:$0xff]  ;;  %v9280_v0 = vld [vmem:[#allocation2 + $0x738] sm:$0xff] }
 0x44c   :  { %9088 = vmatprep.subr.bf16.mxu1 %v9057_v1  ;;  %9169 = vmatprep.subr.bf16.mxu0 %v9132_v2  ;;  %v9200_v1 = vld [vmem:[#allocation2 + $0x630] sm:$0xff] }
 0x44d   :  { %v9279_v2 = vld [vmem:[#allocation2 + $0x730] sm:$0xff] }
 0x44f   :  { %9089 = vmatpush1.bf16.msra.mxu1 %v9056_v3  ;;  %9170 = vmatpush1.bf16.msra.mxu0 %v9131_v4  ;;  %v9203_v3 = vld [vmem:[#allocation2 + $0x648] sm:$0xff] }
 0x450   :  { %9090 = vmatprep.subr.bf16.mxu1 %v9059_v5  ;;  %9171 = vmatprep.subr.bf16.mxu0 %v9134_v6  ;;  %v9282_v4 = vld [vmem:[#allocation2 + $0x748] sm:$0xff]  ;;  %v9202_v5 = vld [vmem:[#allocation2 + $0x640] sm:$0xff] }
 0x451   :  { %v9281_v6 = vld [vmem:[#allocation2 + $0x740] sm:$0xff] }
 0x453   :  { %9091 = vmatpush1.bf16.msra.mxu1 %v9058_v8  ;;  %9172 = vmatpush1.bf16.msra.mxu0 %v9133_v9  ;;  %v9205_v8 = vld [vmem:[#allocation2 + $0x658] sm:$0xff] }
 0x454   :  { %9092 = vmatprep.subr.bf16.mxu1 %v9061_v10  ;;  %9173 = vmatprep.subr.bf16.mxu0 %v9136_v11  ;;  %v9284_v9 = vld [vmem:[#allocation2 + $0x758] sm:$0xff]  ;;  %v9204_v10 = vld [vmem:[#allocation2 + $0x650] sm:$0xff] }
 0x455   :  { %v9283_v11 = vld [vmem:[#allocation2 + $0x750] sm:$0xff] }
 0x457   :  { %9093 = vmatpush1.bf16.msra.mxu1 %v9060_v12  ;;  %9174 = vmatpush1.bf16.msra.mxu0 %v9135_v13  ;;  %v9207_v12 = vld [vmem:[#allocation2 + $0x668] sm:$0xff] }
 0x458   :  { %9094 = vmatprep.subr.bf16.mxu1 %v9063_v15  ;;  %9175 = vmatprep.subr.bf16.mxu0 %v9138_v26  ;;  %v9286_v13 = vld [vmem:[#allocation2 + $0x768] sm:$0xff]  ;;  %v9206_v15 = vld [vmem:[#allocation2 + $0x660] sm:$0xff] }
 0x459   :  { %v9285_v26 = vld [vmem:[#allocation2 + $0x760] sm:$0xff] }
 0x45b   :  { %9095 = vmatpush1.bf16.msra.mxu1 %v9062_v28  ;;  %9176 = vmatpush1.bf16.msra.mxu0 %v9137_v17  ;;  %v9209_v28 = vld [vmem:[#allocation2 + $0x678] sm:$0xff] }
 0x45c   :  { %9096 = vmatprep.subr.bf16.mxu1 %v9065_v21  ;;  %9177 = vmatprep.subr.bf16.mxu0 %v9140_v18  ;;  %v9288_v17 = vld [vmem:[#allocation2 + $0x778] sm:$0xff]  ;;  %v9208_v21 = vld [vmem:[#allocation2 + $0x670] sm:$0xff] }
 0x45d   :  { %v9287_v18 = vld [vmem:[#allocation2 + $0x770] sm:$0xff] }
 0x45f   :  { %9097 = vmatpush1.bf16.msra.mxu1 %v9064_v20  ;;  %9178 = vmatpush1.bf16.msra.mxu0 %v9139_v22  ;;  %v9211_v20 = vld [vmem:[#allocation2 + $0x688] sm:$0xff] }
 0x460   :  { %9098 = vmatprep.subr.bf16.mxu1 %v9067_v24  ;;  %9179 = vmatprep.subr.bf16.mxu0 %v9142_v29  ;;  %v9290_v22 = vld [vmem:[#allocation2 + $0x788] sm:$0xff]  ;;  %v9210_v24 = vld [vmem:[#allocation2 + $0x680] sm:$0xff] }
 0x461   :  { %v9289_v29 = vld [vmem:[#allocation2 + $0x780] sm:$0xff] }
 0x463   :  { %9099 = vmatpush1.bf16.msra.mxu1 %v9066_v31  ;;  %9180 = vmatpush1.bf16.msra.mxu0 %v9141_v34  ;;  %v9213_v31 = vld [vmem:[#allocation2 + $0x698] sm:$0xff] }
 0x464   :  { %9100 = vmatprep.subr.bf16.mxu1 %v9069_v35  ;;  %9181 = vmatprep.subr.bf16.mxu0 %v9144_v40  ;;  %v9292_v34 = vld [vmem:[#allocation2 + $0x798] sm:$0xff]  ;;  %v9212_v35 = vld [vmem:[#allocation2 + $0x690] sm:$0xff] }
 0x465   :  { %v9291_v40 = vld [vmem:[#allocation2 + $0x790] sm:$0xff] }
 0x467   :  { %9101 = vmatpush1.bf16.msra.mxu1 %v9068_v14  ;;  %9182 = vmatpush1.bf16.msra.mxu0 %v9143_v19  ;;  %v9215_v14 = vld [vmem:[#allocation2 + $0x6a8] sm:$0xff] }
 0x468   :  { %9230 = vmatprep.subr.bf16.mxu1 %v9195_v43  ;;  %9309 = vmatprep.subr.bf16.mxu0 %v9274_v46  ;;  %v9294_v19 = vld [vmem:[#allocation2 + $0x7a8] sm:$0xff]  ;;  %v9214_v43 = vld [vmem:[#allocation2 + $0x6a0] sm:$0xff] }
 0x469   :  { %v9293_v46 = vld [vmem:[#allocation2 + $0x7a0] sm:$0xff] }
 0x46a   :  { %9103 = vmatmul.mubr.bf16.vlgmr.msra.gmra.mrb[8].mxu1 %v17915_v42  ;;  %9184 = vmatmul.mubr.bf16.vlgmr.msra.gmra.mrb[20].mxu0 %v9147_v49  ;;  %v9217_v49 = vld [vmem:[#allocation2 + $0x6b8] sm:$0xff] }
 0x46b   :  { %9231 = vmatpush1.bf16.msra.mxu1 %v9194_v51  ;;  %9310 = vmatpush1.bf16.msra.mxu0 %v9273_v53  ;;  %v9296_v51 = vld [vmem:[#allocation2 + $0x7b8] sm:$0xff]  ;;  %v9216_v53 = vld [vmem:[#allocation2 + $0x6b0] sm:$0xff] }
 0x46c   :  { %9232 = vmatprep.subr.bf16.mxu1 %v9197_v55  ;;  %9311 = vmatprep.subr.bf16.mxu0 %v9276_v23  ;;  %v9295_v55 = vld [vmem:[#allocation2 + $0x7b0] sm:$0xff]  ;;  %v9219_v23 = vld [vmem:[#allocation2 + $0x6c8] sm:$0xff] }
 0x46d   :  { %9262 = vmatprep.mubr.bf16.mxu1 %v9227_v27  ;;  %9341 = vmatprep.mubr.bf16.mxu0 %v9306_v58  ;;  %v9298_v27 = vld [vmem:[#allocation2 + $0x7c8] sm:$0xff]  ;;  %v9218_v58 = vld [vmem:[#allocation2 + $0x6c0] sm:$0xff] }
 0x46f   :  { %9233 = vmatpush1.bf16.msra.mxu1 %v9196_v57  ;;  %9312 = vmatpush1.bf16.msra.mxu0 %v9275_v59  ;;  %v9297_v57 = vld [vmem:[#allocation2 + $0x7c0] sm:$0xff]  ;;  %v9221_v59 = vld [vmem:[#allocation2 + $0x6d8] sm:$0xff] }
 0x470   :  { %9234 = vmatprep.subr.bf16.mxu1 %v9199_v60  ;;  %9313 = vmatprep.subr.bf16.mxu0 %v9278_v61  ;;  %v9300_v60 = vld [vmem:[#allocation2 + $0x7d8] sm:$0xff]  ;;  %v9220_v61 = vld [vmem:[#allocation2 + $0x6d0] sm:$0xff] }
 0x473   :  { %9235 = vmatpush1.bf16.msra.mxu1 %v9198_v62  ;;  %9314 = vmatpush1.bf16.msra.mxu0 %v9277_v63  ;;  %v9299_v62 = vld [vmem:[#allocation2 + $0x7d0] sm:$0xff]  ;;  %v9223_v63 = vld [vmem:[#allocation2 + $0x6e8] sm:$0xff] }
 0x474   :  { %9236 = vmatprep.subr.bf16.mxu1 %v9201_v7  ;;  %9315 = vmatprep.subr.bf16.mxu0 %v9280_v0  ;;  %v9302_v7 = vld [vmem:[#allocation2 + $0x7e8] sm:$0xff]  ;;  %v9222_v0 = vld [vmem:[#allocation2 + $0x6e0] sm:$0xff] }
 0x477   :  { %9237 = vmatpush1.bf16.msra.mxu1 %v9200_v1  ;;  %9316 = vmatpush1.bf16.msra.mxu0 %v9279_v2  ;;  %v9301_v1 = vld [vmem:[#allocation2 + $0x7e0] sm:$0xff]  ;;  %v9225_v2 = vld [vmem:[#allocation2 + $0x6f8] sm:$0xff] }
 0x478   :  { %9238 = vmatprep.subr.bf16.mxu1 %v9203_v3  ;;  %9317 = vmatprep.subr.bf16.mxu0 %v9282_v4  ;;  %v9304_v3 = vld [vmem:[#allocation2 + $0x7f8] sm:$0xff]  ;;  %v9224_v4 = vld [vmem:[#allocation2 + $0x6f0] sm:$0xff] }
 0x47b   :  { %9239 = vmatpush1.bf16.msra.mxu1 %v9202_v5  ;;  %9318 = vmatpush1.bf16.msra.mxu0 %v9281_v6  ;;  %v9303_v5 = vld [vmem:[#allocation2 + $0x7f0] sm:$0xff]  ;;  %v9355_v6 = vld [vmem:[#allocation2 + $0x808] sm:$0xff] }
 0x47c   :  { %9240 = vmatprep.subr.bf16.mxu1 %v9205_v8  ;;  %9319 = vmatprep.subr.bf16.mxu0 %v9284_v9  ;;  %v9430_v8 = vld [vmem:[#allocation2 + $0x908] sm:$0xff]  ;;  %v17924_v9 = vpack.c.bf16 %v8631_v38, %v8631_v38  ;;  %v9431_v38 = vld [vmem:[#allocation2 + $0x910] sm:$0xff] }
 0x47f   :  { %9241 = vmatpush1.bf16.msra.mxu1 %v9204_v10  ;;  %9320 = vmatpush1.bf16.msra.mxu0 %v9283_v11  ;;  %v9226_v10 = vrot.slane %v17915_v42, 2  ;;  %v9305_v11 = vrot.slane %v17915_v42, 3  ;;  %v9434_v42 = vld [vmem:[#allocation2 + $0x928] sm:$0xff] }
 0x480   :  { %9242 = vmatprep.subr.bf16.mxu1 %v9207_v12  ;;  %9321 = vmatprep.subr.bf16.mxu0 %v9286_v13  ;;  %v9354_v12 = vld [vmem:[#allocation2 + $0x800] sm:$0xff] }
 0x481   :  { %v9429_v13 = vld [vmem:[#allocation2 + $0x900] sm:$0xff] }
 0x483   :  { %9243 = vmatpush1.bf16.msra.mxu1 %v9206_v15  ;;  %9322 = vmatpush1.bf16.msra.mxu0 %v9285_v26  ;;  %v9357_v15 = vld [vmem:[#allocation2 + $0x818] sm:$0xff] }
 0x484   :  { %9244 = vmatprep.subr.bf16.mxu1 %v9209_v28  ;;  %9323 = vmatprep.subr.bf16.mxu0 %v9288_v17  ;;  %v9432_v26 = vld [vmem:[#allocation2 + $0x918] sm:$0xff]  ;;  %v9464_v28 = vrot.slane %v17924_v9, 1  ;;  %v9359_v17 = vld [vmem:[#allocation2 + $0x828] sm:$0xff] }
 0x487   :  { %9245 = vmatpush1.bf16.msra.mxu1 %v9208_v21  ;;  %9324 = vmatpush1.bf16.msra.mxu0 %v9287_v18  ;;  %v9358_v21 = vld [vmem:[#allocation2 + $0x820] sm:$0xff] }
 0x488   :  { %9246 = vmatprep.subr.bf16.mxu1 %v9211_v20  ;;  %9325 = vmatprep.subr.bf16.mxu0 %v9290_v22  ;;  %v9433_v18 = vld [vmem:[#allocation2 + $0x920] sm:$0xff]  ;;  %v9361_v20 = vld [vmem:[#allocation2 + $0x838] sm:$0xff] }
 0x489   :  { %v9436_v22 = vld [vmem:[#allocation2 + $0x938] sm:$0xff] }
 0x48b   :  { %9247 = vmatpush1.bf16.msra.mxu1 %v9210_v24  ;;  %9326 = vmatpush1.bf16.msra.mxu0 %v9289_v29  ;;  %v9360_v24 = vld [vmem:[#allocation2 + $0x830] sm:$0xff] }
 0x48c   :  { %9248 = vmatprep.subr.bf16.mxu1 %v9213_v31  ;;  %9327 = vmatprep.subr.bf16.mxu0 %v9292_v34  ;;  %v9435_v29 = vld [vmem:[#allocation2 + $0x930] sm:$0xff]  ;;  %v9363_v31 = vld [vmem:[#allocation2 + $0x848] sm:$0xff] }
 0x48d   :  { %v9438_v34 = vld [vmem:[#allocation2 + $0x948] sm:$0xff] }
 0x48f   :  { %9249 = vmatpush1.bf16.msra.mxu1 %v9212_v35  ;;  %9328 = vmatpush1.bf16.msra.mxu0 %v9291_v40  ;;  %v9362_v35 = vld [vmem:[#allocation2 + $0x840] sm:$0xff] }
 0x490   :  { %9250 = vmatprep.subr.bf16.mxu1 %v9215_v14  ;;  %9329 = vmatprep.subr.bf16.mxu0 %v9294_v19  ;;  %v9437_v40 = vld [vmem:[#allocation2 + $0x940] sm:$0xff]  ;;  %v9365_v14 = vld [vmem:[#allocation2 + $0x858] sm:$0xff] }
 0x491   :  { %v9440_v19 = vld [vmem:[#allocation2 + $0x958] sm:$0xff] }
 0x493   :  { %9251 = vmatpush1.bf16.msra.mxu1 %v9214_v43  ;;  %9330 = vmatpush1.bf16.msra.mxu0 %v9293_v46  ;;  %v9364_v43 = vld [vmem:[#allocation2 + $0x850] sm:$0xff] }
 0x494   :  { %9252 = vmatprep.subr.bf16.mxu1 %v9217_v49  ;;  %9331 = vmatprep.subr.bf16.mxu0 %v9296_v51  ;;  %v9439_v46 = vld [vmem:[#allocation2 + $0x950] sm:$0xff] }
 0x497   :  { %9253 = vmatpush1.bf16.msra.mxu1 %v9216_v53  ;;  %9332 = vmatpush1.bf16.msra.mxu0 %v9295_v55  ;;  %v9367_v53 = vld [vmem:[#allocation2 + $0x868] sm:$0xff] }
 0x498   :  { %9254 = vmatprep.subr.bf16.mxu1 %v9219_v23  ;;  %9333 = vmatprep.subr.bf16.mxu0 %v9298_v27  ;;  %v9442_v55 = vld [vmem:[#allocation2 + $0x968] sm:$0xff] }
 0x49b   :  { %9255 = vmatpush1.bf16.msra.mxu1 %v9218_v58  ;;  %9334 = vmatpush1.bf16.msra.mxu0 %v9297_v57 }
 0x49c   :  { %9256 = vmatprep.subr.bf16.mxu1 %v9221_v59  ;;  %9335 = vmatprep.subr.bf16.mxu0 %v9300_v60 }
 0x49f   :  { %9257 = vmatpush1.bf16.msra.mxu1 %v9220_v61  ;;  %9336 = vmatpush1.bf16.msra.mxu0 %v9299_v62 }
 0x4a0   :  { %9258 = vmatprep.subr.bf16.mxu1 %v9223_v63  ;;  %9337 = vmatprep.subr.bf16.mxu0 %v9302_v7  ;;  %v9366_v63 = vld [vmem:[#allocation2 + $0x860] sm:$0xff] }
 0x4a1   :  { %v9441_v7 = vld [vmem:[#allocation2 + $0x960] sm:$0xff] }
 0x4a3   :  { %9259 = vmatpush1.bf16.msra.mxu1 %v9222_v0  ;;  %9338 = vmatpush1.bf16.msra.mxu0 %v9301_v1  ;;  %v9369_v0 = vld [vmem:[#allocation2 + $0x878] sm:$0xff] }
 0x4a4   :  { %9260 = vmatprep.subr.bf16.mxu1 %v9225_v2  ;;  %9339 = vmatprep.subr.bf16.mxu0 %v9304_v3  ;;  %v9444_v1 = vld [vmem:[#allocation2 + $0x978] sm:$0xff]  ;;  %v9368_v2 = vld [vmem:[#allocation2 + $0x870] sm:$0xff] }
 0x4a5   :  { %v9443_v3 = vld [vmem:[#allocation2 + $0x970] sm:$0xff] }
 0x4a7   :  { %9261 = vmatpush1.bf16.msra.mxu1 %v9224_v4  ;;  %9340 = vmatpush1.bf16.msra.mxu0 %v9303_v5  ;;  %v9371_v4 = vld [vmem:[#allocation2 + $0x888] sm:$0xff] }
 0x4a8   :  { %9386 = vmatprep.subr.bf16.mxu1 %v9355_v6  ;;  %9467 = vmatprep.subr.bf16.mxu0 %v9430_v8  ;;  %v9446_v5 = vld [vmem:[#allocation2 + $0x988] sm:$0xff]  ;;  %v9370_v6 = vld [vmem:[#allocation2 + $0x880] sm:$0xff] }
 0x4a9   :  { %v9445_v8 = vld [vmem:[#allocation2 + $0x980] sm:$0xff] }
 0x4aa   :  { %9263 = vmatmul.mubr.bf16.vlgmr.msra.gmra.mrb[12].mxu1 %v9226_v10  ;;  %9342 = vmatmul.mubr.bf16.vlgmr.msra.gmra.mrb[24].mxu0 %v9305_v11  ;;  %v9373_v10 = vld [vmem:[#allocation2 + $0x898] sm:$0xff] }
 0x4ab   :  { %9387 = vmatpush1.bf16.msra.mxu1 %v9354_v12  ;;  %9468 = vmatpush1.bf16.msra.mxu0 %v9429_v13  ;;  %v9448_v11 = vld [vmem:[#allocation2 + $0x998] sm:$0xff]  ;;  %v9372_v12 = vld [vmem:[#allocation2 + $0x890] sm:$0xff] }
 0x4ac   :  { %9388 = vmatprep.subr.bf16.mxu1 %v9357_v15  ;;  %9469 = vmatprep.subr.bf16.mxu0 %v9432_v26  ;;  %v9447_v13 = vld [vmem:[#allocation2 + $0x990] sm:$0xff]  ;;  %v9375_v15 = vld [vmem:[#allocation2 + $0x8a8] sm:$0xff] }
 0x4ad   :  { %9418 = vmatprep.mubr.bf16.mxu1 %v17924_v9  ;;  %9499 = vmatprep.mubr.bf16.mxu0 %v9464_v28  ;;  %v9450_v26 = vld [vmem:[#allocation2 + $0x9a8] sm:$0xff]  ;;  %v9374_v28 = vld [vmem:[#allocation2 + $0x8a0] sm:$0xff] }
 0x4af   :  { %9389 = vmatpush1.bf16.msra.mxu1 %v9356_v33  ;;  %9470 = vmatpush1.bf16.msra.mxu0 %v9431_v38  ;;  %v9449_v33 = vld [vmem:[#allocation2 + $0x9a0] sm:$0xff]  ;;  %v9377_v38 = vld [vmem:[#allocation2 + $0x8b8] sm:$0xff] }
 0x4b0   :  { %9390 = vmatprep.subr.bf16.mxu1 %v9359_v17  ;;  %9471 = vmatprep.subr.bf16.mxu0 %v9434_v42  ;;  %v9452_v17 = vld [vmem:[#allocation2 + $0x9b8] sm:$0xff]  ;;  %v9376_v42 = vld [vmem:[#allocation2 + $0x8b0] sm:$0xff] }
 0x4b3   :  { %9391 = vmatpush1.bf16.msra.mxu1 %v9358_v21  ;;  %9472 = vmatpush1.bf16.msra.mxu0 %v9433_v18  ;;  %v9451_v21 = vld [vmem:[#allocation2 + $0x9b0] sm:$0xff]  ;;  %v9379_v18 = vld [vmem:[#allocation2 + $0x8c8] sm:$0xff] }
 0x4b4   :  { %9392 = vmatprep.subr.bf16.mxu1 %v9361_v20  ;;  %9473 = vmatprep.subr.bf16.mxu0 %v9436_v22  ;;  %v9454_v20 = vld [vmem:[#allocation2 + $0x9c8] sm:$0xff]  ;;  %v9378_v22 = vld [vmem:[#allocation2 + $0x8c0] sm:$0xff] }
 0x4b7   :  { %9393 = vmatpush1.bf16.msra.mxu1 %v9360_v24  ;;  %9474 = vmatpush1.bf16.msra.mxu0 %v9435_v29  ;;  %v9453_v24 = vld [vmem:[#allocation2 + $0x9c0] sm:$0xff]  ;;  %v9381_v29 = vld [vmem:[#allocation2 + $0x8d8] sm:$0xff] }
 0x4b8   :  { %9394 = vmatprep.subr.bf16.mxu1 %v9363_v31  ;;  %9475 = vmatprep.subr.bf16.mxu0 %v9438_v34  ;;  %v9456_v31 = vld [vmem:[#allocation2 + $0x9d8] sm:$0xff]  ;;  %v9380_v34 = vld [vmem:[#allocation2 + $0x8d0] sm:$0xff] }
 0x4bb   :  { %9395 = vmatpush1.bf16.msra.mxu1 %v9362_v35  ;;  %9476 = vmatpush1.bf16.msra.mxu0 %v9437_v40  ;;  %v9455_v35 = vld [vmem:[#allocation2 + $0x9d0] sm:$0xff]  ;;  %v9383_v40 = vld [vmem:[#allocation2 + $0x8e8] sm:$0xff] }
 0x4bc   :  { %9396 = vmatprep.subr.bf16.mxu1 %v9365_v14  ;;  %9477 = vmatprep.subr.bf16.mxu0 %v9440_v19  ;;  %v9458_v14 = vld [vmem:[#allocation2 + $0x9e8] sm:$0xff]  ;;  %v9382_v19 = vld [vmem:[#allocation2 + $0x8e0] sm:$0xff] }
 0x4bd   :  { %v8830_v49 = vpop.f32.mrb[0].mxu1  ;;  %v8871_v51 = vpop.f32.mrb[12].mxu0 }
 0x4be   :  { %v17930_v23 = vadd.f32 %v8871_v51, %v8830_v49  ;;  %v8832_v27 = vpop.f32.mrb[1].mxu1  ;;  %v8873_v58 = vpop.f32.mrb[13].mxu0  ;;  %v9460_v49 = vld [vmem:[#allocation2 + $0x9f8] sm:$0xff]  ;;  %v17937_v51 = vpack.c.bf16 %v8630_v37, %v8630_v37  ;;  %v9543_v37 = vrot.slane %v17924_v9, 2 }
 0x4bf   :  { %v17932_v57 = vadd.f32 %v8873_v58, %v8832_v27  ;;  %v8834_v59 = vpop.f32.mrb[2].mxu1  ;;  %v8875_v60 = vpop.f32.mrb[14].mxu0  ;;  %9397 = vmatpush1.bf16.msra.mxu1 %v9364_v43  ;;  %9478 = vmatpush1.bf16.msra.mxu0 %v9439_v46  ;;  %v9457_v43 = vld [vmem:[#allocation2 + $0x9e0] sm:$0xff]  ;;  %v9385_v46 = vld [vmem:[#allocation2 + $0x8f8] sm:$0xff]  ;;  %v9511_v27 = vld [vmem:[#allocation2 + $0xa08] sm:$0xff] }
 0x4c0   :  { %v8835_v61 = vpop.f32.mrb[3].mxu1  ;;  %v8876_v62 = vpop.f32.mrb[15].mxu0  ;;  %9398 = vmatprep.subr.bf16.mxu1 %v9367_v53  ;;  %9479 = vmatprep.subr.bf16.mxu0 %v9442_v55  ;;  %v9384_v53 = vld [vmem:[#allocation2 + $0x8f0] sm:$0xff]  ;;  %v9590_v58 = vld [vmem:[#allocation2 + $0xb08] sm:$0xff]  ;;  %v9463_v59 = vrot.slane %v17937_v51, 1  ;;  %v9510_v60 = vld [vmem:[#allocation2 + $0xa00] sm:$0xff] }
 0x4c1   :  { %v9459_v55 = vld [vmem:[#allocation2 + $0x9f0] sm:$0xff]  ;;  %v9589_v61 = vld [vmem:[#allocation2 + $0xb00] sm:$0xff]  ;;  %v9592_v62 = vld [vmem:[#allocation2 + $0xb18] sm:$0xff] }
 0x4c3   :  { %9399 = vmatpush1.bf16.msra.mxu1 %v9366_v63  ;;  %9480 = vmatpush1.bf16.msra.mxu0 %v9441_v7  ;;  %v9622_v63 = vrot.slane %v17924_v9, 3  ;;  %v9512_v7 = vld [vmem:[#allocation2 + $0xa10] sm:$0xff]  ;;  %v9517_v9 = vld [vmem:[#allocation2 + $0xa38] sm:$0xff] }
 0x4c4   :  { %9400 = vmatprep.subr.bf16.mxu1 %v9369_v0  ;;  %9481 = vmatprep.subr.bf16.mxu0 %v9444_v1  ;;  %v9591_v0 = vld [vmem:[#allocation2 + $0xb10] sm:$0xff]  ;;  %v9515_v1 = vld [vmem:[#allocation2 + $0xa28] sm:$0xff] }
 0x4c7   :  { %9401 = vmatpush1.bf16.msra.mxu1 %v9368_v2  ;;  %9482 = vmatpush1.bf16.msra.mxu0 %v9443_v3  ;;  %v9594_v2 = vld [vmem:[#allocation2 + $0xb28] sm:$0xff]  ;;  %v9514_v3 = vld [vmem:[#allocation2 + $0xa20] sm:$0xff] }
 0x4c8   :  { %9402 = vmatprep.subr.bf16.mxu1 %v9371_v4  ;;  %9483 = vmatprep.subr.bf16.mxu0 %v9446_v5  ;;  %v9593_v4 = vld [vmem:[#allocation2 + $0xb20] sm:$0xff]  ;;  %v9596_v5 = vld [vmem:[#allocation2 + $0xb38] sm:$0xff] }
 0x4cb   :  { %9403 = vmatpush1.bf16.msra.mxu1 %v9370_v6  ;;  %9484 = vmatpush1.bf16.msra.mxu0 %v9445_v8  ;;  %v9516_v6 = vld [vmem:[#allocation2 + $0xa30] sm:$0xff] }
 0x4cc   :  { %9404 = vmatprep.subr.bf16.mxu1 %v9373_v10  ;;  %9485 = vmatprep.subr.bf16.mxu0 %v9448_v11  ;;  %v9595_v8 = vld [vmem:[#allocation2 + $0xb30] sm:$0xff]  ;;  %v9519_v10 = vld [vmem:[#allocation2 + $0xa48] sm:$0xff] }
 0x4cd   :  { %v9598_v11 = vld [vmem:[#allocation2 + $0xb48] sm:$0xff] }
 0x4cf   :  { %9405 = vmatpush1.bf16.msra.mxu1 %v9372_v12  ;;  %9486 = vmatpush1.bf16.msra.mxu0 %v9447_v13  ;;  %v9518_v12 = vld [vmem:[#allocation2 + $0xa40] sm:$0xff] }
 0x4d0   :  { %9406 = vmatprep.subr.bf16.mxu1 %v9375_v15  ;;  %9487 = vmatprep.subr.bf16.mxu0 %v9450_v26  ;;  %v9597_v13 = vld [vmem:[#allocation2 + $0xb40] sm:$0xff]  ;;  %v9521_v15 = vld [vmem:[#allocation2 + $0xa58] sm:$0xff] }
 0x4d1   :  { %v9600_v26 = vld [vmem:[#allocation2 + $0xb58] sm:$0xff] }
 0x4d3   :  { %9407 = vmatpush1.bf16.msra.mxu1 %v9374_v28  ;;  %9488 = vmatpush1.bf16.msra.mxu0 %v9449_v33  ;;  %v9520_v28 = vld [vmem:[#allocation2 + $0xa50] sm:$0xff] }
 0x4d4   :  { %9408 = vmatprep.subr.bf16.mxu1 %v9377_v38  ;;  %9489 = vmatprep.subr.bf16.mxu0 %v9452_v17  ;;  %v9599_v33 = vld [vmem:[#allocation2 + $0xb50] sm:$0xff] }
 0x4d7   :  { %9409 = vmatpush1.bf16.msra.mxu1 %v9376_v42  ;;  %9490 = vmatpush1.bf16.msra.mxu0 %v9451_v21  ;;  %v9523_v42 = vld [vmem:[#allocation2 + $0xa68] sm:$0xff] }
 0x4d8   :  { %9410 = vmatprep.subr.bf16.mxu1 %v9379_v18  ;;  %9491 = vmatprep.subr.bf16.mxu0 %v9454_v20  ;;  %v9602_v21 = vld [vmem:[#allocation2 + $0xb68] sm:$0xff] }
 0x4db   :  { %9411 = vmatpush1.bf16.msra.mxu1 %v9378_v22  ;;  %9492 = vmatpush1.bf16.msra.mxu0 %v9453_v24 }
 0x4dc   :  { %9412 = vmatprep.subr.bf16.mxu1 %v9381_v29  ;;  %9493 = vmatprep.subr.bf16.mxu0 %v9456_v31 }
 0x4df   :  { %9413 = vmatpush1.bf16.msra.mxu1 %v9380_v34  ;;  %9494 = vmatpush1.bf16.msra.mxu0 %v9455_v35 }
 0x4e0   :  { %9414 = vmatprep.subr.bf16.mxu1 %v9383_v40  ;;  %9495 = vmatprep.subr.bf16.mxu0 %v9458_v14  ;;  %v9522_v14 = vld [vmem:[#allocation2 + $0xa60] sm:$0xff] }
 0x4e3   :  { %9415 = vmatpush1.bf16.msra.mxu1 %v9382_v19  ;;  %9496 = vmatpush1.bf16.msra.mxu0 %v9457_v43  ;;  %v9601_v19 = vld [vmem:[#allocation2 + $0xb60] sm:$0xff] }
 0x4e4   :  { %9416 = vmatprep.subr.bf16.mxu1 %v9385_v46  ;;  %9497 = vmatprep.subr.bf16.mxu0 %v9460_v49  ;;  %v9525_v46 = vld [vmem:[#allocation2 + $0xa78] sm:$0xff]  ;;  %v9603_v49 = vld [vmem:[#allocation2 + $0xb70] sm:$0xff] }
 0x4e7   :  { %9417 = vmatpush1.bf16.msra.mxu1 %v9384_v53  ;;  %9498 = vmatpush1.bf16.msra.mxu0 %v9459_v55  ;;  %v9527_v53 = vld [vmem:[#allocation2 + $0xa88] sm:$0xff] }
 0x4e8   :  { %9546 = vmatprep.subr.bf16.mxu1 %v9511_v27  ;;  %9625 = vmatprep.subr.bf16.mxu0 %v9590_v58  ;;  %v9606_v55 = vld [vmem:[#allocation2 + $0xb88] sm:$0xff]  ;;  %v9526_v27 = vld [vmem:[#allocation2 + $0xa80] sm:$0xff] }
 0x4e9   :  { %v9605_v58 = vld [vmem:[#allocation2 + $0xb80] sm:$0xff] }
 0x4ea   :  { %9419 = vmatmul.mubr.bf16.vlgmr.msra.gmra.mrb[16].mxu1 %v17937_v51  ;;  %9500 = vmatmul.mubr.bf16.vlgmr.msra.gmra.mrb[28].mxu0 %v9463_v59  ;;  %v9529_v59 = vld [vmem:[#allocation2 + $0xa98] sm:$0xff] }
 0x4eb   :  { %9547 = vmatpush1.bf16.msra.mxu1 %v9510_v60  ;;  %9626 = vmatpush1.bf16.msra.mxu0 %v9589_v61  ;;  %v9608_v60 = vld [vmem:[#allocation2 + $0xb98] sm:$0xff]  ;;  %v9528_v61 = vld [vmem:[#allocation2 + $0xa90] sm:$0xff] }
 0x4ec   :  { %9548 = vmatprep.subr.bf16.mxu1 %v9513_v30  ;;  %9627 = vmatprep.subr.bf16.mxu0 %v9592_v62  ;;  %v9607_v30 = vld [vmem:[#allocation2 + $0xb90] sm:$0xff]  ;;  %v9531_v62 = vld [vmem:[#allocation2 + $0xaa8] sm:$0xff] }
 0x4ed   :  { %9578 = vmatprep.mubr.bf16.mxu1 %v9543_v37  ;;  %9657 = vmatprep.mubr.bf16.mxu0 %v9622_v63  ;;  %v9610_v37 = vld [vmem:[#allocation2 + $0xba8] sm:$0xff]  ;;  %v9530_v63 = vld [vmem:[#allocation2 + $0xaa0] sm:$0xff] }
 0x4ef   :  { %9549 = vmatpush1.bf16.msra.mxu1 %v9512_v7  ;;  %9628 = vmatpush1.bf16.msra.mxu0 %v9591_v0  ;;  %v9609_v7 = vld [vmem:[#allocation2 + $0xba0] sm:$0xff]  ;;  %v9533_v0 = vld [vmem:[#allocation2 + $0xab8] sm:$0xff] }
 0x4f0   :  { %9550 = vmatprep.subr.bf16.mxu1 %v9515_v1  ;;  %9629 = vmatprep.subr.bf16.mxu0 %v9594_v2  ;;  %v9612_v1 = vld [vmem:[#allocation2 + $0xbb8] sm:$0xff]  ;;  %v9532_v2 = vld [vmem:[#allocation2 + $0xab0] sm:$0xff] }
 0x4f3   :  { %9551 = vmatpush1.bf16.msra.mxu1 %v9514_v3  ;;  %9630 = vmatpush1.bf16.msra.mxu0 %v9593_v4  ;;  %v9611_v3 = vld [vmem:[#allocation2 + $0xbb0] sm:$0xff]  ;;  %v9535_v4 = vld [vmem:[#allocation2 + $0xac8] sm:$0xff] }
 0x4f4   :  { %9552 = vmatprep.subr.bf16.mxu1 %v9517_v9  ;;  %9631 = vmatprep.subr.bf16.mxu0 %v9596_v5  ;;  %v9614_v9 = vld [vmem:[#allocation2 + $0xbc8] sm:$0xff]  ;;  %v9534_v5 = vld [vmem:[#allocation2 + $0xac0] sm:$0xff] }
 0x4f7   :  { %9553 = vmatpush1.bf16.msra.mxu1 %v9516_v6  ;;  %9632 = vmatpush1.bf16.msra.mxu0 %v9595_v8  ;;  %v9613_v6 = vld [vmem:[#allocation2 + $0xbc0] sm:$0xff]  ;;  %v9537_v8 = vld [vmem:[#allocation2 + $0xad8] sm:$0xff] }
 0x4f8   :  { %9554 = vmatprep.subr.bf16.mxu1 %v9519_v10  ;;  %9633 = vmatprep.subr.bf16.mxu0 %v9598_v11  ;;  %v9616_v10 = vld [vmem:[#allocation2 + $0xbd8] sm:$0xff]  ;;  %v9536_v11 = vld [vmem:[#allocation2 + $0xad0] sm:$0xff] }
 0x4fb   :  { %9555 = vmatpush1.bf16.msra.mxu1 %v9518_v12  ;;  %9634 = vmatpush1.bf16.msra.mxu0 %v9597_v13  ;;  %v9615_v12 = vld [vmem:[#allocation2 + $0xbd0] sm:$0xff]  ;;  %v9539_v13 = vld [vmem:[#allocation2 + $0xae8] sm:$0xff] }
 0x4fc   :  { %9556 = vmatprep.subr.bf16.mxu1 %v9521_v15  ;;  %9635 = vmatprep.subr.bf16.mxu0 %v9600_v26  ;;  %v9618_v15 = vld [vmem:[#allocation2 + $0xbe8] sm:$0xff]  ;;  %v9538_v26 = vld [vmem:[#allocation2 + $0xae0] sm:$0xff] }
 0x4fd   :  { %v8948_v38 = vpop.f32.mrb[4].mxu1  ;;  %v9027_v17 = vpop.f32.mrb[16].mxu0 }
 0x4fe   :  { %v8955_v18 = vadd.f32 %v8948_v38, %v17930_v23  ;;  %v8950_v20 = vpop.f32.mrb[5].mxu1  ;;  %v9029_v22 = vpop.f32.mrb[17].mxu0  ;;  %v9604_v23 = vld [vmem:[#allocation2 + $0xb78] sm:$0xff] }
 0x4ff   :  { %v8956_v24 = vadd.f32 %v8950_v20, %v17932_v57  ;;  %v8952_v29 = vpop.f32.mrb[6].mxu1  ;;  %v9031_v31 = vpop.f32.mrb[18].mxu0  ;;  %9557 = vmatpush1.bf16.msra.mxu1 %v9520_v28  ;;  %9636 = vmatpush1.bf16.msra.mxu0 %v9599_v33  ;;  %v9524_v57 = vld [vmem:[#allocation2 + $0xa70] sm:$0xff]  ;;  %v9617_v28 = vld [vmem:[#allocation2 + $0xbe0] sm:$0xff]  ;;  %v9541_v33 = vld [vmem:[#allocation2 + $0xaf8] sm:$0xff]  ;;  %v17952_v20 = vpack.c.bf16 %v8633_v48, %v8633_v48 }
 0x500   :  { %v17945_v34 = vadd.f32 %v9027_v17, %v8955_v18  ;;  %v8953_v35 = vpop.f32.mrb[7].mxu1  ;;  %v9032_v40 = vpop.f32.mrb[19].mxu0  ;;  %9558 = vmatprep.subr.bf16.mxu1 %v9523_v42  ;;  %9637 = vmatprep.subr.bf16.mxu0 %v9602_v21  ;;  %v9620_v38 = vld [vmem:[#allocation2 + $0xbf8] sm:$0xff]  ;;  %v9540_v17 = vld [vmem:[#allocation2 + $0xaf0] sm:$0xff]  ;;  %v9671_v21 = vld [vmem:[#allocation2 + $0xc08] sm:$0xff] }
 0x501   :  { %v17947_v43 = vadd.f32 %v9029_v22, %v8956_v24  ;;  %v9619_v42 = vld [vmem:[#allocation2 + $0xbf0] sm:$0xff]  ;;  %v9746_v18 = vld [vmem:[#allocation2 + $0xd08] sm:$0xff]  ;;  %v9542_v22 = vrot.slane %v17937_v51, 2  ;;  %v9621_v24 = vrot.slane %v17937_v51, 3  ;;  %v9670_v29 = vld [vmem:[#allocation2 + $0xc00] sm:$0xff] }
 0x502   :  { %v9745_v31 = vld [vmem:[#allocation2 + $0xd00] sm:$0xff]  ;;  %v9673_v35 = vld [vmem:[#allocation2 + $0xc18] sm:$0xff]  ;;  %v9747_v48 = vld [vmem:[#allocation2 + $0xd10] sm:$0xff] }
 0x503   :  { %9559 = vmatpush1.bf16.msra.mxu1 %v9522_v14  ;;  %9638 = vmatpush1.bf16.msra.mxu0 %v9601_v19  ;;  %v9748_v40 = vld [vmem:[#allocation2 + $0xd18] sm:$0xff]  ;;  %v9780_v14 = vrot.slane %v17952_v20, 1  ;;  %v9675_v19 = vld [vmem:[#allocation2 + $0xc28] sm:$0xff] }
 0x504   :  { %9560 = vmatprep.subr.bf16.mxu1 %v9525_v46  ;;  %9639 = vmatprep.subr.bf16.mxu0 %v9604_v23  ;;  %v9750_v51 = vld [vmem:[#allocation2 + $0xd28] sm:$0xff]  ;;  %v9674_v46 = vld [vmem:[#allocation2 + $0xc20] sm:$0xff] }
 0x505   :  { %v9749_v23 = vld [vmem:[#allocation2 + $0xd20] sm:$0xff] }
 0x507   :  { %9561 = vmatpush1.bf16.msra.mxu1 %v9524_v57  ;;  %9640 = vmatpush1.bf16.msra.mxu0 %v9603_v49  ;;  %v9677_v57 = vld [vmem:[#allocation2 + $0xc38] sm:$0xff] }
 0x508   :  { %9562 = vmatprep.subr.bf16.mxu1 %v9527_v53  ;;  %9641 = vmatprep.subr.bf16.mxu0 %v9606_v55  ;;  %v9752_v49 = vld [vmem:[#allocation2 + $0xd38] sm:$0xff]  ;;  %v9676_v53 = vld [vmem:[#allocation2 + $0xc30] sm:$0xff] }
 0x509   :  { %v9751_v55 = vld [vmem:[#allocation2 + $0xd30] sm:$0xff] }
 0x50b   :  { %9563 = vmatpush1.bf16.msra.mxu1 %v9526_v27  ;;  %9642 = vmatpush1.bf16.msra.mxu0 %v9605_v58  ;;  %v9679_v27 = vld [vmem:[#allocation2 + $0xc48] sm:$0xff] }
 0x50c   :  { %9564 = vmatprep.subr.bf16.mxu1 %v9529_v59  ;;  %9643 = vmatprep.subr.bf16.mxu0 %v9608_v60  ;;  %v9754_v58 = vld [vmem:[#allocation2 + $0xd48] sm:$0xff]  ;;  %v9678_v59 = vld [vmem:[#allocation2 + $0xc40] sm:$0xff] }
 0x50d   :  { %v9753_v60 = vld [vmem:[#allocation2 + $0xd40] sm:$0xff] }
 0x50f   :  { %9565 = vmatpush1.bf16.msra.mxu1 %v9528_v61  ;;  %9644 = vmatpush1.bf16.msra.mxu0 %v9607_v30  ;;  %v9681_v61 = vld [vmem:[#allocation2 + $0xc58] sm:$0xff] }
 0x510   :  { %9566 = vmatprep.subr.bf16.mxu1 %v9531_v62  ;;  %9645 = vmatprep.subr.bf16.mxu0 %v9610_v37  ;;  %v9756_v30 = vld [vmem:[#allocation2 + $0xd58] sm:$0xff]  ;;  %v9680_v62 = vld [vmem:[#allocation2 + $0xc50] sm:$0xff] }
 0x511   :  { %v9755_v37 = vld [vmem:[#allocation2 + $0xd50] sm:$0xff] }
 0x513   :  { %9567 = vmatpush1.bf16.msra.mxu1 %v9530_v63  ;;  %9646 = vmatpush1.bf16.msra.mxu0 %v9609_v7 }
 0x514   :  { %9568 = vmatprep.subr.bf16.mxu1 %v9533_v0  ;;  %9647 = vmatprep.subr.bf16.mxu0 %v9612_v1  ;;  %v9683_v0 = vld [vmem:[#allocation2 + $0xc68] sm:$0xff] }
 0x515   :  { %v9758_v1 = vld [vmem:[#allocation2 + $0xd68] sm:$0xff] }
 0x517   :  { %9569 = vmatpush1.bf16.msra.mxu1 %v9532_v2  ;;  %9648 = vmatpush1.bf16.msra.mxu0 %v9611_v3 }
 0x518   :  { %9570 = vmatprep.subr.bf16.mxu1 %v9535_v4  ;;  %9649 = vmatprep.subr.bf16.mxu0 %v9614_v9 }
 0x51b   :  { %9571 = vmatpush1.bf16.msra.mxu1 %v9534_v5  ;;  %9650 = vmatpush1.bf16.msra.mxu0 %v9613_v6 }
 0x51c   :  { %9572 = vmatprep.subr.bf16.mxu1 %v9537_v8  ;;  %9651 = vmatprep.subr.bf16.mxu0 %v9616_v10 }
 0x51f   :  { %9573 = vmatpush1.bf16.msra.mxu1 %v9536_v11  ;;  %9652 = vmatpush1.bf16.msra.mxu0 %v9615_v12  ;;  %v9682_v12 = vld [vmem:[#allocation2 + $0xc60] sm:$0xff] }
 0x520   :  { %9574 = vmatprep.subr.bf16.mxu1 %v9539_v13  ;;  %9653 = vmatprep.subr.bf16.mxu0 %v9618_v15  ;;  %v9757_v13 = vld [vmem:[#allocation2 + $0xd60] sm:$0xff] }
 0x523   :  { %9575 = vmatpush1.bf16.msra.mxu1 %v9538_v26  ;;  %9654 = vmatpush1.bf16.msra.mxu0 %v9617_v28  ;;  %v9685_v26 = vld [vmem:[#allocation2 + $0xc78] sm:$0xff]  ;;  %v9759_v28 = vld [vmem:[#allocation2 + $0xd70] sm:$0xff] }
 0x524   :  { %9576 = vmatprep.subr.bf16.mxu1 %v9541_v33  ;;  %9655 = vmatprep.subr.bf16.mxu0 %v9620_v38  ;;  %v9687_v33 = vld [vmem:[#allocation2 + $0xc88] sm:$0xff] }
 0x525   :  { %v9762_v38 = vld [vmem:[#allocation2 + $0xd88] sm:$0xff] }
 0x527   :  { %9577 = vmatpush1.bf16.msra.mxu1 %v9540_v17  ;;  %9656 = vmatpush1.bf16.msra.mxu0 %v9619_v42  ;;  %v9686_v17 = vld [vmem:[#allocation2 + $0xc80] sm:$0xff] }
 0x528   :  { %9702 = vmatprep.subr.bf16.mxu1 %v9671_v21  ;;  %9783 = vmatprep.subr.bf16.mxu0 %v9746_v18  ;;  %v9761_v42 = vld [vmem:[#allocation2 + $0xd80] sm:$0xff]  ;;  %v9689_v21 = vld [vmem:[#allocation2 + $0xc98] sm:$0xff] }
 0x529   :  { %v9764_v18 = vld [vmem:[#allocation2 + $0xd98] sm:$0xff] }
 0x52a   :  { %9579 = vmatmul.mubr.bf16.vlgmr.msra.gmra.mrb[20].mxu1 %v9542_v22  ;;  %9658 = vmatmul.mubr.bf16.vlgmr.msra.gmra.mrb[32].mxu0 %v9621_v24  ;;  %v9688_v22 = vld [vmem:[#allocation2 + $0xc90] sm:$0xff] }
 0x52b   :  { %9703 = vmatpush1.bf16.msra.mxu1 %v9670_v29  ;;  %9784 = vmatpush1.bf16.msra.mxu0 %v9745_v31  ;;  %v9763_v24 = vld [vmem:[#allocation2 + $0xd90] sm:$0xff]  ;;  %v9691_v29 = vld [vmem:[#allocation2 + $0xca8] sm:$0xff] }
 0x52c   :  { %9704 = vmatprep.subr.bf16.mxu1 %v9673_v35  ;;  %9785 = vmatprep.subr.bf16.mxu0 %v9748_v40  ;;  %v9766_v31 = vld [vmem:[#allocation2 + $0xda8] sm:$0xff]  ;;  %v9690_v35 = vld [vmem:[#allocation2 + $0xca0] sm:$0xff] }
 0x52d   :  { %9734 = vmatprep.mubr.bf16.mxu1 %v17952_v20  ;;  %9815 = vmatprep.mubr.bf16.mxu0 %v9780_v14  ;;  %v9765_v40 = vld [vmem:[#allocation2 + $0xda0] sm:$0xff]  ;;  %v9693_v14 = vld [vmem:[#allocation2 + $0xcb8] sm:$0xff] }
 0x52f   :  { %9705 = vmatpush1.bf16.msra.mxu1 %v9672_v45  ;;  %9786 = vmatpush1.bf16.msra.mxu0 %v9747_v48  ;;  %v9768_v45 = vld [vmem:[#allocation2 + $0xdb8] sm:$0xff]  ;;  %v9692_v48 = vld [vmem:[#allocation2 + $0xcb0] sm:$0xff] }
 0x530   :  { %9706 = vmatprep.subr.bf16.mxu1 %v9675_v19  ;;  %9787 = vmatprep.subr.bf16.mxu0 %v9750_v51  ;;  %v9767_v19 = vld [vmem:[#allocation2 + $0xdb0] sm:$0xff]  ;;  %v9695_v51 = vld [vmem:[#allocation2 + $0xcc8] sm:$0xff] }
 0x533   :  { %9707 = vmatpush1.bf16.msra.mxu1 %v9674_v46  ;;  %9788 = vmatpush1.bf16.msra.mxu0 %v9749_v23  ;;  %v9770_v46 = vld [vmem:[#allocation2 + $0xdc8] sm:$0xff]  ;;  %v9694_v23 = vld [vmem:[#allocation2 + $0xcc0] sm:$0xff] }
 0x534   :  { %9708 = vmatprep.subr.bf16.mxu1 %v9677_v57  ;;  %9789 = vmatprep.subr.bf16.mxu0 %v9752_v49  ;;  %v9769_v57 = vld [vmem:[#allocation2 + $0xdc0] sm:$0xff]  ;;  %v9697_v49 = vld [vmem:[#allocation2 + $0xcd8] sm:$0xff] }
 0x537   :  { %9709 = vmatpush1.bf16.msra.mxu1 %v9676_v53  ;;  %9790 = vmatpush1.bf16.msra.mxu0 %v9751_v55  ;;  %v9772_v53 = vld [vmem:[#allocation2 + $0xdd8] sm:$0xff]  ;;  %v9696_v55 = vld [vmem:[#allocation2 + $0xcd0] sm:$0xff] }
 0x538   :  { %9710 = vmatprep.subr.bf16.mxu1 %v9679_v27  ;;  %9791 = vmatprep.subr.bf16.mxu0 %v9754_v58  ;;  %v9771_v27 = vld [vmem:[#allocation2 + $0xdd0] sm:$0xff]  ;;  %v9699_v58 = vld [vmem:[#allocation2 + $0xce8] sm:$0xff] }
 0x53b   :  { %9711 = vmatpush1.bf16.msra.mxu1 %v9678_v59  ;;  %9792 = vmatpush1.bf16.msra.mxu0 %v9753_v60  ;;  %v9774_v59 = vld [vmem:[#allocation2 + $0xde8] sm:$0xff]  ;;  %v9698_v60 = vld [vmem:[#allocation2 + $0xce0] sm:$0xff] }
 0x53c   :  { %9712 = vmatprep.subr.bf16.mxu1 %v9681_v61  ;;  %9793 = vmatprep.subr.bf16.mxu0 %v9756_v30  ;;  %v9773_v61 = vld [vmem:[#allocation2 + $0xde0] sm:$0xff]  ;;  %v9701_v30 = vld [vmem:[#allocation2 + $0xcf8] sm:$0xff] }
 0x53d   :  { %v9104_v63 = vpop.f32.mrb[8].mxu1  ;;  %v9185_v7 = vpop.f32.mrb[20].mxu0 }
 0x53e   :  { %v9111_v2 = vadd.f32 %v9104_v63, %v17945_v34  ;;  %v9106_v3 = vpop.f32.mrb[9].mxu1  ;;  %v9187_v4 = vpop.f32.mrb[21].mxu0  ;;  %v9760_v34 = vld [vmem:[#allocation2 + $0xd78] sm:$0xff]  ;;  %v9700_v63 = vld [vmem:[#allocation2 + $0xcf0] sm:$0xff] }
 0x53f   :  { %v9112_v9 = vadd.f32 %v9106_v3, %v17947_v43  ;;  %v9108_v5 = vpop.f32.mrb[10].mxu1  ;;  %v9189_v6 = vpop.f32.mrb[22].mxu0  ;;  %9713 = vmatpush1.bf16.msra.mxu1 %v9680_v62  ;;  %9794 = vmatpush1.bf16.msra.mxu0 %v9755_v37  ;;  %v9684_v43 = vld [vmem:[#allocation2 + $0xc70] sm:$0xff]  ;;  %v9776_v62 = vld [vmem:[#allocation2 + $0xdf8] sm:$0xff]  ;;  %v17967_v37 = vpack.c.bf16 %v8632_v47, %v8632_v47  ;;  %v9826_v3 = vld [vmem:[#allocation2 + $0xe00] sm:$0xff]  ;;  %v9859_v47 = vrot.slane %v17952_v20, 2 }
 0x540   :  { %v17960_v8 = vadd.f32 %v9185_v7, %v9111_v2  ;;  %v9109_v10 = vpop.f32.mrb[11].mxu1  ;;  %v9190_v11 = vpop.f32.mrb[23].mxu0  ;;  %9714 = vmatprep.subr.bf16.mxu1 %v9683_v0  ;;  %9795 = vmatprep.subr.bf16.mxu0 %v9758_v1  ;;  %v9775_v7 = vld [vmem:[#allocation2 + $0xdf0] sm:$0xff]  ;;  %v9827_v0 = vld [vmem:[#allocation2 + $0xe08] sm:$0xff]  ;;  %v9938_v5 = vrot.slane %v17952_v20, 3  ;;  %v9833_v20 = vld [vmem:[#allocation2 + $0xe38] sm:$0xff] }
 0x541   :  { %v17962_v15 = vadd.f32 %v9187_v4, %v9112_v9  ;;  %v9906_v1 = vld [vmem:[#allocation2 + $0xf08] sm:$0xff]  ;;  %v9779_v2 = vrot.slane %v17967_v37, 1  ;;  %v9905_v4 = vld [vmem:[#allocation2 + $0xf00] sm:$0xff]  ;;  %v9908_v9 = vld [vmem:[#allocation2 + $0xf18] sm:$0xff] }
 0x542   :  { %v9828_v6 = vld [vmem:[#allocation2 + $0xe10] sm:$0xff]  ;;  %v9831_v11 = vld [vmem:[#allocation2 + $0xe28] sm:$0xff] }
 0x543   :  { %9715 = vmatpush1.bf16.msra.mxu1 %v9682_v12  ;;  %9796 = vmatpush1.bf16.msra.mxu0 %v9757_v13  ;;  %v9907_v10 = vld [vmem:[#allocation2 + $0xf10] sm:$0xff]  ;;  %v9910_v12 = vld [vmem:[#allocation2 + $0xf28] sm:$0xff]  ;;  %v9830_v13 = vld [vmem:[#allocation2 + $0xe20] sm:$0xff] }
 0x544   :  { %9716 = vmatprep.subr.bf16.mxu1 %v9685_v26  ;;  %9797 = vmatprep.subr.bf16.mxu0 %v9760_v34  ;;  %v9909_v26 = vld [vmem:[#allocation2 + $0xf20] sm:$0xff]  ;;  %v9912_v34 = vld [vmem:[#allocation2 + $0xf38] sm:$0xff] }
 0x547   :  { %9717 = vmatpush1.bf16.msra.mxu1 %v9684_v43  ;;  %9798 = vmatpush1.bf16.msra.mxu0 %v9759_v28  ;;  %v9832_v43 = vld [vmem:[#allocation2 + $0xe30] sm:$0xff] }
 0x548   :  { %9718 = vmatprep.subr.bf16.mxu1 %v9687_v33  ;;  %9799 = vmatprep.subr.bf16.mxu0 %v9762_v38  ;;  %v9911_v28 = vld [vmem:[#allocation2 + $0xf30] sm:$0xff]  ;;  %v9835_v33 = vld [vmem:[#allocation2 + $0xe48] sm:$0xff] }
 0x549   :  { %v9914_v38 = vld [vmem:[#allocation2 + $0xf48] sm:$0xff] }
 0x54b   :  { %9719 = vmatpush1.bf16.msra.mxu1 %v9686_v17  ;;  %9800 = vmatpush1.bf16.msra.mxu0 %v9761_v42  ;;  %v9834_v17 = vld [vmem:[#allocation2 + $0xe40] sm:$0xff] }
 0x54c   :  { %9720 = vmatprep.subr.bf16.mxu1 %v9689_v21  ;;  %9801 = vmatprep.subr.bf16.mxu0 %v9764_v18  ;;  %v9913_v42 = vld [vmem:[#allocation2 + $0xf40] sm:$0xff]  ;;  %v9837_v21 = vld [vmem:[#allocation2 + $0xe58] sm:$0xff] }
 0x54d   :  { %v9916_v18 = vld [vmem:[#allocation2 + $0xf58] sm:$0xff] }
 0x54f   :  { %9721 = vmatpush1.bf16.msra.mxu1 %v9688_v22  ;;  %9802 = vmatpush1.bf16.msra.mxu0 %v9763_v24  ;;  %v9836_v22 = vld [vmem:[#allocation2 + $0xe50] sm:$0xff] }
 0x550   :  { %9722 = vmatprep.subr.bf16.mxu1 %v9691_v29  ;;  %9803 = vmatprep.subr.bf16.mxu0 %v9766_v31  ;;  %v9915_v24 = vld [vmem:[#allocation2 + $0xf50] sm:$0xff] }
 0x553   :  { %9723 = vmatpush1.bf16.msra.mxu1 %v9690_v35  ;;  %9804 = vmatpush1.bf16.msra.mxu0 %v9765_v40  ;;  %v9839_v35 = vld [vmem:[#allocation2 + $0xe68] sm:$0xff] }
 0x554   :  { %9724 = vmatprep.subr.bf16.mxu1 %v9693_v14  ;;  %9805 = vmatprep.subr.bf16.mxu0 %v9768_v45  ;;  %v9918_v40 = vld [vmem:[#allocation2 + $0xf68] sm:$0xff] }
 0x557   :  { %9725 = vmatpush1.bf16.msra.mxu1 %v9692_v48  ;;  %9806 = vmatpush1.bf16.msra.mxu0 %v9767_v19 }
 0x558   :  { %9726 = vmatprep.subr.bf16.mxu1 %v9695_v51  ;;  %9807 = vmatprep.subr.bf16.mxu0 %v9770_v46 }
 0x55b   :  { %9727 = vmatpush1.bf16.msra.mxu1 %v9694_v23  ;;  %9808 = vmatpush1.bf16.msra.mxu0 %v9769_v57 }
 0x55c   :  { %9728 = vmatprep.subr.bf16.mxu1 %v9697_v49  ;;  %9809 = vmatprep.subr.bf16.mxu0 %v9772_v53  ;;  %v9838_v53 = vld [vmem:[#allocation2 + $0xe60] sm:$0xff] }
 0x55f   :  { %9729 = vmatpush1.bf16.msra.mxu1 %v9696_v55  ;;  %9810 = vmatpush1.bf16.msra.mxu0 %v9771_v27  ;;  %v9917_v55 = vld [vmem:[#allocation2 + $0xf60] sm:$0xff] }
 0x560   :  { %9730 = vmatprep.subr.bf16.mxu1 %v9699_v58  ;;  %9811 = vmatprep.subr.bf16.mxu0 %v9774_v59  ;;  %v9841_v58 = vld [vmem:[#allocation2 + $0xe78] sm:$0xff]  ;;  %v9919_v59 = vld [vmem:[#allocation2 + $0xf70] sm:$0xff] }
 0x563   :  { %9731 = vmatpush1.bf16.msra.mxu1 %v9698_v60  ;;  %9812 = vmatpush1.bf16.msra.mxu0 %v9773_v61  ;;  %v9843_v60 = vld [vmem:[#allocation2 + $0xe88] sm:$0xff] }
 0x564   :  { %9732 = vmatprep.subr.bf16.mxu1 %v9701_v30  ;;  %9813 = vmatprep.subr.bf16.mxu0 %v9776_v62  ;;  %v9922_v61 = vld [vmem:[#allocation2 + $0xf88] sm:$0xff]  ;;  %v9842_v30 = vld [vmem:[#allocation2 + $0xe80] sm:$0xff] }
 0x565   :  { %v9921_v62 = vld [vmem:[#allocation2 + $0xf80] sm:$0xff] }
 0x567   :  { %9733 = vmatpush1.bf16.msra.mxu1 %v9700_v63  ;;  %9814 = vmatpush1.bf16.msra.mxu0 %v9775_v7  ;;  %v9845_v63 = vld [vmem:[#allocation2 + $0xe98] sm:$0xff] }
 0x568   :  { %9862 = vmatprep.subr.bf16.mxu1 %v9827_v0  ;;  %9941 = vmatprep.subr.bf16.mxu0 %v9906_v1  ;;  %v9924_v7 = vld [vmem:[#allocation2 + $0xf98] sm:$0xff]  ;;  %v9844_v0 = vld [vmem:[#allocation2 + $0xe90] sm:$0xff] }
 0x569   :  { %v9923_v1 = vld [vmem:[#allocation2 + $0xf90] sm:$0xff] }
 0x56a   :  { %9735 = vmatmul.mubr.bf16.vlgmr.msra.gmra.mrb[24].mxu1 %v17967_v37  ;;  %9816 = vmatmul.mubr.bf16.vlgmr.msra.gmra.mrb[36].mxu0 %v9779_v2  ;;  %v9847_v2 = vld [vmem:[#allocation2 + $0xea8] sm:$0xff] }
 0x56b   :  { %9863 = vmatpush1.bf16.msra.mxu1 %v9826_v3  ;;  %9942 = vmatpush1.bf16.msra.mxu0 %v9905_v4  ;;  %v9926_v3 = vld [vmem:[#allocation2 + $0xfa8] sm:$0xff]  ;;  %v9846_v4 = vld [vmem:[#allocation2 + $0xea0] sm:$0xff] }
 0x56c   :  { %9864 = vmatprep.subr.bf16.mxu1 %v9829_v41  ;;  %9943 = vmatprep.subr.bf16.mxu0 %v9908_v9  ;;  %v9925_v41 = vld [vmem:[#allocation2 + $0xfa0] sm:$0xff]  ;;  %v9849_v9 = vld [vmem:[#allocation2 + $0xeb8] sm:$0xff] }
 0x56d   :  { %9894 = vmatprep.mubr.bf16.mxu1 %v9859_v47  ;;  %9973 = vmatprep.mubr.bf16.mxu0 %v9938_v5  ;;  %v9928_v47 = vld [vmem:[#allocation2 + $0xfb8] sm:$0xff]  ;;  %v9848_v5 = vld [vmem:[#allocation2 + $0xeb0] sm:$0xff] }
 0x56f   :  { %9865 = vmatpush1.bf16.msra.mxu1 %v9828_v6  ;;  %9944 = vmatpush1.bf16.msra.mxu0 %v9907_v10  ;;  %v9927_v6 = vld [vmem:[#allocation2 + $0xfb0] sm:$0xff]  ;;  %v9851_v10 = vld [vmem:[#allocation2 + $0xec8] sm:$0xff] }
 0x570   :  { %9866 = vmatprep.subr.bf16.mxu1 %v9831_v11  ;;  %9945 = vmatprep.subr.bf16.mxu0 %v9910_v12  ;;  %v9930_v11 = vld [vmem:[#allocation2 + $0xfc8] sm:$0xff]  ;;  %v9850_v12 = vld [vmem:[#allocation2 + $0xec0] sm:$0xff] }
 0x573   :  { %9867 = vmatpush1.bf16.msra.mxu1 %v9830_v13  ;;  %9946 = vmatpush1.bf16.msra.mxu0 %v9909_v26  ;;  %v9929_v13 = vld [vmem:[#allocation2 + $0xfc0] sm:$0xff]  ;;  %v9853_v26 = vld [vmem:[#allocation2 + $0xed8] sm:$0xff] }
 0x574   :  { %9868 = vmatprep.subr.bf16.mxu1 %v9833_v20  ;;  %9947 = vmatprep.subr.bf16.mxu0 %v9912_v34  ;;  %v9932_v20 = vld [vmem:[#allocation2 + $0xfd8] sm:$0xff]  ;;  %v9852_v34 = vld [vmem:[#allocation2 + $0xed0] sm:$0xff] }
 0x577   :  { %9869 = vmatpush1.bf16.msra.mxu1 %v9832_v43  ;;  %9948 = vmatpush1.bf16.msra.mxu0 %v9911_v28  ;;  %v9931_v43 = vld [vmem:[#allocation2 + $0xfd0] sm:$0xff]  ;;  %v9855_v28 = vld [vmem:[#allocation2 + $0xee8] sm:$0xff] }
 0x578   :  { %9870 = vmatprep.subr.bf16.mxu1 %v9835_v33  ;;  %9949 = vmatprep.subr.bf16.mxu0 %v9914_v38  ;;  %v9934_v33 = vld [vmem:[#allocation2 + $0xfe8] sm:$0xff]  ;;  %v9854_v38 = vld [vmem:[#allocation2 + $0xee0] sm:$0xff] }
 0x57b   :  { %9871 = vmatpush1.bf16.msra.mxu1 %v9834_v17  ;;  %9950 = vmatpush1.bf16.msra.mxu0 %v9913_v42  ;;  %v9933_v17 = vld [vmem:[#allocation2 + $0xfe0] sm:$0xff]  ;;  %v9857_v42 = vld [vmem:[#allocation2 + $0xef8] sm:$0xff] }
 0x57c   :  { %9872 = vmatprep.subr.bf16.mxu1 %v9837_v21  ;;  %9951 = vmatprep.subr.bf16.mxu0 %v9916_v18  ;;  %v9936_v21 = vld [vmem:[#allocation2 + $0xff8] sm:$0xff]  ;;  %v9856_v18 = vld [vmem:[#allocation2 + $0xef0] sm:$0xff] }
 0x57d   :  { %v9264_v29 = vpop.f32.mrb[12].mxu1  ;;  %v9343_v31 = vpop.f32.mrb[24].mxu0 }
 0x57e   :  { %v9271_v14 = vadd.f32 %v9264_v29, %v17960_v8  ;;  %v9266_v45 = vpop.f32.mrb[13].mxu1  ;;  %v9345_v48 = vpop.f32.mrb[25].mxu0  ;;  %v9920_v8 = vld [vmem:[#allocation2 + $0xf78] sm:$0xff]  ;;  %v9937_v29 = vrot.slane %v17967_v37, 3 }
 0x57f   :  { %v9272_v19 = vadd.f32 %v9266_v45, %v17962_v15  ;;  %v9268_v51 = vpop.f32.mrb[14].mxu1  ;;  %v9347_v46 = vpop.f32.mrb[26].mxu0  ;;  %9873 = vmatpush1.bf16.msra.mxu1 %v9836_v22  ;;  %9952 = vmatpush1.bf16.msra.mxu0 %v9915_v24  ;;  %v9840_v15 = vld [vmem:[#allocation2 + $0xe70] sm:$0xff]  ;;  %v9858_v24 = vrot.slane %v17967_v37, 2 }
 0x580   :  { %v17975_v23 = vadd.f32 %v9343_v31, %v9271_v14  ;;  %v9269_v57 = vpop.f32.mrb[15].mxu1  ;;  %v9348_v49 = vpop.f32.mrb[27].mxu0  ;;  %9874 = vmatprep.subr.bf16.mxu1 %v9839_v35  ;;  %9953 = vmatprep.subr.bf16.mxu0 %v9918_v40  ;;  %v9935_v22 = vld [vmem:[#allocation2 + $0xff0] sm:$0xff] }
 0x581   :  { %v17977_v27 = vadd.f32 %v9345_v48, %v9272_v19 }
 0x583   :  { %9875 = vmatpush1.bf16.msra.mxu1 %v9838_v53  ;;  %9954 = vmatpush1.bf16.msra.mxu0 %v9917_v55  ;;  %v14773_v53 = vld [vmem:[%s18958_s15] ss:$8 sps:$4 sm:$0xff]   ;;  %v14775_v55 = vld [vmem:[%s18958_s15 + $0x4] ss:$8 sps:$4 sm:$0xff]  }
 0x584   :  { %9876 = vmatprep.subr.bf16.mxu1 %v9841_v58  ;;  %9955 = vmatprep.subr.bf16.mxu0 %v9920_v8  ;;  %v14781_v58 = vld [vmem:[%s18958_s15 + $0x24] ss:$8 sps:$4 sm:$0xff]   ;;  %v14779_v8 = vld [vmem:[%s18958_s15 + $0x20] ss:$8 sps:$4 sm:$0xff]  }
 0x587   :  { %9877 = vmatpush1.bf16.msra.mxu1 %v9840_v15  ;;  %9956 = vmatpush1.bf16.msra.mxu0 %v9919_v59  ;;  %v14784_v15 = vld [vmem:[%s18958_s15 + $0x34] ss:$8 sps:$4 sm:$0xff]   ;;  %v14782_v59 = vld [vmem:[%s18958_s15 + $0x30] ss:$8 sps:$4 sm:$0xff]  }
 0x588   :  { %9878 = vmatprep.subr.bf16.mxu1 %v9843_v60  ;;  %9957 = vmatprep.subr.bf16.mxu0 %v9922_v61  ;;  %v14787_v60 = vld [vmem:[%s18958_s15 + $0x44] ss:$8 sps:$4 sm:$0xff]   ;;  %v14785_v61 = vld [vmem:[%s18958_s15 + $0x40] ss:$8 sps:$4 sm:$0xff]  }
 0x58b   :  { %9879 = vmatpush1.bf16.msra.mxu1 %v9842_v30  ;;  %9958 = vmatpush1.bf16.msra.mxu0 %v9921_v62  ;;  %v14790_v30 = vld [vmem:[%s18958_s15 + $0x54] ss:$8 sps:$4 sm:$0xff]   ;;  %v14788_v62 = vld [vmem:[%s18958_s15 + $0x50] ss:$8 sps:$4 sm:$0xff]  }
 0x58c   :  { %9880 = vmatprep.subr.bf16.mxu1 %v9845_v63  ;;  %9959 = vmatprep.subr.bf16.mxu0 %v9924_v7  ;;  %v14793_v63 = vld [vmem:[%s18958_s15 + $0x64] ss:$8 sps:$4 sm:$0xff]   ;;  %v14791_v7 = vld [vmem:[%s18958_s15 + $0x60] ss:$8 sps:$4 sm:$0xff]  }
 0x58f   :  { %9881 = vmatpush1.bf16.msra.mxu1 %v9844_v0  ;;  %9960 = vmatpush1.bf16.msra.mxu0 %v9923_v1  ;;  %v14796_v0 = vld [vmem:[%s18958_s15 + $0x74] ss:$8 sps:$4 sm:$0xff]   ;;  %v14794_v1 = vld [vmem:[%s18958_s15 + $0x70] ss:$8 sps:$4 sm:$0xff]  }
 0x590   :  { %9882 = vmatprep.subr.bf16.mxu1 %v9847_v2  ;;  %9961 = vmatprep.subr.bf16.mxu0 %v9926_v3  ;;  %v14799_v2 = vld [vmem:[%s18958_s15 + $0x84] ss:$8 sps:$4 sm:$0xff]   ;;  %v14797_v3 = vld [vmem:[%s18958_s15 + $0x80] ss:$8 sps:$4 sm:$0xff]  }
 0x593   :  { %9883 = vmatpush1.bf16.msra.mxu1 %v9846_v4  ;;  %9962 = vmatpush1.bf16.msra.mxu0 %v9925_v41  ;;  %v14802_v4 = vld [vmem:[%s18958_s15 + $0x94] ss:$8 sps:$4 sm:$0xff]   ;;  %v14800_v41 = vld [vmem:[%s18958_s15 + $0x90] ss:$8 sps:$4 sm:$0xff]  }
 0x594   :  { %9884 = vmatprep.subr.bf16.mxu1 %v9849_v9  ;;  %9963 = vmatprep.subr.bf16.mxu0 %v9928_v47  ;;  %v14805_v9 = vld [vmem:[%s18958_s15 + $0xa4] ss:$8 sps:$4 sm:$0xff]   ;;  %v14803_v47 = vld [vmem:[%s18958_s15 + $0xa0] ss:$8 sps:$4 sm:$0xff]  }
 0x597   :  { %9885 = vmatpush1.bf16.msra.mxu1 %v9848_v5  ;;  %9964 = vmatpush1.bf16.msra.mxu0 %v9927_v6  ;;  %v14808_v5 = vld [vmem:[%s18958_s15 + $0xb4] ss:$8 sps:$4 sm:$0xff]   ;;  %v14806_v6 = vld [vmem:[%s18958_s15 + $0xb0] ss:$8 sps:$4 sm:$0xff]  }
 0x598   :  { %9886 = vmatprep.subr.bf16.mxu1 %v9851_v10  ;;  %9965 = vmatprep.subr.bf16.mxu0 %v9930_v11  ;;  %v14811_v10 = vld [vmem:[%s18958_s15 + $0xc4] ss:$8 sps:$4 sm:$0xff]   ;;  %v14809_v11 = vld [vmem:[%s18958_s15 + $0xc0] ss:$8 sps:$4 sm:$0xff]  }
 0x59b   :  { %9887 = vmatpush1.bf16.msra.mxu1 %v9850_v12  ;;  %9966 = vmatpush1.bf16.msra.mxu0 %v9929_v13  ;;  %v14814_v12 = vld [vmem:[%s18958_s15 + $0xd4] ss:$8 sps:$4 sm:$0xff]  }
 0x59c   :  { %9888 = vmatprep.subr.bf16.mxu1 %v9853_v26  ;;  %9967 = vmatprep.subr.bf16.mxu0 %v9932_v20  ;;  %v14812_v20 = vld [vmem:[%s18958_s15 + $0xd0] ss:$8 sps:$4 sm:$0xff]  }
 0x59f   :  { %9889 = vmatpush1.bf16.msra.mxu1 %v9852_v34  ;;  %9968 = vmatpush1.bf16.msra.mxu0 %v9931_v43 }
 0x5a0   :  { %9890 = vmatprep.subr.bf16.mxu1 %v9855_v28  ;;  %9969 = vmatprep.subr.bf16.mxu0 %v9934_v33 }
 0x5a3   :  { %9891 = vmatpush1.bf16.msra.mxu1 %v9854_v38  ;;  %9970 = vmatpush1.bf16.msra.mxu0 %v9933_v17 }
 0x5a4   :  { %9892 = vmatprep.subr.bf16.mxu1 %v9857_v42  ;;  %9971 = vmatprep.subr.bf16.mxu0 %v9936_v21 }
 0x5a7   :  { %9893 = vmatpush1.bf16.msra.mxu1 %v9856_v18  ;;  %9972 = vmatpush1.bf16.msra.mxu0 %v9935_v22  ;;  %v14817_v22 = vld [vmem:[%s18958_s15 + $0xe4] ss:$8 sps:$4 sm:$0xff]  }
 0x5a8   :  { %10194 = vmatprep.subr.bf16.mxu1 %v14775_v55 }
 0x5aa   :  { %9895 = vmatmul.mubr.bf16.vlgmr.msra.gmra.mrb[28].mxu1 %v9858_v24  ;;  %9974 = vmatmul.mubr.bf16.vlgmr.msra.gmra.mrb[40].mxu0 %v9937_v29  ;;  %v14815_v29 = vld [vmem:[%s18958_s15 + $0xe0] ss:$8 sps:$4 sm:$0xff]  }
 0x5ab   :  { %10331 = vmatprep.mubr.f32.mxu0 %v15091_v39  ;;  %10195 = vmatpush1.bf16.msra.mxu1 %v14773_v53 }
 0x5bd   :  { %v9420_v31 = vpop.f32.mrb[16].mxu1  ;;  %v9501_v35 = vpop.f32.mrb[28].mxu0 }
 0x5be   :  { %v9427_v40 = vadd.f32 %v9420_v31, %v17975_v23  ;;  %v9422_v14 = vpop.f32.mrb[17].mxu1  ;;  %v9503_v45 = vpop.f32.mrb[29].mxu0  ;;  %v14778_v23 = vld [vmem:[%s18958_s15 + $0x14] ss:$8 sps:$4 sm:$0xff]  }
 0x5bf   :  { %v9428_v48 = vadd.f32 %v9422_v14, %v17977_v27  ;;  %v9424_v19 = vpop.f32.mrb[18].mxu1  ;;  %v9505_v51 = vpop.f32.mrb[30].mxu0  ;;  %v14776_v27 = vld [vmem:[%s18958_s15 + $0x10] ss:$8 sps:$4 sm:$0xff]   ;;  %10196 = vmatprep.subr.bf16.mxu1 %v14778_v23  ;;  %v14820_v31 = vld [vmem:[%s18958_s15 + $0xf4] ss:$8 sps:$4 sm:$0xff]  }
 0x5c0   :  { %v9508_v46 = vadd.f32 %v9501_v35, %v9427_v40  ;;  %v9425_v57 = vpop.f32.mrb[19].mxu1  ;;  %v9506_v49 = vpop.f32.mrb[31].mxu0  ;;  %10197 = vmatpush1.bf16.msra.mxu1 %v14776_v27  ;;  %v14818_v35 = vld [vmem:[%s18958_s15 + $0xf0] ss:$8 sps:$4 sm:$0xff]   ;;  %v9984_v23 = vld [vmem:[%s18955_s12] sm:$0x3] }
 0x5c1   :  { %v9509_v37 = vadd.f32 %v9503_v45, %v9428_v48  ;;  %10198 = vmatprep.subr.bf16.mxu1 %v14781_v58  ;;  %s18989_s12 = sld [smem:[#allocation11_spill]] }
 0x5c4   :  { %10199 = vmatpush1.bf16.msra.mxu1 %v14779_v8 }
 0x5c5   :  { %10200 = vmatprep.subr.bf16.mxu1 %v14784_v15  ;;  %v9989_v15 = vrot.slane %v9984_v23, %v17861_v32 }
 0x5c8   :  { %10201 = vmatpush1.bf16.msra.mxu1 %v14782_v59 }
 0x5c9   :  { %10202 = vmatprep.subr.bf16.mxu1 %v14787_v60 }
 0x5cc   :  { %10203 = vmatpush1.bf16.msra.mxu1 %v14785_v61 }
 0x5cd   :  { %10204 = vmatprep.subr.bf16.mxu1 %v14790_v30  ;;  %v9993_v30 = vrot.slane %v9984_v23, %v17869_v36  ;;  %v10624_v23 = vand.u32 1, %v17852_v25 }
 0x5d0   :  { %10205 = vmatpush1.bf16.msra.mxu1 %v14788_v62 }
 0x5d1   :  { %10206 = vmatprep.subr.bf16.mxu1 %v14793_v63 }
 0x5d4   :  { %10207 = vmatpush1.bf16.msra.mxu1 %v14791_v7 }
 0x5d5   :  { %10208 = vmatprep.subr.bf16.mxu1 %v14796_v0 }
 0x5d8   :  { %10209 = vmatpush1.bf16.msra.mxu1 %v14794_v1 }
 0x5d9   :  { %10210 = vmatprep.subr.bf16.mxu1 %v14799_v2 }
 0x5dc   :  { %10211 = vmatpush1.bf16.msra.mxu1 %v14797_v3 }
 0x5dd   :  { %10212 = vmatprep.subr.bf16.mxu1 %v14802_v4 }
 0x5e0   :  { %10213 = vmatpush1.bf16.msra.mxu1 %v14800_v41 }
 0x5e1   :  { %10214 = vmatprep.subr.bf16.mxu1 %v14805_v9 }
 0x5e4   :  { %10215 = vmatpush1.bf16.msra.mxu1 %v14803_v47 }
 0x5e5   :  { %10216 = vmatprep.subr.bf16.mxu1 %v14808_v5 }
 0x5e8   :  { %10217 = vmatpush1.bf16.msra.mxu1 %v14806_v6  ;;  %v18092_v6 = vand.u32 127, %v8643_v16 }
 0x5e9   :  { %10218 = vmatprep.subr.bf16.mxu1 %v14811_v10 }
 0x5ea   :  { %v10243_v10 = vadd.s32 1, %v18092_v6 }
 0x5ec   :  { %10219 = vmatpush1.bf16.msra.mxu1 %v14809_v11  ;;  %v10240_v11 = vmul.u32 8, %v18092_v6 }
 0x5ed   :  { %10220 = vmatprep.subr.bf16.mxu1 %v14814_v12  ;;  %v10244_v12 = vmul.u32 8, %v10243_v10 }
 0x5ee   :  { %vm10241_vm2 = vcmp.ge.s32.totalorder %v17852_v25, %v10240_v11 }
 0x5ef   :  { %vm10245_vm3 = vcmp.lt.s32.totalorder %v17852_v25, %v10244_v12 }
 0x5f0   :  { %10221 = vmatpush1.bf16.msra.mxu1 %v14812_v20  ;;  %vm10247_vm4 = vmand %vm10241_vm2, %vm10245_vm3  ;;  %vm10661_vm3 = vcmp.gt.s32.totalorder %v17852_v25, %v18092_v6 }
 0x5f1   :  { %10222 = vmatprep.subr.bf16.mxu1 %v14817_v22  ;;  %v13940_v20 = vsel %vm10247_vm4, 1.0, %v15091_v39 }
 0x5f4   :  { %10223 = vmatpush1.bf16.msra.mxu1 %v14815_v29 }
 0x5f5   :  { %10224 = vmatprep.subr.bf16.mxu1 %v14820_v31 }
 0x5f8   :  { %10225 = vmatpush1.bf16.msra.mxu1 %v14818_v35 }
 0x5fd   :  { %v9580_v13 = vpop.f32.mrb[20].mxu1  ;;  %v9659_v26 = vpop.f32.mrb[32].mxu0 }
 0x5fe   :  { %v9587_v34 = vadd.f32 %v9580_v13, %v9508_v46  ;;  %v9582_v43 = vpop.f32.mrb[21].mxu1  ;;  %v9661_v28 = vpop.f32.mrb[33].mxu0  ;;  %v18099_v13 = vadd.s32 8, %v17852_v25 }
 0x5ff   :  { %v9588_v33 = vadd.f32 %v9582_v43, %v9509_v37  ;;  %v9584_v38 = vpop.f32.mrb[22].mxu1  ;;  %v9663_v17 = vpop.f32.mrb[34].mxu0 }
 0x600   :  { %v9666_v42 = vadd.f32 %v9659_v26, %v9587_v34  ;;  %v9585_v21 = vpop.f32.mrb[23].mxu1  ;;  %v9664_v18 = vpop.f32.mrb[35].mxu0  ;;  %vm10242_vm6 = vcmp.ge.s32.totalorder %v18099_v13, %v10240_v11  ;;  %vm10246_vm7 = vcmp.lt.s32.totalorder %v18099_v13, %v10244_v12  ;;  %v10354_v38 = vadd.s32 1, %v17852_v25  ;;  %v14834_v11 = vld [vmem:[%s18966_s23 + $0x30] sm:$0xff]   ;;  %v14858_v12 = vld [vmem:[%s18964_s21 + $0x28] sm:$0xff]  }
 0x601   :  { %v9667_v24 = vadd.f32 %v9661_v28, %v9588_v33  ;;  %vm10248_vm9 = vmand %vm10242_vm6, %vm10246_vm7  ;;  %v10435_v33 = vld [vmem:[%s18987_s16] sm:$0x3]  ;;  %v10352_v18 = vmul.u32 8, %v17852_v25  ;;  %vm10662_vm4 = vcmp.gt.s32.totalorder %v18099_v13, %v18092_v6 }
 0x602   :  { %v13941_v28 = vsel %vm10248_vm9, 1.0, %v15091_v39  ;;  %10438 = vperm.xlu0 %14772, %v10435_v33   ;;  %v10355_v22 = vmul.u32 8, %v10354_v38  ;;  %vm14710_vm7 = vmpackc.low %vm10662_vm4, %vm10661_vm3  ;;  %v15093_v38 = vmov 1.0|1.0   ;;  %v14869_v33 = vld [vmem:[%s18964_s21 + $0x1c0] sm:$0xff]  }
 0x603   :  { %vm10353_vm10 = vcmp.ge.s32.totalorder %v18092_v6, %v10352_v18  ;;  %v14839_v18 = vld [vmem:[%s18964_s21 + $0xc0] sm:$0xff]  }
 0x604   :  { %vm10356_vm11 = vcmp.lt.s32.totalorder %v18092_v6, %v10355_v22  ;;  %v14840_v22 = vld [vmem:[%s18964_s21 + $0x80] sm:$0xff]   ;;  %14421 = vmatprep.subr.bf16.mxu1 %v14839_v18 }
 0x605   :  { %vm10357_vm12 = vmand %vm10353_vm10, %vm10356_vm11 }
 0x63d   :  { %v9736_v40 = vpop.f32.mrb[24].mxu1  ;;  %v9817_v14 = vpop.f32.mrb[36].mxu0 }
 0x63e   :  { %v9743_v45 = vadd.f32 %v9736_v40, %v9666_v42  ;;  %v9738_v48 = vpop.f32.mrb[25].mxu1  ;;  %v9819_v19 = vpop.f32.mrb[37].mxu0 }
 0x63f   :  { %v9744_v51 = vadd.f32 %v9738_v48, %v9667_v24  ;;  %v9740_v46 = vpop.f32.mrb[26].mxu1  ;;  %v9821_v57 = vpop.f32.mrb[38].mxu0 }
 0x640   :  { %v9824_v49 = vadd.f32 %v9817_v14, %v9743_v45  ;;  %v9741_v37 = vpop.f32.mrb[27].mxu1  ;;  %v9822_v53 = vpop.f32.mrb[39].mxu0  ;;  %v14823_v46 = vld [vmem:[%s18966_s23 + $0x48] sm:$0xff]  }
 0x641   :  { %v9825_v55 = vadd.f32 %v9819_v19, %v9744_v51  ;;  %v14824_v57 = vld [vmem:[%s18966_s23 + $0x8] sm:$0xff]   ;;  %v14826_v37 = vld [vmem:[%s18966_s23 + $0x10] sm:$0xff]   ;;  %v14827_v53 = vld [vmem:[%s18966_s23 + $0x58] sm:$0xff]  }
 0x67d   :  { %v9896_v27 = vpop.f32.mrb[28].mxu1  ;;  %v9975_v58 = vpop.f32.mrb[40].mxu0 }
 0x67e   :  { %v9903_v8 = vadd.f32 %v9896_v27, %v9824_v49  ;;  %v9898_v59 = vpop.f32.mrb[29].mxu1  ;;  %v9977_v60 = vpop.f32.mrb[41].mxu0  ;;  %v14825_v49 = vld [vmem:[%s18966_s23 + $0x50] sm:$0xff]   ;;  %v10635_v27 = vld [vmem:[%s18989_s12] sm:$0x1] }
 0x67f   :  { %v9904_v61 = vadd.f32 %v9898_v59, %v9825_v55  ;;  %v9900_v62 = vpop.f32.mrb[30].mxu1  ;;  %v9979_v63 = vpop.f32.mrb[42].mxu0  ;;  %v10622_v55 = vld [vmem:[%s18988_s10] sm:$0x1]  ;;  %vm10636_vm14 = vcmp.eq.s32.totalorder %v10635_v27, 0  ;;  %v10641_v59 = vadd.s32 1, %v10624_v23 }
 0x680   :  { %v9982_v7 = vadd.f32 %v9975_v58, %v9903_v8  ;;  %v9901_v0 = vpop.f32.mrb[31].mxu1  ;;  %v9980_v1 = vpop.f32.mrb[43].mxu0  ;;  %v14828_v58 = vld [vmem:[%s18966_s23 + $0x18] sm:$0xff]   ;;  %v10623_v8 = vand.u32 7, %v10622_v55  ;;  %v10649_v62 = vsel %vm10636_vm14, 1, %v15092_v44  ;;  %v10625_v63 = vand.u32 1, %v18099_v13 }
 0x681   :  { %v9983_v2 = vadd.f32 %v9977_v60, %v9904_v61  ;;  %v14830_v60 = vld [vmem:[%s18966_s23 + $0x20] sm:$0xff]   ;;  %v10643_v0 = vmul.u32 8, %v10641_v59  ;;  %v14832_v1 = vld [vmem:[%s18966_s23 + $0x28] sm:$0xff]   ;;  %v14833_v44 = vld [vmem:[%s18966_s23 + $0x70] sm:$0xff]  }
 0x682   :  { %v9996_v3 = vadd.f32 %v9989_v15, %v9982_v7  ;;  %v14829_v15 = vld [vmem:[%s18966_s23 + $0x60] sm:$0xff]   ;;  %v10628_v61 = vmul.u32 2, %v10623_v8  ;;  %v10637_v7 = vmul.u32 8, %v10624_v23  ;;  %v10642_v10 = vadd.s32 1, %v10625_v63 }
 0x683   :  { %v9997_v4 = vadd.f32 %v9993_v30, %v9983_v2  ;;  %v14831_v30 = vld [vmem:[%s18966_s23 + $0x68] sm:$0xff]   ;;  %v10626_v2 = vsub.s32 %v17852_v25, %v10624_v23  ;;  %vm18187_vm0 = vcmp.lt.s32.totalorder %v18092_v6, %v10643_v0  ;;  %v13948_v23 = vld [vmem:[%s18967_s24] ss:$0 sm:$0xff] }
 0x684   :  { %v9998_v41 = vmax.f32 %v9996_v3, 0.0  ;;  %v10632_v3 = vrot.slane %v10628_v61, %v17861_v32  ;;  %vm18182_vm15 = vcmp.ge.s32.totalorder %v18092_v6, %v10637_v7  ;;  %v14841_v7 = vld [vmem:[%s18964_s21 + $0x48] sm:$0xff]  }
 0x685   :  { %v9999_v9 = vmax.f32 %v9997_v4, 0.0  ;;  %v10653_v4 = vrot.slane %v10649_v62, %v17861_v32 }
 0x686   :  { %v18087_v5 = vpack.c.bf16 %v9998_v41, %v9998_v41  ;;  %vm18194_vm1 = vcmp.eq.s32.totalorder %v10632_v3, %v10626_v2  ;;  %v14845_v2 = vld [vmem:[%s18964_s21 + $0x50] sm:$0xff]   ;;  %v14850_v41 = vld [vmem:[%s18964_s21 + $0x18] sm:$0xff]  }
 0x687   :  { %v18085_v47 = vpack.c.bf16 %v9999_v9, %v9999_v9  ;;  %vm18198_vm2 = vcmp.eq.s32.totalorder %v10653_v4, 1  ;;  %v14846_v4 = vld [vmem:[%s18964_s21 + $0x10] sm:$0xff]   ;;  %v14853_v9 = vld [vmem:[%s18964_s21 + $0x60] sm:$0xff]  }
 0x688   :  { %vm10655_vm6 = vmand %vm18194_vm1, %vm18198_vm2 }
 0x689   :  { %10226 = vmatprep.mubr.bf16.mxu1 %v18085_v47 }
 0x68a   :  { %10227 = vmatmul.mubr.bf16.vlgmr.msra.gmra.mrb[32].mxu1 %v18087_v5 }
 0x68b   :  { %14422 = vmatpush3.bf16.msra.mxu1 %v14840_v22 }
 0x75d   :  { %v10228_v16 = vpop.f32.mrb[32].mxu1 }
 0x75e   :  { %v10230_v26 = vpop.f32.mrb[33].mxu1 }
 0x75f   :  { %v10232_v34 = vpop.f32.mrb[34].mxu1  ;;  %13942 = vmatprep.subr.msk.mxu0 %vm10260_vm5, %v10230_v26  ;;  %v14835_v26 = vld [vmem:[%s18966_s23 + $0x78] sm:$0xff]  }
 0x760   :  { %v10233_v43 = vpop.f32.mrb[35].mxu1  ;;  %13943 = vmatpush1.msk.msra.mxu0 %vm10260_vm5, %v10228_v16  ;;  %vm10647_vm5 = vmand %vm18182_vm15, %vm18187_vm0  ;;  %v10638_v34 = vmul.u32 8, %v10625_v63  ;;  %v14861_v16 = vld [vmem:[%s18964_s21 + $0x70] sm:$0xff]  }
 0x761   :  { %13944 = vmatmul.mubr.msk.f32.vlgmr.msra.gmra.mrb[44].mxu0 %vm10253_vm8, %v13940_v20  ;;  %v10627_v20 = vsub.s32 %v18099_v13, %v10625_v63  ;;  %v10644_v43 = vmul.u32 8, %v10642_v10  ;;  %vm10657_vm9 = vmand %vm10655_vm6, %vm10647_vm5  ;;  %v14838_v63 = vld [vmem:[%s18964_s21] sm:$0xff]  }
 0x762   :  { %10337 = vmatprep.mubr.f32.mxu0 %v15091_v39  ;;  %vm10640_vm10 = vcmp.ge.s32.totalorder %v18092_v6, %v10638_v34  ;;  %v14854_v10 = vld [vmem:[%s18964_s21 + $0x20] sm:$0xff]   ;;  %v14866_v34 = vld [vmem:[%s18964_s21 + $0x38] sm:$0xff]  }
 0x763   :  { %vm10646_vm11 = vcmp.lt.s32.totalorder %v18092_v6, %v10644_v43  ;;  %v14867_v43 = vld [vmem:[%s18964_s21 + $0xf8] sm:$0xff]  }
 0x764   :  { %vm10648_vm14 = vmand %vm10640_vm10, %vm10646_vm11 }
 0x765   :  { %13945 = vmatmul.mubr.msk.f32.gmra.mrb[46].mxu0 %vm10253_vm8, %v13941_v28  ;;  %v14836_v28 = vld [vmem:[%s18966_s23 + $0x38] sm:$0xff]   ;;  %vm18221_vm8 = vcmp.eq.s32.totalorder %v10632_v3, %v10627_v20 }
 0x766   :  { %10428 = vmatprep.mubr.f32.mxu0 %v15091_v39  ;;  %v14865_v20 = vld [vmem:[%s18964_s21 + $0x78] sm:$0xff]  }
 0x834   :  { %v10333_v17 = vpop.f32.mrb[44].mxu0 }
 0x835   :  { %v10335_v42 = vpop.f32.mrb[45].mxu0  ;;  %v10344_v21 = vadd.f32 %v10333_v17, %v17881_v50  ;;  %v10659_v17 = vsel %vm10657_vm9, 1.0, %v15091_v39 }
 0x836   :  { %v10345_v24 = vadd.f32 %v10335_v42, %v17883_v52  ;;  %v14821_v52 = vld [vmem:[%s18966_s23 + $0x40] sm:$0xff]  }
 0x837   :  { %v10348_v14 = vmax.f32 %v10344_v21, 0.0  ;;  %v14837_v21 = vld [vmem:[%s18964_s21 + $0x40] sm:$0xff]  }
 0x838   :  { %v10339_v29 = vpop.f32.mrb[46].mxu0  ;;  %v10349_v48 = vmax.f32 %v10345_v24, 0.0  ;;  %v14843_v24 = vld [vmem:[%s18964_s21 + $0xc8] sm:$0xff]  }
 0x839   :  { %v10346_v31 = vadd.f32 %v10339_v29, %v17885_v54  ;;  %v10341_v35 = vpop.f32.mrb[47].mxu0  ;;  %v18128_v54 = vsel %vm10357_vm12, 1.0, %v15091_v39  ;;  %vm10656_vm12 = vmand %vm18221_vm8, %vm18198_vm2  ;;  %v14844_v29 = vld [vmem:[%s18964_s21 + $0x88] sm:$0xff]   ;;  %14423 = vmatprep.subr.bf16.mxu1 %v14843_v24  ;;  %v14870_v24 = vld [vmem:[%s18964_s21 + $0x180] sm:$0xff]  }
 0x83a   :  { %v10347_v40 = vadd.f32 %v10341_v35, %v17887_v56  ;;  %v14822_v56 = vld [vmem:[%s18966_s23] sm:$0xff]   ;;  %vm10658_vm15 = vmand %vm10656_vm12, %vm10648_vm14  ;;  %14424 = vmatpush3.bf16.msra.mxu1 %v14844_v29  ;;  %v14848_v35 = vld [vmem:[%s18964_s21 + $0x90] sm:$0xff]  }
 0x83b   :  { %v10350_v45 = vmax.f32 %v10346_v31, 0.0  ;;  %v18238_v42 = vsel %vm10658_vm15, 1.0, %v15091_v39  ;;  %v14847_v31 = vld [vmem:[%s18964_s21 + $0xd0] sm:$0xff]   ;;  %v14873_v29 = vld [vmem:[%s18964_s21 + $0x1c8] sm:$0xff]  }
 0x83c   :  { %v10351_v19 = vmax.f32 %v10347_v40, 0.0  ;;  %14425 = vmatprep.subr.bf16.mxu1 %v14847_v31  ;;  %v14851_v40 = vld [vmem:[%s18964_s21 + $0xd8] sm:$0xff]  }
 0x83d   :  { %v18118_v50 = vpack.c.bf16 %v10350_v45, %v10348_v14  ;;  %v14852_v14 = vld [vmem:[%s18964_s21 + $0x98] sm:$0xff]   ;;  %v14855_v45 = vld [vmem:[%s18964_s21 + $0xe0] sm:$0xff]  }
 0x83e   :  { %v18120_v51 = vpack.c.bf16 %v10351_v19, %v10349_v48  ;;  %14426 = vmatpush3.bf16.msra.mxu1 %v14848_v35  ;;  %v14856_v48 = vld [vmem:[%s18964_s21 + $0xa0] sm:$0xff]   ;;  %v14859_v19 = vld [vmem:[%s18964_s21 + $0xe8] sm:$0xff]  }
 0x83f   :  { %14427 = vmatprep.subr.bf16.mxu1 %v14851_v40  ;;  %v14872_v40 = vld [vmem:[%s18964_s21 + $0x100] sm:$0xff]  }
 0x840   :  { %14707 = vmatprep.subr.bf16.mxu0 %v18120_v51 }
 0x841   :  { %14709 = vmatpush1.bf16.msra.mxu0 %v18118_v50 }
 0x842   :  { %14395 = vmatprep.subr.bf16.mxu0 %v14821_v52  ;;  %14428 = vmatpush3.bf16.msra.mxu1 %v14852_v14  ;;  %v14864_v52 = vld [vmem:[%s18964_s21 + $0xb0] sm:$0xff]  }
 0x843   :  { %14429 = vmatprep.subr.bf16.mxu1 %v14855_v45 }
 0x844   :  { %13947 = vmatmul.mubr.msk.f32.vlgmr.msra.gmra.mrb[48].mxu0 %vm10360_vm13, %v18128_v54 }
 0x845   :  { %14396 = vmatpush3.bf16.msra.mxu0 %v14822_v56  ;;  %10613 = vmatprep.mubr.bf16.mxu0 %v18120_v51  ;;  %v10439_v56 = vpop.permute.xlu0 %10438 }
 0x846   :  { %14397 = vmatprep.subr.bf16.mxu0 %v14823_v46  ;;  %14430 = vmatpush3.bf16.msra.mxu1 %v14856_v48  ;;  %14965 = vrcp.f32 %v10439_v56  ;;  %v14875_v48 = vld [vmem:[%s18964_s21 + $0x148] sm:$0xff]  }
 0x847   :  { %14431 = vmatprep.subr.bf16.mxu1 %v14859_v19  ;;  %v14876_v56 = vld [vmem:[%s18964_s21 + $0x108] sm:$0xff]  }
 0x849   :  { %14398 = vmatpush3.bf16.msra.mxu0 %v14824_v57 }
 0x84a   :  { %14399 = vmatprep.subr.bf16.mxu0 %v14825_v49 }
 0x84d   :  { %14400 = vmatpush3.bf16.msra.mxu0 %v14826_v37 }
 0x84e   :  { %14401 = vmatprep.subr.bf16.mxu0 %v14827_v53 }
 0x850   :  { %v14966_v46 = vpop.eup %14965 }
 0x851   :  { %14402 = vmatpush3.bf16.msra.mxu0 %v14828_v58 }
 0x852   :  { %14403 = vmatprep.subr.bf16.mxu0 %v14829_v15 }
 0x855   :  { %14404 = vmatpush3.bf16.msra.mxu0 %v14830_v60 }
 0x856   :  { %14405 = vmatprep.subr.bf16.mxu0 %v14831_v30 }
 0x859   :  { %14406 = vmatpush3.bf16.msra.mxu0 %v14832_v1  ;;  %v14842_v1 = vld [vmem:[%s18964_s21 + $0x8] sm:$0xff]  }
 0x85a   :  { %14407 = vmatprep.subr.bf16.mxu0 %v14833_v44  ;;  %v14849_v44 = vld [vmem:[%s18964_s21 + $0x58] sm:$0xff]  }
 0x85d   :  { %14408 = vmatpush3.bf16.msra.mxu0 %v14834_v11  ;;  %v14857_v11 = vld [vmem:[%s18964_s21 + $0x68] sm:$0xff]  }
 0x85e   :  { %14409 = vmatprep.subr.bf16.mxu0 %v14835_v26  ;;  %v14862_v26 = vld [vmem:[%s18964_s21 + $0x30] sm:$0xff]  }
 0x861   :  { %14410 = vmatpush3.bf16.msra.mxu0 %v14836_v28  ;;  %v14868_v28 = vld [vmem:[%s18964_s21 + $0xb8] sm:$0xff]  }
 0x862   :  { %14711 = vmatprep.subr.msk.bf16.mxu0 %vm14710_vm7, %v15093_v38 }
 0x864   :  { %10614 = vmatmul.mubr.bf16.vlgmr.msra.gmra.mrb[52].mxu0 %v18118_v50 }
 0x865   :  { %14713 = vmatpush3.bf16.msk.msra.mxu0 %vm14710_vm7, %v15093_v38  ;;  %14673 = vmatprep.mubr.msk.f32.mxu0 %vm10360_vm13, %v10659_v17 }
 0x866   :  { %14715 = vmatprep.subr.bf16.mxu0 %v18120_v51  ;;  %v14863_v51 = vld [vmem:[%s18964_s21 + $0xf0] sm:$0xff]  }
 0x86c   :  { %14674 = vmatmul.mubr.msk.f32.vlgmr.msra.gmra.mrb[50].mxu0 %vm10360_vm13, %v18238_v42 }
 0x86d   :  { %14717 = vmatpush1.bf16.msra.mxu0 %v18118_v50  ;;  %10822 = vmatprep.mubr.f32.mxu0 %v15091_v39  ;;  %v14860_v50 = vld [vmem:[%s18964_s21 + $0xa8] sm:$0xff]  }
 0x86e   :  { %14443 = vmatprep.subr.bf16.mxu0 %v14837_v21  ;;  %14432 = vmatpush3.bf16.msra.mxu1 %v14860_v50  ;;  %v14874_v50 = vld [vmem:[%s18964_s21 + $0x188] sm:$0xff]  }
 0x86f   :  { %14433 = vmatprep.subr.bf16.mxu1 %v14863_v51 }
 0x872   :  { %14434 = vmatpush3.bf16.msra.mxu1 %v14864_v52  ;;  %v14877_v52 = vld [vmem:[%s18964_s21 + $0x1d0] sm:$0xff]  }
 0x873   :  { %14435 = vmatprep.subr.bf16.mxu1 %v14867_v43 }
 0x876   :  { %14436 = vmatpush3.bf16.msra.mxu1 %v14868_v28  ;;  %v14904_v28 = vld [vmem:[%s18964_s21 + $0x200] sm:$0xff]  }
 0x917   :  { %v10430_v57 = vpop.f32.mrb[48].mxu0 }
 0x918   :  { %v18289_v49 = vmul.f32 %v14966_v46, %v10430_v57  ;;  %v10432_v37 = vpop.f32.mrb[49].mxu0  ;;  %v14878_v57 = vld [vmem:[%s18964_s21 + $0x190] sm:$0xff]  }
 0x919   :  { %v18291_v53 = vmul.f32 %v14966_v46, %v10432_v37  ;;  %v14879_v46 = vld [vmem:[%s18964_s21 + $0x150] sm:$0xff]   ;;  %v14881_v37 = vld [vmem:[%s18964_s21 + $0x1d8] sm:$0xff]  }
 0x937   :  { %v14411_v55 = vpop.f32.mrb[52].mxu0 }
 0x938   :  { %v14412_v27 = vpop.f32.mrb[53].mxu0 }
 0x939   :  { %v14413_v58 = vadd.f32 %v14412_v27, %v14411_v55  ;;  %v14414_v8 = vpop.f32.mrb[54].mxu0  ;;  %v14880_v55 = vld [vmem:[%s18964_s21 + $0x110] sm:$0xff]   ;;  %v14882_v27 = vld [vmem:[%s18964_s21 + $0x198] sm:$0xff]  }
 0x93a   :  { %v14415_v15 = vpop.f32.mrb[55].mxu0 }
 0x93b   :  { %v18296_v59 = vadd.f32 %v14413_v58, %v13948_v23  ;;  %v14416_v60 = vadd.f32 %v14415_v15, %v14414_v8  ;;  %v14885_v58 = vld [vmem:[%s18964_s21 + $0x1e0] sm:$0xff]   ;;  %v14884_v8 = vld [vmem:[%s18964_s21 + $0x118] sm:$0xff]  }
 0x93c   :  { %v14887_v15 = vld [vmem:[%s18964_s21 + $0x160] sm:$0xff]  }
 0x93d   :  { %v18298_v61 = vadd.f32 %v14416_v60, %v13948_v23  ;;  %v14883_v23 = vld [vmem:[%s18964_s21 + $0x158] sm:$0xff]   ;;  %v14886_v60 = vld [vmem:[%s18964_s21 + $0x1a0] sm:$0xff]  }
 0x93f   :  { %v14675_v30 = vpop.f32.mrb[50].mxu0 }
 0x940   :  { %v10739_v62 = vpop.f32.mrb[51].mxu0  ;;  %vm10749_vm1 = vcmp.eq.f32.partialorder %v14675_v30, 0.0  ;;  %v14889_v30 = vld [vmem:[%s18964_s21 + $0x1e8] sm:$0xff]  }
 0x941   :  { %vm10748_vm0 = vcmp.eq.f32.partialorder %v10739_v62, 0.0  ;;  %v10751_v3 = vsel %vm10749_vm1, %v18238_v42, 0.0  ;;  %v14888_v62 = vld [vmem:[%s18964_s21 + $0x120] sm:$0xff]  }
 0x942   :  { %v10750_v0 = vsel %vm10748_vm0, %v10659_v17, 0.0  ;;  %v14871_v17 = vld [vmem:[%s18964_s21 + $0x140] sm:$0xff]  }
 0x943   :  { %13971 = vmatmul.mubr.msk.f32.vlgmr.msra.gmra.mrb[56].mxu0 %vm10360_vm13, %v10750_v0  ;;  %14465 = vmatprep.subr.bf16.mxu1 %v14871_v17  ;;  %v14893_v0 = vld [vmem:[%s18964_s21 + $0x1f0] sm:$0xff]   ;;  %v14907_v17 = vld [vmem:[%s18964_s21 + $0x248] sm:$0xff]  }
 0x944   :  { %10828 = vmatprep.mubr.f32.mxu0 %v15091_v39  ;;  %14444 = vmatpush3.bf16.msra.mxu0 %v14838_v63  ;;  %v14891_v63 = vld [vmem:[%s18964_s21 + $0x168] sm:$0xff]  }
 0x945   :  { %14445 = vmatprep.subr.bf16.mxu0 %v14841_v7  ;;  %v14890_v7 = vld [vmem:[%s18964_s21 + $0x1a8] sm:$0xff]  }
 0x947   :  { %13972 = vmatmul.mubr.msk.f32.gmra.mrb[58].mxu0 %vm10360_vm13, %v10751_v3  ;;  %v14894_v3 = vld [vmem:[%s18964_s21 + $0x1b0] sm:$0xff]  }
 0x948   :  { %14446 = vmatpush3.bf16.msra.mxu0 %v14842_v1  ;;  %v14892_v1 = vld [vmem:[%s18964_s21 + $0x128] sm:$0xff]  }
 0x949   :  { %14447 = vmatprep.subr.bf16.mxu0 %v14845_v2  ;;  %v14895_v2 = vld [vmem:[%s18964_s21 + $0x170] sm:$0xff]  }
 0x94c   :  { %14448 = vmatpush3.bf16.msra.mxu0 %v14846_v4  ;;  %v14897_v4 = vld [vmem:[%s18964_s21 + $0x1f8] sm:$0xff]  }
 0x94d   :  { %14449 = vmatprep.subr.bf16.mxu0 %v14849_v44  ;;  %v14896_v44 = vld [vmem:[%s18964_s21 + $0x130] sm:$0xff]  }
 0x950   :  { %14450 = vmatpush3.bf16.msra.mxu0 %v14850_v41  ;;  %v14899_v41 = vld [vmem:[%s18964_s21 + $0x178] sm:$0xff]  }
 0x951   :  { %14451 = vmatprep.subr.bf16.mxu0 %v14853_v9  ;;  %v14898_v9 = vld [vmem:[%s18964_s21 + $0x1b8] sm:$0xff]  }
 0x954   :  { %14452 = vmatpush3.bf16.msra.mxu0 %v14854_v10  ;;  %v14901_v10 = vld [vmem:[%s18964_s21 + $0x2c0] sm:$0xff]  }
 0x955   :  { %14453 = vmatprep.subr.bf16.mxu0 %v14857_v11 }
 0x958   :  { %14454 = vmatpush3.bf16.msra.mxu0 %v14858_v12  ;;  %v14900_v12 = vld [vmem:[%s18964_s21 + $0x138] sm:$0xff]  }
 0x959   :  { %14455 = vmatprep.subr.bf16.mxu0 %v14861_v16  ;;  %v14903_v16 = vld [vmem:[%s18964_s21 + $0x240] sm:$0xff]  }
 0x95c   :  { %14456 = vmatpush3.bf16.msra.mxu0 %v14862_v26  ;;  %v14902_v26 = vld [vmem:[%s18964_s21 + $0x280] sm:$0xff]  }
 0x95d   :  { %14457 = vmatprep.subr.bf16.mxu0 %v14865_v20 }
 0x960   :  { %14458 = vmatpush3.bf16.msra.mxu0 %v14866_v34  ;;  %v14905_v34 = vld [vmem:[%s18964_s21 + $0x2c8] sm:$0xff]  }
 0x961   :  { %14487 = vmatprep.subr.bf16.mxu0 %v14869_v33 }
 0xa16   :  { %v10824_v42 = vpop.f32.mrb[56].mxu0 }
 0xa17   :  { %v18361_v21 = vpack.c.bf16 %v10824_v42, %v10824_v42  ;;  %v10826_v18 = vpop.f32.mrb[57].mxu0  ;;  %v14906_v42 = vld [vmem:[%s18964_s21 + $0x288] sm:$0xff]  }
 0xa18   :  { %v10836_v22 = vpack.c.bf16 %v10826_v18, %v10826_v18  ;;  %v14909_v18 = vld [vmem:[%s18964_s21 + $0x2d0] sm:$0xff]  }
 0xa19   :  { %v10904_v45 = vrot.slane %v18361_v21, 1  ;;  %v11387_v20 = vrot.slane %v18361_v21, 3  ;;  %v11213_v33 = vrot.slane %v18361_v21, 2 }
 0xa1a   :  { %11172 = vmatprep.mubr.bf16.mxu0 %v10836_v22  ;;  %v18369_v31 = vpop.f32.mrb[58].mxu0  ;;  %v10905_v35 = vrot.slane %v10836_v22, 1  ;;  %v11388_v19 = vrot.slane %v10836_v22, 3  ;;  %v11214_v51 = vrot.slane %v10836_v22, 2  ;;  %v14911_v22 = vld [vmem:[%s18964_s21 + $0x250] sm:$0xff]  }
 0xa1b   :  { %11173 = vmatmul.mubr.bf16.vlgmr.msra.gmra.mrb[60].mxu0 %v18361_v21  ;;  %v10832_v14 = vpop.f32.mrb[59].mxu0  ;;  %v14908_v21 = vld [vmem:[%s18964_s21 + $0x208] sm:$0xff]  }
 0xa1c   :  { %14488 = vmatpush3.bf16.msra.mxu0 %v14870_v24  ;;  %11036 = vmatprep.mubr.bf16.mxu1 %v10905_v35  ;;  %v18457_v11 = vpack.c.bf16 %v10832_v14, %v10832_v14  ;;  %v14910_v24 = vld [vmem:[%s18964_s21 + $0x290] sm:$0xff]   ;;  %v14914_v14 = vld [vmem:[%s18964_s21 + $0x298] sm:$0xff]  }
 0xa1d   :  { %11037 = vmatmul.mubr.bf16.vlgmr.msra.gmra.mrb[36].mxu1 %v10904_v45  ;;  %14489 = vmatprep.subr.bf16.mxu0 %v14873_v29  ;;  %v14913_v29 = vld [vmem:[%s18964_s21 + $0x2d8] sm:$0xff]   ;;  %v14912_v35 = vld [vmem:[%s18964_s21 + $0x210] sm:$0xff]   ;;  %v14917_v45 = vld [vmem:[%s18964_s21 + $0x2e0] sm:$0xff]  }
 0xa1e   :  { %14466 = vmatpush3.bf16.msra.mxu1 %v14872_v40  ;;  %11345 = vmatprep.mubr.bf16.mxu1 %v11214_v51  ;;  %v11736_v43 = vrot.slane %v18457_v11, 1  ;;  %v14915_v40 = vld [vmem:[%s18964_s21 + $0x258] sm:$0xff]   ;;  %v14921_v51 = vld [vmem:[%s18964_s21 + $0x2e8] sm:$0xff]  }
 0xa1f   :  { %14467 = vmatprep.subr.bf16.mxu1 %v14875_v48  ;;  %11519 = vmatprep.mubr.bf16.mxu0 %v11388_v19  ;;  %v14916_v48 = vld [vmem:[%s18964_s21 + $0x218] sm:$0xff]   ;;  %v14919_v19 = vld [vmem:[%s18964_s21 + $0x260] sm:$0xff]  }
 0xa20   :  { %14490 = vmatpush3.bf16.msra.mxu0 %v14874_v50  ;;  %v14918_v50 = vld [vmem:[%s18964_s21 + $0x2a0] sm:$0xff]  }
 0xa21   :  { %14491 = vmatprep.subr.bf16.mxu0 %v14877_v52  ;;  %v14920_v52 = vld [vmem:[%s18964_s21 + $0x220] sm:$0xff]  }
 0xa22   :  { %14468 = vmatpush3.bf16.msra.mxu1 %v14876_v56  ;;  %v14923_v56 = vld [vmem:[%s18964_s21 + $0x268] sm:$0xff]  }
 0xa23   :  { %14469 = vmatprep.subr.bf16.mxu1 %v14879_v46  ;;  %v14922_v46 = vld [vmem:[%s18964_s21 + $0x2a8] sm:$0xff]  }
 0xa24   :  { %14492 = vmatpush3.bf16.msra.mxu0 %v14878_v57  ;;  %v14925_v57 = vld [vmem:[%s18964_s21 + $0x2f0] sm:$0xff]  }
 0xa25   :  { %14493 = vmatprep.subr.bf16.mxu0 %v14881_v37  ;;  %v14924_v37 = vld [vmem:[%s18964_s21 + $0x228] sm:$0xff]  }
 0xa26   :  { %14470 = vmatpush3.bf16.msra.mxu1 %v14880_v55  ;;  %v14927_v55 = vld [vmem:[%s18964_s21 + $0x270] sm:$0xff]  }
 0xa27   :  { %14471 = vmatprep.subr.bf16.mxu1 %v14883_v23  ;;  %v14926_v23 = vld [vmem:[%s18964_s21 + $0x2b0] sm:$0xff]  }
 0xa28   :  { %14494 = vmatpush3.bf16.msra.mxu0 %v14882_v27  ;;  %v14929_v27 = vld [vmem:[%s18964_s21 + $0x2f8] sm:$0xff]  }
 0xa29   :  { %14495 = vmatprep.subr.bf16.mxu0 %v14885_v58  ;;  %v14928_v58 = vld [vmem:[%s18964_s21 + $0x230] sm:$0xff]  }
 0xa2a   :  { %14472 = vmatpush3.bf16.msra.mxu1 %v14884_v8  ;;  %v14931_v8 = vld [vmem:[%s18964_s21 + $0x278] sm:$0xff]  }
 0xa2b   :  { %14473 = vmatprep.subr.bf16.mxu1 %v14887_v15  ;;  %v14930_v15 = vld [vmem:[%s18964_s21 + $0x2b8] sm:$0xff]  }
 0xa2c   :  { %14496 = vmatpush3.bf16.msra.mxu0 %v14886_v60  ;;  %v18558_v60 = vpack.c.bf16 %v18369_v31, %v18369_v31  ;;  %v14934_v31 = vld [vmem:[%s18964_s21 + $0x380] sm:$0xff]  }
 0xa2d   :  { %14497 = vmatprep.subr.bf16.mxu0 %v14889_v30  ;;  %v14933_v30 = vld [vmem:[%s18964_s21 + $0x3c0] sm:$0xff]  }
 0xa2e   :  { %14474 = vmatpush3.bf16.msra.mxu1 %v14888_v62  ;;  %v14932_v62 = vld [vmem:[%s18964_s21 + $0x238] sm:$0xff]  }
 0xa2f   :  { %14475 = vmatprep.subr.bf16.mxu1 %v14891_v63  ;;  %v14935_v63 = vld [vmem:[%s18964_s21 + $0x340] sm:$0xff]  }
 0xa30   :  { %14498 = vmatpush3.bf16.msra.mxu0 %v14890_v7  ;;  %v11735_v7 = vrot.slane %v18558_v60, 1 }
 0xa31   :  { %14499 = vmatprep.subr.bf16.mxu0 %v14893_v0  ;;  %v14937_v0 = vld [vmem:[%s18964_s21 + $0x3c8] sm:$0xff]  }
 0xa32   :  { %14476 = vmatpush3.bf16.msra.mxu1 %v14892_v1  ;;  %v12084_v1 = vrot.slane %v18457_v11, 3 }
 0xa33   :  { %14477 = vmatprep.subr.bf16.mxu1 %v14895_v2  ;;  %v14936_v2 = vld [vmem:[%s18964_s21 + $0x300] sm:$0xff]  }
 0xa34   :  { %14500 = vmatpush3.bf16.msra.mxu0 %v14894_v3  ;;  %v14939_v3 = vld [vmem:[%s18964_s21 + $0x348] sm:$0xff]  }
 0xa35   :  { %14501 = vmatprep.subr.bf16.mxu0 %v14897_v4  ;;  %v11910_v4 = vrot.slane %v18457_v11, 2 }
 0xa36   :  { %14478 = vmatpush3.bf16.msra.mxu1 %v14896_v44  ;;  %v14938_v44 = vld [vmem:[%s18964_s21 + $0x388] sm:$0xff]  }
 0xa37   :  { %14479 = vmatprep.subr.bf16.mxu1 %v14899_v41  ;;  %v14941_v41 = vld [vmem:[%s18964_s21 + $0x3d0] sm:$0xff]  }
 0xa38   :  { %14502 = vmatpush3.bf16.msra.mxu0 %v14898_v9  ;;  %v14940_v9 = vld [vmem:[%s18964_s21 + $0x308] sm:$0xff]  }
 0xa39   :  { %14531 = vmatprep.subr.bf16.mxu0 %v14901_v10  ;;  %v14943_v10 = vld [vmem:[%s18964_s21 + $0x350] sm:$0xff]  }
 0xa3a   :  { %14480 = vmatpush3.bf16.msra.mxu1 %v14900_v12  ;;  %v14945_v12 = vld [vmem:[%s18964_s21 + $0x3d8] sm:$0xff]  }
 0xa3b   :  { %11520 = vmatmul.mubr.bf16.vlgmr.msra.gmra.mrb[64].mxu0 %v11387_v20  ;;  %14509 = vmatprep.subr.bf16.mxu1 %v14903_v16  ;;  %v14944_v16 = vld [vmem:[%s18964_s21 + $0x310] sm:$0xff]   ;;  %v14946_v20 = vld [vmem:[%s18964_s21 + $0x398] sm:$0xff]  }
 0xa3c   :  { %14532 = vmatpush3.bf16.msra.mxu0 %v14902_v26  ;;  %11867 = vmatprep.mubr.bf16.mxu0 %v11736_v43  ;;  %v14947_v26 = vld [vmem:[%s18964_s21 + $0x358] sm:$0xff]  }
 0xa3d   :  { %11346 = vmatmul.mubr.bf16.vlgmr.msra.gmra.mrb[40].mxu1 %v11213_v33  ;;  %14533 = vmatprep.subr.bf16.mxu0 %v14905_v34  ;;  %v14949_v34 = vld [vmem:[%s18964_s21 + $0x3e0] sm:$0xff]   ;;  %v14948_v43 = vld [vmem:[%s18964_s21 + $0x318] sm:$0xff]  }
 0xa3e   :  { %14510 = vmatpush3.bf16.msra.mxu1 %v14904_v28  ;;  %11691 = vmatprep.mubr.bf16.mxu1 %v18457_v11  ;;  %v14942_v11 = vld [vmem:[%s18964_s21 + $0x390] sm:$0xff]   ;;  %v14951_v28 = vld [vmem:[%s18964_s21 + $0x360] sm:$0xff]  }
 0xa3f   :  { %14511 = vmatprep.subr.bf16.mxu1 %v14907_v17  ;;  %v14950_v33 = vld [vmem:[%s18964_s21 + $0x3a0] sm:$0xff]   ;;  %v14953_v17 = vld [vmem:[%s18964_s21 + $0x3e8] sm:$0xff]  }
 0xa40   :  { %14534 = vmatpush3.bf16.msra.mxu0 %v14906_v42  ;;  %v14952_v42 = vld [vmem:[%s18964_s21 + $0x320] sm:$0xff]  }
 0xa41   :  { %14535 = vmatprep.subr.bf16.mxu0 %v14909_v18  ;;  %v14955_v18 = vld [vmem:[%s18964_s21 + $0x368] sm:$0xff]  }
 0xa42   :  { %14512 = vmatpush3.bf16.msra.mxu1 %v14908_v21  ;;  %v14954_v21 = vld [vmem:[%s18964_s21 + $0x3a8] sm:$0xff]  }
 0xa43   :  { %14513 = vmatprep.subr.bf16.mxu1 %v14911_v22  ;;  %v14957_v22 = vld [vmem:[%s18964_s21 + $0x3f0] sm:$0xff]  }
 0xa44   :  { %14536 = vmatpush3.bf16.msra.mxu0 %v14910_v24  ;;  %v14956_v24 = vld [vmem:[%s18964_s21 + $0x328] sm:$0xff]  }
 0xa45   :  { %14537 = vmatprep.subr.bf16.mxu0 %v14913_v29  ;;  %v14959_v29 = vld [vmem:[%s18964_s21 + $0x370] sm:$0xff]  }
 0xa46   :  { %14514 = vmatpush3.bf16.msra.mxu1 %v14912_v35  ;;  %v14958_v35 = vld [vmem:[%s18964_s21 + $0x3b0] sm:$0xff]  }
 0xa47   :  { %14515 = vmatprep.subr.bf16.mxu1 %v14915_v40  ;;  %v14961_v40 = vld [vmem:[%s18964_s21 + $0x3f8] sm:$0xff]  }
 0xa48   :  { %14538 = vmatpush3.bf16.msra.mxu0 %v14914_v14  ;;  %v14960_v14 = vld [vmem:[%s18964_s21 + $0x330] sm:$0xff]  }
 0xa49   :  { %14539 = vmatprep.subr.bf16.mxu0 %v14917_v45  ;;  %v14963_v45 = vld [vmem:[%s18964_s21 + $0x378] sm:$0xff]  }
 0xa4a   :  { %14516 = vmatpush3.bf16.msra.mxu1 %v14916_v48  ;;  %v14962_v48 = vld [vmem:[%s18964_s21 + $0x3b8] sm:$0xff]  }
 0xa4b   :  { %14517 = vmatprep.subr.bf16.mxu1 %v14919_v19  ;;  %v14964_v19 = vld [vmem:[%s18964_s21 + $0x338] sm:$0xff]  }
 0xa4c   :  { %14540 = vmatpush3.bf16.msra.mxu0 %v14918_v50  ;;  %v12083_v50 = vrot.slane %v18558_v60, 3 }
 0xa4d   :  { %14541 = vmatprep.subr.bf16.mxu0 %v14921_v51  ;;  %v11909_v51 = vrot.slane %v18558_v60, 2 }
 0xa4e   :  { %14518 = vmatpush3.bf16.msra.mxu1 %v14920_v52 }
 0xa4f   :  { %14519 = vmatprep.subr.bf16.mxu1 %v14923_v56 }
 0xa50   :  { %14542 = vmatpush3.bf16.msra.mxu0 %v14922_v46 }
 0xa51   :  { %14543 = vmatprep.subr.bf16.mxu0 %v14925_v57 }
 0xa52   :  { %14520 = vmatpush3.bf16.msra.mxu1 %v14924_v37 }
 0xa53   :  { %14521 = vmatprep.subr.bf16.mxu1 %v14927_v55 }
 0xa54   :  { %14544 = vmatpush3.bf16.msra.mxu0 %v14926_v23 }
 0xa55   :  { %14545 = vmatprep.subr.bf16.mxu0 %v14929_v27 }
 0xa56   :  { %14522 = vmatpush3.bf16.msra.mxu1 %v14928_v58 }
 0xa57   :  { %14523 = vmatprep.subr.bf16.mxu1 %v14931_v8 }
 0xa58   :  { %14546 = vmatpush3.bf16.msra.mxu0 %v14930_v15 }
 0xa59   :  { %14575 = vmatprep.subr.bf16.mxu0 %v14933_v30 }
 0xa5a   :  { %14524 = vmatpush3.bf16.msra.mxu1 %v14932_v62 }
 0xa5b   :  { %11868 = vmatmul.mubr.bf16.vlgmr.msra.gmra.mrb[68].mxu0 %v11735_v7  ;;  %14553 = vmatprep.subr.bf16.mxu1 %v14935_v63 }
 0xa5c   :  { %14576 = vmatpush3.bf16.msra.mxu0 %v14934_v31  ;;  %12215 = vmatprep.mubr.bf16.mxu0 %v12084_v1 }
 0xa5d   :  { %11692 = vmatmul.mubr.bf16.vlgmr.msra.gmra.mrb[44].mxu1 %v18558_v60  ;;  %14577 = vmatprep.subr.bf16.mxu0 %v14937_v0 }
 0xa5e   :  { %14554 = vmatpush3.bf16.msra.mxu1 %v14936_v2  ;;  %12041 = vmatprep.mubr.bf16.mxu1 %v11910_v4 }
 0xa5f   :  { %14555 = vmatprep.subr.bf16.mxu1 %v14939_v3 }
 0xa60   :  { %14578 = vmatpush3.bf16.msra.mxu0 %v14938_v44 }
 0xa61   :  { %14579 = vmatprep.subr.bf16.mxu0 %v14941_v41 }
 0xa62   :  { %14556 = vmatpush3.bf16.msra.mxu1 %v14940_v9 }
 0xa63   :  { %14557 = vmatprep.subr.bf16.mxu1 %v14943_v10 }
 0xa64   :  { %14580 = vmatpush3.bf16.msra.mxu0 %v14942_v11 }
 0xa65   :  { %14581 = vmatprep.subr.bf16.mxu0 %v14945_v12 }
 0xa66   :  { %14558 = vmatpush3.bf16.msra.mxu1 %v14944_v16 }
 0xa67   :  { %14559 = vmatprep.subr.bf16.mxu1 %v14947_v26 }
 0xa68   :  { %14582 = vmatpush3.bf16.msra.mxu0 %v14946_v20 }
 0xa69   :  { %14583 = vmatprep.subr.bf16.mxu0 %v14949_v34 }
 0xa6a   :  { %14560 = vmatpush3.bf16.msra.mxu1 %v14948_v43 }
 0xa6b   :  { %14561 = vmatprep.subr.bf16.mxu1 %v14951_v28 }
 0xa6c   :  { %14584 = vmatpush3.bf16.msra.mxu0 %v14950_v33 }
 0xa6d   :  { %14585 = vmatprep.subr.bf16.mxu0 %v14953_v17 }
 0xa6e   :  { %14562 = vmatpush3.bf16.msra.mxu1 %v14952_v42 }
 0xa6f   :  { %14563 = vmatprep.subr.bf16.mxu1 %v14955_v18 }
 0xa70   :  { %14586 = vmatpush3.bf16.msra.mxu0 %v14954_v21 }
 0xa71   :  { %14587 = vmatprep.subr.bf16.mxu0 %v14957_v22 }
 0xa72   :  { %14564 = vmatpush3.bf16.msra.mxu1 %v14956_v24 }
 0xa73   :  { %14565 = vmatprep.subr.bf16.mxu1 %v14959_v29 }
 0xa74   :  { %14588 = vmatpush3.bf16.msra.mxu0 %v14958_v35 }
 0xa75   :  { %14589 = vmatprep.subr.bf16.mxu0 %v14961_v40 }
 0xa76   :  { %14566 = vmatpush3.bf16.msra.mxu1 %v14960_v14 }
 0xa77   :  { %14567 = vmatprep.subr.bf16.mxu1 %v14963_v45 }
 0xa78   :  { %14590 = vmatpush3.bf16.msra.mxu0 %v14962_v48 }
 0xa7a   :  { %14568 = vmatpush3.bf16.msra.mxu1 %v14964_v19 }
 0xa7b   :  { %12216 = vmatmul.mubr.bf16.vlgmr.msra.gmra.mrb[72].mxu0 %v12083_v50 }
 0xa7d   :  { %12042 = vmatmul.mubr.bf16.vlgmr.msra.gmra.mrb[48].mxu1 %v11909_v51 }
 0xaee   :  { %v14459_v52 = vpop.f32.mrb[60].mxu0 }
 0xaef   :  { %v14460_v56 = vpop.f32.mrb[61].mxu0 }
 0xaf0   :  { %v14461_v46 = vadd.f32 %v14460_v56, %v14459_v52  ;;  %v14437_v57 = vpop.f32.mrb[36].mxu1  ;;  %v14462_v37 = vpop.f32.mrb[62].mxu0 }
 0xaf1   :  { %v14438_v55 = vpop.f32.mrb[37].mxu1  ;;  %v14463_v23 = vpop.f32.mrb[63].mxu0 }
 0xaf2   :  { %v14439_v27 = vadd.f32 %v14438_v55, %v14437_v57  ;;  %v14440_v58 = vpop.f32.mrb[38].mxu1 }
 0xaf3   :  { %v14441_v8 = vpop.f32.mrb[39].mxu1 }
 0xaf4   :  { %v11175_v15 = vadd.f32 %v14461_v46, %v14439_v27 }
 0xb0e   :  { %v14503_v30 = vpop.f32.mrb[64].mxu0 }
 0xb0f   :  { %v14504_v62 = vpop.f32.mrb[65].mxu0 }
 0xb10   :  { %v14505_v63 = vadd.f32 %v14504_v62, %v14503_v30  ;;  %v14481_v31 = vpop.f32.mrb[40].mxu1  ;;  %v14506_v7 = vpop.f32.mrb[66].mxu0 }
 0xb11   :  { %v14482_v0 = vpop.f32.mrb[41].mxu1  ;;  %v14507_v1 = vpop.f32.mrb[67].mxu0 }
 0xb12   :  { %v14483_v60 = vadd.f32 %v14482_v0, %v14481_v31  ;;  %v14484_v2 = vpop.f32.mrb[42].mxu1 }
 0xb13   :  { %v14485_v3 = vpop.f32.mrb[43].mxu1 }
 0xb14   :  { %v11353_v4 = vadd.f32 %v14483_v60, %v11175_v15 }
 0xb16   :  { %v11527_v44 = vadd.f32 %v14505_v63, %v11353_v4 }
 0xb2e   :  { %v14547_v41 = vpop.f32.mrb[68].mxu0 }
 0xb2f   :  { %v14548_v9 = vpop.f32.mrb[69].mxu0 }
 0xb30   :  { %v14549_v10 = vadd.f32 %v14548_v9, %v14547_v41  ;;  %v14525_v11 = vpop.f32.mrb[44].mxu1  ;;  %v14550_v12 = vpop.f32.mrb[70].mxu0 }
 0xb31   :  { %v14526_v16 = vpop.f32.mrb[45].mxu1  ;;  %v14551_v26 = vpop.f32.mrb[71].mxu0 }
 0xb32   :  { %v14527_v20 = vadd.f32 %v14526_v16, %v14525_v11  ;;  %v14528_v34 = vpop.f32.mrb[46].mxu1 }
 0xb33   :  { %v14529_v43 = vpop.f32.mrb[47].mxu1 }
 0xb34   :  { %v11699_v28 = vadd.f32 %v14527_v20, %v11527_v44 }
 0xb36   :  { %v11875_v33 = vadd.f32 %v14549_v10, %v11699_v28 }
 0xb4e   :  { %v14591_v17 = vpop.f32.mrb[72].mxu0 }
 0xb4f   :  { %v14592_v42 = vpop.f32.mrb[73].mxu0 }
 0xb50   :  { %v14593_v18 = vadd.f32 %v14592_v42, %v14591_v17  ;;  %v14569_v21 = vpop.f32.mrb[48].mxu1  ;;  %v14594_v22 = vpop.f32.mrb[74].mxu0 }
 0xb51   :  { %v14570_v24 = vpop.f32.mrb[49].mxu1  ;;  %v14595_v29 = vpop.f32.mrb[75].mxu0 }
 0xb52   :  { %v14571_v35 = vadd.f32 %v14570_v24, %v14569_v21  ;;  %v14572_v40 = vpop.f32.mrb[50].mxu1 }
 0xb53   :  { %v14573_v14 = vpop.f32.mrb[51].mxu1 }
 0xb54   :  { %v12049_v45 = vadd.f32 %v14571_v35, %v11875_v33 }
 0xb56   :  { %v18665_v48 = vadd.f32 %v14593_v18, %v12049_v45 }
 0xb57   :  { %15073 = dma.done.wait [#allocation4 + $0x1], 32768 }
 0xb58   :  { %15074 = vsyncadd [#allocation4 + $0x1], 4294934528  ;;  %v12373_v19 = vld [vmem:[#allocation3 + $0x408] sm:$0xff]  ;;  %v12375_v50 = vld [vmem:[#allocation3 + $0x418] sm:$0xff]  ;;  %s19000_s26 = sld [smem:[#allocation14_spill]]  ;;  %s19001_s21 = sld [smem:[#allocation15_spill]] }
 0xb59   :  { %v12372_v51 = vld [vmem:[#allocation3 + $0x400] sm:$0xff]  ;;  %12500 = vmatprep.subr.bf16.mxu1 %v12373_v19  ;;  %12541 = vmatprep.subr.bf16.mxu0 %v12375_v50  ;;  %v12374_v52 = vld [vmem:[#allocation3 + $0x410] sm:$0xff]  ;;  %v12381_v56 = vld [vmem:[#allocation3 + $0x448] sm:$0xff]  ;;  %vm13517_vm2 = vcmask 523264   ;;  %vm15095_vm4 = vmmov 0   ;;  %s19002_s2 = sld [smem:[#allocation17_spill]] }
 0xb5a   :  { %v12383_v46 = vld [vmem:[#allocation3 + $0x458] sm:$0xff]  ;;  %12501 = vmatpush1.bf16.msra.mxu1 %v12372_v51  ;;  %12542 = vmatpush1.bf16.msra.mxu0 %v12374_v52  ;;  %v12380_v57 = vld [vmem:[#allocation3 + $0x440] sm:$0xff]  ;;  %v12382_v37 = vld [vmem:[#allocation3 + $0x450] sm:$0xff]  ;;  %s19003_s30 = sld [smem:[#allocation16_spill]]  ;;  %vm13683_vm9 = vcmask 58368   ;;  %s15097_s8 = smov 9  }
 0xb5b   :  { %12502 = vmatprep.subr.bf16.mxu1 %v12381_v56  ;;  %12543 = vmatprep.subr.bf16.mxu0 %v12383_v46  ;;  %v12389_v55 = vld [vmem:[#allocation3 + $0x488] sm:$0xff]  ;;  %v12391_v23 = vld [vmem:[#allocation3 + $0x498] sm:$0xff]  ;;  %v12388_v27 = vld [vmem:[#allocation3 + $0x480] sm:$0xff]  ;;  %vm13724_vm0 = vcmask 132168   ;;  %vm13727_vm1 = vcmask 140424  }
 0xb5c   :  { %v12390_v58 = vld [vmem:[#allocation3 + $0x490] sm:$0xff]  ;;  %v12397_v8 = vld [vmem:[#allocation3 + $0x4c8] sm:$0xff]  ;;  %v12399_v15 = vld [vmem:[#allocation3 + $0x4d8] sm:$0xff] }
 0xb5d   :  { %v12396_v30 = vld [vmem:[#allocation3 + $0x4c0] sm:$0xff]  ;;  %v12398_v62 = vld [vmem:[#allocation3 + $0x4d0] sm:$0xff]  ;;  %v12405_v63 = vld [vmem:[#allocation3 + $0x508] sm:$0xff] }
 0xb5e   :  { %12503 = vmatpush1.bf16.msra.mxu1 %v12380_v57  ;;  %12544 = vmatpush1.bf16.msra.mxu0 %v12382_v37  ;;  %v12407_v31 = vld [vmem:[#allocation3 + $0x518] sm:$0xff]  ;;  %v12404_v7 = vld [vmem:[#allocation3 + $0x500] sm:$0xff]  ;;  %v12406_v0 = vld [vmem:[#allocation3 + $0x510] sm:$0xff] }
 0xb5f   :  { %12504 = vmatprep.subr.bf16.mxu1 %v12389_v55  ;;  %12545 = vmatprep.subr.bf16.mxu0 %v12391_v23  ;;  %v12413_v1 = vld [vmem:[#allocation3 + $0x548] sm:$0xff]  ;;  %v12415_v60 = vld [vmem:[#allocation3 + $0x558] sm:$0xff]  ;;  %v12412_v2 = vld [vmem:[#allocation3 + $0x540] sm:$0xff] }
 0xb60   :  { %v12414_v3 = vld [vmem:[#allocation3 + $0x550] sm:$0xff]  ;;  %v12421_v4 = vld [vmem:[#allocation3 + $0x588] sm:$0xff]  ;;  %v12423_v44 = vld [vmem:[#allocation3 + $0x598] sm:$0xff] }
 0xb61   :  { %v18670_v41 = vld.sshfl [vmem:[%s19000_s26] sm:$0x33 pattern:$0x76325410]  ;;  %v12422_v11 = vld [vmem:[#allocation3 + $0x590] sm:$0xff]  ;;  %v12429_v12 = vld [vmem:[#allocation3 + $0x5c8] sm:$0xff] }
 0xb62   :  { %12505 = vmatpush1.bf16.msra.mxu1 %v12388_v27  ;;  %12546 = vmatpush1.bf16.msra.mxu0 %v12390_v58  ;;  %v12367_v9 = vcombine.high %v18670_v41, %v18670_v41  ;;  %v12420_v10 = vld [vmem:[#allocation3 + $0x580] sm:$0xff]  ;;  %v12431_v16 = vld [vmem:[#allocation3 + $0x5d8] sm:$0xff]  ;;  %v12430_v34 = vld [vmem:[#allocation3 + $0x5d0] sm:$0xff] }
 0xb63   :  { %12506 = vmatprep.subr.bf16.mxu1 %v12397_v8  ;;  %12547 = vmatprep.subr.bf16.mxu0 %v12399_v15  ;;  %v12428_v20 = vld [vmem:[#allocation3 + $0x5c0] sm:$0xff]  ;;  %v12437_v43 = vld [vmem:[#allocation3 + $0x608] sm:$0xff]  ;;  %v12439_v28 = vld [vmem:[#allocation3 + $0x618] sm:$0xff] }
 0xb64   :  { %v18674_v26 = vpack.c.bf16 %v12367_v9, %v12367_v9  ;;  %v12436_v33 = vld [vmem:[#allocation3 + $0x600] sm:$0xff]  ;;  %v12438_v17 = vld [vmem:[#allocation3 + $0x610] sm:$0xff]  ;;  %v12445_v42 = vld [vmem:[#allocation3 + $0x648] sm:$0xff] }
 0xb65   :  { %v12447_v18 = vld [vmem:[#allocation3 + $0x658] sm:$0xff]  ;;  %v12444_v21 = vld [vmem:[#allocation3 + $0x640] sm:$0xff]  ;;  %v12446_v22 = vld [vmem:[#allocation3 + $0x650] sm:$0xff] }
 0xb66   :  { %12507 = vmatpush1.bf16.msra.mxu1 %v12396_v30  ;;  %12548 = vmatpush1.bf16.msra.mxu0 %v12398_v62  ;;  %v12453_v24 = vld [vmem:[#allocation3 + $0x688] sm:$0xff]  ;;  %v12455_v29 = vld [vmem:[#allocation3 + $0x698] sm:$0xff]  ;;  %v12452_v35 = vld [vmem:[#allocation3 + $0x680] sm:$0xff] }
 0xb67   :  { %12508 = vmatprep.subr.bf16.mxu1 %v12405_v63  ;;  %12549 = vmatprep.subr.bf16.mxu0 %v12407_v31  ;;  %v12454_v40 = vld [vmem:[#allocation3 + $0x690] sm:$0xff]  ;;  %v12461_v14 = vld [vmem:[#allocation3 + $0x6c8] sm:$0xff]  ;;  %v12463_v45 = vld [vmem:[#allocation3 + $0x6d8] sm:$0xff] }
 0xb68   :  { %12532 = vmatprep.mubr.bf16.mxu1 %v18674_v26  ;;  %12573 = vmatprep.mubr.bf16.mxu0 %v18674_v26  ;;  %v12460_v19 = vld [vmem:[#allocation3 + $0x6c0] sm:$0xff]  ;;  %v12462_v50 = vld [vmem:[#allocation3 + $0x6d0] sm:$0xff]  ;;  %v12469_v51 = vld [vmem:[#allocation3 + $0x708] sm:$0xff] }
 0xb69   :  { %v12471_v52 = vld [vmem:[#allocation3 + $0x718] sm:$0xff]  ;;  %v12468_v56 = vld [vmem:[#allocation3 + $0x700] sm:$0xff]  ;;  %v12470_v46 = vld [vmem:[#allocation3 + $0x710] sm:$0xff] }
 0xb6a   :  { %12509 = vmatpush1.bf16.msra.mxu1 %v12404_v7  ;;  %12550 = vmatpush1.bf16.msra.mxu0 %v12406_v0  ;;  %v12477_v57 = vld [vmem:[#allocation3 + $0x748] sm:$0xff]  ;;  %v12479_v37 = vld [vmem:[#allocation3 + $0x758] sm:$0xff]  ;;  %v12476_v55 = vld [vmem:[#allocation3 + $0x740] sm:$0xff] }
 0xb6b   :  { %12510 = vmatprep.subr.bf16.mxu1 %v12413_v1  ;;  %12551 = vmatprep.subr.bf16.mxu0 %v12415_v60  ;;  %v12478_v23 = vld [vmem:[#allocation3 + $0x750] sm:$0xff]  ;;  %v12485_v27 = vld [vmem:[#allocation3 + $0x788] sm:$0xff]  ;;  %v12487_v58 = vld [vmem:[#allocation3 + $0x798] sm:$0xff]  ;;  %v18680_v1 = vpack.c.bf16 %v18670_v41, %v18670_v41 }
 0xb6c   :  { %v12484_v8 = vld [vmem:[#allocation3 + $0x780] sm:$0xff]  ;;  %v12486_v15 = vld [vmem:[#allocation3 + $0x790] sm:$0xff]  ;;  %v12493_v30 = vld [vmem:[#allocation3 + $0x7c8] sm:$0xff] }
 0xb6d   :  { %v12495_v62 = vld [vmem:[#allocation3 + $0x7d8] sm:$0xff]  ;;  %v12492_v63 = vld [vmem:[#allocation3 + $0x7c0] sm:$0xff]  ;;  %v12494_v31 = vld [vmem:[#allocation3 + $0x7d0] sm:$0xff] }
 0xb6e   :  { %12511 = vmatpush1.bf16.msra.mxu1 %v12412_v2  ;;  %12552 = vmatpush1.bf16.msra.mxu0 %v12414_v3  ;;  %v12377_v7 = vld [vmem:[#allocation3 + $0x428] sm:$0xff]  ;;  %v12379_v0 = vld [vmem:[#allocation3 + $0x438] sm:$0xff]  ;;  %v12376_v60 = vld [vmem:[#allocation3 + $0x420] sm:$0xff] }
 0xb6f   :  { %12512 = vmatprep.subr.bf16.mxu1 %v12421_v4  ;;  %12553 = vmatprep.subr.bf16.mxu0 %v12423_v44  ;;  %v12378_v2 = vld [vmem:[#allocation3 + $0x430] sm:$0xff]  ;;  %v12385_v3 = vld [vmem:[#allocation3 + $0x468] sm:$0xff]  ;;  %v12387_v4 = vld [vmem:[#allocation3 + $0x478] sm:$0xff] }
 0xb70   :  { %v12384_v44 = vld [vmem:[#allocation3 + $0x460] sm:$0xff]  ;;  %v12386_v9 = vld [vmem:[#allocation3 + $0x470] sm:$0xff]  ;;  %v12393_v41 = vld [vmem:[#allocation3 + $0x4a8] sm:$0xff] }
 0xb71   :  { %vm14720_vm3 = vmpackc.low %vm13517_vm2, %vm13517_vm2 }
 0xb72   :  { %12513 = vmatpush1.bf16.msra.mxu1 %v12420_v10  ;;  %12554 = vmatpush1.bf16.msra.mxu0 %v12422_v11  ;;  %v12395_v10 = vld [vmem:[#allocation3 + $0x4b8] sm:$0xff]  ;;  %v12392_v11 = vld [vmem:[#allocation3 + $0x4a0] sm:$0xff] }
 0xb73   :  { %12514 = vmatprep.subr.bf16.mxu1 %v12429_v12  ;;  %12555 = vmatprep.subr.bf16.mxu0 %v12431_v16  ;;  %v12394_v12 = vld [vmem:[#allocation3 + $0x4b0] sm:$0xff]  ;;  %v12401_v16 = vld [vmem:[#allocation3 + $0x4e8] sm:$0xff] }
 0xb76   :  { %12515 = vmatpush1.bf16.msra.mxu1 %v12428_v20  ;;  %12556 = vmatpush1.bf16.msra.mxu0 %v12430_v34  ;;  %v12403_v20 = vld [vmem:[#allocation3 + $0x4f8] sm:$0xff]  ;;  %v12400_v34 = vld [vmem:[#allocation3 + $0x4e0] sm:$0xff] }
 0xb77   :  { %12516 = vmatprep.subr.bf16.mxu1 %v12437_v43  ;;  %12557 = vmatprep.subr.bf16.mxu0 %v12439_v28  ;;  %v12402_v43 = vld [vmem:[#allocation3 + $0x4f0] sm:$0xff]  ;;  %v12409_v28 = vld [vmem:[#allocation3 + $0x528] sm:$0xff] }
 0xb7a   :  { %12517 = vmatpush1.bf16.msra.mxu1 %v12436_v33  ;;  %12558 = vmatpush1.bf16.msra.mxu0 %v12438_v17  ;;  %v12411_v33 = vld [vmem:[#allocation3 + $0x538] sm:$0xff]  ;;  %v12408_v17 = vld [vmem:[#allocation3 + $0x520] sm:$0xff] }
 0xb7b   :  { %12518 = vmatprep.subr.bf16.mxu1 %v12445_v42  ;;  %12559 = vmatprep.subr.bf16.mxu0 %v12447_v18  ;;  %v12417_v42 = vld [vmem:[#allocation3 + $0x568] sm:$0xff]  ;;  %v12419_v18 = vld [vmem:[#allocation3 + $0x578] sm:$0xff] }
 0xb7e   :  { %12519 = vmatpush1.bf16.msra.mxu1 %v12444_v21  ;;  %12560 = vmatpush1.bf16.msra.mxu0 %v12446_v22  ;;  %v12416_v21 = vld [vmem:[#allocation3 + $0x560] sm:$0xff]  ;;  %v12418_v22 = vld [vmem:[#allocation3 + $0x570] sm:$0xff] }
 0xb7f   :  { %12520 = vmatprep.subr.bf16.mxu1 %v12453_v24  ;;  %12561 = vmatprep.subr.bf16.mxu0 %v12455_v29  ;;  %v12425_v24 = vld [vmem:[#allocation3 + $0x5a8] sm:$0xff]  ;;  %v12427_v29 = vld [vmem:[#allocation3 + $0x5b8] sm:$0xff] }
 0xb82   :  { %12521 = vmatpush1.bf16.msra.mxu1 %v12452_v35  ;;  %12562 = vmatpush1.bf16.msra.mxu0 %v12454_v40  ;;  %v12424_v35 = vld [vmem:[#allocation3 + $0x5a0] sm:$0xff]  ;;  %v12426_v40 = vld [vmem:[#allocation3 + $0x5b0] sm:$0xff] }
 0xb83   :  { %12522 = vmatprep.subr.bf16.mxu1 %v12461_v14  ;;  %12563 = vmatprep.subr.bf16.mxu0 %v12463_v45  ;;  %v12433_v14 = vld [vmem:[#allocation3 + $0x5e8] sm:$0xff]  ;;  %v12435_v45 = vld [vmem:[#allocation3 + $0x5f8] sm:$0xff] }
 0xb86   :  { %12523 = vmatpush1.bf16.msra.mxu1 %v12460_v19  ;;  %12564 = vmatpush1.bf16.msra.mxu0 %v12462_v50  ;;  %v12432_v19 = vld [vmem:[#allocation3 + $0x5e0] sm:$0xff]  ;;  %v12434_v50 = vld [vmem:[#allocation3 + $0x5f0] sm:$0xff] }
 0xb87   :  { %12524 = vmatprep.subr.bf16.mxu1 %v12469_v51  ;;  %12565 = vmatprep.subr.bf16.mxu0 %v12471_v52  ;;  %v12441_v51 = vld [vmem:[#allocation3 + $0x628] sm:$0xff]  ;;  %v12443_v52 = vld [vmem:[#allocation3 + $0x638] sm:$0xff] }
 0xb8a   :  { %12525 = vmatpush1.bf16.msra.mxu1 %v12468_v56  ;;  %12566 = vmatpush1.bf16.msra.mxu0 %v12470_v46  ;;  %v12440_v56 = vld [vmem:[#allocation3 + $0x620] sm:$0xff]  ;;  %v12442_v46 = vld [vmem:[#allocation3 + $0x630] sm:$0xff] }
 0xb8b   :  { %12526 = vmatprep.subr.bf16.mxu1 %v12477_v57  ;;  %12567 = vmatprep.subr.bf16.mxu0 %v12479_v37  ;;  %v12449_v57 = vld [vmem:[#allocation3 + $0x668] sm:$0xff]  ;;  %v12451_v37 = vld [vmem:[#allocation3 + $0x678] sm:$0xff] }
 0xb8e   :  { %12527 = vmatpush1.bf16.msra.mxu1 %v12476_v55  ;;  %12568 = vmatpush1.bf16.msra.mxu0 %v12478_v23  ;;  %v12448_v55 = vld [vmem:[#allocation3 + $0x660] sm:$0xff]  ;;  %v12450_v23 = vld [vmem:[#allocation3 + $0x670] sm:$0xff] }
 0xb8f   :  { %12528 = vmatprep.subr.bf16.mxu1 %v12485_v27  ;;  %12569 = vmatprep.subr.bf16.mxu0 %v12487_v58  ;;  %v12457_v27 = vld [vmem:[#allocation3 + $0x6a8] sm:$0xff]  ;;  %v12459_v58 = vld [vmem:[#allocation3 + $0x6b8] sm:$0xff] }
 0xb92   :  { %12529 = vmatpush1.bf16.msra.mxu1 %v12484_v8  ;;  %12570 = vmatpush1.bf16.msra.mxu0 %v12486_v15  ;;  %v12456_v8 = vld [vmem:[#allocation3 + $0x6a0] sm:$0xff]  ;;  %v12458_v15 = vld [vmem:[#allocation3 + $0x6b0] sm:$0xff] }
 0xb93   :  { %12530 = vmatprep.subr.bf16.mxu1 %v12493_v30  ;;  %12571 = vmatprep.subr.bf16.mxu0 %v12495_v62  ;;  %v12465_v30 = vld [vmem:[#allocation3 + $0x6e8] sm:$0xff]  ;;  %v12467_v62 = vld [vmem:[#allocation3 + $0x6f8] sm:$0xff] }
 0xb96   :  { %12531 = vmatpush1.bf16.msra.mxu1 %v12492_v63  ;;  %12572 = vmatpush1.bf16.msra.mxu0 %v12494_v31  ;;  %v12464_v63 = vld [vmem:[#allocation3 + $0x6e0] sm:$0xff]  ;;  %v12466_v31 = vld [vmem:[#allocation3 + $0x6f0] sm:$0xff] }
 0xb97   :  { %12582 = vmatprep.subr.bf16.mxu1 %v12377_v7  ;;  %12623 = vmatprep.subr.bf16.mxu0 %v12379_v0  ;;  %v12473_v7 = vld [vmem:[#allocation3 + $0x728] sm:$0xff]  ;;  %v12475_v0 = vld [vmem:[#allocation3 + $0x738] sm:$0xff] }
 0xb99   :  { %12533 = vmatmul.mubr.bf16.vlgmr.msra.gmra.mrb[52].mxu1 %v18680_v1  ;;  %12574 = vmatmul.mubr.bf16.vlgmr.msra.gmra.mrb[76].mxu0 %v18680_v1 }
 0xb9a   :  { %12583 = vmatpush1.bf16.msra.mxu1 %v12376_v60  ;;  %12624 = vmatpush1.bf16.msra.mxu0 %v12378_v2  ;;  %v12472_v60 = vld [vmem:[#allocation3 + $0x720] sm:$0xff]  ;;  %v12474_v2 = vld [vmem:[#allocation3 + $0x730] sm:$0xff] }
 0xb9b   :  { %12584 = vmatprep.subr.bf16.mxu1 %v12385_v3  ;;  %12625 = vmatprep.subr.bf16.mxu0 %v12387_v4  ;;  %v12481_v3 = vld [vmem:[#allocation3 + $0x768] sm:$0xff]  ;;  %v12483_v4 = vld [vmem:[#allocation3 + $0x778] sm:$0xff] }
 0xb9c   :  { %12614 = vmatprep.mubr.bf16.mxu1 %v18674_v26  ;;  %12655 = vmatprep.mubr.bf16.mxu0 %v18674_v26  ;;  %v12410_v26 = vld [vmem:[#allocation3 + $0x530] sm:$0xff] }
 0xb9e   :  { %12585 = vmatpush1.bf16.msra.mxu1 %v12384_v44  ;;  %12626 = vmatpush1.bf16.msra.mxu0 %v12386_v9  ;;  %v12480_v44 = vld [vmem:[#allocation3 + $0x760] sm:$0xff]  ;;  %v12482_v9 = vld [vmem:[#allocation3 + $0x770] sm:$0xff] }
 0xb9f   :  { %12586 = vmatprep.subr.bf16.mxu1 %v12393_v41  ;;  %12627 = vmatprep.subr.bf16.mxu0 %v12395_v10  ;;  %v12489_v41 = vld [vmem:[#allocation3 + $0x7a8] sm:$0xff]  ;;  %v12491_v10 = vld [vmem:[#allocation3 + $0x7b8] sm:$0xff] }
 0xba2   :  { %12587 = vmatpush1.bf16.msra.mxu1 %v12392_v11  ;;  %12628 = vmatpush1.bf16.msra.mxu0 %v12394_v12  ;;  %v12488_v11 = vld [vmem:[#allocation3 + $0x7a0] sm:$0xff]  ;;  %v12490_v12 = vld [vmem:[#allocation3 + $0x7b0] sm:$0xff] }
 0xba3   :  { %12588 = vmatprep.subr.bf16.mxu1 %v12401_v16  ;;  %12629 = vmatprep.subr.bf16.mxu0 %v12403_v20  ;;  %v12497_v16 = vld [vmem:[#allocation3 + $0x7e8] sm:$0xff]  ;;  %v12499_v20 = vld [vmem:[#allocation3 + $0x7f8] sm:$0xff] }
 0xba6   :  { %12589 = vmatpush1.bf16.msra.mxu1 %v12400_v34  ;;  %12630 = vmatpush1.bf16.msra.mxu0 %v12402_v43  ;;  %v12496_v34 = vld [vmem:[#allocation3 + $0x7e0] sm:$0xff]  ;;  %v12498_v43 = vld [vmem:[#allocation3 + $0x7f0] sm:$0xff] }
 0xba7   :  { %12590 = vmatprep.subr.bf16.mxu1 %v12409_v28  ;;  %12631 = vmatprep.subr.bf16.mxu0 %v12411_v33  ;;  %v12231_v28 = vld [vmem:[#allocation3 + $0x8] sm:$0xff]  ;;  %v12233_v33 = vld [vmem:[#allocation3 + $0x18] sm:$0xff] }
 0xbaa   :  { %12591 = vmatpush1.bf16.msra.mxu1 %v12408_v17  ;;  %12632 = vmatpush1.bf16.msra.mxu0 %v12410_v26  ;;  %v12230_v17 = vld [vmem:[#allocation3] sm:$0xff]  ;;  %v12232_v26 = vld [vmem:[#allocation3 + $0x10] sm:$0xff] }
 0xbab   :  { %12592 = vmatprep.subr.bf16.mxu1 %v12417_v42  ;;  %12633 = vmatprep.subr.bf16.mxu0 %v12419_v18  ;;  %v12239_v42 = vld [vmem:[#allocation3 + $0x48] sm:$0xff]  ;;  %v12241_v18 = vld [vmem:[#allocation3 + $0x58] sm:$0xff] }
 0xbae   :  { %12593 = vmatpush1.bf16.msra.mxu1 %v12416_v21  ;;  %12634 = vmatpush1.bf16.msra.mxu0 %v12418_v22  ;;  %v18688_v21 = vpack.c.bf16 %v18291_v53, %v18291_v53  ;;  %v12238_v22 = vld [vmem:[#allocation3 + $0x40] sm:$0xff] }
 0xbaf   :  { %12594 = vmatprep.subr.bf16.mxu1 %v12425_v24  ;;  %12635 = vmatprep.subr.bf16.mxu0 %v12427_v29  ;;  %v12240_v24 = vld [vmem:[#allocation3 + $0x50] sm:$0xff]  ;;  %v12247_v29 = vld [vmem:[#allocation3 + $0x88] sm:$0xff]  ;;  %v12246_v53 = vld [vmem:[#allocation3 + $0x80] sm:$0xff] }
 0xbb2   :  { %12595 = vmatpush1.bf16.msra.mxu1 %v12424_v35  ;;  %12636 = vmatpush1.bf16.msra.mxu0 %v12426_v40  ;;  %v12249_v35 = vld [vmem:[#allocation3 + $0x98] sm:$0xff]  ;;  %v12248_v40 = vld [vmem:[#allocation3 + $0x90] sm:$0xff] }
 0xbb3   :  { %12596 = vmatprep.subr.bf16.mxu1 %v12433_v14  ;;  %12637 = vmatprep.subr.bf16.mxu0 %v12435_v45  ;;  %v12255_v14 = vld [vmem:[#allocation3 + $0xc8] sm:$0xff]  ;;  %v12254_v45 = vld [vmem:[#allocation3 + $0xc0] sm:$0xff] }
 0xbb6   :  { %12597 = vmatpush1.bf16.msra.mxu1 %v12432_v19  ;;  %12638 = vmatpush1.bf16.msra.mxu0 %v12434_v50  ;;  %v12256_v19 = vld [vmem:[#allocation3 + $0xd0] sm:$0xff]  ;;  %v12263_v50 = vld [vmem:[#allocation3 + $0x108] sm:$0xff] }
 0xbb7   :  { %12598 = vmatprep.subr.bf16.mxu1 %v12441_v51  ;;  %12639 = vmatprep.subr.bf16.mxu0 %v12443_v52  ;;  %v12265_v51 = vld [vmem:[#allocation3 + $0x118] sm:$0xff]  ;;  %v12262_v52 = vld [vmem:[#allocation3 + $0x100] sm:$0xff] }
 0xbba   :  { %12599 = vmatpush1.bf16.msra.mxu1 %v12440_v56  ;;  %12640 = vmatpush1.bf16.msra.mxu0 %v12442_v46  ;;  %v12264_v56 = vld [vmem:[#allocation3 + $0x110] sm:$0xff]  ;;  %v12271_v46 = vld [vmem:[#allocation3 + $0x148] sm:$0xff] }
 0xbbb   :  { %12600 = vmatprep.subr.bf16.mxu1 %v12449_v57  ;;  %12641 = vmatprep.subr.bf16.mxu0 %v12451_v37  ;;  %v12273_v57 = vld [vmem:[#allocation3 + $0x158] sm:$0xff]  ;;  %v12270_v37 = vld [vmem:[#allocation3 + $0x140] sm:$0xff] }
 0xbbe   :  { %12601 = vmatpush1.bf16.msra.mxu1 %v12448_v55  ;;  %12642 = vmatpush1.bf16.msra.mxu0 %v12450_v23  ;;  %v12272_v55 = vld [vmem:[#allocation3 + $0x150] sm:$0xff]  ;;  %v12279_v23 = vld [vmem:[#allocation3 + $0x188] sm:$0xff] }
 0xbbf   :  { %12602 = vmatprep.subr.bf16.mxu1 %v12457_v27  ;;  %12643 = vmatprep.subr.bf16.mxu0 %v12459_v58  ;;  %v12281_v27 = vld [vmem:[#allocation3 + $0x198] sm:$0xff]  ;;  %v12278_v58 = vld [vmem:[#allocation3 + $0x180] sm:$0xff] }
 0xbc2   :  { %12603 = vmatpush1.bf16.msra.mxu1 %v12456_v8  ;;  %12644 = vmatpush1.bf16.msra.mxu0 %v12458_v15  ;;  %v12280_v8 = vld [vmem:[#allocation3 + $0x190] sm:$0xff]  ;;  %v12287_v15 = vld [vmem:[#allocation3 + $0x1c8] sm:$0xff] }
 0xbc3   :  { %12604 = vmatprep.subr.bf16.mxu1 %v12465_v30  ;;  %12645 = vmatprep.subr.bf16.mxu0 %v12467_v62  ;;  %v12289_v30 = vld [vmem:[#allocation3 + $0x1d8] sm:$0xff]  ;;  %v12286_v62 = vld [vmem:[#allocation3 + $0x1c0] sm:$0xff] }
 0xbc6   :  { %12605 = vmatpush1.bf16.msra.mxu1 %v12464_v63  ;;  %12646 = vmatpush1.bf16.msra.mxu0 %v12466_v31  ;;  %v12288_v63 = vld [vmem:[#allocation3 + $0x1d0] sm:$0xff]  ;;  %v12295_v31 = vld [vmem:[#allocation3 + $0x208] sm:$0xff] }
 0xbc7   :  { %12606 = vmatprep.subr.bf16.mxu1 %v12473_v7  ;;  %12647 = vmatprep.subr.bf16.mxu0 %v12475_v0  ;;  %v12297_v7 = vld [vmem:[#allocation3 + $0x218] sm:$0xff]  ;;  %v12294_v0 = vld [vmem:[#allocation3 + $0x200] sm:$0xff] }
 0xbca   :  { %12607 = vmatpush1.bf16.msra.mxu1 %v12472_v60  ;;  %12648 = vmatpush1.bf16.msra.mxu0 %v12474_v2  ;;  %v12296_v60 = vld [vmem:[#allocation3 + $0x210] sm:$0xff]  ;;  %v12303_v2 = vld [vmem:[#allocation3 + $0x248] sm:$0xff] }
 0xbcb   :  { %12608 = vmatprep.subr.bf16.mxu1 %v12481_v3  ;;  %12649 = vmatprep.subr.bf16.mxu0 %v12483_v4  ;;  %v12305_v3 = vld [vmem:[#allocation3 + $0x258] sm:$0xff]  ;;  %v12302_v4 = vld [vmem:[#allocation3 + $0x240] sm:$0xff] }
 0xbce   :  { %12609 = vmatpush1.bf16.msra.mxu1 %v12480_v44  ;;  %12650 = vmatpush1.bf16.msra.mxu0 %v12482_v9  ;;  %v12304_v44 = vld [vmem:[#allocation3 + $0x250] sm:$0xff]  ;;  %v12311_v9 = vld [vmem:[#allocation3 + $0x288] sm:$0xff] }
 0xbcf   :  { %12610 = vmatprep.subr.bf16.mxu1 %v12489_v41  ;;  %12651 = vmatprep.subr.bf16.mxu0 %v12491_v10  ;;  %v12313_v41 = vld [vmem:[#allocation3 + $0x298] sm:$0xff]  ;;  %v12310_v10 = vld [vmem:[#allocation3 + $0x280] sm:$0xff] }
 0xbd2   :  { %12611 = vmatpush1.bf16.msra.mxu1 %v12488_v11  ;;  %12652 = vmatpush1.bf16.msra.mxu0 %v12490_v12  ;;  %v12312_v11 = vld [vmem:[#allocation3 + $0x290] sm:$0xff]  ;;  %v12319_v12 = vld [vmem:[#allocation3 + $0x2c8] sm:$0xff] }
 0xbd3   :  { %12612 = vmatprep.subr.bf16.mxu1 %v12497_v16  ;;  %12653 = vmatprep.subr.bf16.mxu0 %v12499_v20  ;;  %v12321_v16 = vld [vmem:[#allocation3 + $0x2d8] sm:$0xff]  ;;  %v12318_v20 = vld [vmem:[#allocation3 + $0x2c0] sm:$0xff] }
 0xbd6   :  { %12613 = vmatpush1.bf16.msra.mxu1 %v12496_v34  ;;  %12654 = vmatpush1.bf16.msra.mxu0 %v12498_v43  ;;  %v12320_v34 = vld [vmem:[#allocation3 + $0x2d0] sm:$0xff]  ;;  %v12327_v43 = vld [vmem:[#allocation3 + $0x308] sm:$0xff] }
 0xbd7   :  { %12664 = vmatprep.subr.bf16.mxu1 %v12231_v28  ;;  %12705 = vmatprep.subr.bf16.mxu0 %v12233_v33  ;;  %v12329_v28 = vld [vmem:[#allocation3 + $0x318] sm:$0xff]  ;;  %v12326_v33 = vld [vmem:[#allocation3 + $0x300] sm:$0xff] }
 0xbd9   :  { %12615 = vmatmul.mubr.bf16.vlgmr.msra.gmra.mrb[56].mxu1 %v18680_v1  ;;  %12656 = vmatmul.mubr.bf16.vlgmr.msra.gmra.mrb[80].mxu0 %v18680_v1  ;;  %v12257_v1 = vld [vmem:[#allocation3 + $0xd8] sm:$0xff] }
 0xbda   :  { %12665 = vmatpush1.bf16.msra.mxu1 %v12230_v17  ;;  %12706 = vmatpush1.bf16.msra.mxu0 %v12232_v26  ;;  %v12328_v17 = vld [vmem:[#allocation3 + $0x310] sm:$0xff]  ;;  %v12335_v26 = vld [vmem:[#allocation3 + $0x348] sm:$0xff] }
 0xbdb   :  { %12666 = vmatprep.subr.bf16.mxu1 %v12239_v42  ;;  %12707 = vmatprep.subr.bf16.mxu0 %v12241_v18  ;;  %v12337_v42 = vld [vmem:[#allocation3 + $0x358] sm:$0xff]  ;;  %v12334_v18 = vld [vmem:[#allocation3 + $0x340] sm:$0xff] }
 0xbdc   :  { %12696 = vmatprep.mubr.bf16.mxu1 %v18688_v21  ;;  %12737 = vmatprep.mubr.bf16.mxu0 %v18688_v21 }
 0xbde   :  { %12667 = vmatpush1.bf16.msra.mxu1 %v12238_v22  ;;  %12708 = vmatpush1.bf16.msra.mxu0 %v12240_v24  ;;  %v12336_v22 = vld [vmem:[#allocation3 + $0x350] sm:$0xff]  ;;  %v12343_v24 = vld [vmem:[#allocation3 + $0x388] sm:$0xff] }
 0xbdf   :  { %12668 = vmatprep.subr.bf16.mxu1 %v12247_v29  ;;  %12709 = vmatprep.subr.bf16.mxu0 %v12249_v35  ;;  %v12345_v29 = vld [vmem:[#allocation3 + $0x398] sm:$0xff]  ;;  %v12342_v35 = vld [vmem:[#allocation3 + $0x380] sm:$0xff] }
 0xbe2   :  { %12669 = vmatpush1.bf16.msra.mxu1 %v12246_v53  ;;  %12710 = vmatpush1.bf16.msra.mxu0 %v12248_v40  ;;  %v12344_v53 = vld [vmem:[#allocation3 + $0x390] sm:$0xff]  ;;  %v12351_v40 = vld [vmem:[#allocation3 + $0x3c8] sm:$0xff] }
 0xbe3   :  { %12670 = vmatprep.subr.bf16.mxu1 %v12255_v14  ;;  %12711 = vmatprep.subr.bf16.mxu0 %v12257_v1  ;;  %v12353_v14 = vld [vmem:[#allocation3 + $0x3d8] sm:$0xff]  ;;  %v12350_v1 = vld [vmem:[#allocation3 + $0x3c0] sm:$0xff] }
 0xbe6   :  { %12671 = vmatpush1.bf16.msra.mxu1 %v12254_v45  ;;  %12712 = vmatpush1.bf16.msra.mxu0 %v12256_v19  ;;  %v12352_v45 = vld [vmem:[#allocation3 + $0x3d0] sm:$0xff]  ;;  %v12235_v19 = vld [vmem:[#allocation3 + $0x28] sm:$0xff] }
 0xbe7   :  { %12672 = vmatprep.subr.bf16.mxu1 %v12263_v50  ;;  %12713 = vmatprep.subr.bf16.mxu0 %v12265_v51  ;;  %v12237_v50 = vld [vmem:[#allocation3 + $0x38] sm:$0xff]  ;;  %v18696_v51 = vpack.c.bf16 %v18289_v49, %v18289_v49  ;;  %v12251_v49 = vld [vmem:[#allocation3 + $0xa8] sm:$0xff] }
 0xbea   :  { %12673 = vmatpush1.bf16.msra.mxu1 %v12262_v52  ;;  %12714 = vmatpush1.bf16.msra.mxu0 %v12264_v56  ;;  %v12234_v52 = vld [vmem:[#allocation3 + $0x20] sm:$0xff]  ;;  %v12236_v56 = vld [vmem:[#allocation3 + $0x30] sm:$0xff] }
 0xbeb   :  { %12674 = vmatprep.subr.bf16.mxu1 %v12271_v46  ;;  %12715 = vmatprep.subr.bf16.mxu0 %v12273_v57  ;;  %v12243_v46 = vld [vmem:[#allocation3 + $0x68] sm:$0xff]  ;;  %v12245_v57 = vld [vmem:[#allocation3 + $0x78] sm:$0xff] }
 0xbee   :  { %12675 = vmatpush1.bf16.msra.mxu1 %v12270_v37  ;;  %12716 = vmatpush1.bf16.msra.mxu0 %v12272_v55  ;;  %v12242_v37 = vld [vmem:[#allocation3 + $0x60] sm:$0xff]  ;;  %v12244_v55 = vld [vmem:[#allocation3 + $0x70] sm:$0xff] }
 0xbef   :  { %12676 = vmatprep.subr.bf16.mxu1 %v12279_v23  ;;  %12717 = vmatprep.subr.bf16.mxu0 %v12281_v27  ;;  %v12253_v23 = vld [vmem:[#allocation3 + $0xb8] sm:$0xff]  ;;  %v12250_v27 = vld [vmem:[#allocation3 + $0xa0] sm:$0xff] }
 0xbf2   :  { %12677 = vmatpush1.bf16.msra.mxu1 %v12278_v58  ;;  %12718 = vmatpush1.bf16.msra.mxu0 %v12280_v8  ;;  %v12252_v58 = vld [vmem:[#allocation3 + $0xb0] sm:$0xff]  ;;  %v12259_v8 = vld [vmem:[#allocation3 + $0xe8] sm:$0xff] }
 0xbf3   :  { %12678 = vmatprep.subr.bf16.mxu1 %v12287_v15  ;;  %12719 = vmatprep.subr.bf16.mxu0 %v12289_v30  ;;  %v12261_v15 = vld [vmem:[#allocation3 + $0xf8] sm:$0xff]  ;;  %v12258_v30 = vld [vmem:[#allocation3 + $0xe0] sm:$0xff] }
 0xbf6   :  { %12679 = vmatpush1.bf16.msra.mxu1 %v12286_v62  ;;  %12720 = vmatpush1.bf16.msra.mxu0 %v12288_v63  ;;  %v12260_v62 = vld [vmem:[#allocation3 + $0xf0] sm:$0xff]  ;;  %v12267_v63 = vld [vmem:[#allocation3 + $0x128] sm:$0xff] }
 0xbf7   :  { %12680 = vmatprep.subr.bf16.mxu1 %v12295_v31  ;;  %12721 = vmatprep.subr.bf16.mxu0 %v12297_v7  ;;  %v12269_v31 = vld [vmem:[#allocation3 + $0x138] sm:$0xff]  ;;  %v12268_v7 = vld [vmem:[#allocation3 + $0x130] sm:$0xff] }
 0xbfa   :  { %12681 = vmatpush1.bf16.msra.mxu1 %v12294_v0  ;;  %12722 = vmatpush1.bf16.msra.mxu0 %v12296_v60  ;;  %v12275_v0 = vld [vmem:[#allocation3 + $0x168] sm:$0xff]  ;;  %v12277_v60 = vld [vmem:[#allocation3 + $0x178] sm:$0xff] }
 0xbfb   :  { %12682 = vmatprep.subr.bf16.mxu1 %v12303_v2  ;;  %12723 = vmatprep.subr.bf16.mxu0 %v12305_v3  ;;  %v12274_v2 = vld [vmem:[#allocation3 + $0x160] sm:$0xff]  ;;  %v12276_v3 = vld [vmem:[#allocation3 + $0x170] sm:$0xff] }
 0xbfe   :  { %12683 = vmatpush1.bf16.msra.mxu1 %v12302_v4  ;;  %12724 = vmatpush1.bf16.msra.mxu0 %v12304_v44  ;;  %v12283_v4 = vld [vmem:[#allocation3 + $0x1a8] sm:$0xff]  ;;  %v12285_v44 = vld [vmem:[#allocation3 + $0x1b8] sm:$0xff] }
 0xbff   :  { %12684 = vmatprep.subr.bf16.mxu1 %v12311_v9  ;;  %12725 = vmatprep.subr.bf16.mxu0 %v12313_v41  ;;  %v12282_v9 = vld [vmem:[#allocation3 + $0x1a0] sm:$0xff]  ;;  %v12284_v41 = vld [vmem:[#allocation3 + $0x1b0] sm:$0xff] }
 0xc02   :  { %12685 = vmatpush1.bf16.msra.mxu1 %v12310_v10  ;;  %12726 = vmatpush1.bf16.msra.mxu0 %v12312_v11  ;;  %v12291_v10 = vld [vmem:[#allocation3 + $0x1e8] sm:$0xff]  ;;  %v12293_v11 = vld [vmem:[#allocation3 + $0x1f8] sm:$0xff] }
 0xc03   :  { %12686 = vmatprep.subr.bf16.mxu1 %v12319_v12  ;;  %12727 = vmatprep.subr.bf16.mxu0 %v12321_v16  ;;  %v12290_v12 = vld [vmem:[#allocation3 + $0x1e0] sm:$0xff]  ;;  %v12292_v16 = vld [vmem:[#allocation3 + $0x1f0] sm:$0xff] }
 0xc06   :  { %12687 = vmatpush1.bf16.msra.mxu1 %v12318_v20  ;;  %12728 = vmatpush1.bf16.msra.mxu0 %v12320_v34  ;;  %v12299_v20 = vld [vmem:[#allocation3 + $0x228] sm:$0xff]  ;;  %v12301_v34 = vld [vmem:[#allocation3 + $0x238] sm:$0xff] }
 0xc07   :  { %12688 = vmatprep.subr.bf16.mxu1 %v12327_v43  ;;  %12729 = vmatprep.subr.bf16.mxu0 %v12329_v28  ;;  %v12298_v43 = vld [vmem:[#allocation3 + $0x220] sm:$0xff]  ;;  %v12300_v28 = vld [vmem:[#allocation3 + $0x230] sm:$0xff] }
 0xc0a   :  { %12689 = vmatpush1.bf16.msra.mxu1 %v12326_v33  ;;  %12730 = vmatpush1.bf16.msra.mxu0 %v12328_v17  ;;  %v12307_v33 = vld [vmem:[#allocation3 + $0x268] sm:$0xff]  ;;  %v12309_v17 = vld [vmem:[#allocation3 + $0x278] sm:$0xff] }
 0xc0b   :  { %12690 = vmatprep.subr.bf16.mxu1 %v12335_v26  ;;  %12731 = vmatprep.subr.bf16.mxu0 %v12337_v42  ;;  %v12306_v26 = vld [vmem:[#allocation3 + $0x260] sm:$0xff]  ;;  %v12308_v42 = vld [vmem:[#allocation3 + $0x270] sm:$0xff] }
 0xc0e   :  { %12691 = vmatpush1.bf16.msra.mxu1 %v12334_v18  ;;  %12732 = vmatpush1.bf16.msra.mxu0 %v12336_v22  ;;  %v12315_v18 = vld [vmem:[#allocation3 + $0x2a8] sm:$0xff]  ;;  %v12317_v22 = vld [vmem:[#allocation3 + $0x2b8] sm:$0xff] }
 0xc0f   :  { %12692 = vmatprep.subr.bf16.mxu1 %v12343_v24  ;;  %12733 = vmatprep.subr.bf16.mxu0 %v12345_v29  ;;  %v12314_v24 = vld [vmem:[#allocation3 + $0x2a0] sm:$0xff]  ;;  %v12316_v29 = vld [vmem:[#allocation3 + $0x2b0] sm:$0xff] }
 0xc12   :  { %12693 = vmatpush1.bf16.msra.mxu1 %v12342_v35  ;;  %12734 = vmatpush1.bf16.msra.mxu0 %v12344_v53  ;;  %v12323_v35 = vld [vmem:[#allocation3 + $0x2e8] sm:$0xff]  ;;  %v12325_v53 = vld [vmem:[#allocation3 + $0x2f8] sm:$0xff] }
 0xc13   :  { %12694 = vmatprep.subr.bf16.mxu1 %v12351_v40  ;;  %12735 = vmatprep.subr.bf16.mxu0 %v12353_v14  ;;  %v12322_v40 = vld [vmem:[#allocation3 + $0x2e0] sm:$0xff]  ;;  %v12324_v14 = vld [vmem:[#allocation3 + $0x2f0] sm:$0xff] }
 0xc16   :  { %12695 = vmatpush1.bf16.msra.mxu1 %v12350_v1  ;;  %12736 = vmatpush1.bf16.msra.mxu0 %v12352_v45  ;;  %v12331_v1 = vld [vmem:[#allocation3 + $0x328] sm:$0xff]  ;;  %v12333_v45 = vld [vmem:[#allocation3 + $0x338] sm:$0xff] }
 0xc17   :  { %12746 = vmatprep.subr.bf16.mxu1 %v12235_v19  ;;  %12787 = vmatprep.subr.bf16.mxu0 %v12237_v50  ;;  %v12330_v19 = vld [vmem:[#allocation3 + $0x320] sm:$0xff]  ;;  %v12332_v50 = vld [vmem:[#allocation3 + $0x330] sm:$0xff] }
 0xc19   :  { %12697 = vmatmul.mubr.bf16.vlgmr.msra.gmra.mrb[60].mxu1 %v18696_v51  ;;  %12738 = vmatmul.mubr.bf16.vlgmr.msra.gmra.mrb[84].mxu0 %v18696_v51 }
 0xc1a   :  { %12747 = vmatpush1.bf16.msra.mxu1 %v12234_v52  ;;  %12788 = vmatpush1.bf16.msra.mxu0 %v12236_v56  ;;  %v12339_v52 = vld [vmem:[#allocation3 + $0x368] sm:$0xff]  ;;  %v12341_v56 = vld [vmem:[#allocation3 + $0x378] sm:$0xff] }
 0xc1b   :  { %12748 = vmatprep.subr.bf16.mxu1 %v12243_v46  ;;  %12789 = vmatprep.subr.bf16.mxu0 %v12245_v57  ;;  %v12338_v46 = vld [vmem:[#allocation3 + $0x360] sm:$0xff]  ;;  %v12340_v57 = vld [vmem:[#allocation3 + $0x370] sm:$0xff] }
 0xc1c   :  { %12778 = vmatprep.mubr.bf16.mxu1 %v18688_v21  ;;  %12819 = vmatprep.mubr.bf16.mxu0 %v18688_v21  ;;  %v12266_v21 = vld [vmem:[#allocation3 + $0x120] sm:$0xff] }
 0xc1e   :  { %12749 = vmatpush1.bf16.msra.mxu1 %v12242_v37  ;;  %12790 = vmatpush1.bf16.msra.mxu0 %v12244_v55  ;;  %v12347_v37 = vld [vmem:[#allocation3 + $0x3a8] sm:$0xff]  ;;  %v12349_v55 = vld [vmem:[#allocation3 + $0x3b8] sm:$0xff] }
 0xc1f   :  { %12750 = vmatprep.subr.bf16.mxu1 %v12251_v49  ;;  %12791 = vmatprep.subr.bf16.mxu0 %v12253_v23  ;;  %v12346_v49 = vld [vmem:[#allocation3 + $0x3a0] sm:$0xff]  ;;  %v12348_v23 = vld [vmem:[#allocation3 + $0x3b0] sm:$0xff] }
 0xc22   :  { %12751 = vmatpush1.bf16.msra.mxu1 %v12250_v27  ;;  %12792 = vmatpush1.bf16.msra.mxu0 %v12252_v58  ;;  %v12355_v27 = vld [vmem:[#allocation3 + $0x3e8] sm:$0xff]  ;;  %v12357_v58 = vld [vmem:[#allocation3 + $0x3f8] sm:$0xff] }
 0xc23   :  { %12752 = vmatprep.subr.bf16.mxu1 %v12259_v8  ;;  %12793 = vmatprep.subr.bf16.mxu0 %v12261_v15  ;;  %v12354_v8 = vld [vmem:[#allocation3 + $0x3e0] sm:$0xff]  ;;  %v12356_v15 = vld [vmem:[#allocation3 + $0x3f0] sm:$0xff] }
 0xc26   :  { %12753 = vmatpush1.bf16.msra.mxu1 %v12258_v30  ;;  %12794 = vmatpush1.bf16.msra.mxu0 %v12260_v62 }
 0xc27   :  { %12754 = vmatprep.subr.bf16.mxu1 %v12267_v63  ;;  %12795 = vmatprep.subr.bf16.mxu0 %v12269_v31 }
 0xc2a   :  { %12755 = vmatpush1.bf16.msra.mxu1 %v12266_v21  ;;  %12796 = vmatpush1.bf16.msra.mxu0 %v12268_v7 }
 0xc2b   :  { %12756 = vmatprep.subr.bf16.mxu1 %v12275_v0  ;;  %12797 = vmatprep.subr.bf16.mxu0 %v12277_v60 }
 0xc2e   :  { %12757 = vmatpush1.bf16.msra.mxu1 %v12274_v2  ;;  %12798 = vmatpush1.bf16.msra.mxu0 %v12276_v3  ;;  %v14967_v2 = vld [vmem:[%s18961_s18 + $0xc0] sm:$0xff]   ;;  %v14970_v3 = vld [vmem:[%s18961_s18 + $0x88] sm:$0xff]  }
 0xc2f   :  { %12758 = vmatprep.subr.bf16.mxu1 %v12283_v4  ;;  %12799 = vmatprep.subr.bf16.mxu0 %v12285_v44  ;;  %v14971_v4 = vld [vmem:[%s18961_s18 + $0xd0] sm:$0xff]  }
 0xc30   :  { %v14972_v44 = vld [vmem:[%s18961_s18 + $0x90] sm:$0xff]  }
 0xc32   :  { %12759 = vmatpush1.bf16.msra.mxu1 %v12282_v9  ;;  %12800 = vmatpush1.bf16.msra.mxu0 %v12284_v41  ;;  %v14973_v9 = vld [vmem:[%s18961_s18 + $0xd8] sm:$0xff]  }
 0xc33   :  { %12760 = vmatprep.subr.bf16.mxu1 %v12291_v10  ;;  %12801 = vmatprep.subr.bf16.mxu0 %v12293_v11  ;;  %v14974_v41 = vld [vmem:[%s18961_s18 + $0x98] sm:$0xff]   ;;  %v14975_v10 = vld [vmem:[%s18961_s18 + $0xe0] sm:$0xff]  }
 0xc34   :  { %v14976_v11 = vld [vmem:[%s18961_s18 + $0xa0] sm:$0xff]  }
 0xc36   :  { %12761 = vmatpush1.bf16.msra.mxu1 %v12290_v12  ;;  %12802 = vmatpush1.bf16.msra.mxu0 %v12292_v16  ;;  %v14977_v12 = vld [vmem:[%s18961_s18 + $0xe8] sm:$0xff]  }
 0xc37   :  { %12762 = vmatprep.subr.bf16.mxu1 %v12299_v20  ;;  %12803 = vmatprep.subr.bf16.mxu0 %v12301_v34  ;;  %v14978_v16 = vld [vmem:[%s18961_s18 + $0xa8] sm:$0xff]   ;;  %v14979_v20 = vld [vmem:[%s18961_s18 + $0xf0] sm:$0xff]  }
 0xc38   :  { %v14980_v34 = vld [vmem:[%s18961_s18 + $0xb0] sm:$0xff]  }
 0xc3a   :  { %12763 = vmatpush1.bf16.msra.mxu1 %v12298_v43  ;;  %12804 = vmatpush1.bf16.msra.mxu0 %v12300_v28  ;;  %v14981_v43 = vld [vmem:[%s18961_s18 + $0xf8] sm:$0xff]  }
 0xc3b   :  { %12764 = vmatprep.subr.bf16.mxu1 %v12307_v33  ;;  %12805 = vmatprep.subr.bf16.mxu0 %v12309_v17  ;;  %v14982_v17 = vld [vmem:[%s18961_s18 + $0xb8] sm:$0xff]  }
 0xc3e   :  { %12765 = vmatpush1.bf16.msra.mxu1 %v12306_v26  ;;  %12806 = vmatpush1.bf16.msra.mxu0 %v12308_v42 }
 0xc3f   :  { %12766 = vmatprep.subr.bf16.mxu1 %v12315_v18  ;;  %12807 = vmatprep.subr.bf16.mxu0 %v12317_v22 }
 0xc42   :  { %12767 = vmatpush1.bf16.msra.mxu1 %v12314_v24  ;;  %12808 = vmatpush1.bf16.msra.mxu0 %v12316_v29 }
 0xc43   :  { %12768 = vmatprep.subr.bf16.mxu1 %v12323_v35  ;;  %12809 = vmatprep.subr.bf16.mxu0 %v12325_v53  ;;  %v14983_v35 = vld [vmem:[%s18961_s18 + $0x40] sm:$0xff]  }
 0xc44   :  { %v14984_v53 = vld [vmem:[%s18963_s20 + $0x40] sm:$0xff]  }
 0xc46   :  { %12769 = vmatpush1.bf16.msra.mxu1 %v12322_v40  ;;  %12810 = vmatpush1.bf16.msra.mxu0 %v12324_v14  ;;  %v14985_v40 = vld [vmem:[%s18961_s18] sm:$0xff]  }
 0xc47   :  { %12770 = vmatprep.subr.bf16.mxu1 %v12331_v1  ;;  %12811 = vmatprep.subr.bf16.mxu0 %v12333_v45  ;;  %v14986_v14 = vld [vmem:[%s18963_s20] sm:$0xff]   ;;  %v14988_v1 = vld [vmem:[%s18963_s20 + $0x48] sm:$0xff]  }
 0xc48   :  { %v14989_v45 = vld [vmem:[%s18961_s18 + $0x8] sm:$0xff]  }
 0xc4a   :  { %12771 = vmatpush1.bf16.msra.mxu1 %v12330_v19  ;;  %12812 = vmatpush1.bf16.msra.mxu0 %v12332_v50  ;;  %v14990_v19 = vld [vmem:[%s18963_s20 + $0x8] sm:$0xff]   ;;  %v14991_v50 = vld [vmem:[%s18961_s18 + $0x50] sm:$0xff]  }
 0xc4b   :  { %12772 = vmatprep.subr.bf16.mxu1 %v12339_v52  ;;  %12813 = vmatprep.subr.bf16.mxu0 %v12341_v56  ;;  %v14992_v52 = vld [vmem:[%s18963_s20 + $0x50] sm:$0xff]  }
 0xc4c   :  { %v14993_v56 = vld [vmem:[%s18961_s18 + $0x10] sm:$0xff]  }
 0xc4e   :  { %12773 = vmatpush1.bf16.msra.mxu1 %v12338_v46  ;;  %12814 = vmatpush1.bf16.msra.mxu0 %v12340_v57  ;;  %v14994_v46 = vld [vmem:[%s18963_s20 + $0x10] sm:$0xff]   ;;  %v14995_v57 = vld [vmem:[%s18961_s18 + $0x58] sm:$0xff]  }
 0xc4f   :  { %12774 = vmatprep.subr.bf16.mxu1 %v12347_v37  ;;  %12815 = vmatprep.subr.bf16.mxu0 %v12349_v55  ;;  %v14996_v37 = vld [vmem:[%s18963_s20 + $0x58] sm:$0xff]  }
 0xc50   :  { %v14997_v55 = vld [vmem:[%s18961_s18 + $0x18] sm:$0xff]  }
 0xc52   :  { %12775 = vmatpush1.bf16.msra.mxu1 %v12346_v49  ;;  %12816 = vmatpush1.bf16.msra.mxu0 %v12348_v23  ;;  %v14998_v49 = vld [vmem:[%s18963_s20 + $0x18] sm:$0xff]   ;;  %v14999_v23 = vld [vmem:[%s18961_s18 + $0x60] sm:$0xff]  }
 0xc53   :  { %12776 = vmatprep.subr.bf16.mxu1 %v12355_v27  ;;  %12817 = vmatprep.subr.bf16.mxu0 %v12357_v58  ;;  %v15000_v27 = vld [vmem:[%s18963_s20 + $0x60] sm:$0xff]  }
 0xc54   :  { %v15001_v58 = vld [vmem:[%s18961_s18 + $0x20] sm:$0xff]  }
 0xc56   :  { %12777 = vmatpush1.bf16.msra.mxu1 %v12354_v8  ;;  %12818 = vmatpush1.bf16.msra.mxu0 %v12356_v15  ;;  %v15002_v8 = vld [vmem:[%s18963_s20 + $0x20] sm:$0xff]   ;;  %v15003_v15 = vld [vmem:[%s18961_s18 + $0x68] sm:$0xff]  }
 0xc57   :  { %14597 = vmatprep.subr.bf16.mxu1 %v14967_v2  ;;  %14619 = vmatprep.subr.bf16.mxu0 %v14983_v35  ;;  %v15008_v2 = vld [vmem:[%s18963_s20 + $0x70] sm:$0xff]   ;;  %v12828_v35 = vld [vmem:[%s18960_s17] sm:$0xff] }
 0xc59   :  { %12779 = vmatmul.mubr.bf16.vlgmr.msra.gmra.mrb[64].mxu1 %v18696_v51  ;;  %12820 = vmatmul.mubr.bf16.vlgmr.msra.gmra.mrb[88].mxu0 %v18696_v51  ;;  %v14969_v51 = vld [vmem:[%s18961_s18 + $0xc8] sm:$0xff]  }
 0xc5a   :  { %13156 = vmatprep.mubr.bf16.mxu1 %v18085_v47  ;;  %v14968_v47 = vld [vmem:[%s18961_s18 + $0x80] sm:$0xff]   ;;  %14620 = vmatpush3.bf16.msra.mxu0 %v14985_v40 }
 0xc5b   :  { %14598 = vmatpush3.bf16.msra.mxu1 %v14968_v47  ;;  %v15009_v47 = vld [vmem:[%s18961_s18 + $0x30] sm:$0xff]  }
 0xc5c   :  { %14599 = vmatprep.subr.bf16.mxu1 %v14969_v51  ;;  %v15010_v51 = vld [vmem:[%s18963_s20 + $0x30] sm:$0xff]  }
 0xc5f   :  { %14600 = vmatpush3.bf16.msra.mxu1 %v14970_v3  ;;  %v15011_v3 = vld [vmem:[%s18961_s18 + $0x78] sm:$0xff]  }
 0xc60   :  { %14601 = vmatprep.subr.bf16.mxu1 %v14971_v4  ;;  %v15012_v4 = vld [vmem:[%s18963_s20 + $0x78] sm:$0xff]  }
 0xc63   :  { %14602 = vmatpush3.bf16.msra.mxu1 %v14972_v44  ;;  %v15013_v44 = vld [vmem:[%s18961_s18 + $0x38] sm:$0xff]  }
 0xc64   :  { %14603 = vmatprep.subr.bf16.mxu1 %v14973_v9  ;;  %v15014_v9 = vld [vmem:[%s18963_s20 + $0x38] sm:$0xff]  }
 0xc67   :  { %14604 = vmatpush3.bf16.msra.mxu1 %v14974_v41 }
 0xc68   :  { %14605 = vmatprep.subr.bf16.mxu1 %v14975_v10 }
 0xc6b   :  { %14606 = vmatpush3.bf16.msra.mxu1 %v14976_v11 }
 0xc6c   :  { %v18705_v30 = vpop.f32.mrb[52].mxu1  ;;  %v18707_v62 = vpop.f32.mrb[76].mxu0  ;;  %14607 = vmatprep.subr.bf16.mxu1 %v14977_v12 }
 0xc6d   :  { %v18709_v63 = vpop.f32.mrb[53].mxu1  ;;  %v18711_v31 = vpop.f32.mrb[77].mxu0 }
 0xc6e   :  { %v12538_v21 = vpop.f32.mrb[54].mxu1  ;;  %v12579_v7 = vpop.f32.mrb[78].mxu0 }
 0xc6f   :  { %v12539_v0 = vpop.f32.mrb[55].mxu1  ;;  %v12580_v60 = vpop.f32.mrb[79].mxu0  ;;  %14608 = vmatpush3.bf16.msra.mxu1 %v14978_v16  ;;  %v15004_v21 = vld [vmem:[%s18963_s20 + $0x68] sm:$0xff]  }
 0xc70   :  { %14609 = vmatprep.subr.bf16.mxu1 %v14979_v20  ;;  %v15005_v7 = vld [vmem:[%s18961_s18 + $0x28] sm:$0xff]   ;;  %v15007_v60 = vld [vmem:[%s18961_s18 + $0x70] sm:$0xff]  }
 0xc71   :  { %v15006_v0 = vld [vmem:[%s18963_s20 + $0x28] sm:$0xff]  }
 0xc73   :  { %14610 = vmatpush3.bf16.msra.mxu1 %v14980_v34 }
 0xc74   :  { %14611 = vmatprep.subr.bf16.mxu1 %v14981_v43 }
 0xc77   :  { %14612 = vmatpush3.bf16.msra.mxu1 %v14982_v17 }
 0xc78   :  { %14641 = vmatprep.subr.bf16.mxu1 %v14984_v53  ;;  %v12833_v53 = vrot.slane %v12828_v35, %v17861_v32  ;;  %v12848_v32 = vsub.s32 4, %v17852_v25 }
 0xc7a   :  { %13157 = vmatmul.mubr.bf16.vlgmr.msra.gmra.mrb[68].mxu1 %v18087_v5  ;;  %v14987_v5 = vld [vmem:[%s18961_s18 + $0x48] sm:$0xff]  }
 0xc7b   :  { %14642 = vmatpush3.bf16.msra.mxu1 %v14986_v14  ;;  %14621 = vmatprep.subr.bf16.mxu0 %v14987_v5 }
 0xc7c   :  { %14643 = vmatprep.subr.bf16.mxu1 %v14988_v1  ;;  %14622 = vmatpush3.bf16.msra.mxu0 %v14989_v45 }
 0xc7d   :  { %14623 = vmatprep.subr.bf16.mxu0 %v14991_v50 }
 0xc7f   :  { %14644 = vmatpush3.bf16.msra.mxu1 %v14990_v19 }
 0xc80   :  { %14645 = vmatprep.subr.bf16.mxu1 %v14992_v52  ;;  %14624 = vmatpush3.bf16.msra.mxu0 %v14993_v56 }
 0xc81   :  { %14625 = vmatprep.subr.bf16.mxu0 %v14995_v57 }
 0xc83   :  { %14646 = vmatpush3.bf16.msra.mxu1 %v14994_v46 }
 0xc84   :  { %14647 = vmatprep.subr.bf16.mxu1 %v14996_v37  ;;  %14626 = vmatpush3.bf16.msra.mxu0 %v14997_v55  ;;  %v12856_v37 = vsub.s32 6, %v17852_v25  ;;  %v12852_v55 = vsub.s32 5, %v17852_v25 }
 0xc85   :  { %14627 = vmatprep.subr.bf16.mxu0 %v14999_v23 }
 0xc87   :  { %14648 = vmatpush3.bf16.msra.mxu1 %v14998_v49  ;;  %v12860_v49 = vsub.s32 7, %v17852_v25 }
 0xc88   :  { %14649 = vmatprep.subr.bf16.mxu1 %v15000_v27  ;;  %14628 = vmatpush3.bf16.msra.mxu0 %v15001_v58 }
 0xc89   :  { %14629 = vmatprep.subr.bf16.mxu0 %v15003_v15  ;;  %v12849_v15 = vrot.slane %v12828_v35, %v12848_v32 }
 0xc8b   :  { %14650 = vmatpush3.bf16.msra.mxu1 %v15002_v8 }
 0xc8c   :  { %14651 = vmatprep.subr.bf16.mxu1 %v15004_v21  ;;  %14630 = vmatpush3.bf16.msra.mxu0 %v15005_v7  ;;  %v12857_v21 = vrot.slane %v12828_v35, %v12856_v37 }
 0xc8d   :  { %14631 = vmatprep.subr.bf16.mxu0 %v15007_v60 }
 0xc8f   :  { %14652 = vmatpush3.bf16.msra.mxu1 %v15006_v0 }
 0xc90   :  { %14653 = vmatprep.subr.bf16.mxu1 %v15008_v2  ;;  %14632 = vmatpush3.bf16.msra.mxu0 %v15009_v47  ;;  %v12853_v2 = vrot.slane %v12828_v35, %v12852_v55  ;;  %v12861_v47 = vrot.slane %v12828_v35, %v12860_v49 }
 0xc91   :  { %14633 = vmatprep.subr.bf16.mxu0 %v15011_v3 }
 0xc93   :  { %14654 = vmatpush3.bf16.msra.mxu1 %v15010_v51 }
 0xc94   :  { %14655 = vmatprep.subr.bf16.mxu1 %v15012_v4  ;;  %14634 = vmatpush3.bf16.msra.mxu0 %v15013_v44 }
 0xc97   :  { %14656 = vmatpush3.bf16.msra.mxu1 %v15014_v9 }
 0xcac   :  { %v18758_v28 = vpop.f32.mrb[56].mxu1  ;;  %v18760_v33 = vpop.f32.mrb[80].mxu0 }
 0xcad   :  { %v18765_v26 = vpop.f32.mrb[57].mxu1  ;;  %v18767_v42 = vpop.f32.mrb[81].mxu0 }
 0xcae   :  { %v12620_v18 = vpop.f32.mrb[58].mxu1  ;;  %v12661_v22 = vpop.f32.mrb[82].mxu0 }
 0xcaf   :  { %v12621_v24 = vpop.f32.mrb[59].mxu1  ;;  %v12662_v29 = vpop.f32.mrb[83].mxu0 }
 0xcb0   :  { %v15094_v29 = vmov 0.0|0.0  }
 0xcb1   :  { %14718 = vmatprep.subr.bf16.mxu1 %v15094_v29  ;;  %14722 = vmatprep.subr.bf16.mxu0 %v15094_v29 }
 0xcec   :  { %v12698_v41 = vpop.f32.mrb[60].mxu1  ;;  %v12739_v10 = vpop.f32.mrb[84].mxu0 }
 0xced   :  { %v12699_v11 = vadd.f32 %v12698_v41, %v18705_v30  ;;  %v12740_v12 = vadd.f32 %v12739_v10, %v18707_v62  ;;  %v12700_v16 = vpop.f32.mrb[61].mxu1  ;;  %v12741_v20 = vpop.f32.mrb[85].mxu0  ;;  %v12840_v30 = vsub.s32 2, %v17852_v25  ;;  %v12844_v62 = vsub.s32 3, %v17852_v25 }
 0xcee   :  { %v12701_v34 = vadd.f32 %v12700_v16, %v18709_v63  ;;  %v12742_v43 = vadd.f32 %v12741_v20, %v18711_v31  ;;  %v12702_v17 = vpop.f32.mrb[62].mxu1  ;;  %v12743_v18 = vpop.f32.mrb[86].mxu0  ;;  %v12837_v31 = vrot.slane %v12828_v35, %v17869_v36 }
 0xcef   :  { %v12703_v22 = vpop.f32.mrb[63].mxu1  ;;  %v12744_v24 = vpop.f32.mrb[87].mxu0  ;;  %v12841_v63 = vrot.slane %v12828_v35, %v12840_v30  ;;  %v12845_v40 = vrot.slane %v12828_v35, %v12844_v62  ;;  %v12870_v14 = vadd.f32 %v12833_v53, %v12699_v11 }
 0xcf0   :  { %v12871_v1 = vadd.f32 %v12837_v31, %v12701_v34 }
 0xcf1   :  { %v12872_v5 = vadd.f32 %v12841_v63, %v12740_v12  ;;  %v12873_v45 = vadd.f32 %v12845_v40, %v12742_v43  ;;  %v14326_v19 = vmul.f32 -1.442695, %v12870_v14 }
 0xcf2   :  { %v14327_v52 = vmul.f32 -1.442695, %v12871_v1 }
 0xcf3   :  { %v14328_v50 = vmul.f32 -1.442695, %v12872_v5  ;;  %v14329_v56 = vmul.f32 -1.442695, %v12873_v45  ;;  %15015 = vpow2.f32 %v14326_v19 }
 0xcf5   :  { %15017 = vpow2.f32 %v14328_v50 }
 0xcf6   :  { %15019 = vpow2.f32 %v14327_v52 }
 0xcf7   :  { %15021 = vpow2.f32 %v14329_v56 }
 0xcfd   :  { %v15016_v46 = vpop.eup %15015 }
 0xcfe   :  { %v12884_v27 = vadd.f32 1.0, %v15016_v46 }
 0xcff   :  { %v15018_v57 = vpop.eup %15017 }
 0xd00   :  { %v15020_v36 = vpop.eup %15019  ;;  %v12896_v58 = vadd.f32 1.0, %v15018_v57  ;;  %15023 = vrcp.f32 %v12884_v27 }
 0xd01   :  { %v15022_v23 = vpop.eup %15021  ;;  %v12885_v8 = vadd.f32 1.0, %v15020_v36 }
 0xd02   :  { %v12897_v7 = vadd.f32 1.0, %v15022_v23  ;;  %15025 = vrcp.f32 %v12896_v58 }
 0xd03   :  { %15027 = vrcp.f32 %v12885_v8 }
 0xd04   :  { %15029 = vrcp.f32 %v12897_v7  ;;  %v13597_v7 = vand.u32 7, %v17852_v25 }
 0xd06   :  { %vm13599_vm5 = vcmp.eq.s32.totalorder %v13597_v7, %v18092_v6 }
 0xd2c   :  { %v12780_v0 = vpop.f32.mrb[64].mxu1  ;;  %v12821_v60 = vpop.f32.mrb[88].mxu0 }
 0xd2d   :  { %v12781_v51 = vadd.f32 %v12780_v0, %v18758_v28  ;;  %v12822_v3 = vadd.f32 %v12821_v60, %v18760_v33  ;;  %v12782_v4 = vpop.f32.mrb[65].mxu1  ;;  %v12823_v44 = vpop.f32.mrb[89].mxu0  ;;  %v13598_v0 = vand.u32 7, %v18099_v13 }
 0xd2e   :  { %v12783_v9 = vadd.f32 %v12782_v4, %v18765_v26  ;;  %v12824_v41 = vadd.f32 %v12823_v44, %v18767_v42  ;;  %v12784_v10 = vpop.f32.mrb[66].mxu1  ;;  %v12825_v11 = vpop.f32.mrb[90].mxu0  ;;  %v14332_v26 = vld.sshfl [vmem:[%s19001_s21] sm:$0x33 pattern:$0x76325410] }
 0xd2f   :  { %v12874_v12 = vadd.f32 %v12849_v15, %v12781_v51  ;;  %v12876_v16 = vadd.f32 %v12857_v21, %v12822_v3  ;;  %v12785_v20 = vpop.f32.mrb[67].mxu1  ;;  %v12826_v34 = vpop.f32.mrb[91].mxu0  ;;  %v12925_v24 = vcombine.high %v14332_v26, %v14332_v26  ;;  %v14719_v21 = vpack.c.bf16 %v18298_v61, %v18296_v59 }
 0xd30   :  { %v12875_v43 = vadd.f32 %v12853_v2, %v12783_v9  ;;  %v12877_v17 = vadd.f32 %v12861_v47, %v12824_v41  ;;  %v15024_v42 = vpop.eup %15023  ;;  %vm13600_vm6 = vcmp.eq.s32.totalorder %v13598_v0, %v18092_v6  ;;  %v14367_v20 = vld [vmem:[%s18962_s19] ss:$0 sm:$0xff] }
 0xd31   :  { %15031 = vtanh.f32 %v12874_v12  ;;  %v14330_v28 = vmul.f32 -1.442695, %v12876_v16  ;;  %v15026_v18 = vpop.eup %15025  ;;  %vm14723_vm7 = vmpackc.low %vm13600_vm6, %vm13599_vm5  ;;  %v13680_v16 = vld [vmem:[%s19002_s2] sm:$0x3] }
 0xd32   :  { %15033 = vtanh.f32 %v12875_v43  ;;  %v14331_v33 = vmul.f32 -1.442695, %v12877_v17  ;;  %v15028_v22 = vpop.eup %15027  ;;  %v12928_v62 = vmul.f32 %v15026_v18, %v14332_v26  ;;  %vm13681_vm8 = vcmp.gt.f32.partialorder %v13680_v16, 0.0 }
 0xd33   :  { %15035 = vpow2.f32 %v14330_v28  ;;  %v15030_v29 = vpop.eup %15029 }
 0xd34   :  { %15037 = vpow2.f32 %v14331_v33  ;;  %v12929_v31 = vmul.f32 %v15030_v29, %v12925_v24 }
 0xd3b   :  { %v15032_v35 = vpop.eup %15031 }
 0xd3c   :  { %v15034_v30 = vpop.eup %15033  ;;  %v12930_v53 = vmul.f32 %v15032_v35, %v15024_v42 }
 0xd3d   :  { %v15036_v63 = vpop.eup %15035  ;;  %v12931_v40 = vmul.f32 %v15034_v30, %v15028_v22 }
 0xd3e   :  { %v15038_v14 = vpop.eup %15037  ;;  %v12932_v5 = vadd.f32 %v12930_v53, %v12928_v62  ;;  %v12910_v1 = vadd.f32 1.0, %v15036_v63 }
 0xd3f   :  { %v12933_v45 = vadd.f32 %v12931_v40, %v12929_v31  ;;  %v12911_v19 = vadd.f32 1.0, %v15038_v14 }
 0xd40   :  { %15039 = vtanh.f32 %v12932_v5 }
 0xd41   :  { %15041 = vrcp.f32 %v12910_v1  ;;  %v12952_v50 = vcombine.low %v12932_v5, %v12933_v45 }
 0xd42   :  { %15043 = vrcp.f32 %v12911_v19 }
 0xd43   :  { %14334 = vst.sshfl [vmem:[%s18968_s25 + $0x4] sm:$0x33 pattern:$0x76325410] %v12952_v50  ;;  %15045 = vtanh.f32 %v12933_v45 }
 0xd4a   :  { %v15040_v52 = vpop.eup %15039 }
 0xd4b   :  { %v15042_v56 = vpop.eup %15041 }
 0xd4c   :  { %v15044_v46 = vpop.eup %15043  ;;  %v12936_v57 = vmul.f32 %v15042_v56, %v15040_v52 }
 0xd4d   :  { %v15046_v32 = vpop.eup %15045  ;;  %v14613_v23 = vpop.f32.mrb[68].mxu1 }
 0xd4e   :  { %v12937_v37 = vmul.f32 %v15046_v32, %v15044_v46  ;;  %v12962_v49 = vpack.c.bf16 %v12936_v57, %v12936_v57  ;;  %v14614_v27 = vpop.f32.mrb[69].mxu1 }
 0xd4f   :  { %v14615_v58 = vadd.f32 %v14614_v27, %v14613_v23  ;;  %v14616_v8 = vpop.f32.mrb[70].mxu1  ;;  %v15096_v27 = vmov 1983009808  }
 0xd50   :  { %v12940_v36 = vcombine.low %v12936_v57, %v12937_v37  ;;  %v12963_v55 = vpack.c.bf16 %v12937_v37, %v12937_v37  ;;  %v14617_v15 = vpop.f32.mrb[71].mxu1 }
 0xd52   :  { %14333 = vst.sshfl [vmem:[%s18968_s25] sm:$0x33 pattern:$0x76325410] %v12940_v36  ;;  %13292 = vmatprep.mubr.bf16.mxu0 %v12963_v55  ;;  %13500 = vmatprep.mubr.bf16.mxu1 %v12963_v55 }
 0xd53   :  { %13293 = vmatmul.mubr.bf16.vlgmr.msra.gmra.mrb[92].mxu0 %v12962_v49  ;;  %13501 = vmatmul.mubr.bf16.vlgmr.msra.gmra.mrb[72].mxu1 %v12962_v49 }
 0xd54   :  { %14721 = vmatpush3.bf16.xpose.msk.msra.mxu1 %vm14720_vm3, %v14719_v21  ;;  %14680 = vmatprep.mubr.msk.f32.mxu1 %vm15095_vm4, %v15091_v39 }
 0xd55   :  { %14687 = vmatprep.mubr.msk.f32.mxu0 %vm15095_vm4, %v15091_v39  ;;  %14724 = vmatpush3.bf16.msk.msra.mxu0 %vm14723_vm7, %v15093_v38  ;;  %v14384_v39 = vld [vmem:[%s18965_s22] ss:$0 sm:$0xff] }
 0xe26   :  { %v14635_v59 = vpop.f32.mrb[92].mxu0  ;;  %v14657_v61 = vpop.f32.mrb[72].mxu1 }
 0xe27   :  { %v14636_v60 = vpop.f32.mrb[93].mxu0  ;;  %v14658_v2 = vpop.f32.mrb[73].mxu1 }
 0xe28   :  { %v14637_v47 = vadd.f32 %v14636_v60, %v14635_v59  ;;  %v14659_v51 = vadd.f32 %v14658_v2, %v14657_v61  ;;  %v14638_v3 = vpop.f32.mrb[94].mxu0  ;;  %v14660_v4 = vpop.f32.mrb[74].mxu1 }
 0xe29   :  { %v14639_v13 = vpop.f32.mrb[95].mxu0  ;;  %v14661_v44 = vpop.f32.mrb[75].mxu1 }
 0xe2a   :  { %v13295_v9 = vadd.f32 %v14637_v47, %v14615_v58  ;;  %v13508_v41 = vadd.f32 %v14659_v51, %v18665_v48  ;;  %v13308_v48 = vld [vmem:[%s19003_s30] sm:$0x3]  ;;  %v13715_v58 = vunpack.c.l.s4 %v15096_v27 }
 0xe2b   :  { %vm13309_vm10 = vcmp.gt.f32.partialorder %v13308_v48, 0.0 }
 0xe2c   :  { %v13516_v10 = vadd.f32 %v14384_v39, %v13508_v41  ;;  %v13307_v43 = vadd.f32 %v14367_v20, %v13295_v9  ;;  %v13716_v8 = vunpack.c.0.s8 %v13715_v58 }
 0xe2e   :  { %14681 = vmatmul.mubr.msk.f32.vlgmr.msra.gmra.mrb[76].mxu1 %vm13517_vm2, %v13516_v10  ;;  %v13310_v26 = vsel %vm13309_vm10, %v13307_v43, -1e+09  ;;  %v13719_v7 = vsub.s32 %v13716_v8, %v17852_v25  ;;  %vm13730_vm2 = vcmask 148624  }
 0xf01   :  { %v13593_v38 = vpop.f32.mrb[76].mxu1 }
 0xf02   :  { %v13605_v11 = vmul.f32 %v18128_v54, %v13593_v38  ;;  %v14682_v12 = vpop.f32.mrb[77].mxu1 }
 0xf04   :  { %14688 = vmatmul.mubr.msk.f32.vlgmr.msra.gmra.mrb[96].mxu0 %vm10360_vm13, %v13605_v11  ;;  %vm13311_vm13 = vcmask 66560  }
 0xf05   :  { %v13312_v42 = vsel %vm13311_vm13, %v13310_v26, -inf }
 0xfd7   :  { %v13675_v34 = vpop.f32.mrb[96].mxu0 }
 0xfd8   :  { %v13679_v17 = vmul.f32 0.125, %v13675_v34  ;;  %v14689_v54 = vpop.f32.mrb[97].mxu0 }
 0xfda   :  { %v13682_v28 = vsel %vm13681_vm8, %v13679_v17, -1e+09 }
 0xfdb   :  { %v13684_v33 = vsel %vm13683_vm9, %v13682_v28, -inf }
 0xfdc   :  { %13685 = vmax.xlane.f32.xlu0 %v13684_v33 }
 0xfe0   :  { %13313 = vmax.xlane.f32.xlu0 %v13312_v42 }
0x1069   :  { %v13686_v18 = vpop.xlane.xlu0 %13685 }
0x106a   :  { %v13687_v22 = vsub.f32 %v13682_v28, %v13686_v18  ;;  %vm13695_vm11 = vcmp.ge.f32.partialorder %v13682_v28, %v13686_v18 }
0x106b   :  { %v13696_v29 = vsel %vm13695_vm11, %v18092_v6, 8 }
0x106c   :  { %v13688_v24 = vmul.f32 1.442695, %v13687_v22  ;;  %v13697_v31 = vsel %vm13683_vm9, %v13696_v29, 2147483647 }
0x106d   :  { %v13314_v35 = vpop.xlane.xlu0 %13313  ;;  %v13699_v5 = vshra.s32 %v13697_v31, 16  ;;  %v13698_v57 = vand.u32 65535, %v13697_v31 }
0x106e   :  { %15047 = vpow2.f32 %v13688_v24  ;;  %v13315_v30 = vsub.f32 %v13310_v26, %v13314_v35  ;;  %vm13323_vm12 = vcmp.ge.f32.partialorder %v13310_v26, %v13314_v35 }
0x106f   :  { %v13324_v62 = vsel %vm13323_vm12, %v18092_v6, 9  ;;  %v13701_v1 = vcvt.s32.f32 %v13699_v5  ;;  %v13700_v36 = vcvt.s32.f32 %v13698_v57 }
0x1070   :  { %v13316_v53 = vmul.f32 1.442695, %v13315_v30  ;;  %v13325_v63 = vsel %vm13311_vm13, %v13324_v62, 2147483647 }
0x1071   :  { %v13327_v40 = vshra.s32 %v13325_v63, 16  ;;  %v13326_v6 = vand.u32 65535, %v13325_v63 }
0x1072   :  { %15049 = vpow2.f32 %v13316_v53 }
0x1073   :  { %v13329_v14 = vcvt.s32.f32 %v13327_v40  ;;  %v13328_v46 = vcvt.s32.f32 %v13326_v6 }
0x1075   :  { %13330 = vmin.xlane.f32.xlu1 %v13329_v14 }
0x1078   :  { %v15048_v45 = vpop.eup %15047 }
0x1079   :  { %13702 = vmin.xlane.f32.xlu1 %v13701_v1  ;;  %v13690_v19 = vsel %vm13683_vm9, %v15048_v45, 0.0 }
0x107a   :  { %13691 = vadd.xlane.f32.xlu0 %v13690_v19 }
0x107c   :  { %v15050_v50 = vpop.eup %15049 }
0x107d   :  { %v13318_v52 = vsel %vm13311_vm13, %v15050_v50, 0.0 }
0x107e   :  { %13319 = vadd.xlane.f32.xlu1 %v13318_v52 }
0x1102   :  { %v13331_v56 = vpop.xlane.xlu1 %13330 }
0x1103   :  { %vm13332_vm14 = vcmp.eq.f32.partialorder %v13329_v14, %v13331_v56  ;;  %v13337_v60 = vcvt.f32.s32 %v13331_v56 }
0x1104   :  { %v13333_v32 = vsel %vm13332_vm14, %v13328_v46, inf }
0x1105   :  { %13334 = vmin.xlane.f32.xlu0 %v13333_v32  ;;  %v13338_v47 = vshll.u32 %v13337_v60, 16 }
0x1106   :  { %v13703_v37 = vpop.xlane.xlu1 %13702 }
0x1107   :  { %v13692_v55 = vpop.xlane.xlu0 %13691  ;;  %vm13704_vm15 = vcmp.eq.f32.partialorder %v13701_v1, %v13703_v37  ;;  %v13709_v51 = vcvt.f32.s32 %v13703_v37 }
0x1108   :  { %15051 = vrcp.f32 %v13692_v55  ;;  %v13705_v49 = vsel %vm13704_vm15, %v13700_v36, inf }
0x1109   :  { %13706 = vmin.xlane.f32.xlu1 %v13705_v49  ;;  %v13710_v13 = vshll.u32 %v13709_v51, 16 }
0x110b   :  { %v13320_v23 = vpop.xlane.xlu1 %13319 }
0x110c   :  { %15053 = vrcp.f32 %v13320_v23 }
0x1112   :  { %v15052_v15 = vpop.eup %15051 }
0x1113   :  { %v13694_v21 = vmul.f32 %v15052_v15, %v15048_v45 }
0x1115   :  { %v13720_v61 = vrot.slane %v13694_v21, %v13719_v7 }
0x1116   :  { %v15054_v0 = vpop.eup %15053 }
0x1117   :  { %v13322_v59 = vmul.f32 %v15054_v0, %v15050_v50 }
0x1119   :  { %13712 = vst.msk [vmem:[%s18968_s25 + $0x8] sm:$0x3] %vm13311_vm13, %v13322_v59 }
0x111b   :  { %13721 = vrot.lane.b32.xlu0 %v13720_v61, %s15097_s8 }
0x1192   :  { %v13335_v2 = vpop.xlane.xlu0 %13334 }
0x1193   :  { %v13336_v3 = vcvt.f32.s32 %v13335_v2 }
0x1195   :  { %v13339_v4 = vadd.s32 %v13338_v47, %v13336_v3 }
0x1196   :  { %v13707_v39 = vpop.xlane.xlu1 %13706  ;;  %v13722_v25 = vpop.permute.xlu0 %13721 }
0x1197   :  { %v13726_v44 = vcvt.s32.f32 %v13339_v4  ;;  %v13708_v9 = vcvt.f32.s32 %v13707_v39  ;;  %13725 = vst.msk [vmem:[%s18968_s25 + $0x8] sm:$0x3] %vm13724_vm0, %v13722_v25 }
0x1199   :  { %v13711_v41 = vadd.s32 %v13710_v13, %v13708_v9  ;;  %13728 = vst.msk [vmem:[%s18968_s25 + $0x8] sm:$0x3] %vm13727_vm1, %v13726_v44 }
0x119b   :  { %v13729_v10 = vcvt.s32.f32 %v13711_v41 }
0x119d   :  { %13731 = vst.msk [vmem:[%s18968_s25 + $0x8] sm:$0x3] %vm13730_vm2, %v13729_v10 }
0x119e   :  { %13736 = vsyncmov [#allocation4] }
0x11a1   :  { %s13737_s5 = vpop.sfrf %13736 }
0x11a2   :  { %p14393_p2 = scmp.ne.s32.totalorder %s13737_s5, 0 }
0x11a4   :  { %13741 = shalt.err (%p14393_p2)  }
0x11a5   :  { %13743 = vsyncmov [#allocation4 + $0x1] }
0x11a8   :  { %s13744_s0 = vpop.sfrf %13743 }
0x11a9   :  { %p14394_p3 = scmp.ne.s32.totalorder %s13744_s0, 0 }
0x11ab   :  { %13748 = shalt.err (%p14394_p3)  }

</bundles_post_ra>
